<compile_context>
chip_gen: v6e
topology: v6e:2x2x1
jax: 0.10.0
libtpu: 0.0.40
codegen_flags: <defaults>
</compile_context>

<pallas_src>
import functools

import numpy as np
import jax
import jax.numpy as jnp
from jax.experimental import pallas as pl
from jax.experimental.pallas import tpu as pltpu

BN_EPS = 1e-5
BN_SCALE = 1.0 / float(np.sqrt(1.0 + BN_EPS))   # gamma / sqrt(running_var+eps)
LANE = 128

# Geometry implied by feature.view(-1, 1024): input is (N, 1, 8, 52).
H_IN, W_IN = 8, 52
KH, KW = 3, 5
H1, W1P, C1 = 6, 16, 32          # conv1 valid (6,48) -> pool (6,16), 32 ch
H2, W2P, C2 = 4, 4, 64           # conv2 valid (4,12) -> pool (4,4),  64 ch
K_IN_PAD = 128                   # conv1 LHS lanes: w_in 52 -> 128 (zero pad)


# ------------------------------- Pallas kernel ------------------------------ #

def _dannet_kernel(x_ref, w1_ref, b1_ref, a1_ref,
                   w2_ref, b2_ref, a2_ref,
                   wh1_ref, bh1_ref, ah1_ref,
                   dw_ref, db_ref, da_ref,
                   wld_ref, bld_ref,
                   feat_ref, out_ref, a_scr):
    NP = x_ref.shape[0] // H_IN          # padded batch (multiple of 8)

    # ---- conv1 (+folded BN) -> MaxPool(1,3) -> bias -> PReLU ---------------
    # x rows are (h_in, n); w1 output lanes are (pool_offset, w1p, cout).
    y1 = jnp.dot(x_ref[pl.ds(0, H1 * NP), :], w1_ref[0],
                 preferred_element_type=jnp.float32)
    for i in range(1, KH):
        y1 = y1 + jnp.dot(x_ref[pl.ds(i * NP, H1 * NP), :], w1_ref[i],
                          preferred_element_type=jnp.float32)
    blk = W1P * C1                                         # 512 lanes / offset
    a = jnp.maximum(jnp.maximum(y1[:, :blk], y1[:, blk:2 * blk]), y1[:, 2 * blk:])
    a = a + b1_ref[...]
    a = jnp.where(a > 0.0, a, a1_ref[...] * a)             # (6*NP, 512) f32
    a_scr[...] = a

    # ---- conv2 (+folded BN) -> MaxPool(1,3) -> bias -> PReLU ---------------
    # a rows are (h1, n), lanes (w1p, cin); w2 output lanes (pool_off, w2p, cout).
    y2 = jnp.dot(a_scr[pl.ds(0, H2 * NP), :].astype(jnp.bfloat16), w2_ref[0],
                 preferred_element_type=jnp.float32)
    for i in range(1, KH):
        y2 = y2 + jnp.dot(a_scr[pl.ds(i * NP, H2 * NP), :].astype(jnp.bfloat16),
                          w2_ref[i], preferred_element_type=jnp.float32)
    blk2 = W2P * C2                                        # 256 lanes / offset
    f = jnp.maximum(jnp.maximum(y2[:, :blk2], y2[:, blk2:2 * blk2]), y2[:, 2 * blk2:])
    f = f + b2_ref[...]
    f = jnp.where(f > 0.0, f, a2_ref[...] * f)             # (4*NP, 256) f32
    feat_ref[...] = f

    # ---- heads: label classifier + 5-layer domain classifier ---------------
    # Kernel-native feature layout per sample: lanes = (h2, w2p, cout); the
    # matching row permutation of the PyTorch flatten is folded into wh1.
    lhs = jnp.concatenate([feat_ref[pl.ds(h * NP, NP), :] for h in range(H2)],
                          axis=-1).astype(jnp.bfloat16)    # (NP, 1024)
    y = jnp.dot(lhs, wh1_ref[...], preferred_element_type=jnp.float32)
    y = y + bh1_ref[...]
    y = jnp.where(y > 0.0, y, ah1_ref[...] * y)            # (NP, 1024) f32
    h_lab = y[:, :512]                                     # label hidden
    d = y[:, 512:]                                         # domain hidden
    for k in range(3):                                     # domain layers 2..4
        z = jnp.dot(d.astype(jnp.bfloat16), dw_ref[k],
                    preferred_element_type=jnp.float32) + db_ref[k]
        d = jnp.where(z > 0.0, z, da_ref[k] * z)
    # Final label(512->nc) and domain(512->1) layers as one block-diagonal
    # matmul writing a lane-dense (NP, 256) slab: [:, :128] label, [:, 128:] dom.
    lhs2 = jnp.concatenate([h_lab, d], axis=-1).astype(jnp.bfloat16)
    out_ref[...] = jnp.dot(lhs2, wld_ref[...],
                           preferred_element_type=jnp.float32) + bld_ref[...]


# ------------------------------ kernel wrapper ------------------------------ #

def _full_spec(shape):
    zeros = (0,) * len(shape)
    return pl.BlockSpec(shape, lambda i, _z=zeros: _z)


def dannet_fused(xp, q, NP):
    """xp: (8*NP, 128) bf16 conv1 LHS, rows (h_in, n), lanes w_in (zero padded)."""
    args = (xp, q["w1"], q["b1"], q["a1"],
            q["w2"], q["b2"], q["a2"],
            q["wh1"], q["bh1"], q["ah1"],
            q["dw"], q["db"], q["da"],
            q["wld"], q["bld"])
    out_shapes = (jax.ShapeDtypeStruct((H2 * NP, W2P * C2), jnp.float32),  # feature
                  jax.ShapeDtypeStruct((NP, 2 * LANE), jnp.float32))       # logits
    # TODO(synk): for large batches add a row-tile grid axis marked "parallel"
    # so v7x's second TensorCore is used; at batch <= 8 one invocation is best.
    return pl.pallas_call(
        _dannet_kernel,
        out_shape=out_shapes,
        grid=(1,),
        in_specs=[_full_spec(a.shape) for a in args],
        out_specs=tuple(_full_spec(s.shape) for s in out_shapes),
        scratch_shapes=[pltpu.VMEM((H1 * NP, W1P * C1), jnp.float32)],
        compiler_params=pltpu.CompilerParams(
            dimension_semantics=("arbitrary",),
            vmem_limit_bytes=32 * 1024 * 1024),
    )(*args)


# --------------------------------- parameters ------------------------------- #

def kaiming_normal(key, shape, fan_in):
    return (2.0 / fan_in) ** 0.5 * jax.random.normal(key, shape, dtype=jnp.float32)


def init_params(key, num_classes):
    """PyTorch-equivalent raw parameters (kaiming weights, zero biases,
    PReLU=0.25, fresh BatchNorm).  Linear weights stored as (in, out)."""
    keys = jax.random.split(key, 16)
    p = {}
    p["conv1_w"] = kaiming_normal(keys[0], (32, 1, 3, 5), 1 * 3 * 5)     # torch layout
    p["conv1_b"] = jnp.zeros((32,), jnp.float32)
    p["prelu1"] = jnp.full((32,), 0.25, jnp.float32)
    p["conv2_w"] = kaiming_normal(keys[1], (64, 32, 3, 5), 32 * 3 * 5)
    p["conv2_b"] = jnp.zeros((64,), jnp.float32)
    p["prelu2"] = jnp.full((64,), 0.25, jnp.float32)
    p["lab_w1"] = kaiming_normal(keys[2], (1024, 512), 1024)
    p["lab_b1"] = jnp.zeros((512,), jnp.float32)
    p["lab_prelu1"] = jnp.full((512,), 0.25, jnp.float32)
    p["lab_w2"] = kaiming_normal(keys[3], (512, num_classes), 512)
    p["lab_b2"] = jnp.zeros((num_classes,), jnp.float32)
    dims = [1024, 512, 512, 512]
    for li in range(4):
        p[f"dom_w{li + 1}"] = kaiming_normal(keys[4 + li], (dims[li], 512), dims[li])
        p[f"dom_b{li + 1}"] = jnp.zeros((512,), jnp.float32)
        p[f"dom_prelu{li + 1}"] = jnp.full((512,), 0.25, jnp.float32)
    p["dom_w5"] = kaiming_normal(keys[8], (512, 1), 512)
    p["dom_b5"] = jnp.zeros((1,), jnp.float32)
    return p


def pack_params(p, num_classes):
    """Fold eval-mode BatchNorm, build block-Toeplitz conv weights whose output
    lanes are (pool_offset, pooled_w, cout), fold the NCHW feature flatten into
    the first head weight, fuse the tiny final layers block-diagonally, and
    cast MXU operands to bf16.  Done once, outside the jitted forward."""
    # TODO(synk): if trained BatchNorm running stats are loaded, fold per-channel
    # mean/var here (currently fresh eval stats: mean=0, var=1, gamma=1, beta=0).
    s = BN_SCALE
    pn = {k: np.asarray(v) for k, v in p.items()}
    q = {}

    # conv1 block-Toeplitz: K = raw w_in lanes, out lanes = (m, w1p, cout).
    w1c = pn["conv1_w"] * s                                  # (32,1,3,5)
    w1 = np.zeros((KH, K_IN_PAD, 3 * W1P * C1), np.float32)
    for i in range(KH):
        for j in range(KW):
            for m in range(3):
                for wp in range(W1P):
                    w_in = 3 * wp + m + j
                    lane = m * (W1P * C1) + wp * C1
                    w1[i, w_in, lane:lane + C1] = w1c[:, 0, i, j]
    q["w1"] = jnp.asarray(w1, jnp.bfloat16)
    q["b1"] = jnp.asarray(np.tile(pn["conv1_b"] * s, W1P)[None, :], jnp.float32)
    q["a1"] = jnp.asarray(np.tile(pn["prelu1"], W1P)[None, :], jnp.float32)

    # conv2 block-Toeplitz: K lanes = (w1p, cin), out lanes = (m, w2p, cout).
    w2c = pn["conv2_w"] * s                                  # (64,32,3,5)
    w2 = np.zeros((KH, W1P * C1, 3 * W2P * C2), np.float32)
    for i in range(KH):
        for j in range(KW):
            for m in range(3):
                for wp in range(W2P):
                    w1p = 3 * wp + m + j
                    k0 = w1p * C1
                    lane = m * (W2P * C2) + wp * C2
                    w2[i, k0:k0 + C1, lane:lane + C2] = w2c[:, :, i, j].T
    q["w2"] = jnp.asarray(w2, jnp.bfloat16)
    q["b2"] = jnp.asarray(np.tile(pn["conv2_b"] * s, W2P)[None, :], jnp.float32)
    q["a2"] = jnp.asarray(np.tile(pn["prelu2"], W2P)[None, :], jnp.float32)

    # First dense layer of both heads fused into one (1024,1024) matmul; rows
    # permuted so the kernel-native (h2, w2p, cout) feature layout is consumed
    # directly (absorbs the PyTorch NCHW flatten / transpose).
    w1orig = np.concatenate([pn["lab_w1"], pn["dom_w1"]], axis=1) * s   # (1024,1024)
    perm = np.zeros((1024,), np.int64)
    for h in range(H2):
        for w in range(W2P):
            for c in range(C2):
                perm[h * (W2P * C2) + w * C2 + c] = c * (H2 * W2P) + h * W2P + w
    q["wh1"] = jnp.asarray(w1orig[perm, :], jnp.bfloat16)
    q["bh1"] = jnp.asarray(
        (np.concatenate([pn["lab_b1"], pn["dom_b1"]]) * s)[None, :], jnp.float32)
    q["ah1"] = jnp.asarray(
        np.concatenate([pn["lab_prelu1"], pn["dom_prelu1"]])[None, :], jnp.float32)

    # Domain layers 2..4 stacked into single VMEM-resident operands.
    q["dw"] = jnp.asarray(np.stack([pn["dom_w2"], pn["dom_w3"], pn["dom_w4"]]) * s,
                          jnp.bfloat16)
    q["db"] = jnp.asarray((np.stack([pn["dom_b2"], pn["dom_b3"], pn["dom_b4"]]) * s
                           ).reshape(3, 1, 512), jnp.float32)
    q["da"] = jnp.asarray(np.stack([pn["dom_prelu2"], pn["dom_prelu3"],
                                    pn["dom_prelu4"]]).reshape(3, 1, 512), jnp.float32)

    # Final label(512->nc) + domain(512->1) layers as one block-diagonal matmul
    # with a lane-dense padded output slab.
    wld = np.zeros((1024, 2 * LANE), np.float32)
    wld[:512, :num_classes] = pn["lab_w2"]
    wld[512:, LANE:LANE + 1] = pn["dom_w5"]
    bld = np.zeros((1, 2 * LANE), np.float32)
    bld[0, :num_classes] = pn["lab_b2"]
    bld[0, LANE] = pn["dom_b5"][0]
    q["wld"] = jnp.asarray(wld, jnp.bfloat16)
    q["bld"] = jnp.asarray(bld, jnp.float32)
    return q


# ---------------------------------- forward --------------------------------- #

def dannet_forward(q, x_nchw, alpha, *, num_classes):
    # alpha only affects ReverseLayerF's backward pass; forward is identity.
    del alpha
    N = x_nchw.shape[0]
    assert x_nchw.shape[1:] == (1, H_IN, W_IN), "DaNNet expects (N,1,8,52) input"
    NP = max(8, -(-N // 8) * 8)          # pad batch so all slices are tile-aligned

    # Tiny host-side layout shuffle of the raw input (rows=(h_in, n), lanes=w_in).
    xs = x_nchw.astype(jnp.float32)[:, 0, :, :]                       # (N, 8, 52)
    xs = jnp.pad(xs, ((0, NP - N), (0, 0), (0, K_IN_PAD - W_IN)))     # (NP, 8, 128)
    xp = jnp.transpose(xs, (1, 0, 2)).reshape(H_IN * NP, K_IN_PAD).astype(jnp.bfloat16)

    feat, head = dannet_fused(xp, q, NP)

    # Present the feature in PyTorch NCHW-flatten order (n, c, h, w).  This is
    # one tiny post-kernel reshuffle of a (4*NP, 256) tensor, no longer an
    # inter-kernel HBM bounce.
    feature = (feat.reshape(H2, NP, W2P, C2)
               .transpose(1, 3, 0, 2)[:N]
               .reshape(N, C2 * H2 * W2P))
    class_out = head[:N, :num_classes]
    domain_out = head[:N, LANE:LANE + 1]
    return class_out, domain_out, feature


if __name__ == "__main__":
    num_classes = 7
    batch = 4
    key = jax.random.PRNGKey(0)
    kx, kp = jax.random.split(key)
    # EMG window: 8 electrode channels x 52 time samples -> 64*4*4 = 1024 feats
    x = jax.random.normal(kx, (batch, 1, H_IN, W_IN), dtype=jnp.float32)
    params = init_params(kp, num_classes)
    packed = pack_params(params, num_classes)

    fwd = jax.jit(functools.partial(dannet_forward, num_classes=num_classes))
    class_out, domain_out, feature = fwd(packed, x, 1.0)
    jax.block_until_ready((class_out, domain_out, feature))

    assert class_out.shape == (batch, num_classes)
    assert domain_out.shape == (batch, 1)
    assert feature.shape == (batch, 1024)
    assert jnp.all(jnp.isfinite(class_out))
    assert jnp.all(jnp.isfinite(domain_out))
    assert jnp.all(jnp.isfinite(feature))
    print("KERNEL_OK")
</pallas_src>

<mosaic_0001>
module attributes {stable_mosaic.version = 11 : i64} {
  func.func @_dannet_kernel(%arg0: i32, %arg1: memref<64x128xbf16, #tpu.memory_space<vmem>>, %arg2: memref<3x128x1536xbf16, #tpu.memory_space<vmem>>, %arg3: memref<1x512xf32, #tpu.memory_space<vmem>>, %arg4: memref<1x512xf32, #tpu.memory_space<vmem>>, %arg5: memref<3x512x768xbf16, #tpu.memory_space<vmem>>, %arg6: memref<1x256xf32, #tpu.memory_space<vmem>>, %arg7: memref<1x256xf32, #tpu.memory_space<vmem>>, %arg8: memref<1024x1024xbf16, #tpu.memory_space<vmem>>, %arg9: memref<1x1024xf32, #tpu.memory_space<vmem>>, %arg10: memref<1x1024xf32, #tpu.memory_space<vmem>>, %arg11: memref<3x512x512xbf16, #tpu.memory_space<vmem>>, %arg12: memref<3x1x512xf32, #tpu.memory_space<vmem>>, %arg13: memref<3x1x512xf32, #tpu.memory_space<vmem>>, %arg14: memref<1024x256xbf16, #tpu.memory_space<vmem>>, %arg15: memref<1x256xf32, #tpu.memory_space<vmem>>, %arg16: memref<32x256xf32, #tpu.memory_space<vmem>>, %arg17: memref<8x256xf32, #tpu.memory_space<vmem>>, %arg18: memref<48x512xf32, #tpu.memory_space<vmem>>) attributes {dimension_semantics = [#tpu.dimension_semantics<arbitrary>], iteration_bounds = array<i64: 1>, scalar_prefetch = 0 : i64, scratch_operands = 1 : i64, tpu.core_type = #tpu.core_type<tc>, window_params = [{pipeline_mode = #tpu.pipeline_mode<synchronous>, transform_indices = @transform_0, window_bounds = array<i64: 64, 128>}, {pipeline_mode = #tpu.pipeline_mode<synchronous>, transform_indices = @transform_1, window_bounds = array<i64: 3, 128, 1536>}, {pipeline_mode = #tpu.pipeline_mode<synchronous>, transform_indices = @transform_2, window_bounds = array<i64: 1, 512>}, {pipeline_mode = #tpu.pipeline_mode<synchronous>, transform_indices = @transform_3, window_bounds = array<i64: 1, 512>}, {pipeline_mode = #tpu.pipeline_mode<synchronous>, transform_indices = @transform_4, window_bounds = array<i64: 3, 512, 768>}, {pipeline_mode = #tpu.pipeline_mode<synchronous>, transform_indices = @transform_5, window_bounds = array<i64: 1, 256>}, {pipeline_mode = #tpu.pipeline_mode<synchronous>, transform_indices = @transform_6, window_bounds = array<i64: 1, 256>}, {pipeline_mode = #tpu.pipeline_mode<synchronous>, transform_indices = @transform_7, window_bounds = array<i64: 1024, 1024>}, {pipeline_mode = #tpu.pipeline_mode<synchronous>, transform_indices = @transform_8, window_bounds = array<i64: 1, 1024>}, {pipeline_mode = #tpu.pipeline_mode<synchronous>, transform_indices = @transform_9, window_bounds = array<i64: 1, 1024>}, {pipeline_mode = #tpu.pipeline_mode<synchronous>, transform_indices = @transform_10, window_bounds = array<i64: 3, 512, 512>}, {pipeline_mode = #tpu.pipeline_mode<synchronous>, transform_indices = @transform_11, window_bounds = array<i64: 3, 1, 512>}, {pipeline_mode = #tpu.pipeline_mode<synchronous>, transform_indices = @transform_12, window_bounds = array<i64: 3, 1, 512>}, {pipeline_mode = #tpu.pipeline_mode<synchronous>, transform_indices = @transform_13, window_bounds = array<i64: 1024, 256>}, {pipeline_mode = #tpu.pipeline_mode<synchronous>, transform_indices = @transform_14, window_bounds = array<i64: 1, 256>}, {pipeline_mode = #tpu.pipeline_mode<synchronous>, transform_indices = @transform_15, window_bounds = array<i64: 32, 256>}, {pipeline_mode = #tpu.pipeline_mode<synchronous>, transform_indices = @transform_16, window_bounds = array<i64: 8, 256>}]} {
    %c0 = arith.constant 0 : index
    %c0_0 = arith.constant 0 : index
    %0 = vector.load %arg1[%c0, %c0_0] : memref<64x128xbf16, #tpu.memory_space<vmem>>, vector<48x128xbf16>
    %c0_1 = arith.constant 0 : index
    %c0_2 = arith.constant 0 : index
    %c0_3 = arith.constant 0 : index
    %1 = vector.load %arg2[%c0_1, %c0_2, %c0_3] : memref<3x128x1536xbf16, #tpu.memory_space<vmem>>, vector<1x128x1536xbf16>
    %2 = vector.shape_cast %1 : vector<1x128x1536xbf16> to vector<128x1536xbf16>
    %cst = arith.constant dense<0.000000e+00> : vector<48x1536xf32>
    %3 = tpu.matmul %0, %2, %cst {dimension_numbers = #tpu.dot_dimension_numbers<[1], [0], [0], [1], [0, 0, 1, 1], [], []>} : vector<48x128xbf16>, vector<128x1536xbf16>, vector<48x1536xf32> -> vector<48x1536xf32>
    %c8 = arith.constant 8 : index
    %c0_4 = arith.constant 0 : index
    %4 = vector.load %arg1[%c8, %c0_4] : memref<64x128xbf16, #tpu.memory_space<vmem>>, vector<48x128xbf16>
    %c1 = arith.constant 1 : index
    %c0_5 = arith.constant 0 : index
    %c0_6 = arith.constant 0 : index
    %5 = vector.load %arg2[%c1, %c0_5, %c0_6] : memref<3x128x1536xbf16, #tpu.memory_space<vmem>>, vector<1x128x1536xbf16>
    %6 = vector.shape_cast %5 : vector<1x128x1536xbf16> to vector<128x1536xbf16>
    %cst_7 = arith.constant dense<0.000000e+00> : vector<48x1536xf32>
    %7 = tpu.matmul %4, %6, %cst_7 {dimension_numbers = #tpu.dot_dimension_numbers<[1], [0], [0], [1], [0, 0, 1, 1], [], []>} : vector<48x128xbf16>, vector<128x1536xbf16>, vector<48x1536xf32> -> vector<48x1536xf32>
    %8 = arith.addf %3, %7 : vector<48x1536xf32>
    %c16 = arith.constant 16 : index
    %c0_8 = arith.constant 0 : index
    %9 = vector.load %arg1[%c16, %c0_8] : memref<64x128xbf16, #tpu.memory_space<vmem>>, vector<48x128xbf16>
    %c2 = arith.constant 2 : index
    %c0_9 = arith.constant 0 : index
    %c0_10 = arith.constant 0 : index
    %10 = vector.load %arg2[%c2, %c0_9, %c0_10] : memref<3x128x1536xbf16, #tpu.memory_space<vmem>>, vector<1x128x1536xbf16>
    %11 = vector.shape_cast %10 : vector<1x128x1536xbf16> to vector<128x1536xbf16>
    %cst_11 = arith.constant dense<0.000000e+00> : vector<48x1536xf32>
    %12 = tpu.matmul %9, %11, %cst_11 {dimension_numbers = #tpu.dot_dimension_numbers<[1], [0], [0], [1], [0, 0, 1, 1], [], []>} : vector<48x128xbf16>, vector<128x1536xbf16>, vector<48x1536xf32> -> vector<48x1536xf32>
    %13 = arith.addf %8, %12 : vector<48x1536xf32>
    %14 = vector.extract_strided_slice %13 {offsets = [0, 0], sizes = [48, 512], strides = [1, 1]} : vector<48x1536xf32> to vector<48x512xf32>
    %15 = vector.extract_strided_slice %13 {offsets = [0, 512], sizes = [48, 512], strides = [1, 1]} : vector<48x1536xf32> to vector<48x512xf32>
    %16 = arith.maximumf %14, %15 : vector<48x512xf32>
    %17 = vector.extract_strided_slice %13 {offsets = [0, 1024], sizes = [48, 512], strides = [1, 1]} : vector<48x1536xf32> to vector<48x512xf32>
    %18 = arith.maximumf %16, %17 : vector<48x512xf32>
    %c0_12 = arith.constant 0 : index
    %c0_13 = arith.constant 0 : index
    %19 = vector.load %arg3[%c0_12, %c0_13] : memref<1x512xf32, #tpu.memory_space<vmem>>, vector<1x512xf32>
    %20 = vector.broadcast %19 : vector<1x512xf32> to vector<48x512xf32>
    %21 = arith.addf %18, %20 : vector<48x512xf32>
    %cst_14 = arith.constant 0.000000e+00 : f32
    %22 = vector.broadcast %cst_14 : f32 to vector<48x512xf32>
    %23 = arith.cmpf ogt, %21, %22 : vector<48x512xf32>
    %c0_15 = arith.constant 0 : index
    %c0_16 = arith.constant 0 : index
    %24 = vector.load %arg4[%c0_15, %c0_16] : memref<1x512xf32, #tpu.memory_space<vmem>>, vector<1x512xf32>
    %25 = vector.broadcast %24 : vector<1x512xf32> to vector<48x512xf32>
    %26 = arith.mulf %25, %21 : vector<48x512xf32>
    %27 = arith.select %23, %21, %26 : vector<48x512xi1>, vector<48x512xf32>
    %c0_17 = arith.constant 0 : index
    %c0_18 = arith.constant 0 : index
    %28 = vector.load %arg18[%c0_17, %c0_18] : memref<48x512xf32, #tpu.memory_space<vmem>>, vector<48x512xf32>
    tpu.vector_store %arg18[%c0_17, %c0_18], %27 {strides = array<i32>} : memref<48x512xf32, #tpu.memory_space<vmem>>, vector<48x512xf32>,
    %c0_19 = arith.constant 0 : index
    %c0_20 = arith.constant 0 : index
    %29 = vector.load %arg18[%c0_19, %c0_20] : memref<48x512xf32, #tpu.memory_space<vmem>>, vector<32x512xf32>
    %30 = arith.truncf %29 : vector<32x512xf32> to vector<32x512xbf16>
    %c0_21 = arith.constant 0 : index
    %c0_22 = arith.constant 0 : index
    %c0_23 = arith.constant 0 : index
    %31 = vector.load %arg5[%c0_21, %c0_22, %c0_23] : memref<3x512x768xbf16, #tpu.memory_space<vmem>>, vector<1x512x768xbf16>
    %32 = vector.shape_cast %31 : vector<1x512x768xbf16> to vector<512x768xbf16>
    %cst_24 = arith.constant dense<0.000000e+00> : vector<32x768xf32>
    %33 = tpu.matmul %30, %32, %cst_24 {dimension_numbers = #tpu.dot_dimension_numbers<[1], [0], [0], [1], [0, 0, 1, 1], [], []>} : vector<32x512xbf16>, vector<512x768xbf16>, vector<32x768xf32> -> vector<32x768xf32>
    %c8_25 = arith.constant 8 : index
    %c0_26 = arith.constant 0 : index
    %34 = vector.load %arg18[%c8_25, %c0_26] : memref<48x512xf32, #tpu.memory_space<vmem>>, vector<32x512xf32>
    %35 = arith.truncf %34 : vector<32x512xf32> to vector<32x512xbf16>
    %c1_27 = arith.constant 1 : index
    %c0_28 = arith.constant 0 : index
    %c0_29 = arith.constant 0 : index
    %36 = vector.load %arg5[%c1_27, %c0_28, %c0_29] : memref<3x512x768xbf16, #tpu.memory_space<vmem>>, vector<1x512x768xbf16>
    %37 = vector.shape_cast %36 : vector<1x512x768xbf16> to vector<512x768xbf16>
    %cst_30 = arith.constant dense<0.000000e+00> : vector<32x768xf32>
    %38 = tpu.matmul %35, %37, %cst_30 {dimension_numbers = #tpu.dot_dimension_numbers<[1], [0], [0], [1], [0, 0, 1, 1], [], []>} : vector<32x512xbf16>, vector<512x768xbf16>, vector<32x768xf32> -> vector<32x768xf32>
    %39 = arith.addf %33, %38 : vector<32x768xf32>
    %c16_31 = arith.constant 16 : index
    %c0_32 = arith.constant 0 : index
    %40 = vector.load %arg18[%c16_31, %c0_32] : memref<48x512xf32, #tpu.memory_space<vmem>>, vector<32x512xf32>
    %41 = arith.truncf %40 : vector<32x512xf32> to vector<32x512xbf16>
    %c2_33 = arith.constant 2 : index
    %c0_34 = arith.constant 0 : index
    %c0_35 = arith.constant 0 : index
    %42 = vector.load %arg5[%c2_33, %c0_34, %c0_35] : memref<3x512x768xbf16, #tpu.memory_space<vmem>>, vector<1x512x768xbf16>
    %43 = vector.shape_cast %42 : vector<1x512x768xbf16> to vector<512x768xbf16>
    %cst_36 = arith.constant dense<0.000000e+00> : vector<32x768xf32>
    %44 = tpu.matmul %41, %43, %cst_36 {dimension_numbers = #tpu.dot_dimension_numbers<[1], [0], [0], [1], [0, 0, 1, 1], [], []>} : vector<32x512xbf16>, vector<512x768xbf16>, vector<32x768xf32> -> vector<32x768xf32>
    %45 = arith.addf %39, %44 : vector<32x768xf32>
    %46 = vector.extract_strided_slice %45 {offsets = [0, 0], sizes = [32, 256], strides = [1, 1]} : vector<32x768xf32> to vector<32x256xf32>
    %47 = vector.extract_strided_slice %45 {offsets = [0, 256], sizes = [32, 256], strides = [1, 1]} : vector<32x768xf32> to vector<32x256xf32>
    %48 = arith.maximumf %46, %47 : vector<32x256xf32>
    %49 = vector.extract_strided_slice %45 {offsets = [0, 512], sizes = [32, 256], strides = [1, 1]} : vector<32x768xf32> to vector<32x256xf32>
    %50 = arith.maximumf %48, %49 : vector<32x256xf32>
    %c0_37 = arith.constant 0 : index
    %c0_38 = arith.constant 0 : index
    %51 = vector.load %arg6[%c0_37, %c0_38] : memref<1x256xf32, #tpu.memory_space<vmem>>, vector<1x256xf32>
    %52 = vector.broadcast %51 : vector<1x256xf32> to vector<32x256xf32>
    %53 = arith.addf %50, %52 : vector<32x256xf32>
    %cst_39 = arith.constant 0.000000e+00 : f32
    %54 = vector.broadcast %cst_39 : f32 to vector<32x256xf32>
    %55 = arith.cmpf ogt, %53, %54 : vector<32x256xf32>
    %c0_40 = arith.constant 0 : index
    %c0_41 = arith.constant 0 : index
    %56 = vector.load %arg7[%c0_40, %c0_41] : memref<1x256xf32, #tpu.memory_space<vmem>>, vector<1x256xf32>
    %57 = vector.broadcast %56 : vector<1x256xf32> to vector<32x256xf32>
    %58 = arith.mulf %57, %53 : vector<32x256xf32>
    %59 = arith.select %55, %53, %58 : vector<32x256xi1>, vector<32x256xf32>
    %c0_42 = arith.constant 0 : index
    %c0_43 = arith.constant 0 : index
    %60 = vector.load %arg16[%c0_42, %c0_43] : memref<32x256xf32, #tpu.memory_space<vmem>>, vector<32x256xf32>
    tpu.vector_store %arg16[%c0_42, %c0_43], %59 {strides = array<i32>} : memref<32x256xf32, #tpu.memory_space<vmem>>, vector<32x256xf32>,
    %c0_44 = arith.constant 0 : index
    %c0_45 = arith.constant 0 : index
    %61 = vector.load %arg16[%c0_44, %c0_45] : memref<32x256xf32, #tpu.memory_space<vmem>>, vector<8x256xf32>
    %c8_46 = arith.constant 8 : index
    %c0_47 = arith.constant 0 : index
    %62 = vector.load %arg16[%c8_46, %c0_47] : memref<32x256xf32, #tpu.memory_space<vmem>>, vector<8x256xf32>
    %c16_48 = arith.constant 16 : index
    %c0_49 = arith.constant 0 : index
    %63 = vector.load %arg16[%c16_48, %c0_49] : memref<32x256xf32, #tpu.memory_space<vmem>>, vector<8x256xf32>
    %c24 = arith.constant 24 : index
    %c0_50 = arith.constant 0 : index
    %64 = vector.load %arg16[%c24, %c0_50] : memref<32x256xf32, #tpu.memory_space<vmem>>, vector<8x256xf32>
    %65 = tpu.concatenate %61, %62, %63, %64 in 1 : vector<8x256xf32>, vector<8x256xf32>, vector<8x256xf32>, vector<8x256xf32> -> vector<8x1024xf32>
    %66 = arith.truncf %65 : vector<8x1024xf32> to vector<8x1024xbf16>
    %c0_51 = arith.constant 0 : index
    %c0_52 = arith.constant 0 : index
    %67 = vector.load %arg8[%c0_51, %c0_52] : memref<1024x1024xbf16, #tpu.memory_space<vmem>>, vector<1024x1024xbf16>
    %cst_53 = arith.constant dense<0.000000e+00> : vector<8x1024xf32>
    %68 = tpu.matmul %66, %67, %cst_53 {dimension_numbers = #tpu.dot_dimension_numbers<[1], [0], [0], [1], [0, 0, 1, 1], [], []>} : vector<8x1024xbf16>, vector<1024x1024xbf16>, vector<8x1024xf32> -> vector<8x1024xf32>
    %c0_54 = arith.constant 0 : index
    %c0_55 = arith.constant 0 : index
    %69 = vector.load %arg9[%c0_54, %c0_55] : memref<1x1024xf32, #tpu.memory_space<vmem>>, vector<1x1024xf32>
    %70 = vector.broadcast %69 : vector<1x1024xf32> to vector<8x1024xf32>
    %71 = arith.addf %68, %70 : vector<8x1024xf32>
    %cst_56 = arith.constant 0.000000e+00 : f32
    %72 = vector.broadcast %cst_56 : f32 to vector<8x1024xf32>
    %73 = arith.cmpf ogt, %71, %72 : vector<8x1024xf32>
    %c0_57 = arith.constant 0 : index
    %c0_58 = arith.constant 0 : index
    %74 = vector.load %arg10[%c0_57, %c0_58] : memref<1x1024xf32, #tpu.memory_space<vmem>>, vector<1x1024xf32>
    %75 = vector.broadcast %74 : vector<1x1024xf32> to vector<8x1024xf32>
    %76 = arith.mulf %75, %71 : vector<8x1024xf32>
    %77 = arith.select %73, %71, %76 : vector<8x1024xi1>, vector<8x1024xf32>
    %78 = vector.extract_strided_slice %77 {offsets = [0, 0], sizes = [8, 512], strides = [1, 1]} : vector<8x1024xf32> to vector<8x512xf32>
    %79 = vector.extract_strided_slice %77 {offsets = [0, 512], sizes = [8, 512], strides = [1, 1]} : vector<8x1024xf32> to vector<8x512xf32>
    %80 = arith.truncf %79 : vector<8x512xf32> to vector<8x512xbf16>
    %c0_59 = arith.constant 0 : index
    %c0_60 = arith.constant 0 : index
    %c0_61 = arith.constant 0 : index
    %81 = vector.load %arg11[%c0_59, %c0_60, %c0_61] : memref<3x512x512xbf16, #tpu.memory_space<vmem>>, vector<1x512x512xbf16>
    %82 = vector.shape_cast %81 : vector<1x512x512xbf16> to vector<512x512xbf16>
    %cst_62 = arith.constant dense<0.000000e+00> : vector<8x512xf32>
    %83 = tpu.matmul %80, %82, %cst_62 {dimension_numbers = #tpu.dot_dimension_numbers<[1], [0], [0], [1], [0, 0, 1, 1], [], []>} : vector<8x512xbf16>, vector<512x512xbf16>, vector<8x512xf32> -> vector<8x512xf32>
    %c0_63 = arith.constant 0 : index
    %c0_64 = arith.constant 0 : index
    %c0_65 = arith.constant 0 : index
    %84 = vector.load %arg12[%c0_63, %c0_64, %c0_65] : memref<3x1x512xf32, #tpu.memory_space<vmem>>, vector<1x1x512xf32>
    %85 = vector.shape_cast %84 : vector<1x1x512xf32> to vector<1x512xf32>
    %86 = vector.broadcast %85 : vector<1x512xf32> to vector<8x512xf32>
    %87 = arith.addf %83, %86 : vector<8x512xf32>
    %cst_66 = arith.constant 0.000000e+00 : f32
    %88 = vector.broadcast %cst_66 : f32 to vector<8x512xf32>
    %89 = arith.cmpf ogt, %87, %88 : vector<8x512xf32>
    %c0_67 = arith.constant 0 : index
    %c0_68 = arith.constant 0 : index
    %c0_69 = arith.constant 0 : index
    %90 = vector.load %arg13[%c0_67, %c0_68, %c0_69] : memref<3x1x512xf32, #tpu.memory_space<vmem>>, vector<1x1x512xf32>
    %91 = vector.shape_cast %90 : vector<1x1x512xf32> to vector<1x512xf32>
    %92 = vector.broadcast %91 : vector<1x512xf32> to vector<8x512xf32>
    %93 = arith.mulf %92, %87 : vector<8x512xf32>
    %94 = arith.select %89, %87, %93 : vector<8x512xi1>, vector<8x512xf32>
    %95 = arith.truncf %94 : vector<8x512xf32> to vector<8x512xbf16>
    %c1_70 = arith.constant 1 : index
    %c0_71 = arith.constant 0 : index
    %c0_72 = arith.constant 0 : index
    %96 = vector.load %arg11[%c1_70, %c0_71, %c0_72] : memref<3x512x512xbf16, #tpu.memory_space<vmem>>, vector<1x512x512xbf16>
    %97 = vector.shape_cast %96 : vector<1x512x512xbf16> to vector<512x512xbf16>
    %cst_73 = arith.constant dense<0.000000e+00> : vector<8x512xf32>
    %98 = tpu.matmul %95, %97, %cst_73 {dimension_numbers = #tpu.dot_dimension_numbers<[1], [0], [0], [1], [0, 0, 1, 1], [], []>} : vector<8x512xbf16>, vector<512x512xbf16>, vector<8x512xf32> -> vector<8x512xf32>
    %c1_74 = arith.constant 1 : index
    %c0_75 = arith.constant 0 : index
    %c0_76 = arith.constant 0 : index
    %99 = vector.load %arg12[%c1_74, %c0_75, %c0_76] : memref<3x1x512xf32, #tpu.memory_space<vmem>>, vector<1x1x512xf32>
    %100 = vector.shape_cast %99 : vector<1x1x512xf32> to vector<1x512xf32>
    %101 = vector.broadcast %100 : vector<1x512xf32> to vector<8x512xf32>
    %102 = arith.addf %98, %101 : vector<8x512xf32>
    %cst_77 = arith.constant 0.000000e+00 : f32
    %103 = vector.broadcast %cst_77 : f32 to vector<8x512xf32>
    %104 = arith.cmpf ogt, %102, %103 : vector<8x512xf32>
    %c1_78 = arith.constant 1 : index
    %c0_79 = arith.constant 0 : index
    %c0_80 = arith.constant 0 : index
    %105 = vector.load %arg13[%c1_78, %c0_79, %c0_80] : memref<3x1x512xf32, #tpu.memory_space<vmem>>, vector<1x1x512xf32>
    %106 = vector.shape_cast %105 : vector<1x1x512xf32> to vector<1x512xf32>
    %107 = vector.broadcast %106 : vector<1x512xf32> to vector<8x512xf32>
    %108 = arith.mulf %107, %102 : vector<8x512xf32>
    %109 = arith.select %104, %102, %108 : vector<8x512xi1>, vector<8x512xf32>
    %110 = arith.truncf %109 : vector<8x512xf32> to vector<8x512xbf16>
    %c2_81 = arith.constant 2 : index
    %c0_82 = arith.constant 0 : index
    %c0_83 = arith.constant 0 : index
    %111 = vector.load %arg11[%c2_81, %c0_82, %c0_83] : memref<3x512x512xbf16, #tpu.memory_space<vmem>>, vector<1x512x512xbf16>
    %112 = vector.shape_cast %111 : vector<1x512x512xbf16> to vector<512x512xbf16>
    %cst_84 = arith.constant dense<0.000000e+00> : vector<8x512xf32>
    %113 = tpu.matmul %110, %112, %cst_84 {dimension_numbers = #tpu.dot_dimension_numbers<[1], [0], [0], [1], [0, 0, 1, 1], [], []>} : vector<8x512xbf16>, vector<512x512xbf16>, vector<8x512xf32> -> vector<8x512xf32>
    %c2_85 = arith.constant 2 : index
    %c0_86 = arith.constant 0 : index
    %c0_87 = arith.constant 0 : index
    %114 = vector.load %arg12[%c2_85, %c0_86, %c0_87] : memref<3x1x512xf32, #tpu.memory_space<vmem>>, vector<1x1x512xf32>
    %115 = vector.shape_cast %114 : vector<1x1x512xf32> to vector<1x512xf32>
    %116 = vector.broadcast %115 : vector<1x512xf32> to vector<8x512xf32>
    %117 = arith.addf %113, %116 : vector<8x512xf32>
    %cst_88 = arith.constant 0.000000e+00 : f32
    %118 = vector.broadcast %cst_88 : f32 to vector<8x512xf32>
    %119 = arith.cmpf ogt, %117, %118 : vector<8x512xf32>
    %c2_89 = arith.constant 2 : index
    %c0_90 = arith.constant 0 : index
    %c0_91 = arith.constant 0 : index
    %120 = vector.load %arg13[%c2_89, %c0_90, %c0_91] : memref<3x1x512xf32, #tpu.memory_space<vmem>>, vector<1x1x512xf32>
    %121 = vector.shape_cast %120 : vector<1x1x512xf32> to vector<1x512xf32>
    %122 = vector.broadcast %121 : vector<1x512xf32> to vector<8x512xf32>
    %123 = arith.mulf %122, %117 : vector<8x512xf32>
    %124 = arith.select %119, %117, %123 : vector<8x512xi1>, vector<8x512xf32>
    %125 = tpu.concatenate %78, %124 in 1 : vector<8x512xf32>, vector<8x512xf32> -> vector<8x1024xf32>
    %126 = arith.truncf %125 : vector<8x1024xf32> to vector<8x1024xbf16>
    %c0_92 = arith.constant 0 : index
    %c0_93 = arith.constant 0 : index
    %127 = vector.load %arg14[%c0_92, %c0_93] : memref<1024x256xbf16, #tpu.memory_space<vmem>>, vector<1024x256xbf16>
    %cst_94 = arith.constant dense<0.000000e+00> : vector<8x256xf32>
    %128 = tpu.matmul %126, %127, %cst_94 {dimension_numbers = #tpu.dot_dimension_numbers<[1], [0], [0], [1], [0, 0, 1, 1], [], []>} : vector<8x1024xbf16>, vector<1024x256xbf16>, vector<8x256xf32> -> vector<8x256xf32>
    %c0_95 = arith.constant 0 : index
    %c0_96 = arith.constant 0 : index
    %129 = vector.load %arg15[%c0_95, %c0_96] : memref<1x256xf32, #tpu.memory_space<vmem>>, vector<1x256xf32>
    %130 = vector.broadcast %129 : vector<1x256xf32> to vector<8x256xf32>
    %131 = arith.addf %128, %130 : vector<8x256xf32>
    %c0_97 = arith.constant 0 : index
    %c0_98 = arith.constant 0 : index
    %132 = vector.load %arg17[%c0_97, %c0_98] : memref<8x256xf32, #tpu.memory_space<vmem>>, vector<8x256xf32>
    tpu.vector_store %arg17[%c0_97, %c0_98], %131 {strides = array<i32>} : memref<8x256xf32, #tpu.memory_space<vmem>>, vector<8x256xf32>,
    return
  }
  func.func @transform_0(%arg0: i32) -> (i32, i32) {
    %c0_i32 = arith.constant 0 : i32
    %c0_i32_0 = arith.constant 0 : i32
    %c0_i32_1 = arith.constant 0 : i32
    return %c0_i32, %c0_i32_0 : i32, i32
  }
  func.func @transform_1(%arg0: i32) -> (i32, i32, i32) {
    %c0_i32 = arith.constant 0 : i32
    %c0_i32_0 = arith.constant 0 : i32
    %c0_i32_1 = arith.constant 0 : i32
    %c0_i32_2 = arith.constant 0 : i32
    return %c0_i32, %c0_i32_0, %c0_i32_1 : i32, i32, i32
  }
  func.func @transform_2(%arg0: i32) -> (i32, i32) {
    %c0_i32 = arith.constant 0 : i32
    %c0_i32_0 = arith.constant 0 : i32
    %c0_i32_1 = arith.constant 0 : i32
    return %c0_i32, %c0_i32_0 : i32, i32
  }
  func.func @transform_3(%arg0: i32) -> (i32, i32) {
    %c0_i32 = arith.constant 0 : i32
    %c0_i32_0 = arith.constant 0 : i32
    %c0_i32_1 = arith.constant 0 : i32
    return %c0_i32, %c0_i32_0 : i32, i32
  }
  func.func @transform_4(%arg0: i32) -> (i32, i32, i32) {
    %c0_i32 = arith.constant 0 : i32
    %c0_i32_0 = arith.constant 0 : i32
    %c0_i32_1 = arith.constant 0 : i32
    %c0_i32_2 = arith.constant 0 : i32
    return %c0_i32, %c0_i32_0, %c0_i32_1 : i32, i32, i32
  }
  func.func @transform_5(%arg0: i32) -> (i32, i32) {
    %c0_i32 = arith.constant 0 : i32
    %c0_i32_0 = arith.constant 0 : i32
    %c0_i32_1 = arith.constant 0 : i32
    return %c0_i32, %c0_i32_0 : i32, i32
  }
  func.func @transform_6(%arg0: i32) -> (i32, i32) {
    %c0_i32 = arith.constant 0 : i32
    %c0_i32_0 = arith.constant 0 : i32
    %c0_i32_1 = arith.constant 0 : i32
    return %c0_i32, %c0_i32_0 : i32, i32
  }
  func.func @transform_7(%arg0: i32) -> (i32, i32) {
    %c0_i32 = arith.constant 0 : i32
    %c0_i32_0 = arith.constant 0 : i32
    %c0_i32_1 = arith.constant 0 : i32
    return %c0_i32, %c0_i32_0 : i32, i32
  }
  func.func @transform_8(%arg0: i32) -> (i32, i32) {
    %c0_i32 = arith.constant 0 : i32
    %c0_i32_0 = arith.constant 0 : i32
    %c0_i32_1 = arith.constant 0 : i32
    return %c0_i32, %c0_i32_0 : i32, i32
  }
  func.func @transform_9(%arg0: i32) -> (i32, i32) {
    %c0_i32 = arith.constant 0 : i32
    %c0_i32_0 = arith.constant 0 : i32
    %c0_i32_1 = arith.constant 0 : i32
    return %c0_i32, %c0_i32_0 : i32, i32
  }
  func.func @transform_10(%arg0: i32) -> (i32, i32, i32) {
    %c0_i32 = arith.constant 0 : i32
    %c0_i32_0 = arith.constant 0 : i32
    %c0_i32_1 = arith.constant 0 : i32
    %c0_i32_2 = arith.constant 0 : i32
    return %c0_i32, %c0_i32_0, %c0_i32_1 : i32, i32, i32
  }
  func.func @transform_11(%arg0: i32) -> (i32, i32, i32) {
    %c0_i32 = arith.constant 0 : i32
    %c0_i32_0 = arith.constant 0 : i32
    %c0_i32_1 = arith.constant 0 : i32
    %c0_i32_2 = arith.constant 0 : i32
    return %c0_i32, %c0_i32_0, %c0_i32_1 : i32, i32, i32
  }
  func.func @transform_12(%arg0: i32) -> (i32, i32, i32) {
    %c0_i32 = arith.constant 0 : i32
    %c0_i32_0 = arith.constant 0 : i32
    %c0_i32_1 = arith.constant 0 : i32
    %c0_i32_2 = arith.constant 0 : i32
    return %c0_i32, %c0_i32_0, %c0_i32_1 : i32, i32, i32
  }
  func.func @transform_13(%arg0: i32) -> (i32, i32) {
    %c0_i32 = arith.constant 0 : i32
    %c0_i32_0 = arith.constant 0 : i32
    %c0_i32_1 = arith.constant 0 : i32
    return %c0_i32, %c0_i32_0 : i32, i32
  }
  func.func @transform_14(%arg0: i32) -> (i32, i32) {
    %c0_i32 = arith.constant 0 : i32
    %c0_i32_0 = arith.constant 0 : i32
    %c0_i32_1 = arith.constant 0 : i32
    return %c0_i32, %c0_i32_0 : i32, i32
  }
  func.func @transform_15(%arg0: i32) -> (i32, i32) {
    %c0_i32 = arith.constant 0 : i32
    %c0_i32_0 = arith.constant 0 : i32
    %c0_i32_1 = arith.constant 0 : i32
    return %c0_i32, %c0_i32_0 : i32, i32
  }
  func.func @transform_16(%arg0: i32) -> (i32, i32) {
    %c0_i32 = arith.constant 0 : i32
    %c0_i32_0 = arith.constant 0 : i32
    %c0_i32_1 = arith.constant 0 : i32
    return %c0_i32, %c0_i32_0 : i32, i32
  }
}

</mosaic_0001>

<bundles_post_ra>
// kernel: dannet_forward.1
= control target key start
LH: loop header
LB: loop body
LE: loop exit
PB: predicated region body
PF: predicated region fallthrough
CT: control target
= control target key end

     0   :  { %s22092_s0 = inlined_call_operand.vmem [shape: bf16[64,128], index: 0, kind: input, shape index: {}]   ;;  %s22093_s1 = inlined_call_operand.hbm [shape: bf16[3,128,1536], index: 1, kind: input, shape index: {}]   ;;  %s22094_s2 = inlined_call_operand.hbm [shape: f32[1,512], index: 2, kind: input, shape index: {}]   ;;  %s22095_s3 = inlined_call_operand.hbm [shape: f32[1,512], index: 3, kind: input, shape index: {}]   ;;  %s22096_s4 = inlined_call_operand.hbm [shape: bf16[3,512,768], index: 4, kind: input, shape index: {}]   ;;  %s22097_s5 = inlined_call_operand.hbm [shape: f32[1,256], index: 5, kind: input, shape index: {}]   ;;  %s22098_s6 = inlined_call_operand.hbm [shape: f32[1,256], index: 6, kind: input, shape index: {}]   ;;  %s22099_s7 = inlined_call_operand.hbm [shape: bf16[1024,1024], index: 7, kind: input, shape index: {}]   ;;  %s22100_s8 = inlined_call_operand.hbm [shape: f32[1,1024], index: 8, kind: input, shape index: {}]   ;;  %s22101_s9 = inlined_call_operand.hbm [shape: f32[1,1024], index: 9, kind: input, shape index: {}]   ;;  %s22102_s10 = inlined_call_operand.hbm [shape: bf16[3,512,512], index: 10, kind: input, shape index: {}]   ;;  %s22103_s11 = inlined_call_operand.hbm [shape: f32[3,1,512], index: 11, kind: input, shape index: {}]   ;;  %s22104_s12 = inlined_call_operand.hbm [shape: f32[3,1,512], index: 12, kind: input, shape index: {}]   ;;  %s22105_s13 = inlined_call_operand.hbm [shape: bf16[1024,256], index: 13, kind: input, shape index: {}]   ;;  %s22106_s14 = inlined_call_operand.hbm [shape: f32[1,256], index: 14, kind: input, shape index: {}]   ;;  %s22107_s15 = inlined_call_operand.vmem [shape: f32[32,256], index: 15, kind: output, shape index: {0}]   ;;  %s22108_s16 = inlined_call_operand.vmem [shape: f32[8,256], index: 16, kind: output, shape index: {1}]  }
   0x1   :  { %22148 = sst [smem:[#allocation143_spill]] %s22092_s0 }
   0x2   :  { %22 = vsyncpa [#allocation4], 0 }
   0x3   :  { %23 = vsyncpa [#allocation6], 0 }
   0x4   :  { %24 = vsyncpa [#allocation9], 0 }
   0x5   :  { %25 = vsyncpa [#allocation12], 0 }
   0x6   :  { %26 = vsyncpa [#allocation15], 0 }
   0x7   :  { %27 = vsyncpa [#allocation18], 0 }
   0x8   :  { %28 = vsyncpa [#allocation21], 0 }
   0x9   :  { %29 = vsyncpa [#allocation24], 0  ;;  %s20109_s21 = smov [#allocation5]   ;;  %s20110_s23 = smov [#allocation8]  }
   0xa   :  { %s50_s22 = sshll.u32 %s20109_s21, 4  ;;  %s69_s24 = sshll.u32 %s20110_s23, 4  ;;  %s51_s22 = int_to_ptr.vmem [resolvable:$true] %s50_s22  ;;  %s70_s24 = int_to_ptr.vmem [resolvable:$true] %s69_s24 }
   0xb   :  { %s19821_s25 = scalar_lea.vmem %s51_s22, 64  ;;  %p19826_p1 = scmp.lt.s32.totalorder %s51_s22, %s51_s22 }
   0xc   :  { %p19822_p0 = scmp.ne.s32.totalorder %s51_s22, %s19821_s25  ;;  %p19827_p2 = scmp.lt.s32.totalorder %s19821_s25, %s19821_s25 }
   0xe   :  { %p19828_p3 = por %p19827_p2, %p19826_p1 }
  0x10   :  { %p19829_p4 = pnand %p19828_p3, %p19822_p0 }
  0x12   :  { %19832 = shalt.err (!%p19829_p4)
}
  0x13   :  { %53 = dma.hbm_to_vmem [thread:$0]  %s22094_s2, 64, %s51_s22, [#allocation6]  }
  0x14   :  { %s19841_s28 = scalar_lea.vmem %s70_s24, 73728  ;;  %p19846_p6 = scmp.lt.s32.totalorder %s70_s24, %s70_s24 }
  0x15   :  { %p19842_p5 = scmp.ne.s32.totalorder %s70_s24, %s19841_s28  ;;  %p19847_p7 = scmp.lt.s32.totalorder %s19841_s28, %s19841_s28 }
  0x17   :  { %p19848_p8 = por %p19847_p7, %p19846_p6 }
  0x19   :  { %p19849_p9 = pnand %p19848_p8, %p19842_p5 }
  0x1b   :  { %19852 = shalt.err (!%p19849_p9)
}
  0x1c   :  { %s20111_s29 = smov 384   ;;  %s20112_s30 = smov 24  }
  0x1d   :  { %75 = dma.hbm_to_vmem [thread:$0]  %s22096_s4, 73728, %s70_s24, [#allocation9], %s20111_s29, %s20111_s29, %s20112_s30  }
  0x1e   :  { %s20113_s18 = smov [#allocation11]   ;;  %s20114_s20 = smov [#allocation14]  }
  0x1f   :  { %s92_s19 = sshll.u32 %s20113_s18, 4  ;;  %s114_s21 = sshll.u32 %s20114_s20, 4  ;;  %s93_s19 = int_to_ptr.vmem [resolvable:$true] %s92_s19  ;;  %s115_s21 = int_to_ptr.vmem [resolvable:$true] %s114_s21 }
  0x20   :  { %s19861_s2 = scalar_lea.vmem %s93_s19, 32  ;;  %p19866_p11 = scmp.lt.s32.totalorder %s93_s19, %s93_s19 }
  0x21   :  { %p19862_p10 = scmp.ne.s32.totalorder %s93_s19, %s19861_s2  ;;  %p19867_p12 = scmp.lt.s32.totalorder %s19861_s2, %s19861_s2 }
  0x23   :  { %p19868_p13 = por %p19867_p12, %p19866_p11 }
  0x25   :  { %p19869_p0 = pnand %p19868_p13, %p19862_p10 }
  0x27   :  { %19872 = shalt.err (!%p19869_p0)
}
  0x28   :  { %95 = dma.hbm_to_vmem [thread:$0]  %s22098_s6, 32, %s93_s19, [#allocation12]  }
  0x29   :  { %s19881_s25 = scalar_lea.vmem %s115_s21, 128  ;;  %p19886_p2 = scmp.lt.s32.totalorder %s115_s21, %s115_s21 }
  0x2a   :  { %p19882_p1 = scmp.ne.s32.totalorder %s115_s21, %s19881_s25  ;;  %p19887_p3 = scmp.lt.s32.totalorder %s19881_s25, %s19881_s25 }
  0x2c   :  { %p19888_p4 = por %p19887_p3, %p19886_p2 }
  0x2e   :  { %p19889_p5 = pnand %p19888_p4, %p19882_p1 }
  0x30   :  { %19892 = shalt.err (!%p19889_p5)
}
  0x31   :  { %117 = dma.hbm_to_vmem [thread:$0]  %s22100_s8, 128, %s115_s21, [#allocation15]  }
  0x32   :  { %s20115_s26 = smov [#allocation17]  }
  0x33   :  { %s133_s27 = sshll.u32 %s20115_s26, 4  ;;  %s134_s27 = int_to_ptr.vmem [resolvable:$true] %s133_s27 }
  0x34   :  { %s19901_s28 = scalar_lea.vmem %s134_s27, 49152  ;;  %p19906_p7 = scmp.lt.s32.totalorder %s134_s27, %s134_s27 }
  0x35   :  { %p19902_p6 = scmp.ne.s32.totalorder %s134_s27, %s19901_s28  ;;  %p19907_p8 = scmp.lt.s32.totalorder %s19901_s28, %s19901_s28 }
  0x37   :  { %p19908_p9 = por %p19907_p8, %p19906_p7 }
  0x39   :  { %p19909_p10 = pnand %p19908_p9, %p19902_p6 }
  0x3b   :  { %19912 = shalt.err (!%p19909_p10)
}
  0x3c   :  { %s20116_s6 = smov 256   ;;  %s20117_s29 = smov 16  }
  0x3d   :  { %139 = dma.hbm_to_vmem [thread:$0]  %s22102_s10, 49152, %s134_s27, [#allocation18], %s20116_s6, %s20116_s6, %s20117_s29  }
  0x3e   :  { %s20118_s17 = smov [#allocation20]   ;;  %s20119_s8 = smov [#allocation3]  }
  0x3f   :  { %s157_s18 = sshll.u32 %s20118_s17, 4  ;;  %s37_s19 = sshll.u32 %s20119_s8, 4  ;;  %s158_s18 = int_to_ptr.vmem [resolvable:$true] %s157_s18  ;;  %s38_s19 = int_to_ptr.vmem [resolvable:$true] %s37_s19 }
  0x40   :  { %s19921_s20 = scalar_lea.vmem %s158_s18, 192  ;;  %p19926_p12 = scmp.lt.s32.totalorder %s158_s18, %s158_s18 }
  0x41   :  { %p19922_p11 = scmp.ne.s32.totalorder %s158_s18, %s19921_s20  ;;  %p19927_p13 = scmp.lt.s32.totalorder %s19921_s20, %s19921_s20 }
  0x43   :  { %p19928_p0 = por %p19927_p13, %p19926_p12 }
  0x45   :  { %p19929_p1 = pnand %p19928_p0, %p19922_p11 }
  0x47   :  { %19932 = shalt.err (!%p19929_p1)
}
  0x48   :  { %s20120_s21 = smov 64   ;;  %s20121_s2 = smov 4  }
  0x49   :  { %163 = dma.hbm_to_vmem [thread:$0]  %s22104_s12, 192, %s158_s18, [#allocation21], %s20120_s21, %s20120_s21, %s20121_s2  }
  0x4a   :  { %s19941_s10 = scalar_lea.vmem %s38_s19, 36864  ;;  %p19946_p3 = scmp.lt.s32.totalorder %s38_s19, %s38_s19 }
  0x4b   :  { %p19942_p2 = scmp.ne.s32.totalorder %s38_s19, %s19941_s10  ;;  %p19947_p4 = scmp.lt.s32.totalorder %s19941_s10, %s19941_s10 }
  0x4d   :  { %p19948_p5 = por %p19947_p4, %p19946_p3 }
  0x4f   :  { %p19949_p6 = pnand %p19948_p5, %p19942_p2 }
  0x51   :  { %19952 = shalt.err (!%p19949_p6)
}
  0x52   :  { %s20122_s25 = smov 768   ;;  %s20123_s4 = smov 48  }
  0x53   :  { %43 = dma.hbm_to_vmem [thread:$0]  %s22093_s1, 36864, %s38_s19, [#allocation4], %s20122_s25, %s20122_s25, %s20123_s4  }
  0x54   :  { %s20124_s27 = smov [#allocation7]   ;;  %s20125_s6 = smov [#allocation10]  }
  0x55   :  { %s60_s28 = sshll.u32 %s20124_s27, 4  ;;  %s82_s29 = sshll.u32 %s20125_s6, 4  ;;  %s61_s28 = int_to_ptr.vmem [resolvable:$true] %s60_s28  ;;  %s83_s29 = int_to_ptr.vmem [resolvable:$true] %s82_s29 }
  0x56   :  { %s19961_s12 = scalar_lea.vmem %s61_s28, 64  ;;  %p19966_p8 = scmp.lt.s32.totalorder %s61_s28, %s61_s28 }
  0x57   :  { %p19962_p7 = scmp.ne.s32.totalorder %s61_s28, %s19961_s12  ;;  %p19967_p9 = scmp.lt.s32.totalorder %s19961_s12, %s19961_s12 }
  0x59   :  { %p19968_p10 = por %p19967_p9, %p19966_p8 }
  0x5b   :  { %p19969_p11 = pnand %p19968_p10, %p19962_p7 }
  0x5d   :  { %19972 = shalt.err (!%p19969_p11)
}
  0x5e   :  { %63 = dma.hbm_to_vmem [thread:$0]  %s22095_s3, 64, %s61_s28, [#allocation6]  }
  0x5f   :  { %s19981_s17 = scalar_lea.vmem %s83_s29, 32  ;;  %p19986_p13 = scmp.lt.s32.totalorder %s83_s29, %s83_s29 }
  0x60   :  { %p19982_p12 = scmp.ne.s32.totalorder %s83_s29, %s19981_s17  ;;  %p19987_p0 = scmp.lt.s32.totalorder %s19981_s17, %s19981_s17 }
  0x62   :  { %p19988_p1 = por %p19987_p0, %p19986_p13 }
  0x64   :  { %p19989_p2 = pnand %p19988_p1, %p19982_p12 }
  0x66   :  { %19992 = shalt.err (!%p19989_p2)
}
  0x67   :  { %85 = dma.hbm_to_vmem [thread:$0]  %s22097_s5, 32, %s83_s29, [#allocation9]  }
  0x68   :  { %s20126_s8 = smov [#allocation13]  }
  0x69   :  { %s101_s19 = sshll.u32 %s20126_s8, 4  ;;  %s102_s19 = int_to_ptr.vmem [resolvable:$true] %s101_s19 }
  0x6a   :  { %s20001_s20 = scalar_lea.vmem %s102_s19, 65536  ;;  %p20006_p4 = scmp.lt.s32.totalorder %s102_s19, %s102_s19 }
  0x6b   :  { %p20002_p3 = scmp.ne.s32.totalorder %s102_s19, %s20001_s20  ;;  %p20007_p5 = scmp.lt.s32.totalorder %s20001_s20, %s20001_s20 }
  0x6d   :  { %p20008_p6 = por %p20007_p5, %p20006_p4 }
  0x6f   :  { %p20009_p7 = pnand %p20008_p6, %p20002_p3 }
  0x71   :  { %20012 = shalt.err (!%p20009_p7)
}
  0x72   :  { %s20127_s3 = smov 512   ;;  %s20128_s22 = smov 32  }
  0x73   :  { %107 = dma.hbm_to_vmem [thread:$0]  %s22099_s7, 65536, %s102_s19, [#allocation12], %s20127_s3, %s20127_s3, %s20128_s22  }
  0x74   :  { %s20129_s25 = smov [#allocation16]   ;;  %s20130_s24 = smov [#allocation19]  }
  0x75   :  { %s124_s4 = sshll.u32 %s20129_s25, 4  ;;  %s145_s5 = sshll.u32 %s20130_s24, 4  ;;  %s125_s4 = int_to_ptr.vmem [resolvable:$true] %s124_s4  ;;  %s146_s5 = int_to_ptr.vmem [resolvable:$true] %s145_s5 }
  0x76   :  { %s20021_s26 = scalar_lea.vmem %s125_s4, 128  ;;  %p20026_p9 = scmp.lt.s32.totalorder %s125_s4, %s125_s4 }
  0x77   :  { %p20022_p8 = scmp.ne.s32.totalorder %s125_s4, %s20021_s26  ;;  %p20027_p10 = scmp.lt.s32.totalorder %s20021_s26, %s20021_s26 }
  0x79   :  { %p20028_p11 = por %p20027_p10, %p20026_p9 }
  0x7b   :  { %p20029_p12 = pnand %p20028_p11, %p20022_p8 }
  0x7d   :  { %20032 = shalt.err (!%p20029_p12)
}
  0x7e   :  { %127 = dma.hbm_to_vmem [thread:$0]  %s22101_s9, 128, %s125_s4, [#allocation15]  }
  0x7f   :  { %s20041_s6 = scalar_lea.vmem %s146_s5, 192  ;;  %p20046_p0 = scmp.lt.s32.totalorder %s146_s5, %s146_s5 }
  0x80   :  { %p20042_p13 = scmp.ne.s32.totalorder %s146_s5, %s20041_s6  ;;  %p20047_p1 = scmp.lt.s32.totalorder %s20041_s6, %s20041_s6 }
  0x82   :  { %p20048_p2 = por %p20047_p1, %p20046_p0 }
  0x84   :  { %p20049_p3 = pnand %p20048_p2, %p20042_p13 }
  0x86   :  { %20052 = shalt.err (!%p20049_p3)
}
  0x87   :  { %151 = dma.hbm_to_vmem [thread:$0]  %s22103_s11, 192, %s146_s5, [#allocation18], %s20120_s21, %s20120_s21, %s20121_s2  }
  0x88   :  { %s20131_s12 = smov [#allocation22]  }
  0x89   :  { %s169_s30 = sshll.u32 %s20131_s12, 4  ;;  %s170_s30 = int_to_ptr.vmem [resolvable:$true] %s169_s30 }
  0x8a   :  { %s20061_s0 = scalar_lea.vmem %s170_s30, 16384  ;;  %p20066_p5 = scmp.lt.s32.totalorder %s170_s30, %s170_s30 }
  0x8b   :  { %p20062_p4 = scmp.ne.s32.totalorder %s170_s30, %s20061_s0  ;;  %p20067_p6 = scmp.lt.s32.totalorder %s20061_s0, %s20061_s0 }
  0x8d   :  { %p20068_p7 = por %p20067_p6, %p20066_p5 }
  0x8f   :  { %p20069_p8 = pnand %p20068_p7, %p20062_p4 }
  0x91   :  { %20072 = shalt.err (!%p20069_p8)
}
  0x92   :  { %s20132_s9 = smov 128   ;;  %s20133_s17 = smov 8  }
  0x93   :  { %175 = dma.hbm_to_vmem [thread:$0]  %s22105_s13, 16384, %s170_s30, [#allocation21], %s20132_s9, %s20132_s9, %s20133_s17  }
  0x94   :  { %s20134_s8 = smov [#allocation23]  }
  0x95   :  { %s182_s19 = sshll.u32 %s20134_s8, 4  ;;  %s183_s19 = int_to_ptr.vmem [resolvable:$true] %s182_s19 }
  0x96   :  { %s20081_s11 = scalar_lea.vmem %s183_s19, 32  ;;  %p20086_p10 = scmp.lt.s32.totalorder %s183_s19, %s183_s19 }
  0x97   :  { %p20082_p9 = scmp.ne.s32.totalorder %s183_s19, %s20081_s11  ;;  %p20087_p11 = scmp.lt.s32.totalorder %s20081_s11, %s20081_s11 }
  0x99   :  { %p20088_p12 = por %p20087_p11, %p20086_p10 }
  0x9b   :  { %p20089_p13 = pnand %p20088_p12, %p20082_p9 }
  0x9d   :  { %20092 = shalt.err (!%p20089_p13)
}
  0x9e   :  { %185 = dma.hbm_to_vmem [thread:$0]  %s22106_s14, 32, %s183_s19, [#allocation24]  }
  0x9f   :  { %20093 = dma.done.wait [#allocation4], 36864  }
  0xa0   :  { %20094 = vsyncadd [#allocation4], 4294930432 }
  0xa1   :  { %20095 = dma.done.wait [#allocation6], 128  }
  0xa2   :  { %20096 = vsyncadd [#allocation6], 4294967168 }
  0xa3   :  { %20097 = dma.done.wait [#allocation9], 73760  }
  0xa4   :  { %20098 = vsyncadd [#allocation9], 4294893536 }
  0xa5   :  { %20099 = dma.done.wait [#allocation12], 65568  }
  0xa6   :  { %20100 = vsyncadd [#allocation12], 4294901728 }
  0xa7   :  { %20101 = dma.done.wait [#allocation15], 256  }
  0xa8   :  { %20102 = vsyncadd [#allocation15], 4294967040 }
  0xa9   :  { %20103 = dma.done.wait [#allocation18], 49344  }
  0xaa   :  { %20104 = vsyncadd [#allocation18], 4294917952 }
  0xab   :  { %20105 = dma.done.wait [#allocation21], 16576  }
  0xac   :  { %20106 = vsyncadd [#allocation21], 4294950720 }
  0xad   :  { %20107 = dma.done.wait [#allocation24], 32  }
  0xae   :  { %20108 = vsyncadd [#allocation24], 4294967264  ;;  %v20135_v0 = vmov 0   ;;  %v17738_v1 = vld [vmem:[#allocation3 + $0x5a4] ss:$48 sps:$4 sm:$0xff]   ;;  %s22149_s20 = sld [smem:[#allocation143_spill]] }
  0xaf   :  { %959 = vmatprep.mubr.bf16.mxu0 %v20135_v0  ;;  %1022 = vmatprep.mubr.bf16.mxu1 %v20135_v0  ;;  %v17740_v2 = vld [vmem:[#allocation3 + $0x5ac] ss:$48 sps:$4 sm:$0xff]   ;;  %v17742_v3 = vld [vmem:[#allocation3 + $0x5a0] ss:$48 sps:$4 sm:$0xff]   ;;  %v17743_v4 = vld [vmem:[#allocation3 + $0x5a8] ss:$48 sps:$4 sm:$0xff]  }
  0xb0   :  { %927 = vmatprep.subr.bf16.mxu0 %v17738_v1  ;;  %990 = vmatprep.subr.bf16.mxu1 %v17740_v2  ;;  %v17744_v5 = vld [vmem:[#allocation3 + $0x544] ss:$48 sps:$4 sm:$0xff]   ;;  %v17746_v6 = vld [vmem:[#allocation3 + $0x54c] ss:$48 sps:$4 sm:$0xff]   ;;  %v17748_v7 = vld [vmem:[#allocation3 + $0x540] ss:$48 sps:$4 sm:$0xff]  }
  0xb1   :  { %928 = vmatpush1.bf16.msra.mxu0 %v17742_v3  ;;  %991 = vmatpush1.bf16.msra.mxu1 %v17743_v4  ;;  %v17749_v8 = vld [vmem:[#allocation3 + $0x548] ss:$48 sps:$4 sm:$0xff]   ;;  %v17750_v9 = vld [vmem:[#allocation3 + $0x4e4] ss:$48 sps:$4 sm:$0xff]   ;;  %v17752_v10 = vld [vmem:[#allocation3 + $0x4ec] ss:$48 sps:$4 sm:$0xff]  }
  0xb2   :  { %929 = vmatprep.subr.bf16.mxu0 %v17744_v5  ;;  %992 = vmatprep.subr.bf16.mxu1 %v17746_v6  ;;  %v17754_v11 = vld [vmem:[#allocation3 + $0x4e0] ss:$48 sps:$4 sm:$0xff]   ;;  %v17755_v12 = vld [vmem:[#allocation3 + $0x4e8] ss:$48 sps:$4 sm:$0xff]   ;;  %v17756_v13 = vld [vmem:[#allocation3 + $0x484] ss:$48 sps:$4 sm:$0xff]  }
  0xb3   :  { %v17758_v14 = vld [vmem:[#allocation3 + $0x48c] ss:$48 sps:$4 sm:$0xff]   ;;  %v17760_v15 = vld [vmem:[#allocation3 + $0x480] ss:$48 sps:$4 sm:$0xff]   ;;  %v17761_v16 = vld [vmem:[#allocation3 + $0x488] ss:$48 sps:$4 sm:$0xff]  }
  0xb4   :  { %v17762_v17 = vld [vmem:[#allocation3 + $0x424] ss:$48 sps:$4 sm:$0xff]   ;;  %v17764_v18 = vld [vmem:[#allocation3 + $0x42c] ss:$48 sps:$4 sm:$0xff]   ;;  %v17766_v19 = vld [vmem:[#allocation3 + $0x420] ss:$48 sps:$4 sm:$0xff]  }
  0xb5   :  { %930 = vmatpush1.bf16.msra.mxu0 %v17748_v7  ;;  %993 = vmatpush1.bf16.msra.mxu1 %v17749_v8  ;;  %v17767_v20 = vld [vmem:[#allocation3 + $0x428] ss:$48 sps:$4 sm:$0xff]   ;;  %v17768_v21 = vld [vmem:[#allocation3 + $0x3c4] ss:$48 sps:$4 sm:$0xff]   ;;  %v17770_v22 = vld [vmem:[#allocation3 + $0x3cc] ss:$48 sps:$4 sm:$0xff]  }
  0xb6   :  { %931 = vmatprep.subr.bf16.mxu0 %v17750_v9  ;;  %994 = vmatprep.subr.bf16.mxu1 %v17752_v10  ;;  %v17772_v23 = vld [vmem:[#allocation3 + $0x3c0] ss:$48 sps:$4 sm:$0xff]   ;;  %v17773_v24 = vld [vmem:[#allocation3 + $0x3c8] ss:$48 sps:$4 sm:$0xff]   ;;  %v17774_v25 = vld [vmem:[#allocation3 + $0x364] ss:$48 sps:$4 sm:$0xff]  }
  0xb7   :  { %v17776_v26 = vld [vmem:[#allocation3 + $0x36c] ss:$48 sps:$4 sm:$0xff]   ;;  %v17778_v27 = vld [vmem:[#allocation3 + $0x360] ss:$48 sps:$4 sm:$0xff]   ;;  %v17779_v28 = vld [vmem:[#allocation3 + $0x368] ss:$48 sps:$4 sm:$0xff]  }
  0xb8   :  { %v17780_v29 = vld [vmem:[#allocation3 + $0x304] ss:$48 sps:$4 sm:$0xff]   ;;  %v17782_v30 = vld [vmem:[#allocation3 + $0x30c] ss:$48 sps:$4 sm:$0xff]   ;;  %v17784_v31 = vld [vmem:[#allocation3 + $0x300] ss:$48 sps:$4 sm:$0xff]  }
  0xb9   :  { %932 = vmatpush1.bf16.msra.mxu0 %v17754_v11  ;;  %995 = vmatpush1.bf16.msra.mxu1 %v17755_v12  ;;  %v17785_v32 = vld [vmem:[#allocation3 + $0x308] ss:$48 sps:$4 sm:$0xff]   ;;  %v20274_v33 = vld [vmem:[%s22149_s20 + $0x4] sm:$0xf]  ;;  %v17792_v36 = vld [vmem:[#allocation3 + $0x5bc] ss:$48 sps:$4 sm:$0xff]  }
  0xba   :  { %933 = vmatprep.subr.bf16.mxu0 %v17756_v13  ;;  %996 = vmatprep.subr.bf16.mxu1 %v17758_v14  ;;  %v231_v34 = vld [vmem:[%s22149_s20 + $0x8] sm:$0xf]  ;;  %v17789_v35 = vld [vmem:[#allocation3 + $0x5b4] ss:$48 sps:$4 sm:$0xff]   ;;  %v232_v37 = vld [vmem:[%s22149_s20 + $0xc] sm:$0xf] }
  0xbb   :  { %v20283_v38 = vcombine.low %v20274_v33, %v231_v34  ;;  %v17787_v39 = vld [vmem:[#allocation3 + $0x5b0] ss:$48 sps:$4 sm:$0xff]   ;;  %v17790_v40 = vld [vmem:[#allocation3 + $0x5b8] ss:$48 sps:$4 sm:$0xff]   ;;  %v20285_v41 = vcombine.low %v231_v34, %v232_v37  ;;  %v17795_v42 = vld [vmem:[#allocation3 + $0x554] ss:$48 sps:$4 sm:$0xff]  }
  0xbc   :  { %v17798_v43 = vld [vmem:[#allocation3 + $0x55c] ss:$48 sps:$4 sm:$0xff]   ;;  %v17793_v44 = vld [vmem:[#allocation3 + $0x550] ss:$48 sps:$4 sm:$0xff]   ;;  %v17796_v45 = vld [vmem:[#allocation3 + $0x558] ss:$48 sps:$4 sm:$0xff]  }
  0xbd   :  { %934 = vmatpush1.bf16.msra.mxu0 %v17760_v15  ;;  %997 = vmatpush1.bf16.msra.mxu1 %v17761_v16  ;;  %v233_v46 = vld [vmem:[%s22149_s20 + $0x10] sm:$0xf]  ;;  %v234_v47 = vld [vmem:[%s22149_s20 + $0x14] sm:$0xf]  ;;  %v17804_v49 = vld [vmem:[#allocation3 + $0x4fc] ss:$48 sps:$4 sm:$0xff]  }
  0xbe   :  { %935 = vmatprep.subr.bf16.mxu0 %v17762_v17  ;;  %998 = vmatprep.subr.bf16.mxu1 %v17764_v18  ;;  %v17801_v48 = vld [vmem:[#allocation3 + $0x4f4] ss:$48 sps:$4 sm:$0xff]   ;;  %v20295_v50 = vcombine.low %v233_v46, %v234_v47  ;;  %v20299_v51 = vcombine.low %v232_v37, %v233_v46  ;;  %v17799_v52 = vld [vmem:[#allocation3 + $0x4f0] ss:$48 sps:$4 sm:$0xff]   ;;  %v17802_v53 = vld [vmem:[#allocation3 + $0x4f8] ss:$48 sps:$4 sm:$0xff]  }
  0xbf   :  { %v17808_v54 = vld [vmem:[#allocation3 + $0x494] ss:$48 sps:$4 sm:$0xff]   ;;  %v17811_v55 = vld [vmem:[#allocation3 + $0x49c] ss:$48 sps:$4 sm:$0xff]   ;;  %v17806_v56 = vld [vmem:[#allocation3 + $0x490] ss:$48 sps:$4 sm:$0xff]  }
  0xc0   :  { %v17809_v57 = vld [vmem:[#allocation3 + $0x498] ss:$48 sps:$4 sm:$0xff]   ;;  %v17814_v59 = vld [vmem:[#allocation3 + $0x434] ss:$48 sps:$4 sm:$0xff]   ;;  %v17817_v60 = vld [vmem:[#allocation3 + $0x43c] ss:$48 sps:$4 sm:$0xff]  }
  0xc1   :  { %936 = vmatpush1.bf16.msra.mxu0 %v17766_v19  ;;  %999 = vmatpush1.bf16.msra.mxu1 %v17767_v20  ;;  %v331_v58 = vld [vmem:[%s22149_s20 + $0x18] sm:$0xf]  ;;  %v17812_v62 = vld [vmem:[#allocation3 + $0x430] ss:$48 sps:$4 sm:$0xff]   ;;  %v17821_v1 = vld [vmem:[#allocation3 + $0x3d4] ss:$48 sps:$4 sm:$0xff]  }
  0xc2   :  { %937 = vmatprep.subr.bf16.mxu0 %v17768_v21  ;;  %1000 = vmatprep.subr.bf16.mxu1 %v17770_v22  ;;  %v20308_v61 = vcombine.low %v234_v47, %v331_v58  ;;  %v17815_v63 = vld [vmem:[#allocation3 + $0x438] ss:$48 sps:$4 sm:$0xff]   ;;  %v17824_v2 = vld [vmem:[#allocation3 + $0x3dc] ss:$48 sps:$4 sm:$0xff]   ;;  %v17819_v3 = vld [vmem:[#allocation3 + $0x3d0] ss:$48 sps:$4 sm:$0xff]  }
  0xc3   :  { %v17822_v4 = vld [vmem:[#allocation3 + $0x3d8] ss:$48 sps:$4 sm:$0xff]   ;;  %v17827_v5 = vld [vmem:[#allocation3 + $0x374] ss:$48 sps:$4 sm:$0xff]   ;;  %v17830_v6 = vld [vmem:[#allocation3 + $0x37c] ss:$48 sps:$4 sm:$0xff]  }
  0xc4   :  { %v17825_v7 = vld [vmem:[#allocation3 + $0x370] ss:$48 sps:$4 sm:$0xff]   ;;  %v17828_v8 = vld [vmem:[#allocation3 + $0x378] ss:$48 sps:$4 sm:$0xff]   ;;  %v17833_v9 = vld [vmem:[#allocation3 + $0x314] ss:$48 sps:$4 sm:$0xff]  }
  0xc5   :  { %938 = vmatpush1.bf16.msra.mxu0 %v17772_v23  ;;  %1001 = vmatpush1.bf16.msra.mxu1 %v17773_v24  ;;  %v17836_v10 = vld [vmem:[#allocation3 + $0x31c] ss:$48 sps:$4 sm:$0xff]   ;;  %v17831_v11 = vld [vmem:[#allocation3 + $0x310] ss:$48 sps:$4 sm:$0xff]   ;;  %v17834_v12 = vld [vmem:[#allocation3 + $0x318] ss:$48 sps:$4 sm:$0xff]  }
  0xc6   :  { %939 = vmatprep.subr.bf16.mxu0 %v17774_v25  ;;  %1002 = vmatprep.subr.bf16.mxu1 %v17776_v26  ;;  %v17839_v13 = vld [vmem:[#allocation3 + $0x5c4] ss:$48 sps:$4 sm:$0xff]   ;;  %v17842_v14 = vld [vmem:[#allocation3 + $0x5cc] ss:$48 sps:$4 sm:$0xff]   ;;  %v17837_v15 = vld [vmem:[#allocation3 + $0x5c0] ss:$48 sps:$4 sm:$0xff]  }
  0xc7   :  { %v17840_v16 = vld [vmem:[#allocation3 + $0x5c8] ss:$48 sps:$4 sm:$0xff]   ;;  %v17845_v17 = vld [vmem:[#allocation3 + $0x564] ss:$48 sps:$4 sm:$0xff]   ;;  %v17848_v18 = vld [vmem:[#allocation3 + $0x56c] ss:$48 sps:$4 sm:$0xff]  }
  0xc8   :  { %v17843_v19 = vld [vmem:[#allocation3 + $0x560] ss:$48 sps:$4 sm:$0xff]   ;;  %v17846_v20 = vld [vmem:[#allocation3 + $0x568] ss:$48 sps:$4 sm:$0xff]   ;;  %v17851_v21 = vld [vmem:[#allocation3 + $0x504] ss:$48 sps:$4 sm:$0xff]  }
  0xc9   :  { %940 = vmatpush1.bf16.msra.mxu0 %v17778_v27  ;;  %1003 = vmatpush1.bf16.msra.mxu1 %v17779_v28  ;;  %v17854_v22 = vld [vmem:[#allocation3 + $0x50c] ss:$48 sps:$4 sm:$0xff]   ;;  %v17849_v23 = vld [vmem:[#allocation3 + $0x500] ss:$48 sps:$4 sm:$0xff]   ;;  %v17852_v24 = vld [vmem:[#allocation3 + $0x508] ss:$48 sps:$4 sm:$0xff]  }
  0xca   :  { %941 = vmatprep.subr.bf16.mxu0 %v17780_v29  ;;  %1004 = vmatprep.subr.bf16.mxu1 %v17782_v30  ;;  %v17857_v25 = vld [vmem:[#allocation3 + $0x4a4] ss:$48 sps:$4 sm:$0xff]   ;;  %v17860_v26 = vld [vmem:[#allocation3 + $0x4ac] ss:$48 sps:$4 sm:$0xff]   ;;  %v17855_v27 = vld [vmem:[#allocation3 + $0x4a0] ss:$48 sps:$4 sm:$0xff]  }
  0xcb   :  { %v17858_v28 = vld [vmem:[#allocation3 + $0x4a8] ss:$48 sps:$4 sm:$0xff]   ;;  %v17863_v29 = vld [vmem:[#allocation3 + $0x444] ss:$48 sps:$4 sm:$0xff]   ;;  %v17866_v30 = vld [vmem:[#allocation3 + $0x44c] ss:$48 sps:$4 sm:$0xff]  }
  0xcc   :  { %v17869_v34 = vld [vmem:[#allocation3 + $0x3e4] ss:$48 sps:$4 sm:$0xff]   ;;  %v17870_v37 = vld [vmem:[#allocation3 + $0x3e8] ss:$48 sps:$4 sm:$0xff]   ;;  %v17879_v46 = vld [vmem:[#allocation3 + $0x320] ss:$48 sps:$4 sm:$0xff]  }
  0xcd   :  { %942 = vmatpush1.bf16.msra.mxu0 %v17784_v31  ;;  %1005 = vmatpush1.bf16.msra.mxu1 %v17785_v32  ;;  %v17861_v31 = vld [vmem:[#allocation3 + $0x440] ss:$48 sps:$4 sm:$0xff]   ;;  %v17864_v32 = vld [vmem:[#allocation3 + $0x448] ss:$48 sps:$4 sm:$0xff]   ;;  %v17899_v58 = vld [vmem:[#allocation3 + $0x1e4] ss:$48 sps:$4 sm:$0xff]  }
  0xce   :  { %1053 = vmatprep.subr.bf16.mxu0 %v17789_v35  ;;  %1116 = vmatprep.subr.bf16.mxu1 %v17792_v36  ;;  %v17872_v35 = vld [vmem:[#allocation3 + $0x3ec] ss:$48 sps:$4 sm:$0xff]   ;;  %v17867_v36 = vld [vmem:[#allocation3 + $0x3e0] ss:$48 sps:$4 sm:$0xff]   ;;  %v17882_v47 = vld [vmem:[#allocation3 + $0x328] ss:$48 sps:$4 sm:$0xff]  }
  0xd0   :  { %960 = vmatmul.mubr.bf16.vlgmr.msra.gmra.mxu0 %v20283_v38  ;;  %1023 = vmatmul.mubr.bf16.vlgmr.msra.gmra.mxu1 %v20283_v38 }
  0xd1   :  { %1054 = vmatpush1.bf16.msra.mxu0 %v17787_v39  ;;  %1117 = vmatpush1.bf16.msra.mxu1 %v17790_v40  ;;  %v17875_v39 = vld [vmem:[#allocation3 + $0x384] ss:$48 sps:$4 sm:$0xff]   ;;  %v17878_v40 = vld [vmem:[#allocation3 + $0x38c] ss:$48 sps:$4 sm:$0xff]  }
  0xd2   :  { %1055 = vmatprep.subr.bf16.mxu0 %v17795_v42  ;;  %1118 = vmatprep.subr.bf16.mxu1 %v17798_v43  ;;  %v17873_v42 = vld [vmem:[#allocation3 + $0x380] ss:$48 sps:$4 sm:$0xff]   ;;  %v17876_v43 = vld [vmem:[#allocation3 + $0x388] ss:$48 sps:$4 sm:$0xff]  }
  0xd3   :  { %969 = vmatprep.mubr.bf16.mxu0 %v20135_v0  ;;  %1032 = vmatprep.mubr.bf16.mxu1 %v20135_v0 }
  0xd5   :  { %1056 = vmatpush1.bf16.msra.mxu0 %v17793_v44  ;;  %1119 = vmatpush1.bf16.msra.mxu1 %v17796_v45  ;;  %v17881_v44 = vld [vmem:[#allocation3 + $0x324] ss:$48 sps:$4 sm:$0xff]   ;;  %v17884_v45 = vld [vmem:[#allocation3 + $0x32c] ss:$48 sps:$4 sm:$0xff]  }
  0xd6   :  { %1057 = vmatprep.subr.bf16.mxu0 %v17801_v48  ;;  %1120 = vmatprep.subr.bf16.mxu1 %v17804_v49  ;;  %v17887_v48 = vld [vmem:[#allocation3 + $0x2a4] ss:$48 sps:$4 sm:$0xff]   ;;  %v17890_v49 = vld [vmem:[#allocation3 + $0x2ac] ss:$48 sps:$4 sm:$0xff]  }
  0xd8   :  { %970 = vmatmul.mubr.bf16.gmra.mxu0 %v20299_v51  ;;  %1033 = vmatmul.mubr.bf16.gmra.mxu1 %v20299_v51 }
  0xd9   :  { %1058 = vmatpush1.bf16.msra.mxu0 %v17799_v52  ;;  %1121 = vmatpush1.bf16.msra.mxu1 %v17802_v53  ;;  %v17885_v52 = vld [vmem:[#allocation3 + $0x2a0] ss:$48 sps:$4 sm:$0xff]   ;;  %v17888_v53 = vld [vmem:[#allocation3 + $0x2a8] ss:$48 sps:$4 sm:$0xff]  }
  0xda   :  { %1059 = vmatprep.subr.bf16.mxu0 %v17808_v54  ;;  %1122 = vmatprep.subr.bf16.mxu1 %v17811_v55  ;;  %v17893_v54 = vld [vmem:[#allocation3 + $0x244] ss:$48 sps:$4 sm:$0xff]   ;;  %v17896_v55 = vld [vmem:[#allocation3 + $0x24c] ss:$48 sps:$4 sm:$0xff]  }
  0xdb   :  { %979 = vmatprep.mubr.bf16.mxu0 %v20135_v0  ;;  %1042 = vmatprep.mubr.bf16.mxu1 %v20135_v0 }
  0xdd   :  { %1060 = vmatpush1.bf16.msra.mxu0 %v17806_v56  ;;  %1123 = vmatpush1.bf16.msra.mxu1 %v17809_v57  ;;  %v17891_v56 = vld [vmem:[#allocation3 + $0x240] ss:$48 sps:$4 sm:$0xff]   ;;  %v17894_v57 = vld [vmem:[#allocation3 + $0x248] ss:$48 sps:$4 sm:$0xff]  }
  0xde   :  { %1061 = vmatprep.subr.bf16.mxu0 %v17814_v59  ;;  %1124 = vmatprep.subr.bf16.mxu1 %v17817_v60  ;;  %v17902_v59 = vld [vmem:[#allocation3 + $0x1ec] ss:$48 sps:$4 sm:$0xff]   ;;  %v17897_v60 = vld [vmem:[#allocation3 + $0x1e0] ss:$48 sps:$4 sm:$0xff]  }
  0xe0   :  { %980 = vmatmul.mubr.bf16.gmra.mxu0 %v20308_v61  ;;  %1043 = vmatmul.mubr.bf16.gmra.mxu1 %v20308_v61 }
  0xe1   :  { %1062 = vmatpush1.bf16.msra.mxu0 %v17812_v62  ;;  %1125 = vmatpush1.bf16.msra.mxu1 %v17815_v63  ;;  %v17900_v62 = vld [vmem:[#allocation3 + $0x1e8] ss:$48 sps:$4 sm:$0xff]   ;;  %v17905_v63 = vld [vmem:[#allocation3 + $0x184] ss:$48 sps:$4 sm:$0xff]  }
  0xe2   :  { %1063 = vmatprep.subr.bf16.mxu0 %v17821_v1  ;;  %1126 = vmatprep.subr.bf16.mxu1 %v17824_v2  ;;  %v17903_v1 = vld [vmem:[#allocation3 + $0x180] ss:$48 sps:$4 sm:$0xff]   ;;  %v17906_v2 = vld [vmem:[#allocation3 + $0x188] ss:$48 sps:$4 sm:$0xff]  }
  0xe3   :  { %1085 = vmatprep.mubr.bf16.mxu0 %v20135_v0  ;;  %1148 = vmatprep.mubr.bf16.mxu1 %v20135_v0 }
  0xe5   :  { %1064 = vmatpush1.bf16.msra.mxu0 %v17819_v3  ;;  %1127 = vmatpush1.bf16.msra.mxu1 %v17822_v4  ;;  %v17911_v3 = vld [vmem:[#allocation3 + $0x124] ss:$48 sps:$4 sm:$0xff]   ;;  %v17914_v4 = vld [vmem:[#allocation3 + $0x12c] ss:$48 sps:$4 sm:$0xff]  }
  0xe6   :  { %1065 = vmatprep.subr.bf16.mxu0 %v17827_v5  ;;  %1128 = vmatprep.subr.bf16.mxu1 %v17830_v6  ;;  %v17909_v5 = vld [vmem:[#allocation3 + $0x120] ss:$48 sps:$4 sm:$0xff]   ;;  %v17912_v6 = vld [vmem:[#allocation3 + $0x128] ss:$48 sps:$4 sm:$0xff]  }
  0xe9   :  { %1066 = vmatpush1.bf16.msra.mxu0 %v17825_v7  ;;  %1129 = vmatpush1.bf16.msra.mxu1 %v17828_v8  ;;  %v17917_v7 = vld [vmem:[#allocation3 + $0xc4] ss:$48 sps:$4 sm:$0xff]   ;;  %v17915_v8 = vld [vmem:[#allocation3 + $0xc0] ss:$48 sps:$4 sm:$0xff]  }
  0xea   :  { %1067 = vmatprep.subr.bf16.mxu0 %v17833_v9  ;;  %1130 = vmatprep.subr.bf16.mxu1 %v17836_v10  ;;  %v17918_v9 = vld [vmem:[#allocation3 + $0xc8] ss:$48 sps:$4 sm:$0xff]   ;;  %v17923_v10 = vld [vmem:[#allocation3 + $0x64] ss:$48 sps:$4 sm:$0xff]  }
  0xed   :  { %1068 = vmatpush1.bf16.msra.mxu0 %v17831_v11  ;;  %1131 = vmatpush1.bf16.msra.mxu1 %v17834_v12  ;;  %v17926_v11 = vld [vmem:[#allocation3 + $0x6c] ss:$48 sps:$4 sm:$0xff]   ;;  %v17921_v12 = vld [vmem:[#allocation3 + $0x60] ss:$48 sps:$4 sm:$0xff]  }
  0xee   :  { %1179 = vmatprep.subr.bf16.mxu0 %v17839_v13  ;;  %1242 = vmatprep.subr.bf16.mxu1 %v17842_v14  ;;  %v17924_v13 = vld [vmem:[#allocation3 + $0x68] ss:$48 sps:$4 sm:$0xff]   ;;  %v17929_v14 = vld [vmem:[#allocation3 + $0x4] ss:$48 sps:$4 sm:$0xff]  }
  0xf0   :  { %1086 = vmatmul.mubr.bf16.vlgmr.msra.gmra.mxu0 %v20283_v38  ;;  %1149 = vmatmul.mubr.bf16.vlgmr.msra.gmra.mxu1 %v20283_v38 }
  0xf1   :  { %1180 = vmatpush1.bf16.msra.mxu0 %v17837_v15  ;;  %1243 = vmatpush1.bf16.msra.mxu1 %v17840_v16  ;;  %v17927_v15 = vld [vmem:[#allocation3] ss:$48 sps:$4 sm:$0xff]   ;;  %v17930_v16 = vld [vmem:[#allocation3 + $0x8] ss:$48 sps:$4 sm:$0xff]  }
  0xf2   :  { %1181 = vmatprep.subr.bf16.mxu0 %v17845_v17  ;;  %1244 = vmatprep.subr.bf16.mxu1 %v17848_v18  ;;  %v229_v17 = vld [vmem:[%s22149_s20] sm:$0xf]  ;;  %v17936_v18 = vld [vmem:[#allocation3 + $0x2b4] ss:$48 sps:$4 sm:$0xff]  }
  0xf3   :  { %1095 = vmatprep.mubr.bf16.mxu0 %v20135_v0  ;;  %1158 = vmatprep.mubr.bf16.mxu1 %v20135_v0 }
  0xf5   :  { %1182 = vmatpush1.bf16.msra.mxu0 %v17843_v19  ;;  %1245 = vmatpush1.bf16.msra.mxu1 %v17846_v20  ;;  %v17939_v19 = vld [vmem:[#allocation3 + $0x2bc] ss:$48 sps:$4 sm:$0xff]   ;;  %v20342_v20 = vcombine.low %v229_v17, %v20274_v33  ;;  %v18023_v17 = vld [vmem:[#allocation3 + $0x88] ss:$48 sps:$4 sm:$0xff]  }
  0xf6   :  { %1183 = vmatprep.subr.bf16.mxu0 %v17851_v21  ;;  %1246 = vmatprep.subr.bf16.mxu1 %v17854_v22  ;;  %v17934_v21 = vld [vmem:[#allocation3 + $0x2b0] ss:$48 sps:$4 sm:$0xff]   ;;  %v17937_v22 = vld [vmem:[#allocation3 + $0x2b8] ss:$48 sps:$4 sm:$0xff]   ;;  %v17952_v33 = vld [vmem:[#allocation3 + $0x1fc] ss:$48 sps:$4 sm:$0xff]  }
  0xf8   :  { %1096 = vmatmul.mubr.bf16.gmra.mxu0 %v20299_v51  ;;  %1159 = vmatmul.mubr.bf16.gmra.mxu1 %v20299_v51 }
  0xf9   :  { %1184 = vmatpush1.bf16.msra.mxu0 %v17849_v23  ;;  %1247 = vmatpush1.bf16.msra.mxu1 %v17852_v24  ;;  %v17942_v23 = vld [vmem:[#allocation3 + $0x254] ss:$48 sps:$4 sm:$0xff]   ;;  %v17945_v24 = vld [vmem:[#allocation3 + $0x25c] ss:$48 sps:$4 sm:$0xff]  }
  0xfa   :  { %1185 = vmatprep.subr.bf16.mxu0 %v17857_v25  ;;  %1248 = vmatprep.subr.bf16.mxu1 %v17860_v26  ;;  %v17940_v25 = vld [vmem:[#allocation3 + $0x250] ss:$48 sps:$4 sm:$0xff]   ;;  %v17943_v26 = vld [vmem:[#allocation3 + $0x258] ss:$48 sps:$4 sm:$0xff]  }
  0xfb   :  { %1105 = vmatprep.mubr.bf16.mxu0 %v20135_v0  ;;  %1168 = vmatprep.mubr.bf16.mxu1 %v20135_v0 }
  0xfd   :  { %1186 = vmatpush1.bf16.msra.mxu0 %v17855_v27  ;;  %1249 = vmatpush1.bf16.msra.mxu1 %v17858_v28  ;;  %v17949_v27 = vld [vmem:[#allocation3 + $0x1f4] ss:$48 sps:$4 sm:$0xff]   ;;  %v17947_v28 = vld [vmem:[#allocation3 + $0x1f0] ss:$48 sps:$4 sm:$0xff]  }
  0xfe   :  { %1187 = vmatprep.subr.bf16.mxu0 %v17863_v29  ;;  %1250 = vmatprep.subr.bf16.mxu1 %v17866_v30  ;;  %v17950_v29 = vld [vmem:[#allocation3 + $0x1f8] ss:$48 sps:$4 sm:$0xff]   ;;  %v17955_v30 = vld [vmem:[#allocation3 + $0x194] ss:$48 sps:$4 sm:$0xff]  }
 0x100   :  { %1106 = vmatmul.mubr.bf16.gmra.mxu0 %v20308_v61  ;;  %1169 = vmatmul.mubr.bf16.gmra.mxu1 %v20308_v61 }
 0x101   :  { %1188 = vmatpush1.bf16.msra.mxu0 %v17861_v31  ;;  %1251 = vmatpush1.bf16.msra.mxu1 %v17864_v32  ;;  %v17958_v31 = vld [vmem:[#allocation3 + $0x19c] ss:$48 sps:$4 sm:$0xff]   ;;  %v17953_v32 = vld [vmem:[#allocation3 + $0x190] ss:$48 sps:$4 sm:$0xff]  }
 0x102   :  { %1189 = vmatprep.subr.bf16.mxu0 %v17869_v34  ;;  %1252 = vmatprep.subr.bf16.mxu1 %v17872_v35  ;;  %v17956_v34 = vld [vmem:[#allocation3 + $0x198] ss:$48 sps:$4 sm:$0xff]   ;;  %v17962_v35 = vld [vmem:[#allocation3 + $0x134] ss:$48 sps:$4 sm:$0xff]  }
 0x103   :  { %1211 = vmatprep.mubr.bf16.mxu0 %v20135_v0  ;;  %1274 = vmatprep.mubr.bf16.mxu1 %v20135_v0 }
 0x105   :  { %1190 = vmatpush1.bf16.msra.mxu0 %v17867_v36  ;;  %1253 = vmatpush1.bf16.msra.mxu1 %v17870_v37  ;;  %v17965_v36 = vld [vmem:[#allocation3 + $0x13c] ss:$48 sps:$4 sm:$0xff]   ;;  %v17960_v37 = vld [vmem:[#allocation3 + $0x130] ss:$48 sps:$4 sm:$0xff]  }
 0x106   :  { %1191 = vmatprep.subr.bf16.mxu0 %v17875_v39  ;;  %1254 = vmatprep.subr.bf16.mxu1 %v17878_v40  ;;  %v17963_v39 = vld [vmem:[#allocation3 + $0x138] ss:$48 sps:$4 sm:$0xff]   ;;  %v17968_v40 = vld [vmem:[#allocation3 + $0xd4] ss:$48 sps:$4 sm:$0xff]  }
 0x109   :  { %1192 = vmatpush1.bf16.msra.mxu0 %v17873_v42  ;;  %1255 = vmatpush1.bf16.msra.mxu1 %v17876_v43  ;;  %v17971_v42 = vld [vmem:[#allocation3 + $0xdc] ss:$48 sps:$4 sm:$0xff]   ;;  %v17966_v43 = vld [vmem:[#allocation3 + $0xd0] ss:$48 sps:$4 sm:$0xff]  }
 0x10a   :  { %1193 = vmatprep.subr.bf16.mxu0 %v17881_v44  ;;  %1256 = vmatprep.subr.bf16.mxu1 %v17884_v45  ;;  %v17969_v44 = vld [vmem:[#allocation3 + $0xd8] ss:$48 sps:$4 sm:$0xff]   ;;  %v17974_v45 = vld [vmem:[#allocation3 + $0x74] ss:$48 sps:$4 sm:$0xff]  }
 0x10d   :  { %1194 = vmatpush1.bf16.msra.mxu0 %v17879_v46  ;;  %1257 = vmatpush1.bf16.msra.mxu1 %v17882_v47  ;;  %v17977_v46 = vld [vmem:[#allocation3 + $0x7c] ss:$48 sps:$4 sm:$0xff]   ;;  %v17972_v47 = vld [vmem:[#allocation3 + $0x70] ss:$48 sps:$4 sm:$0xff]  }
 0x10e   :  { %1793 = vmatprep.subr.bf16.mxu0 %v17887_v48  ;;  %1856 = vmatprep.subr.bf16.mxu1 %v17890_v49  ;;  %v17975_v48 = vld [vmem:[#allocation3 + $0x78] ss:$48 sps:$4 sm:$0xff]   ;;  %v17980_v49 = vld [vmem:[#allocation3 + $0x14] ss:$48 sps:$4 sm:$0xff]  }
 0x110   :  { %1212 = vmatmul.mubr.bf16.vlgmr.msra.gmra.mxu0 %v20283_v38  ;;  %1275 = vmatmul.mubr.bf16.vlgmr.msra.gmra.mxu1 %v20283_v38  ;;  %v17908_v38 = vld [vmem:[#allocation3 + $0x18c] ss:$48 sps:$4 sm:$0xff]  }
 0x111   :  { %1794 = vmatpush1.bf16.msra.mxu0 %v17885_v52  ;;  %1857 = vmatpush1.bf16.msra.mxu1 %v17888_v53  ;;  %v17983_v52 = vld [vmem:[#allocation3 + $0x1c] ss:$48 sps:$4 sm:$0xff]   ;;  %v17978_v53 = vld [vmem:[#allocation3 + $0x10] ss:$48 sps:$4 sm:$0xff]  }
 0x112   :  { %1795 = vmatprep.subr.bf16.mxu0 %v17893_v54  ;;  %1858 = vmatprep.subr.bf16.mxu1 %v17896_v55  ;;  %v17981_v54 = vld [vmem:[#allocation3 + $0x18] ss:$48 sps:$4 sm:$0xff]   ;;  %v17986_v55 = vld [vmem:[#allocation3 + $0x2c4] ss:$48 sps:$4 sm:$0xff]  }
 0x113   :  { %1221 = vmatprep.mubr.bf16.mxu0 %v20135_v0  ;;  %1284 = vmatprep.mubr.bf16.mxu1 %v20135_v0 }
 0x115   :  { %1796 = vmatpush1.bf16.msra.mxu0 %v17891_v56  ;;  %1859 = vmatpush1.bf16.msra.mxu1 %v17894_v57  ;;  %v17989_v56 = vld [vmem:[#allocation3 + $0x2cc] ss:$48 sps:$4 sm:$0xff]   ;;  %v17984_v57 = vld [vmem:[#allocation3 + $0x2c0] ss:$48 sps:$4 sm:$0xff]  }
 0x116   :  { %1797 = vmatprep.subr.bf16.mxu0 %v17899_v58  ;;  %1860 = vmatprep.subr.bf16.mxu1 %v17902_v59  ;;  %v17987_v58 = vld [vmem:[#allocation3 + $0x2c8] ss:$48 sps:$4 sm:$0xff]   ;;  %v17992_v59 = vld [vmem:[#allocation3 + $0x264] ss:$48 sps:$4 sm:$0xff]  }
 0x118   :  { %1222 = vmatmul.mubr.bf16.gmra.mxu0 %v20299_v51  ;;  %1285 = vmatmul.mubr.bf16.gmra.mxu1 %v20299_v51  ;;  %v17920_v51 = vld [vmem:[#allocation3 + $0xcc] ss:$48 sps:$4 sm:$0xff]  }
 0x119   :  { %1798 = vmatpush1.bf16.msra.mxu0 %v17897_v60  ;;  %1861 = vmatpush1.bf16.msra.mxu1 %v17900_v62  ;;  %v17995_v60 = vld [vmem:[#allocation3 + $0x26c] ss:$48 sps:$4 sm:$0xff]   ;;  %v17990_v62 = vld [vmem:[#allocation3 + $0x260] ss:$48 sps:$4 sm:$0xff]  }
 0x11a   :  { %1799 = vmatprep.subr.bf16.mxu0 %v17905_v63  ;;  %1862 = vmatprep.subr.bf16.mxu1 %v17908_v38  ;;  %v17993_v63 = vld [vmem:[#allocation3 + $0x268] ss:$48 sps:$4 sm:$0xff]   ;;  %v17998_v38 = vld [vmem:[#allocation3 + $0x204] ss:$48 sps:$4 sm:$0xff]  }
 0x11b   :  { %1231 = vmatprep.mubr.bf16.mxu0 %v20135_v0  ;;  %1294 = vmatprep.mubr.bf16.mxu1 %v20135_v0 }
 0x11d   :  { %1800 = vmatpush1.bf16.msra.mxu0 %v17903_v1  ;;  %1863 = vmatpush1.bf16.msra.mxu1 %v17906_v2  ;;  %v18001_v1 = vld [vmem:[#allocation3 + $0x20c] ss:$48 sps:$4 sm:$0xff]   ;;  %v17996_v2 = vld [vmem:[#allocation3 + $0x200] ss:$48 sps:$4 sm:$0xff]  }
 0x11e   :  { %1801 = vmatprep.subr.bf16.mxu0 %v17911_v3  ;;  %1864 = vmatprep.subr.bf16.mxu1 %v17914_v4  ;;  %v17999_v3 = vld [vmem:[#allocation3 + $0x208] ss:$48 sps:$4 sm:$0xff]   ;;  %v18004_v4 = vld [vmem:[#allocation3 + $0x1a4] ss:$48 sps:$4 sm:$0xff]  }
 0x120   :  { %1232 = vmatmul.mubr.bf16.gmra.mxu0 %v20308_v61  ;;  %1295 = vmatmul.mubr.bf16.gmra.mxu1 %v20308_v61  ;;  %v17932_v61 = vld [vmem:[#allocation3 + $0xc] ss:$48 sps:$4 sm:$0xff]  }
 0x121   :  { %1802 = vmatpush1.bf16.msra.mxu0 %v17909_v5  ;;  %1865 = vmatpush1.bf16.msra.mxu1 %v17912_v6  ;;  %v18007_v5 = vld [vmem:[#allocation3 + $0x1ac] ss:$48 sps:$4 sm:$0xff]   ;;  %v18002_v6 = vld [vmem:[#allocation3 + $0x1a0] ss:$48 sps:$4 sm:$0xff]  }
 0x122   :  { %1803 = vmatprep.subr.bf16.mxu0 %v17917_v7  ;;  %1866 = vmatprep.subr.bf16.mxu1 %v17920_v51  ;;  %v18005_v7 = vld [vmem:[#allocation3 + $0x1a8] ss:$48 sps:$4 sm:$0xff]   ;;  %v18010_v51 = vld [vmem:[#allocation3 + $0x144] ss:$48 sps:$4 sm:$0xff]  }
 0x123   :  { %1825 = vmatprep.mubr.bf16.mxu0 %v20135_v0  ;;  %1888 = vmatprep.mubr.bf16.mxu1 %v20135_v0 }
 0x125   :  { %1804 = vmatpush1.bf16.msra.mxu0 %v17915_v8  ;;  %1867 = vmatpush1.bf16.msra.mxu1 %v17918_v9  ;;  %v18013_v8 = vld [vmem:[#allocation3 + $0x14c] ss:$48 sps:$4 sm:$0xff]   ;;  %v18008_v9 = vld [vmem:[#allocation3 + $0x140] ss:$48 sps:$4 sm:$0xff]  }
 0x126   :  { %1805 = vmatprep.subr.bf16.mxu0 %v17923_v10  ;;  %1868 = vmatprep.subr.bf16.mxu1 %v17926_v11  ;;  %v18011_v10 = vld [vmem:[#allocation3 + $0x148] ss:$48 sps:$4 sm:$0xff]   ;;  %v18016_v11 = vld [vmem:[#allocation3 + $0xe4] ss:$48 sps:$4 sm:$0xff]  }
 0x129   :  { %1806 = vmatpush1.bf16.msra.mxu0 %v17921_v12  ;;  %1869 = vmatpush1.bf16.msra.mxu1 %v17924_v13  ;;  %v18019_v12 = vld [vmem:[#allocation3 + $0xec] ss:$48 sps:$4 sm:$0xff]   ;;  %v18014_v13 = vld [vmem:[#allocation3 + $0xe0] ss:$48 sps:$4 sm:$0xff]  }
 0x12a   :  { %1807 = vmatprep.subr.bf16.mxu0 %v17929_v14  ;;  %1870 = vmatprep.subr.bf16.mxu1 %v17932_v61  ;;  %v18017_v14 = vld [vmem:[#allocation3 + $0xe8] ss:$48 sps:$4 sm:$0xff]   ;;  %v18022_v61 = vld [vmem:[#allocation3 + $0x84] ss:$48 sps:$4 sm:$0xff]  }
 0x12d   :  { %1808 = vmatpush1.bf16.msra.mxu0 %v17927_v15  ;;  %1871 = vmatpush1.bf16.msra.mxu1 %v17930_v16  ;;  %v18025_v15 = vld [vmem:[#allocation3 + $0x8c] ss:$48 sps:$4 sm:$0xff]   ;;  %v18020_v16 = vld [vmem:[#allocation3 + $0x80] ss:$48 sps:$4 sm:$0xff]  }
 0x12e   :  { %1919 = vmatprep.subr.bf16.mxu0 %v17936_v18  ;;  %1982 = vmatprep.subr.bf16.mxu1 %v17939_v19  ;;  %v18028_v18 = vld [vmem:[#allocation3 + $0x24] ss:$48 sps:$4 sm:$0xff]   ;;  %v18031_v19 = vld [vmem:[#allocation3 + $0x2c] ss:$48 sps:$4 sm:$0xff]  }
 0x130   :  { %1826 = vmatmul.mubr.bf16.vlgmr.msra.gmra.mxu0 %v20342_v20  ;;  %1889 = vmatmul.mubr.bf16.vlgmr.msra.gmra.mxu1 %v20342_v20 }
 0x131   :  { %1920 = vmatpush1.bf16.msra.mxu0 %v17934_v21  ;;  %1983 = vmatpush1.bf16.msra.mxu1 %v17937_v22  ;;  %v18026_v21 = vld [vmem:[#allocation3 + $0x20] ss:$48 sps:$4 sm:$0xff]   ;;  %v18029_v22 = vld [vmem:[#allocation3 + $0x28] ss:$48 sps:$4 sm:$0xff]  }
 0x132   :  { %1921 = vmatprep.subr.bf16.mxu0 %v17942_v23  ;;  %1984 = vmatprep.subr.bf16.mxu1 %v17945_v24  ;;  %v18034_v23 = vld [vmem:[#allocation3 + $0x8a4] ss:$48 sps:$4 sm:$0xff]   ;;  %v18037_v24 = vld [vmem:[#allocation3 + $0x8ac] ss:$48 sps:$4 sm:$0xff]  }
 0x133   :  { %1835 = vmatprep.mubr.bf16.mxu0 %v20135_v0  ;;  %1898 = vmatprep.mubr.bf16.mxu1 %v20135_v0 }
 0x135   :  { %1922 = vmatpush1.bf16.msra.mxu0 %v17940_v25  ;;  %1985 = vmatpush1.bf16.msra.mxu1 %v17943_v26  ;;  %v18032_v25 = vld [vmem:[#allocation3 + $0x8a0] ss:$48 sps:$4 sm:$0xff]   ;;  %v18035_v26 = vld [vmem:[#allocation3 + $0x8a8] ss:$48 sps:$4 sm:$0xff]  }
 0x136   :  { %1923 = vmatprep.subr.bf16.mxu0 %v17949_v27  ;;  %1986 = vmatprep.subr.bf16.mxu1 %v17952_v33  ;;  %v18040_v27 = vld [vmem:[#allocation3 + $0x844] ss:$48 sps:$4 sm:$0xff]   ;;  %v18043_v33 = vld [vmem:[#allocation3 + $0x84c] ss:$48 sps:$4 sm:$0xff]  }
 0x138   :  { %1836 = vmatmul.mubr.bf16.gmra.mxu0 %v20285_v41  ;;  %1899 = vmatmul.mubr.bf16.gmra.mxu1 %v20285_v41 }
 0x139   :  { %1924 = vmatpush1.bf16.msra.mxu0 %v17947_v28  ;;  %1987 = vmatpush1.bf16.msra.mxu1 %v17950_v29  ;;  %v18038_v28 = vld [vmem:[#allocation3 + $0x840] ss:$48 sps:$4 sm:$0xff]   ;;  %v18041_v29 = vld [vmem:[#allocation3 + $0x848] ss:$48 sps:$4 sm:$0xff]  }
 0x13a   :  { %1925 = vmatprep.subr.bf16.mxu0 %v17955_v30  ;;  %1988 = vmatprep.subr.bf16.mxu1 %v17958_v31  ;;  %v18046_v30 = vld [vmem:[#allocation3 + $0x7e4] ss:$48 sps:$4 sm:$0xff]   ;;  %v18049_v31 = vld [vmem:[#allocation3 + $0x7ec] ss:$48 sps:$4 sm:$0xff]  }
 0x13b   :  { %1845 = vmatprep.mubr.bf16.mxu0 %v20135_v0  ;;  %1908 = vmatprep.mubr.bf16.mxu1 %v20135_v0 }
 0x13d   :  { %1926 = vmatpush1.bf16.msra.mxu0 %v17953_v32  ;;  %1989 = vmatpush1.bf16.msra.mxu1 %v17956_v34  ;;  %v18044_v32 = vld [vmem:[#allocation3 + $0x7e0] ss:$48 sps:$4 sm:$0xff]   ;;  %v18047_v34 = vld [vmem:[#allocation3 + $0x7e8] ss:$48 sps:$4 sm:$0xff]  }
 0x13e   :  { %1927 = vmatprep.subr.bf16.mxu0 %v17962_v35  ;;  %1990 = vmatprep.subr.bf16.mxu1 %v17965_v36  ;;  %v18052_v35 = vld [vmem:[#allocation3 + $0x784] ss:$48 sps:$4 sm:$0xff]   ;;  %v18055_v36 = vld [vmem:[#allocation3 + $0x78c] ss:$48 sps:$4 sm:$0xff]  }
 0x140   :  { %1846 = vmatmul.mubr.bf16.gmra.mxu0 %v20295_v50  ;;  %1909 = vmatmul.mubr.bf16.gmra.mxu1 %v20295_v50 }
 0x141   :  { %1928 = vmatpush1.bf16.msra.mxu0 %v17960_v37  ;;  %1991 = vmatpush1.bf16.msra.mxu1 %v17963_v39  ;;  %v18053_v37 = vld [vmem:[#allocation3 + $0x788] ss:$48 sps:$4 sm:$0xff]   ;;  %v18058_v39 = vld [vmem:[#allocation3 + $0x724] ss:$48 sps:$4 sm:$0xff]  }
 0x142   :  { %1929 = vmatprep.subr.bf16.mxu0 %v17968_v40  ;;  %1992 = vmatprep.subr.bf16.mxu1 %v17971_v42  ;;  %v18061_v40 = vld [vmem:[#allocation3 + $0x72c] ss:$48 sps:$4 sm:$0xff]   ;;  %v18056_v42 = vld [vmem:[#allocation3 + $0x720] ss:$48 sps:$4 sm:$0xff]  }
 0x143   :  { %1951 = vmatprep.mubr.bf16.mxu0 %v20135_v0  ;;  %2014 = vmatprep.mubr.bf16.mxu1 %v20135_v0 }
 0x145   :  { %1930 = vmatpush1.bf16.msra.mxu0 %v17966_v43  ;;  %1993 = vmatpush1.bf16.msra.mxu1 %v17969_v44  ;;  %v18059_v43 = vld [vmem:[#allocation3 + $0x728] ss:$48 sps:$4 sm:$0xff]   ;;  %v18064_v44 = vld [vmem:[#allocation3 + $0x6c4] ss:$48 sps:$4 sm:$0xff]  }
 0x146   :  { %1931 = vmatprep.subr.bf16.mxu0 %v17974_v45  ;;  %1994 = vmatprep.subr.bf16.mxu1 %v17977_v46  ;;  %v18067_v45 = vld [vmem:[#allocation3 + $0x6cc] ss:$48 sps:$4 sm:$0xff]   ;;  %v18062_v46 = vld [vmem:[#allocation3 + $0x6c0] ss:$48 sps:$4 sm:$0xff]  }
 0x149   :  { %1932 = vmatpush1.bf16.msra.mxu0 %v17972_v47  ;;  %1995 = vmatpush1.bf16.msra.mxu1 %v17975_v48  ;;  %v18070_v47 = vld [vmem:[#allocation3 + $0x664] ss:$48 sps:$4 sm:$0xff]   ;;  %v18073_v48 = vld [vmem:[#allocation3 + $0x66c] ss:$48 sps:$4 sm:$0xff]  }
 0x14a   :  { %1933 = vmatprep.subr.bf16.mxu0 %v17980_v49  ;;  %1996 = vmatprep.subr.bf16.mxu1 %v17983_v52  ;;  %v18068_v49 = vld [vmem:[#allocation3 + $0x660] ss:$48 sps:$4 sm:$0xff]   ;;  %v18071_v52 = vld [vmem:[#allocation3 + $0x668] ss:$48 sps:$4 sm:$0xff]  }
 0x14d   :  { %1934 = vmatpush1.bf16.msra.mxu0 %v17978_v53  ;;  %1997 = vmatpush1.bf16.msra.mxu1 %v17981_v54  ;;  %v18076_v53 = vld [vmem:[#allocation3 + $0x604] ss:$48 sps:$4 sm:$0xff]   ;;  %v18079_v54 = vld [vmem:[#allocation3 + $0x60c] ss:$48 sps:$4 sm:$0xff]  }
 0x14e   :  { %2045 = vmatprep.subr.bf16.mxu0 %v17986_v55  ;;  %2108 = vmatprep.subr.bf16.mxu1 %v17989_v56  ;;  %v18074_v55 = vld [vmem:[#allocation3 + $0x600] ss:$48 sps:$4 sm:$0xff]   ;;  %v18083_v56 = vld [vmem:[#allocation3 + $0x8b4] ss:$48 sps:$4 sm:$0xff]  }
 0x150   :  { %1952 = vmatmul.mubr.bf16.vlgmr.msra.gmra.mxu0 %v20342_v20  ;;  %2015 = vmatmul.mubr.bf16.vlgmr.msra.gmra.mxu1 %v20342_v20 }
 0x151   :  { %2046 = vmatpush1.bf16.msra.mxu0 %v17984_v57  ;;  %2109 = vmatpush1.bf16.msra.mxu1 %v17987_v58  ;;  %v18086_v57 = vld [vmem:[#allocation3 + $0x8bc] ss:$48 sps:$4 sm:$0xff]  }
 0x152   :  { %2047 = vmatprep.subr.bf16.mxu0 %v17992_v59  ;;  %2110 = vmatprep.subr.bf16.mxu1 %v17995_v60  ;;  %v20383_v58 = vld [vmem:[%s22149_s20 + $0x8] sm:$0xff]   ;;  %v18081_v59 = vld [vmem:[#allocation3 + $0x8b0] ss:$48 sps:$4 sm:$0xff]  }
 0x153   :  { %1961 = vmatprep.mubr.bf16.mxu0 %v20135_v0  ;;  %2024 = vmatprep.mubr.bf16.mxu1 %v20135_v0  ;;  %v18084_v60 = vld [vmem:[#allocation3 + $0x8b8] ss:$48 sps:$4 sm:$0xff]  }
 0x155   :  { %2048 = vmatpush1.bf16.msra.mxu0 %v17990_v62  ;;  %2111 = vmatpush1.bf16.msra.mxu1 %v17993_v63  ;;  %v18089_v62 = vld [vmem:[#allocation3 + $0x854] ss:$48 sps:$4 sm:$0xff]   ;;  %v18092_v63 = vld [vmem:[#allocation3 + $0x85c] ss:$48 sps:$4 sm:$0xff]  }
 0x156   :  { %2049 = vmatprep.subr.bf16.mxu0 %v17998_v38  ;;  %2112 = vmatprep.subr.bf16.mxu1 %v18001_v1  ;;  %v18087_v38 = vld [vmem:[#allocation3 + $0x850] ss:$48 sps:$4 sm:$0xff]   ;;  %v18090_v1 = vld [vmem:[#allocation3 + $0x858] ss:$48 sps:$4 sm:$0xff]  }
 0x158   :  { %1962 = vmatmul.mubr.bf16.gmra.mxu0 %v20285_v41  ;;  %2025 = vmatmul.mubr.bf16.gmra.mxu1 %v20285_v41 }
 0x159   :  { %2050 = vmatpush1.bf16.msra.mxu0 %v17996_v2  ;;  %2113 = vmatpush1.bf16.msra.mxu1 %v17999_v3 }
 0x15a   :  { %2051 = vmatprep.subr.bf16.mxu0 %v18004_v4  ;;  %2114 = vmatprep.subr.bf16.mxu1 %v18007_v5  ;;  %v18096_v4 = vld [vmem:[#allocation3 + $0x7f4] ss:$48 sps:$4 sm:$0xff]   ;;  %v18099_v5 = vld [vmem:[#allocation3 + $0x7fc] ss:$48 sps:$4 sm:$0xff]  }
 0x15b   :  { %1971 = vmatprep.mubr.bf16.mxu0 %v20135_v0  ;;  %2034 = vmatprep.mubr.bf16.mxu1 %v20135_v0 }
 0x15d   :  { %2052 = vmatpush1.bf16.msra.mxu0 %v18002_v6  ;;  %2115 = vmatpush1.bf16.msra.mxu1 %v18005_v7 }
 0x15e   :  { %2053 = vmatprep.subr.bf16.mxu0 %v18010_v51  ;;  %2116 = vmatprep.subr.bf16.mxu1 %v18013_v8  ;;  %v20398_v51 = vld [vmem:[%s22149_s20 + $0x10] sm:$0xff]  }
 0x15f   :  { %v18094_v8 = vld [vmem:[#allocation3 + $0x7f0] ss:$48 sps:$4 sm:$0xff]  }
 0x160   :  { %1972 = vmatmul.mubr.bf16.gmra.mxu0 %v20295_v50  ;;  %2035 = vmatmul.mubr.bf16.gmra.mxu1 %v20295_v50 }
 0x161   :  { %2054 = vmatpush1.bf16.msra.mxu0 %v18008_v9  ;;  %2117 = vmatpush1.bf16.msra.mxu1 %v18011_v10  ;;  %v18097_v9 = vld [vmem:[#allocation3 + $0x7f8] ss:$48 sps:$4 sm:$0xff]  }
 0x162   :  { %2055 = vmatprep.subr.bf16.mxu0 %v18016_v11  ;;  %2118 = vmatprep.subr.bf16.mxu1 %v18019_v12  ;;  %v18102_v12 = vld [vmem:[#allocation3 + $0x794] ss:$48 sps:$4 sm:$0xff]  }
 0x163   :  { %2077 = vmatprep.mubr.bf16.mxu0 %v20135_v0  ;;  %2140 = vmatprep.mubr.bf16.mxu1 %v20135_v0 }
 0x165   :  { %2056 = vmatpush1.bf16.msra.mxu0 %v18014_v13  ;;  %2119 = vmatpush1.bf16.msra.mxu1 %v18017_v14  ;;  %v18105_v13 = vld [vmem:[#allocation3 + $0x79c] ss:$48 sps:$4 sm:$0xff]  }
 0x166   :  { %2057 = vmatprep.subr.bf16.mxu0 %v18022_v61  ;;  %2120 = vmatprep.subr.bf16.mxu1 %v18025_v15  ;;  %v18100_v15 = vld [vmem:[#allocation3 + $0x790] ss:$48 sps:$4 sm:$0xff]  }
 0x169   :  { %2058 = vmatpush1.bf16.msra.mxu0 %v18020_v16  ;;  %2121 = vmatpush1.bf16.msra.mxu1 %v18023_v17  ;;  %v18103_v16 = vld [vmem:[#allocation3 + $0x798] ss:$48 sps:$4 sm:$0xff]  }
 0x16a   :  { %2059 = vmatprep.subr.bf16.mxu0 %v18028_v18  ;;  %2122 = vmatprep.subr.bf16.mxu1 %v18031_v19  ;;  %v18109_v19 = vld [vmem:[#allocation3 + $0x734] ss:$48 sps:$4 sm:$0xff]  }
 0x16d   :  { %2060 = vmatpush1.bf16.msra.mxu0 %v18026_v21  ;;  %2123 = vmatpush1.bf16.msra.mxu1 %v18029_v22  ;;  %v18112_v21 = vld [vmem:[#allocation3 + $0x73c] ss:$48 sps:$4 sm:$0xff]  }
 0x16e   :  { %2772 = vmatprep.subr.bf16.mxu0 %v18034_v23  ;;  %2835 = vmatprep.subr.bf16.mxu1 %v18037_v24  ;;  %v20423_v24 = vld [vmem:[%s22149_s20 + $0x18] sm:$0xff]  }
 0x170   :  { %2078 = vmatmul.mubr.bf16.vlgmr.msra.gmra.mxu0 %v20342_v20  ;;  %2141 = vmatmul.mubr.bf16.vlgmr.msra.gmra.mxu1 %v20342_v20  ;;  %v18050_v20 = vld [vmem:[#allocation3 + $0x780] ss:$48 sps:$4 sm:$0xff]  }
 0x171   :  { %2773 = vmatpush1.bf16.msra.mxu0 %v18032_v25  ;;  %2836 = vmatpush1.bf16.msra.mxu1 %v18035_v26  ;;  %v18107_v25 = vld [vmem:[#allocation3 + $0x730] ss:$48 sps:$4 sm:$0xff]   ;;  %v18110_v26 = vld [vmem:[#allocation3 + $0x738] ss:$48 sps:$4 sm:$0xff]  }
 0x172   :  { %2774 = vmatprep.subr.bf16.mxu0 %v18040_v27  ;;  %2837 = vmatprep.subr.bf16.mxu1 %v18043_v33 }
 0x173   :  { %2087 = vmatprep.mubr.bf16.mxu0 %v20135_v0  ;;  %2150 = vmatprep.mubr.bf16.mxu1 %v20135_v0 }
 0x175   :  { %2775 = vmatpush1.bf16.msra.mxu0 %v18038_v28  ;;  %2838 = vmatpush1.bf16.msra.mxu1 %v18041_v29  ;;  %v18115_v28 = vld [vmem:[#allocation3 + $0x6d4] ss:$48 sps:$4 sm:$0xff]   ;;  %v18118_v29 = vld [vmem:[#allocation3 + $0x6dc] ss:$48 sps:$4 sm:$0xff]  }
 0x176   :  { %2776 = vmatprep.subr.bf16.mxu0 %v18046_v30  ;;  %2839 = vmatprep.subr.bf16.mxu1 %v18049_v31 }
 0x178   :  { %2088 = vmatmul.mubr.bf16.gmra.mxu0 %v20285_v41  ;;  %2151 = vmatmul.mubr.bf16.gmra.mxu1 %v20285_v41  ;;  %v18065_v41 = vld [vmem:[#allocation3 + $0x6c8] ss:$48 sps:$4 sm:$0xff]  }
 0x179   :  { %2777 = vmatpush1.bf16.msra.mxu0 %v18044_v32  ;;  %2840 = vmatpush1.bf16.msra.mxu1 %v18047_v34  ;;  %v18113_v32 = vld [vmem:[#allocation3 + $0x6d0] ss:$48 sps:$4 sm:$0xff]   ;;  %v18116_v34 = vld [vmem:[#allocation3 + $0x6d8] ss:$48 sps:$4 sm:$0xff]  }
 0x17a   :  { %2778 = vmatprep.subr.bf16.mxu0 %v18052_v35  ;;  %2841 = vmatprep.subr.bf16.mxu1 %v18055_v36  ;;  %v18121_v35 = vld [vmem:[#allocation3 + $0x674] ss:$48 sps:$4 sm:$0xff]   ;;  %v18124_v36 = vld [vmem:[#allocation3 + $0x67c] ss:$48 sps:$4 sm:$0xff]  }
 0x17b   :  { %2097 = vmatprep.mubr.bf16.mxu0 %v20135_v0  ;;  %2160 = vmatprep.mubr.bf16.mxu1 %v20135_v0 }
 0x17d   :  { %2779 = vmatpush1.bf16.msra.mxu0 %v18050_v20  ;;  %2842 = vmatpush1.bf16.msra.mxu1 %v18053_v37 }
 0x17e   :  { %2780 = vmatprep.subr.bf16.mxu0 %v18058_v39  ;;  %2843 = vmatprep.subr.bf16.mxu1 %v18061_v40  ;;  %v18119_v39 = vld [vmem:[#allocation3 + $0x670] ss:$48 sps:$4 sm:$0xff]   ;;  %v18122_v40 = vld [vmem:[#allocation3 + $0x678] ss:$48 sps:$4 sm:$0xff]  }
 0x180   :  { %2098 = vmatmul.mubr.bf16.gmra.mxu0 %v20295_v50  ;;  %2161 = vmatmul.mubr.bf16.gmra.mxu1 %v20295_v50  ;;  %v18077_v50 = vld [vmem:[#allocation3 + $0x608] ss:$48 sps:$4 sm:$0xff]  }
 0x181   :  { %2781 = vmatpush1.bf16.msra.mxu0 %v18056_v42  ;;  %2844 = vmatpush1.bf16.msra.mxu1 %v18059_v43  ;;  %v18127_v42 = vld [vmem:[#allocation3 + $0x614] ss:$48 sps:$4 sm:$0xff]   ;;  %v18130_v43 = vld [vmem:[#allocation3 + $0x61c] ss:$48 sps:$4 sm:$0xff]  }
 0x182   :  { %2782 = vmatprep.subr.bf16.mxu0 %v18064_v44  ;;  %2845 = vmatprep.subr.bf16.mxu1 %v18067_v45 }
 0x183   :  { %2804 = vmatprep.mubr.bf16.mxu0 %v20135_v0  ;;  %2867 = vmatprep.mubr.bf16.mxu1 %v20135_v0 }
 0x185   :  { %2783 = vmatpush1.bf16.msra.mxu0 %v18062_v46  ;;  %2846 = vmatpush1.bf16.msra.mxu1 %v18065_v41  ;;  %v18125_v46 = vld [vmem:[#allocation3 + $0x610] ss:$48 sps:$4 sm:$0xff]   ;;  %v18128_v41 = vld [vmem:[#allocation3 + $0x618] ss:$48 sps:$4 sm:$0xff]  }
 0x186   :  { %2784 = vmatprep.subr.bf16.mxu0 %v18070_v47  ;;  %2847 = vmatprep.subr.bf16.mxu1 %v18073_v48  ;;  %v18133_v47 = vld [vmem:[#allocation3 + $0x8c4] ss:$48 sps:$4 sm:$0xff]   ;;  %v18136_v48 = vld [vmem:[#allocation3 + $0x8cc] ss:$48 sps:$4 sm:$0xff]  }
 0x189   :  { %2785 = vmatpush1.bf16.msra.mxu0 %v18068_v49  ;;  %2848 = vmatpush1.bf16.msra.mxu1 %v18071_v52 }
 0x18a   :  { %2786 = vmatprep.subr.bf16.mxu0 %v18076_v53  ;;  %2849 = vmatprep.subr.bf16.mxu1 %v18079_v54  ;;  %v18131_v53 = vld [vmem:[#allocation3 + $0x8c0] ss:$48 sps:$4 sm:$0xff]   ;;  %v18134_v54 = vld [vmem:[#allocation3 + $0x8c8] ss:$48 sps:$4 sm:$0xff]  }
 0x18d   :  { %2787 = vmatpush1.bf16.msra.mxu0 %v18074_v55  ;;  %2850 = vmatpush1.bf16.msra.mxu1 %v18077_v50  ;;  %v18139_v55 = vld [vmem:[#allocation3 + $0x864] ss:$48 sps:$4 sm:$0xff]   ;;  %v18142_v50 = vld [vmem:[#allocation3 + $0x86c] ss:$48 sps:$4 sm:$0xff]  }
 0x18e   :  { %2898 = vmatprep.subr.bf16.mxu0 %v18083_v56  ;;  %2961 = vmatprep.subr.bf16.mxu1 %v18086_v57 }
 0x190   :  { %v20385_v2 = vpop.f32.mrf.mxu0  ;;  %v20387_v3 = vpop.f32.mrf.mxu1  ;;  %2805 = vmatmul.mubr.bf16.vlgmr.msra.gmra.mxu0 %v20383_v58  ;;  %2868 = vmatmul.mubr.bf16.vlgmr.msra.gmra.mxu1 %v20383_v58 }
 0x191   :  { %2899 = vmatpush1.bf16.msra.mxu0 %v18081_v59  ;;  %2962 = vmatpush1.bf16.msra.mxu1 %v18084_v60  ;;  %v18137_v59 = vld [vmem:[#allocation3 + $0x860] ss:$48 sps:$4 sm:$0xff]   ;;  %v18140_v60 = vld [vmem:[#allocation3 + $0x868] ss:$48 sps:$4 sm:$0xff]  }
 0x192   :  { %v20391_v6 = vpop.f32.mrf.mxu0  ;;  %v20393_v7 = vpop.f32.mrf.mxu1  ;;  %2900 = vmatprep.subr.bf16.mxu0 %v18089_v62  ;;  %2963 = vmatprep.subr.bf16.mxu1 %v18092_v63 }
 0x193   :  { %2814 = vmatprep.mubr.bf16.mxu0 %v20135_v0  ;;  %2877 = vmatprep.mubr.bf16.mxu1 %v20135_v0 }
 0x194   :  { %v20402_v10 = vpop.f32.mrf.mxu0  ;;  %v20404_v11 = vpop.f32.mrf.mxu1 }
 0x195   :  { %2901 = vmatpush1.bf16.msra.mxu0 %v18087_v38  ;;  %2964 = vmatpush1.bf16.msra.mxu1 %v18090_v1  ;;  %v18145_v38 = vld [vmem:[#allocation3 + $0x804] ss:$48 sps:$4 sm:$0xff]   ;;  %v18148_v1 = vld [vmem:[#allocation3 + $0x80c] ss:$48 sps:$4 sm:$0xff]  }
 0x196   :  { %v20406_v14 = vpop.f32.mrf.mxu0  ;;  %v20408_v61 = vpop.f32.mrf.mxu1  ;;  %2902 = vmatprep.subr.bf16.mxu0 %v18096_v4  ;;  %2965 = vmatprep.subr.bf16.mxu1 %v18099_v5 }
 0x197   :  { %22150 = vst [vmem:[#allocation33_spill] sm:$0xff] %v20408_v61 }
 0x198   :  { %2815 = vmatmul.mubr.bf16.gmra.mxu0 %v20398_v51  ;;  %2878 = vmatmul.mubr.bf16.gmra.mxu1 %v20398_v51  ;;  %v20412_v17 = vpop.f32.mrf.mxu0  ;;  %v20414_v18 = vpop.f32.mrf.mxu1 }
 0x199   :  { %2903 = vmatpush1.bf16.msra.mxu0 %v18094_v8  ;;  %2966 = vmatpush1.bf16.msra.mxu1 %v18097_v9  ;;  %v18143_v8 = vld [vmem:[#allocation3 + $0x800] ss:$48 sps:$4 sm:$0xff]   ;;  %v18146_v9 = vld [vmem:[#allocation3 + $0x808] ss:$48 sps:$4 sm:$0xff]  }
 0x19a   :  { %2904 = vmatprep.subr.bf16.mxu0 %v18102_v12  ;;  %2967 = vmatprep.subr.bf16.mxu1 %v18105_v13  ;;  %v20416_v22 = vpop.f32.mrf.mxu0  ;;  %v20418_v23 = vpop.f32.mrf.mxu1 }
 0x19b   :  { %2824 = vmatprep.mubr.bf16.mxu0 %v20135_v0  ;;  %2887 = vmatprep.mubr.bf16.mxu1 %v20135_v0 }
 0x19c   :  { %v20427_v27 = vpop.f32.mrf.mxu0  ;;  %v20429_v33 = vpop.f32.mrf.mxu1 }
 0x19d   :  { %2905 = vmatpush1.bf16.msra.mxu0 %v18100_v15  ;;  %2968 = vmatpush1.bf16.msra.mxu1 %v18103_v16  ;;  %v18151_v15 = vld [vmem:[#allocation3 + $0x7a4] ss:$48 sps:$4 sm:$0xff]   ;;  %v18154_v16 = vld [vmem:[#allocation3 + $0x7ac] ss:$48 sps:$4 sm:$0xff]  }
 0x19e   :  { %2906 = vmatprep.subr.bf16.mxu0 %v18109_v19  ;;  %2969 = vmatprep.subr.bf16.mxu1 %v18112_v21  ;;  %v20431_v30 = vpop.f32.mrf.mxu0  ;;  %v20433_v31 = vpop.f32.mrf.mxu1 }
 0x19f   :  { %22151 = vst [vmem:[#allocation34_spill] sm:$0xff] %v20431_v30  ;;  %22152 = vst [vmem:[#allocation35_spill] sm:$0xff] %v20433_v31 }
 0x1a0   :  { %2825 = vmatmul.mubr.bf16.gmra.mxu0 %v20423_v24  ;;  %2888 = vmatmul.mubr.bf16.gmra.mxu1 %v20423_v24  ;;  %v20437_v20 = vpop.f32.mrf.mxu0  ;;  %v20439_v37 = vpop.f32.mrf.mxu1 }
 0x1a1   :  { %2907 = vmatpush1.bf16.msra.mxu0 %v18107_v25  ;;  %2970 = vmatpush1.bf16.msra.mxu1 %v18110_v26  ;;  %22153 = vst [vmem:[#allocation36_spill] sm:$0xff] %v20437_v20  ;;  %22154 = vst [vmem:[#allocation37_spill] sm:$0xff] %v20439_v37  ;;  %v18149_v25 = vld [vmem:[#allocation3 + $0x7a0] ss:$48 sps:$4 sm:$0xff]   ;;  %v18152_v26 = vld [vmem:[#allocation3 + $0x7a8] ss:$48 sps:$4 sm:$0xff]  }
 0x1a2   :  { %2908 = vmatprep.subr.bf16.mxu0 %v18115_v28  ;;  %2971 = vmatprep.subr.bf16.mxu1 %v18118_v29  ;;  %v20443_v44 = vpop.f32.mrf.mxu0  ;;  %v20445_v45 = vpop.f32.mrf.mxu1  ;;  %v18260_v20 = vld [vmem:[#allocation8 + $0xae0] ss:$24 sps:$4 sm:$0xff]  }
 0x1a3   :  { %2930 = vmatprep.mubr.bf16.mxu0 %v20135_v0  ;;  %2993 = vmatprep.mubr.bf16.mxu1 %v20135_v0  ;;  %22155 = vst [vmem:[#allocation38_spill] sm:$0xff] %v20443_v44  ;;  %22156 = vst [vmem:[#allocation39_spill] sm:$0xff] %v20445_v45  ;;  %v18254_v44 = vld [vmem:[#allocation8 + $0xb10] ss:$24 sps:$4 sm:$0xff]  }
 0x1a4   :  { %v20447_v49 = vpop.f32.mrf.mxu0  ;;  %v20449_v52 = vpop.f32.mrf.mxu1 }
 0x1a5   :  { %2909 = vmatpush1.bf16.msra.mxu0 %v18113_v32  ;;  %2972 = vmatpush1.bf16.msra.mxu1 %v18116_v34  ;;  %v18157_v32 = vld [vmem:[#allocation3 + $0x744] ss:$48 sps:$4 sm:$0xff]   ;;  %v18160_v34 = vld [vmem:[#allocation3 + $0x74c] ss:$48 sps:$4 sm:$0xff]  }
 0x1a6   :  { %2910 = vmatprep.subr.bf16.mxu0 %v18121_v35  ;;  %2973 = vmatprep.subr.bf16.mxu1 %v18124_v36  ;;  %v20451_v56 = vpop.f32.mrf.mxu0  ;;  %v20453_v57 = vpop.f32.mrf.mxu1 }
 0x1a7   :  { %22157 = vst [vmem:[#allocation40_spill] sm:$0xff] %v20451_v56  ;;  %22158 = vst [vmem:[#allocation41_spill] sm:$0xff] %v20453_v57 }
 0x1a9   :  { %2911 = vmatpush1.bf16.msra.mxu0 %v18119_v39  ;;  %2974 = vmatpush1.bf16.msra.mxu1 %v18122_v40  ;;  %v18155_v39 = vld [vmem:[#allocation3 + $0x740] ss:$48 sps:$4 sm:$0xff]   ;;  %v18158_v40 = vld [vmem:[#allocation3 + $0x748] ss:$48 sps:$4 sm:$0xff]  }
 0x1aa   :  { %2912 = vmatprep.subr.bf16.mxu0 %v18127_v42  ;;  %2975 = vmatprep.subr.bf16.mxu1 %v18130_v43 }
 0x1ad   :  { %2913 = vmatpush1.bf16.msra.mxu0 %v18125_v46  ;;  %2976 = vmatpush1.bf16.msra.mxu1 %v18128_v41  ;;  %v18163_v46 = vld [vmem:[#allocation3 + $0x6e4] ss:$48 sps:$4 sm:$0xff]   ;;  %v18166_v41 = vld [vmem:[#allocation3 + $0x6ec] ss:$48 sps:$4 sm:$0xff]  }
 0x1ae   :  { %3024 = vmatprep.subr.bf16.mxu0 %v18133_v47  ;;  %3087 = vmatprep.subr.bf16.mxu1 %v18136_v48 }
 0x1b0   :  { %v20455_v62 = vpop.f32.mrf.mxu0  ;;  %v20457_v63 = vpop.f32.mrf.mxu1  ;;  %2931 = vmatmul.mubr.bf16.vlgmr.msra.gmra.mxu0 %v20383_v58  ;;  %2994 = vmatmul.mubr.bf16.vlgmr.msra.gmra.mxu1 %v20383_v58 }
 0x1b1   :  { %3025 = vmatpush1.bf16.msra.mxu0 %v18131_v53  ;;  %3088 = vmatpush1.bf16.msra.mxu1 %v18134_v54  ;;  %v18161_v53 = vld [vmem:[#allocation3 + $0x6e0] ss:$48 sps:$4 sm:$0xff]   ;;  %v18164_v54 = vld [vmem:[#allocation3 + $0x6e8] ss:$48 sps:$4 sm:$0xff]  }
 0x1b2   :  { %v20461_v4 = vpop.f32.mrf.mxu0  ;;  %v20463_v5 = vpop.f32.mrf.mxu1  ;;  %3026 = vmatprep.subr.bf16.mxu0 %v18139_v55  ;;  %3089 = vmatprep.subr.bf16.mxu1 %v18142_v50  ;;  %v18169_v55 = vld [vmem:[#allocation3 + $0x684] ss:$48 sps:$4 sm:$0xff]   ;;  %v18172_v50 = vld [vmem:[#allocation3 + $0x68c] ss:$48 sps:$4 sm:$0xff]  }
 0x1b3   :  { %2940 = vmatprep.mubr.bf16.mxu0 %v20135_v0  ;;  %3003 = vmatprep.mubr.bf16.mxu1 %v20135_v0 }
 0x1b4   :  { %v20467_v12 = vpop.f32.mrf.mxu0  ;;  %v20469_v13 = vpop.f32.mrf.mxu1 }
 0x1b5   :  { %3027 = vmatpush1.bf16.msra.mxu0 %v18137_v59  ;;  %3090 = vmatpush1.bf16.msra.mxu1 %v18140_v60 }
 0x1b6   :  { %v20471_v19 = vpop.f32.mrf.mxu0  ;;  %v20473_v21 = vpop.f32.mrf.mxu1  ;;  %3028 = vmatprep.subr.bf16.mxu0 %v18145_v38  ;;  %3091 = vmatprep.subr.bf16.mxu1 %v18148_v1  ;;  %v18167_v38 = vld [vmem:[#allocation3 + $0x680] ss:$48 sps:$4 sm:$0xff]   ;;  %v18170_v1 = vld [vmem:[#allocation3 + $0x688] ss:$48 sps:$4 sm:$0xff]  }
 0x1b7   :  { %22159 = vst [vmem:[#allocation42_spill] sm:$0xff] %v20471_v19  ;;  %22160 = vst [vmem:[#allocation43_spill] sm:$0xff] %v20473_v21  ;;  %v18215_v21 = vld [vmem:[#allocation8 + $0x630] ss:$24 sps:$4 sm:$0xff]  }
 0x1b8   :  { %2941 = vmatmul.mubr.bf16.gmra.mxu0 %v20398_v51  ;;  %3004 = vmatmul.mubr.bf16.gmra.mxu1 %v20398_v51  ;;  %v20477_v28 = vpop.f32.mrf.mxu0  ;;  %v20479_v29 = vpop.f32.mrf.mxu1  ;;  %v18218_v19 = vld [vmem:[#allocation8 + $0x930] ss:$24 sps:$4 sm:$0xff]  }
 0x1b9   :  { %3029 = vmatpush1.bf16.msra.mxu0 %v18143_v8  ;;  %3092 = vmatpush1.bf16.msra.mxu1 %v18146_v9  ;;  %v18175_v8 = vld [vmem:[#allocation3 + $0x624] ss:$48 sps:$4 sm:$0xff]   ;;  %v18178_v9 = vld [vmem:[#allocation3 + $0x62c] ss:$48 sps:$4 sm:$0xff]  }
 0x1ba   :  { %3030 = vmatprep.subr.bf16.mxu0 %v18151_v15  ;;  %3093 = vmatprep.subr.bf16.mxu1 %v18154_v16  ;;  %v20481_v35 = vpop.f32.mrf.mxu0  ;;  %v20483_v36 = vpop.f32.mrf.mxu1 }
 0x1bb   :  { %2950 = vmatprep.mubr.bf16.mxu0 %v20135_v0  ;;  %3013 = vmatprep.mubr.bf16.mxu1 %v20135_v0 }
 0x1bc   :  { %v20487_v42 = vpop.f32.mrf.mxu0  ;;  %v20489_v43 = vpop.f32.mrf.mxu1 }
 0x1bd   :  { %22161 = vst [vmem:[#allocation44_spill] sm:$0xff] %v20489_v43  ;;  %3031 = vmatpush1.bf16.msra.mxu0 %v18149_v25  ;;  %3094 = vmatpush1.bf16.msra.mxu1 %v18152_v26  ;;  %v18173_v25 = vld [vmem:[#allocation3 + $0x620] ss:$48 sps:$4 sm:$0xff]   ;;  %v18176_v26 = vld [vmem:[#allocation3 + $0x628] ss:$48 sps:$4 sm:$0xff]  }
 0x1be   :  { %3032 = vmatprep.subr.bf16.mxu0 %v18157_v32  ;;  %3095 = vmatprep.subr.bf16.mxu1 %v18160_v34  ;;  %v20491_v47 = vpop.f32.mrf.mxu0  ;;  %v20493_v48 = vpop.f32.mrf.mxu1  ;;  %v18263_v43 = vld [vmem:[#allocation8 + $0x7b0] ss:$24 sps:$4 sm:$0xff]  }
 0x1bf   :  { %22162 = vst [vmem:[#allocation45_spill] sm:$0xff] %v20491_v47  ;;  %22163 = vst [vmem:[#allocation46_spill] sm:$0xff] %v20493_v48 }
 0x1c0   :  { %2951 = vmatmul.mubr.bf16.gmra.mxu0 %v20423_v24  ;;  %3014 = vmatmul.mubr.bf16.gmra.mxu1 %v20423_v24  ;;  %v20497_v59 = vpop.f32.mrf.mxu0  ;;  %v20499_v60 = vpop.f32.mrf.mxu1 }
 0x1c1   :  { %3033 = vmatpush1.bf16.msra.mxu0 %v18155_v39  ;;  %3096 = vmatpush1.bf16.msra.mxu1 %v18158_v40  ;;  %22164 = vst [vmem:[#allocation47_spill] sm:$0xff] %v20497_v59  ;;  %22165 = vst [vmem:[#allocation48_spill] sm:$0xff] %v20499_v60  ;;  %v18242_v60 = vld [vmem:[#allocation8 + $0xb70] ss:$24 sps:$4 sm:$0xff]   ;;  %v18244_v59 = vld [vmem:[#allocation8 + $0xb74] ss:$24 sps:$4 sm:$0xff]  }
 0x1c2   :  { %3034 = vmatprep.subr.bf16.mxu0 %v18163_v46  ;;  %3097 = vmatprep.subr.bf16.mxu1 %v18166_v41  ;;  %v20503_v15 = vpop.f32.mrf.mxu0  ;;  %v20505_v16 = vpop.f32.mrf.mxu1 }
 0x1c3   :  { %3056 = vmatprep.mubr.bf16.mxu0 %v20135_v0  ;;  %3119 = vmatprep.mubr.bf16.mxu1 %v20135_v0  ;;  %22166 = vst [vmem:[#allocation49_spill] sm:$0xff] %v20503_v15  ;;  %22167 = vst [vmem:[#allocation50_spill] sm:$0xff] %v20505_v16  ;;  %v18233_v16 = vld [vmem:[#allocation8 + $0x8a0] ss:$24 sps:$4 sm:$0xff]  }
 0x1c4   :  { %v20507_v32 = vpop.f32.mrf.mxu0  ;;  %v20509_v34 = vpop.f32.mrf.mxu1  ;;  %v18236_v15 = vld [vmem:[#allocation8 + $0xba0] ss:$24 sps:$4 sm:$0xff]  }
 0x1c5   :  { %3035 = vmatpush1.bf16.msra.mxu0 %v18161_v53  ;;  %3098 = vmatpush1.bf16.msra.mxu1 %v18164_v54  ;;  %22168 = vst [vmem:[#allocation51_spill] sm:$0xff] %v20507_v32  ;;  %22169 = vst [vmem:[#allocation52_spill] sm:$0xff] %v20509_v34  ;;  %v18229_v34 = vld [vmem:[#allocation8 + $0x8d4] ss:$24 sps:$4 sm:$0xff]   ;;  %v18227_v32 = vld [vmem:[#allocation8 + $0x8d0] ss:$24 sps:$4 sm:$0xff]  }
 0x1c6   :  { %3036 = vmatprep.subr.bf16.mxu0 %v18169_v55  ;;  %3099 = vmatprep.subr.bf16.mxu1 %v18172_v50  ;;  %v20511_v39 = vpop.f32.mrf.mxu0  ;;  %v20513_v40 = vpop.f32.mrf.mxu1 }
 0x1c7   :  { %22170 = vst [vmem:[#allocation53_spill] sm:$0xff] %v20511_v39  ;;  %22171 = vst [vmem:[#allocation54_spill] sm:$0xff] %v20513_v40  ;;  %v18209_v40 = vld [vmem:[#allocation8 + $0x660] ss:$24 sps:$4 sm:$0xff]  }
 0x1c8   :  { %v18212_v39 = vld [vmem:[#allocation8 + $0x960] ss:$24 sps:$4 sm:$0xff]  }
 0x1c9   :  { %3037 = vmatpush1.bf16.msra.mxu0 %v18167_v38  ;;  %3100 = vmatpush1.bf16.msra.mxu1 %v18170_v1 }
 0x1ca   :  { %3038 = vmatprep.subr.bf16.mxu0 %v18175_v8  ;;  %3101 = vmatprep.subr.bf16.mxu1 %v18178_v9 }
 0x1cd   :  { %3039 = vmatpush1.bf16.msra.mxu0 %v18173_v25  ;;  %3102 = vmatpush1.bf16.msra.mxu1 %v18176_v26 }
 0x1d0   :  { %v20515_v46 = vpop.f32.mrf.mxu0  ;;  %v20517_v41 = vpop.f32.mrf.mxu1  ;;  %3057 = vmatmul.mubr.bf16.vlgmr.msra.gmra.mxu0 %v20383_v58  ;;  %3120 = vmatmul.mubr.bf16.vlgmr.msra.gmra.mxu1 %v20383_v58 }
 0x1d1   :  { %22172 = vst [vmem:[#allocation55_spill] sm:$0xff] %v20515_v46  ;;  %22173 = vst [vmem:[#allocation56_spill] sm:$0xff] %v20517_v41  ;;  %3066 = vmatprep.mubr.bf16.mxu0 %v20135_v0  ;;  %3129 = vmatprep.mubr.bf16.mxu1 %v20135_v0 }
 0x1d2   :  { %v20523_v53 = vpop.f32.mrf.mxu0  ;;  %v20525_v54 = vpop.f32.mrf.mxu1 }
 0x1d3   :  { %22174 = vst [vmem:[#allocation57_spill] sm:$0xff] %v20523_v53  ;;  %22175 = vst [vmem:[#allocation58_spill] sm:$0xff] %v20525_v54  ;;  %v18193_v54 = vld [vmem:[#allocation8 + $0x6f4] ss:$24 sps:$4 sm:$0xff]  }
 0x1d4   :  { %v20527_v55 = vpop.f32.mrf.mxu0  ;;  %v20529_v50 = vpop.f32.mrf.mxu1  ;;  %v18196_v53 = vld [vmem:[#allocation8 + $0x9f4] ss:$24 sps:$4 sm:$0xff]  }
 0x1d5   :  { %22176 = vst [vmem:[#allocation59_spill] sm:$0xff] %v20527_v55  ;;  %22177 = vst [vmem:[#allocation60_spill] sm:$0xff] %v20529_v50 }
 0x1d6   :  { %v20531_v38 = vpop.f32.mrf.mxu0  ;;  %v20533_v1 = vpop.f32.mrf.mxu1 }
 0x1d7   :  { %22178 = vst [vmem:[#allocation61_spill] sm:$0xff] %v20531_v38  ;;  %22179 = vst [vmem:[#allocation62_spill] sm:$0xff] %v20533_v1 }
 0x1d8   :  { %3067 = vmatmul.mubr.bf16.gmra.mxu0 %v20398_v51  ;;  %3130 = vmatmul.mubr.bf16.gmra.mxu1 %v20398_v51  ;;  %v20537_v58 = vpop.f32.mrf.mxu0  ;;  %v20539_v8 = vpop.f32.mrf.mxu1 }
 0x1d9   :  { %22180 = vst [vmem:[#allocation63_spill] sm:$0xff] %v20537_v58  ;;  %22181 = vst [vmem:[#allocation64_spill] sm:$0xff] %v20539_v8  ;;  %3076 = vmatprep.mubr.bf16.mxu0 %v20135_v0  ;;  %3139 = vmatprep.mubr.bf16.mxu1 %v20135_v0  ;;  %v18181_v0 = vld [vmem:[#allocation8 + $0x754] ss:$24 sps:$4 sm:$0xff]   ;;  %v18179_v58 = vld [vmem:[#allocation8 + $0x750] ss:$24 sps:$4 sm:$0xff]  }
 0x1da   :  { %v20543_v9 = vpop.f32.mrf.mxu0  ;;  %v20545_v25 = vpop.f32.mrf.mxu1  ;;  %4815 = vmatprep.subr.bf16.mxu0 %v18181_v0  ;;  %v18199_v0 = vld [vmem:[#allocation8 + $0x6c4] ss:$24 sps:$4 sm:$0xff]  }
 0x1db   :  { %22182 = vst [vmem:[#allocation65_spill] sm:$0xff] %v20543_v9  ;;  %22183 = vst [vmem:[#allocation66_spill] sm:$0xff] %v20545_v25  ;;  %v18184_v9 = vld [vmem:[#allocation8 + $0xa54] ss:$24 sps:$4 sm:$0xff]   ;;  %v18182_v25 = vld [vmem:[#allocation8 + $0xa50] ss:$24 sps:$4 sm:$0xff]   ;;  %4816 = vmatpush1.bf16.msra.mxu0 %v18179_v58 }
 0x1dc   :  { %v20547_v26 = vpop.f32.mrf.mxu0  ;;  %v20549_v38 = vpop.f32.mrf.mxu1  ;;  %4868 = vmatprep.subr.bf16.mxu1 %v18184_v9 }
 0x1dd   :  { %22184 = vst [vmem:[#allocation67_spill] sm:$0xff] %v20547_v26  ;;  %22185 = vst [vmem:[#allocation68_spill] sm:$0xff] %v20549_v38  ;;  %4869 = vmatpush1.bf16.msra.mxu1 %v18182_v25  ;;  %v18188_v38 = vld [vmem:[#allocation8 + $0xa20] ss:$24 sps:$4 sm:$0xff]  }
 0x1de   :  { %v20551_v1 = vpop.f32.mrf.mxu0  ;;  %v20553_v50 = vpop.f32.mrf.mxu1 }
 0x1df   :  { %22186 = vst [vmem:[#allocation69_spill] sm:$0xff] %v20551_v1  ;;  %22187 = vst [vmem:[#allocation70_spill] sm:$0xff] %v20553_v50  ;;  %v18185_v50 = vld [vmem:[#allocation8 + $0x720] ss:$24 sps:$4 sm:$0xff]   ;;  %v18187_v1 = vld [vmem:[#allocation8 + $0x724] ss:$24 sps:$4 sm:$0xff]  }
 0x1e0   :  { %3077 = vmatmul.mubr.bf16.gmra.mxu0 %v20423_v24  ;;  %3140 = vmatmul.mubr.bf16.gmra.mxu1 %v20423_v24  ;;  %v20557_v51 = vpop.f32.mrf.mxu0  ;;  %v20559_v8 = vpop.f32.mrf.mxu1  ;;  %v18190_v24 = vld [vmem:[#allocation8 + $0xa24] ss:$24 sps:$4 sm:$0xff]  }
 0x1e1   :  { %22188 = vst [vmem:[#allocation71_spill] sm:$0xff] %v20557_v51  ;;  %22189 = vst [vmem:[#allocation72_spill] sm:$0xff] %v20559_v8  ;;  %4817 = vmatprep.subr.bf16.mxu0 %v18187_v1  ;;  %v18191_v51 = vld [vmem:[#allocation8 + $0x6f0] ss:$24 sps:$4 sm:$0xff]   ;;  %4870 = vmatprep.subr.bf16.mxu1 %v18190_v24 }
 0x1e2   :  { %v20561_v55 = vpop.f32.mrf.mxu0  ;;  %v20563_v26 = vpop.f32.mrf.mxu1  ;;  %v18194_v8 = vld [vmem:[#allocation8 + $0x9f0] ss:$24 sps:$4 sm:$0xff]   ;;  %4818 = vmatpush1.bf16.msra.mxu0 %v18185_v50  ;;  %4871 = vmatpush1.bf16.msra.mxu1 %v18188_v38  ;;  %v18205_v38 = vld [vmem:[#allocation8 + $0x694] ss:$24 sps:$4 sm:$0xff]  }
 0x1e3   :  { %22190 = vst [vmem:[#allocation73_spill] sm:$0xff] %v20561_v55  ;;  %22191 = vst [vmem:[#allocation74_spill] sm:$0xff] %v20563_v26  ;;  %4819 = vmatprep.subr.bf16.mxu0 %v18193_v54  ;;  %4872 = vmatprep.subr.bf16.mxu1 %v18196_v53  ;;  %v18202_v26 = vld [vmem:[#allocation8 + $0x9c4] ss:$24 sps:$4 sm:$0xff]   ;;  %v18200_v55 = vld [vmem:[#allocation8 + $0x9c0] ss:$24 sps:$4 sm:$0xff]  }
 0x1e4   :  { %v20565_v41 = vpop.f32.mrf.mxu0  ;;  %v20567_v46 = vpop.f32.mrf.mxu1  ;;  %v18206_v24 = vld [vmem:[#allocation8 + $0x990] ss:$24 sps:$4 sm:$0xff]  }
 0x1e5   :  { %22192 = vst [vmem:[#allocation75_spill] sm:$0xff] %v20565_v41  ;;  %22193 = vst [vmem:[#allocation76_spill] sm:$0xff] %v20567_v46  ;;  %v18197_v41 = vld [vmem:[#allocation8 + $0x6c0] ss:$24 sps:$4 sm:$0xff]  }
 0x1e6   :  { %v20569_v58 = vpop.f32.mrf.mxu0  ;;  %v20571_v9 = vpop.f32.mrf.mxu1  ;;  %4820 = vmatpush1.bf16.msra.mxu0 %v18191_v51  ;;  %4873 = vmatpush1.bf16.msra.mxu1 %v18194_v8  ;;  %v18208_v8 = vld [vmem:[#allocation8 + $0x994] ss:$24 sps:$4 sm:$0xff]   ;;  %v18203_v51 = vld [vmem:[#allocation8 + $0x690] ss:$24 sps:$4 sm:$0xff]  }
 0x1e7   :  { %22194 = vst [vmem:[#allocation77_spill] sm:$0xff] %v20569_v58  ;;  %22195 = vst [vmem:[#allocation78_spill] sm:$0xff] %v20571_v9  ;;  %4821 = vmatprep.subr.bf16.mxu0 %v18199_v0  ;;  %4874 = vmatprep.subr.bf16.mxu1 %v18202_v26  ;;  %v18214_v26 = vld [vmem:[#allocation8 + $0x964] ss:$24 sps:$4 sm:$0xff]  }
 0x1ea   :  { %4822 = vmatpush1.bf16.msra.mxu0 %v18197_v41  ;;  %4875 = vmatpush1.bf16.msra.mxu1 %v18200_v55  ;;  %v18211_v55 = vld [vmem:[#allocation8 + $0x664] ss:$24 sps:$4 sm:$0xff]  }
 0x1eb   :  { %4823 = vmatprep.subr.bf16.mxu0 %v18205_v38  ;;  %4876 = vmatprep.subr.bf16.mxu1 %v18208_v8 }
 0x1ee   :  { %4824 = vmatpush1.bf16.msra.mxu0 %v18203_v51  ;;  %4877 = vmatpush1.bf16.msra.mxu1 %v18206_v24  ;;  %v18217_v51 = vld [vmem:[#allocation8 + $0x634] ss:$24 sps:$4 sm:$0xff]  }
 0x1ef   :  { %4825 = vmatprep.subr.bf16.mxu0 %v18211_v55  ;;  %4878 = vmatprep.subr.bf16.mxu1 %v18214_v26  ;;  %v18220_v24 = vld [vmem:[#allocation8 + $0x934] ss:$24 sps:$4 sm:$0xff]   ;;  %v18223_v55 = vld [vmem:[#allocation8 + $0x604] ss:$24 sps:$4 sm:$0xff]  }
 0x1f0   :  { %v20573_v25 = vpop.f32.mrf.mxu0  ;;  %v20575_v1 = vpop.f32.mrf.mxu1  ;;  %v18226_v26 = vld [vmem:[#allocation8 + $0x904] ss:$24 sps:$4 sm:$0xff]  }
 0x1f2   :  { %v20577_v46 = vpop.f32.mrf.mxu0  ;;  %v20579_v50 = vpop.f32.mrf.mxu1  ;;  %4826 = vmatpush1.bf16.msra.mxu0 %v18209_v40  ;;  %4879 = vmatpush1.bf16.msra.mxu1 %v18212_v39  ;;  %v18221_v40 = vld [vmem:[#allocation8 + $0x600] ss:$24 sps:$4 sm:$0xff]  }
 0x1f3   :  { %4827 = vmatprep.subr.bf16.mxu0 %v18217_v51  ;;  %4880 = vmatprep.subr.bf16.mxu1 %v18220_v24  ;;  %v18224_v39 = vld [vmem:[#allocation8 + $0x900] ss:$24 sps:$4 sm:$0xff]   ;;  %v18238_v24 = vld [vmem:[#allocation8 + $0xba4] ss:$24 sps:$4 sm:$0xff]  }
 0x1f4   :  { %v20581_v53 = vpop.f32.mrf.mxu0  ;;  %v20583_v54 = vpop.f32.mrf.mxu1 }
 0x1f6   :  { %v20585_v9 = vpop.f32.mrf.mxu0  ;;  %v20587_v58 = vpop.f32.mrf.mxu1  ;;  %4828 = vmatpush1.bf16.msra.mxu0 %v18215_v21  ;;  %4881 = vmatpush1.bf16.msra.mxu1 %v18218_v19  ;;  %v18235_v19 = vld [vmem:[#allocation8 + $0x8a4] ss:$24 sps:$4 sm:$0xff]  }
 0x1f7   :  { %22196 = vst [vmem:[#allocation79_spill] sm:$0xff] %v20587_v58  ;;  %4829 = vmatprep.subr.bf16.mxu0 %v18223_v55  ;;  %4882 = vmatprep.subr.bf16.mxu1 %v18226_v26  ;;  %v18239_v55 = vld [vmem:[#allocation8 + $0x870] ss:$24 sps:$4 sm:$0xff]  }
 0x1f8   :  { %v20589_v0 = vpop.f32.mrf.mxu0  ;;  %v20591_v41 = vpop.f32.mrf.mxu1 }
 0x1fa   :  { %v20593_v48 = vpop.f32.mrf.mxu0  ;;  %v20595_v47 = vpop.f32.mrf.mxu1  ;;  %4830 = vmatpush1.bf16.msra.mxu0 %v18221_v40  ;;  %4883 = vmatpush1.bf16.msra.mxu1 %v18224_v39  ;;  %v18241_v39 = vld [vmem:[#allocation8 + $0x874] ss:$24 sps:$4 sm:$0xff]  }
 0x1fb   :  { %4831 = vmatprep.subr.bf16.mxu0 %v18229_v34 }
 0x1fc   :  { %v20597_v38 = vpop.f32.mrf.mxu0  ;;  %v20599_v8 = vpop.f32.mrf.mxu1 }
 0x1fe   :  { %v20601_v57 = vpop.f32.mrf.mxu0  ;;  %v20603_v56 = vpop.f32.mrf.mxu1  ;;  %4832 = vmatpush2.bf16.msra.mxu0 %v18227_v32 }
 0x1ff   :  { %22197 = vst [vmem:[#allocation80_spill] sm:$0xff] %v20601_v57  ;;  %22198 = vst [vmem:[#allocation81_spill] sm:$0xff] %v20603_v56  ;;  %v18232_v57 = vld [vmem:[#allocation8 + $0xbd4] ss:$24 sps:$4 sm:$0xff]   ;;  %v18230_v56 = vld [vmem:[#allocation8 + $0xbd0] ss:$24 sps:$4 sm:$0xff]   ;;  %4833 = vmatprep.subr.bf16.mxu0 %v18235_v19 }
 0x200   :  { %v20605_v31 = vpop.f32.mrf.mxu0  ;;  %v20607_v30 = vpop.f32.mrf.mxu1  ;;  %4884 = vmatprep.subr.bf16.mxu1 %v18232_v57  ;;  %v18250_v19 = vld [vmem:[#allocation8 + $0xb44] ss:$24 sps:$4 sm:$0xff]  }
 0x201   :  { %22199 = vst [vmem:[#allocation82_spill] sm:$0xff] %v20605_v31  ;;  %22200 = vst [vmem:[#allocation83_spill] sm:$0xff] %v20607_v30  ;;  %4885 = vmatpush2.bf16.msra.mxu1 %v18230_v56  ;;  %v18257_v31 = vld [vmem:[#allocation8 + $0x7e0] ss:$24 sps:$4 sm:$0xff]  }
 0x202   :  { %v20609_v51 = vpop.f32.mrf.mxu0  ;;  %v20611_v21 = vpop.f32.mrf.mxu1  ;;  %4886 = vmatprep.subr.bf16.mxu1 %v18238_v24  ;;  %4834 = vmatpush2.bf16.msra.mxu0 %v18233_v16  ;;  %v18245_v16 = vld [vmem:[#allocation8 + $0x840] ss:$24 sps:$4 sm:$0xff]  }
 0x203   :  { %22201 = vst [vmem:[#allocation84_spill] sm:$0xff] %v20609_v51  ;;  %22202 = vst [vmem:[#allocation85_spill] sm:$0xff] %v20611_v21  ;;  %4835 = vmatprep.subr.bf16.mxu0 %v18241_v39  ;;  %v18247_v21 = vld [vmem:[#allocation8 + $0x844] ss:$24 sps:$4 sm:$0xff]   ;;  %v18251_v51 = vld [vmem:[#allocation8 + $0x810] ss:$24 sps:$4 sm:$0xff]  }
 0x204   :  { %v20613_v26 = vpop.f32.mrf.mxu0  ;;  %v20615_v40 = vpop.f32.mrf.mxu1 }
 0x205   :  { %4887 = vmatpush2.bf16.msra.mxu1 %v18236_v15  ;;  %v18248_v15 = vld [vmem:[#allocation8 + $0xb40] ss:$24 sps:$4 sm:$0xff]  }
 0x206   :  { %4888 = vmatprep.subr.bf16.mxu1 %v18244_v59  ;;  %v20617_v57 = vpop.f32.mrf.mxu0  ;;  %v20619_v56 = vpop.f32.mrf.mxu1  ;;  %4836 = vmatpush2.bf16.msra.mxu0 %v18239_v55 }
 0x207   :  { %22203 = vst [vmem:[#allocation86_spill] sm:$0xff] %v20617_v57  ;;  %22204 = vst [vmem:[#allocation87_spill] sm:$0xff] %v20619_v56  ;;  %4837 = vmatprep.subr.bf16.mxu0 %v18247_v21  ;;  %v18253_v56 = vld [vmem:[#allocation8 + $0x814] ss:$24 sps:$4 sm:$0xff]  }
 0x208   :  { %v18256_v57 = vld [vmem:[#allocation8 + $0xb14] ss:$24 sps:$4 sm:$0xff]  }
 0x209   :  { %4889 = vmatpush2.bf16.msra.mxu1 %v18242_v60 }
 0x20a   :  { %4890 = vmatprep.subr.bf16.mxu1 %v18250_v19  ;;  %4838 = vmatpush2.bf16.msra.mxu0 %v18245_v16  ;;  %v18259_v16 = vld [vmem:[#allocation8 + $0x7e4] ss:$24 sps:$4 sm:$0xff]  }
 0x20b   :  { %4839 = vmatprep.subr.bf16.mxu0 %v18253_v56 }
 0x20d   :  { %4891 = vmatpush2.bf16.msra.mxu1 %v18248_v15  ;;  %v18262_v15 = vld [vmem:[#allocation8 + $0xae4] ss:$24 sps:$4 sm:$0xff]  }
 0x20e   :  { %4892 = vmatprep.subr.bf16.mxu1 %v18256_v57  ;;  %4840 = vmatpush2.bf16.msra.mxu0 %v18251_v51  ;;  %v18268_v51 = vld [vmem:[#allocation8 + $0xab4] ss:$24 sps:$4 sm:$0xff]  }
 0x20f   :  { %4841 = vmatprep.subr.bf16.mxu0 %v18259_v16  ;;  %v18271_v16 = vld [vmem:[#allocation8 + $0x784] ss:$24 sps:$4 sm:$0xff]  }
 0x210   :  { %v20621_v32 = vpop.f32.mrf.mxu0  ;;  %v20623_v34 = vpop.f32.mrf.mxu1 }
 0x211   :  { %4893 = vmatpush2.bf16.msra.mxu1 %v18254_v44  ;;  %v18265_v44 = vld [vmem:[#allocation8 + $0x7b4] ss:$24 sps:$4 sm:$0xff]  }
 0x212   :  { %v20625_v24 = vpop.f32.mrf.mxu0  ;;  %v20627_v45 = vpop.f32.mrf.mxu1  ;;  %4894 = vmatprep.subr.bf16.mxu1 %v18262_v15  ;;  %4842 = vmatpush2.bf16.msra.mxu0 %v18257_v31  ;;  %v18274_v15 = vld [vmem:[#allocation8 + $0xa84] ss:$24 sps:$4 sm:$0xff]   ;;  %v18269_v31 = vld [vmem:[#allocation8 + $0x780] ss:$24 sps:$4 sm:$0xff]  }
 0x213   :  { %4843 = vmatprep.subr.bf16.mxu0 %v18265_v44 }
 0x214   :  { %v20629_v59 = vpop.f32.mrf.mxu0  ;;  %v20631_v39 = vpop.f32.mrf.mxu1 }
 0x215   :  { %4895 = vmatpush2.bf16.msra.mxu1 %v18260_v20  ;;  %v18272_v20 = vld [vmem:[#allocation8 + $0xa80] ss:$24 sps:$4 sm:$0xff]  }
 0x216   :  { %v20633_v60 = vpop.f32.mrf.mxu0  ;;  %v20635_v55 = vpop.f32.mrf.mxu1  ;;  %4896 = vmatprep.subr.bf16.mxu1 %v18268_v51  ;;  %4844 = vmatpush2.bf16.msra.mxu0 %v18263_v43 }
 0x217   :  { %22205 = vst [vmem:[#allocation88_spill] sm:$0xff] %v20633_v60  ;;  %22206 = vst [vmem:[#allocation89_spill] sm:$0xff] %v20635_v55  ;;  %4845 = vmatprep.subr.bf16.mxu0 %v18271_v16 }
 0x218   :  { %v20637_v30 = vpop.f32.mrf.mxu0  ;;  %v20639_v37 = vpop.f32.mrf.mxu1 }
 0x21a   :  { %v20641_v21 = vpop.f32.mrf.mxu0  ;;  %v20643_v19 = vpop.f32.mrf.mxu1  ;;  %4846 = vmatpush2.bf16.msra.mxu0 %v18269_v31 }
 0x21c   :  { %v20645_v60 = vpop.f32.mrf.mxu0  ;;  %v20647_v55 = vpop.f32.mrf.mxu1 }
 0x21d   :  { %22207 = vst [vmem:[#allocation90_spill] sm:$0xff] %v20645_v60  ;;  %22208 = vst [vmem:[#allocation91_spill] sm:$0xff] %v20647_v55  ;;  %v18266_v60 = vld [vmem:[#allocation8 + $0xab0] ss:$24 sps:$4 sm:$0xff]  }
 0x21e   :  { %v20649_v58 = vpop.f32.mrf.mxu0  ;;  %v20651_v56 = vpop.f32.mrf.mxu1  ;;  %4897 = vmatpush2.bf16.msra.mxu1 %v18266_v60 }
 0x21f   :  { %22209 = vst [vmem:[#allocation92_spill] sm:$0xff] %v20649_v58  ;;  %22210 = vst [vmem:[#allocation93_spill] sm:$0xff] %v20651_v56  ;;  %4898 = vmatprep.subr.bf16.mxu1 %v18274_v15 }
 0x220   :  { %v20653_v57 = vpop.f32.mrf.mxu0  ;;  %v20655_v61 = vpop.f32.mrf.mxu1 }
 0x221   :  { %22211 = vst [vmem:[#allocation94_spill] sm:$0xff] %v20653_v57  ;;  %22212 = vst [vmem:[#allocation95_spill] sm:$0xff] %v20655_v61 }
 0x222   :  { %v20657_v55 = vpop.f32.mrf.mxu0  ;;  %v20659_v58 = vpop.f32.mrf.mxu1  ;;  %4899 = vmatpush2.bf16.msra.mxu1 %v18272_v20 }
 0x223   :  { %22213 = vst [vmem:[#allocation96_spill] sm:$0xff] %v20657_v55  ;;  %22214 = vst [vmem:[#allocation97_spill] sm:$0xff] %v20659_v58 }
 0x224   :  { %v20661_v56 = vpop.f32.mrf.mxu0  ;;  %v20663_v61 = vpop.f32.mrf.mxu1 }
 0x225   :  { %22215 = vst [vmem:[#allocation98_spill] sm:$0xff] %v20661_v56  ;;  %22216 = vst [vmem:[#allocation99_spill] sm:$0xff] %v20663_v61  ;;  %v18277_v61 = vld [vmem:[#allocation8 + $0x75c] ss:$24 sps:$4 sm:$0xff]  }
 0x226   :  { %v20665_v44 = vpop.f32.mrf.mxu0  ;;  %v20667_v43 = vpop.f32.mrf.mxu1  ;;  %4921 = vmatprep.subr.bf16.mxu0 %v18277_v61 }
 0x227   :  { %22217 = vst [vmem:[#allocation100_spill] sm:$0xff] %v20665_v44  ;;  %22218 = vst [vmem:[#allocation101_spill] sm:$0xff] %v20667_v43  ;;  %v18280_v44 = vld [vmem:[#allocation8 + $0xa5c] ss:$24 sps:$4 sm:$0xff]  }
 0x228   :  { %4974 = vmatprep.subr.bf16.mxu1 %v18280_v44 }
 0x230   :  { %v20669_v60 = vpop.f32.mrf.mxu0  ;;  %v20671_v51 = vpop.f32.mrf.mxu1 }
 0x231   :  { %22219 = vst [vmem:[#allocation102_spill] sm:$0xff] %v20669_v60  ;;  %22220 = vst [vmem:[#allocation103_spill] sm:$0xff] %v20671_v51 }
 0x232   :  { %v20673_v55 = vpop.f32.mrf.mxu0  ;;  %v20675_v58 = vpop.f32.mrf.mxu1 }
 0x233   :  { %22221 = vst [vmem:[#allocation104_spill] sm:$0xff] %v20673_v55  ;;  %22222 = vst [vmem:[#allocation105_spill] sm:$0xff] %v20675_v58 }
 0x234   :  { %v20677_v16 = vpop.f32.mrf.mxu0  ;;  %v20679_v15 = vpop.f32.mrf.mxu1 }
 0x235   :  { %22223 = vst [vmem:[#allocation106_spill] sm:$0xff] %v20677_v16  ;;  %22224 = vst [vmem:[#allocation107_spill] sm:$0xff] %v20679_v15 }
 0x236   :  { %v20681_v31 = vpop.f32.mrf.mxu0  ;;  %v20683_v20 = vpop.f32.mrf.mxu1 }
 0x237   :  { %22225 = vst [vmem:[#allocation108_spill] sm:$0xff] %v20681_v31  ;;  %22226 = vst [vmem:[#allocation109_spill] sm:$0xff] %v20683_v20 }
 0x238   :  { %v20685_v56 = vpop.f32.mrf.mxu0  ;;  %v20687_v43 = vpop.f32.mrf.mxu1 }
 0x239   :  { %22227 = vst [vmem:[#allocation110_spill] sm:$0xff] %v20685_v56  ;;  %22228 = vst [vmem:[#allocation111_spill] sm:$0xff] %v20687_v43 }
 0x23a   :  { %v20689_v51 = vpop.f32.mrf.mxu0  ;;  %v20691_v55 = vpop.f32.mrf.mxu1 }
 0x23b   :  { %22229 = vst [vmem:[#allocation112_spill] sm:$0xff] %v20689_v51  ;;  %22230 = vst [vmem:[#allocation113_spill] sm:$0xff] %v20691_v55 }
 0x23c   :  { %v20693_v58 = vpop.f32.mrf.mxu0  ;;  %v20695_v16 = vpop.f32.mrf.mxu1 }
 0x23d   :  { %22231 = vst [vmem:[#allocation114_spill] sm:$0xff] %v20693_v58  ;;  %22232 = vst [vmem:[#allocation115_spill] sm:$0xff] %v20695_v16 }
 0x23e   :  { %v20697_v15 = vpop.f32.mrf.mxu0  ;;  %v20699_v31 = vpop.f32.mrf.mxu1 }
 0x23f   :  { %22233 = vst [vmem:[#allocation116_spill] sm:$0xff] %v20697_v15  ;;  %22234 = vst [vmem:[#allocation117_spill] sm:$0xff] %v20699_v31  ;;  %v1828_v15 = vadd.f32 %v20573_v25, %v20385_v2 }
 0x240   :  { %v20701_v20 = vpop.f32.mrf.mxu0  ;;  %v20703_v60 = vpop.f32.mrf.mxu1 }
 0x241   :  { %22235 = vst [vmem:[#allocation118_spill] sm:$0xff] %v20701_v20  ;;  %22236 = vst [vmem:[#allocation119_spill] sm:$0xff] %v20703_v60  ;;  %v1891_v20 = vadd.f32 %v20575_v1, %v20387_v3 }
 0x242   :  { %v20705_v56 = vpop.f32.mrf.mxu0  ;;  %v20707_v61 = vpop.f32.mrf.mxu1 }
 0x243   :  { %22237 = vst [vmem:[#allocation120_spill] sm:$0xff] %v20705_v56  ;;  %22238 = vst [vmem:[#allocation121_spill] sm:$0xff] %v20707_v61  ;;  %v1830_v56 = vadd.f32 %v20577_v46, %v20391_v6 }
 0x244   :  { %v20709_v44 = vpop.f32.mrf.mxu0  ;;  %v20711_v51 = vpop.f32.mrf.mxu1 }
 0x245   :  { %22239 = vst [vmem:[#allocation122_spill] sm:$0xff] %v20709_v44  ;;  %22240 = vst [vmem:[#allocation123_spill] sm:$0xff] %v20711_v51  ;;  %v1893_v44 = vadd.f32 %v20579_v50, %v20393_v7 }
 0x246   :  { %v20713_v55 = vpop.f32.mrf.mxu0  ;;  %v20715_v58 = vpop.f32.mrf.mxu1 }
 0x247   :  { %22241 = vst [vmem:[#allocation124_spill] sm:$0xff] %v20713_v55  ;;  %22242 = vst [vmem:[#allocation125_spill] sm:$0xff] %v20715_v58 }
 0x250   :  { %v2806_v31 = vpop.f32.mrf.mxu0  ;;  %v2869_v60 = vpop.f32.mrf.mxu1 }
 0x251   :  { %v20725_v61 = vadd.f32 %v2806_v31, %v1828_v15  ;;  %v20727_v51 = vadd.f32 %v2869_v60, %v1891_v20 }
 0x252   :  { %v2808_v55 = vpop.f32.mrf.mxu0  ;;  %v2871_v58 = vpop.f32.mrf.mxu1 }
 0x253   :  { %v20729_v16 = vadd.f32 %v2808_v55, %v1830_v56  ;;  %v20731_v2 = vadd.f32 %v2871_v58, %v1893_v44 }
 0x254   :  { %v2810_v25 = vpop.f32.mrf.mxu0  ;;  %v2873_v3 = vpop.f32.mrf.mxu1 }
 0x256   :  { %v20733_v1 = vpop.f32.mrf.mxu0  ;;  %v20735_v43 = vpop.f32.mrf.mxu1 }
 0x257   :  { %22243 = vst [vmem:[#allocation126_spill] sm:$0xff] %v20733_v1  ;;  %22244 = vst [vmem:[#allocation127_spill] sm:$0xff] %v20735_v43  ;;  %v1852_v43 = vadd.f32 %v20613_v26, %v20447_v49  ;;  %v1915_v1 = vadd.f32 %v20615_v40, %v20449_v52  ;;  %v1956_v52 = vadd.f32 %v20625_v24, %v20461_v4 }
 0x258   :  { %v20737_v6 = vpop.f32.mrf.mxu0  ;;  %v20739_v46 = vpop.f32.mrf.mxu1  ;;  %v2019_v40 = vadd.f32 %v20627_v45, %v20463_v5 }
 0x25a   :  { %v20741_v7 = vpop.f32.mrf.mxu0  ;;  %v20743_v50 = vpop.f32.mrf.mxu1 }
 0x25c   :  { %v20745_v60 = vpop.f32.mrf.mxu0  ;;  %v20747_v55 = vpop.f32.mrf.mxu1 }
 0x25d   :  { %22245 = vst [vmem:[#allocation128_spill] sm:$0xff] %v20745_v60  ;;  %22246 = vst [vmem:[#allocation129_spill] sm:$0xff] %v20747_v55 }
 0x25e   :  { %v20749_v58 = vpop.f32.mrf.mxu0  ;;  %v20751_v56 = vpop.f32.mrf.mxu1 }
 0x25f   :  { %22247 = vst [vmem:[#allocation130_spill] sm:$0xff] %v20749_v58  ;;  %22248 = vst [vmem:[#allocation131_spill] sm:$0xff] %v20751_v56 }
 0x260   :  { %v20753_v15 = vpop.f32.mrf.mxu0  ;;  %v20755_v31 = vpop.f32.mrf.mxu1 }
 0x261   :  { %22249 = vst [vmem:[#allocation132_spill] sm:$0xff] %v20753_v15 }
 0x262   :  { %v20757_v20 = vpop.f32.mrf.mxu0  ;;  %v20759_v44 = vpop.f32.mrf.mxu1 }
 0x263   :  { %22250 = vst [vmem:[#allocation133_spill] sm:$0xff] %v20757_v20  ;;  %22251 = vst [vmem:[#allocation134_spill] sm:$0xff] %v20759_v44  ;;  %v1954_v20 = vadd.f32 %v20621_v32, %v20455_v62  ;;  %v2017_v44 = vadd.f32 %v20623_v34, %v20457_v63  ;;  %v1895_v62 = vadd.f32 %v20583_v54, %v20404_v11 }
 0x264   :  { %v2830_v57 = vpop.f32.mrf.mxu0  ;;  %v2893_v55 = vpop.f32.mrf.mxu1  ;;  %v1958_v63 = vadd.f32 %v20629_v59, %v20467_v12  ;;  %v2021_v32 = vadd.f32 %v20631_v39, %v20469_v13  ;;  %v20803_v11 = vadd.f32 %v20585_v9, %v20406_v14  ;;  %v1838_v12 = vadd.f32 %v20589_v0, %v20412_v17 }
 0x265   :  { %v20765_v60 = vadd.f32 %v2830_v57, %v1852_v43  ;;  %v20767_v58 = vadd.f32 %v2893_v55, %v1915_v1  ;;  %v1832_v1 = vadd.f32 %v20581_v53, %v20402_v10  ;;  %v20809_v53 = vadd.f32 %v2873_v3, %v1895_v62 }
 0x266   :  { %v20769_v56 = vpop.f32.mrf.mxu0  ;;  %v20771_v15 = vpop.f32.mrf.mxu1  ;;  %v1901_v14 = vadd.f32 %v20591_v41, %v20414_v18  ;;  %v1840_v17 = vadd.f32 %v20593_v48, %v20416_v22  ;;  %v1903_v9 = vadd.f32 %v20595_v47, %v20418_v23  ;;  %v1842_v0 = vadd.f32 %v20597_v38, %v20427_v27  ;;  %v22300_v22 = vld [vmem:[#allocation99_spill] sm:$0xff] }
 0x267   :  { %22252 = vst [vmem:[#allocation135_spill] sm:$0xff] %v20765_v60  ;;  %22253 = vst [vmem:[#allocation136_spill] sm:$0xff] %v20767_v58  ;;  %v20807_v13 = vadd.f32 %v2810_v25, %v1832_v1  ;;  %v1905_v23 = vadd.f32 %v20599_v8, %v20429_v33  ;;  %v1966_v27 = vadd.f32 %v20641_v21, %v20481_v35  ;;  %v22258_v33 = vld [vmem:[#allocation90_spill] sm:$0xff]  ;;  %v22259_v35 = vld [vmem:[#allocation44_spill] sm:$0xff] }
 0x268   :  { %v2029_v47 = vadd.f32 %v20643_v19, %v20483_v36  ;;  %v1968_v8 = vadd.f32 %v22258_v33, %v20487_v42  ;;  %v22260_v21 = vld [vmem:[#allocation91_spill] sm:$0xff]  ;;  %v20860_v36 = vadd.f32 %v20741_v7, %v1840_v17  ;;  %v20863_v19 = vadd.f32 %v20743_v50, %v1903_v9  ;;  %v22267_v7 = vld [vmem:[#allocation128_spill] sm:$0xff]  ;;  %v22269_v50 = vld [vmem:[#allocation129_spill] sm:$0xff] }
 0x269   :  { %v22278_v33 = vld [vmem:[#allocation38_spill] sm:$0xff]  ;;  %v22326_v58 = vld [vmem:[#allocation93_spill] sm:$0xff] }
 0x26a   :  { %22261 = vst [vmem:[#allocation90_spill] sm:$0xff] %v20860_v36  ;;  %22262 = vst [vmem:[#allocation44_spill] sm:$0xff] %v20863_v19  ;;  %v22301_v55 = vld [vmem:[#allocation133_spill] sm:$0xff]  ;;  %v22303_v5 = vld [vmem:[#allocation134_spill] sm:$0xff] }
 0x270   :  { %v2932_v49 = vpop.f32.mrf.mxu0  ;;  %v2995_v26 = vpop.f32.mrf.mxu1 }
 0x271   :  { %v20781_v57 = vadd.f32 %v2932_v49, %v1954_v20  ;;  %v20783_v43 = vadd.f32 %v2995_v26, %v2017_v44  ;;  %v1964_v49 = vadd.f32 %v20637_v30, %v20477_v28  ;;  %v2027_v26 = vadd.f32 %v20639_v37, %v20479_v29 }
 0x272   :  { %v2934_v4 = vpop.f32.mrf.mxu0  ;;  %v2997_v34 = vpop.f32.mrf.mxu1  ;;  %v3272_v28 = vlaneseq  ;;  %v20846_v37 = vadd.f32 %v20737_v6, %v1838_v12  ;;  %v20849_v29 = vadd.f32 %v20739_v46, %v1901_v14  ;;  %v20881_v12 = vadd.f32 %v22269_v50, %v1905_v23  ;;  %v22277_v23 = vld [vmem:[#allocation83_spill] sm:$0xff]  ;;  %v22284_v50 = vld [vmem:[#allocation48_spill] sm:$0xff] }
 0x273   :  { %v20797_v24 = vadd.f32 %v2934_v4, %v1956_v52  ;;  %v20799_v10 = vadd.f32 %v2997_v34, %v2019_v40  ;;  %v2031_v52 = vadd.f32 %v22260_v21, %v22259_v35  ;;  %v20878_v34 = vadd.f32 %v22267_v7, %v1842_v0  ;;  %v22275_v0 = vld [vmem:[#allocation82_spill] sm:$0xff]  ;;  %v22279_v35 = vld [vmem:[#allocation84_spill] sm:$0xff]  ;;  %v22280_v21 = vld [vmem:[#allocation39_spill] sm:$0xff] }
 0x274   :  { %v2936_v54 = vpop.f32.mrf.mxu0  ;;  %v2999_v59 = vpop.f32.mrf.mxu1  ;;  %22254 = vst [vmem:[#allocation137_spill] sm:$0xff] %v20846_v37  ;;  %22255 = vst [vmem:[#allocation138_spill] sm:$0xff] %v20849_v29  ;;  %v20883_v14 = vshrl.u32 %v3272_v28, 7  ;;  %v1850_v28 = vadd.f32 %v22279_v35, %v22278_v33  ;;  %v22283_v7 = vld [vmem:[#allocation94_spill] sm:$0xff]  ;;  %v22299_v46 = vld [vmem:[#allocation52_spill] sm:$0xff] }
 0x275   :  { %v20815_v20 = vadd.f32 %v2936_v54, %v1958_v63  ;;  %v20817_v44 = vadd.f32 %v2999_v59, %v2021_v32  ;;  %v22265_v63 = vld [vmem:[#allocation33_spill] sm:$0xff]  ;;  %v22266_v32 = vld [vmem:[#allocation79_spill] sm:$0xff]  ;;  %v22288_v35 = vld [vmem:[#allocation50_spill] sm:$0xff]  ;;  %v2041_v18 = vadd.f32 %v22300_v22, %v22299_v46 }
 0x276   :  { %v20827_v25 = vpop.f32.mrf.mxu0  ;;  %v20829_v3 = vpop.f32.mrf.mxu1  ;;  %v20875_v4 = vadd.f32 %v22266_v32, %v22265_v63  ;;  %22268 = vst [vmem:[#allocation33_spill] sm:$0xff] %v20878_v34  ;;  %22270 = vst [vmem:[#allocation79_spill] sm:$0xff] %v20881_v12  ;;  %v20918_v1 = vsub.s32 0, %v20883_v14  ;;  %v20938_v39 = vadd.f32 %v22301_v55, %v1850_v28  ;;  %v22307_v22 = vld [vmem:[#allocation34_spill] sm:$0xff]  ;;  %v22308_v46 = vld [vmem:[#allocation80_spill] sm:$0xff]  ;;  %v20956_v45 = vsub.s32 1, %v20883_v14 }
 0x277   :  { %22271 = vst [vmem:[#allocation128_spill] sm:$0xff] %v20883_v14  ;;  %v1844_v55 = vadd.f32 %v22308_v46, %v22307_v22  ;;  %v22309_v28 = vld [vmem:[#allocation35_spill] sm:$0xff]  ;;  %v22315_v22 = vld [vmem:[#allocation40_spill] sm:$0xff]  ;;  %v22316_v46 = vld [vmem:[#allocation86_spill] sm:$0xff] }
 0x278   :  { %v2942_v48 = vpop.f32.mrf.mxu0  ;;  %v3005_v30 = vpop.f32.mrf.mxu1  ;;  %22302 = vst [vmem:[#allocation39_spill] sm:$0xff] %v20938_v39  ;;  %22311 = vst [vmem:[#allocation48_spill] sm:$0xff] %v20956_v45  ;;  %v22332_v39 = vld [vmem:[#allocation55_spill] sm:$0xff]  ;;  %v22338_v12 = vld [vmem:[#allocation58_spill] sm:$0xff] }
 0x279   :  { %v20851_v41 = vadd.f32 %v2942_v48, %v1964_v49  ;;  %v20853_v38 = vadd.f32 %v3005_v30, %v2027_v26  ;;  %v22276_v48 = vld [vmem:[#allocation37_spill] sm:$0xff]  ;;  %v22341_v34 = vld [vmem:[#allocation106_spill] sm:$0xff]  ;;  %v22367_v37 = vld [vmem:[#allocation116_spill] sm:$0xff] }
 0x27a   :  { %v2944_v6 = vpop.f32.mrf.mxu0  ;;  %v3007_v40 = vpop.f32.mrf.mxu1  ;;  %v1911_v30 = vadd.f32 %v22277_v23, %v22276_v48  ;;  %v22286_v48 = vld [vmem:[#allocation49_spill] sm:$0xff]  ;;  %v22287_v23 = vld [vmem:[#allocation96_spill] sm:$0xff]  ;;  %v22361_v29 = vld [vmem:[#allocation114_spill] sm:$0xff] }
 0x27b   :  { %22256 = vst [vmem:[#allocation139_spill] sm:$0xff] %v20851_v41  ;;  %22257 = vst [vmem:[#allocation140_spill] sm:$0xff] %v20853_v38  ;;  %v20869_v62 = vadd.f32 %v2944_v6, %v1966_v27  ;;  %v20871_v42 = vadd.f32 %v3007_v40, %v2029_v47  ;;  %v22274_v27 = vld [vmem:[#allocation36_spill] sm:$0xff]  ;;  %v22281_v6 = vld [vmem:[#allocation85_spill] sm:$0xff]  ;;  %v1976_v33 = vadd.f32 %v22287_v23, %v22286_v48 }
 0x27c   :  { %v2946_v54 = vpop.f32.mrf.mxu0  ;;  %v3009_v59 = vpop.f32.mrf.mxu1  ;;  %v1848_v47 = vadd.f32 %v22275_v0, %v22274_v27  ;;  %v1913_v40 = vadd.f32 %v22281_v6, %v22280_v21  ;;  %v22289_v21 = vld [vmem:[#allocation97_spill] sm:$0xff]  ;;  %22290 = vst [vmem:[#allocation36_spill] sm:$0xff] %v20918_v1  ;;  %v3270_v23 = vld [vmem:[#allocation5] sm:$0xf]  ;;  %v22364_v41 = vld [vmem:[#allocation115_spill] sm:$0xff] }
 0x27d   :  { %22263 = vst [vmem:[#allocation91_spill] sm:$0xff] %v20869_v62  ;;  %22264 = vst [vmem:[#allocation141_spill] sm:$0xff] %v20871_v42  ;;  %v20889_v49 = vadd.f32 %v2946_v54, %v1968_v8  ;;  %v20891_v26 = vadd.f32 %v3009_v59, %v2031_v52  ;;  %v22282_v8 = vld [vmem:[#allocation47_spill] sm:$0xff]  ;;  %v2039_v6 = vadd.f32 %v22289_v21, %v22288_v35  ;;  %v22298_v21 = vld [vmem:[#allocation98_spill] sm:$0xff] }
 0x27e   :  { %v20901_v63 = vpop.f32.mrf.mxu0  ;;  %v20903_v32 = vpop.f32.mrf.mxu1  ;;  %v1974_v52 = vadd.f32 %v22283_v7, %v22282_v8  ;;  %v22285_v54 = vld [vmem:[#allocation95_spill] sm:$0xff]  ;;  %v20921_v8 = vsub.s32 2, %v20883_v14  ;;  %v22292_v7 = vld [vmem:[#allocation132_spill] sm:$0xff] }
 0x27f   :  { %22272 = vst [vmem:[#allocation129_spill] sm:$0xff] %v20889_v49  ;;  %22273 = vst [vmem:[#allocation142_spill] sm:$0xff] %v20891_v26  ;;  %v2037_v59 = vadd.f32 %v22285_v54, %v22284_v50  ;;  %v20924_v50 = vadd.f32 %v22292_v7, %v1848_v47  ;;  %v20927_v54 = vadd.f32 %v20755_v31, %v1911_v30  ;;  %v22297_v35 = vld [vmem:[#allocation51_spill] sm:$0xff] }
 0x280   :  { %v2952_v9 = vpop.f32.mrf.mxu0  ;;  %v3015_v17 = vpop.f32.mrf.mxu1  ;;  %22291 = vst [vmem:[#allocation82_spill] sm:$0xff] %v20921_v8  ;;  %v1978_v27 = vadd.f32 %v22298_v21, %v22297_v35  ;;  %v20941_v47 = vadd.f32 %v22303_v5, %v1913_v40  ;;  %v3340_v30 = vld [vmem:[#allocation7] sm:$0xf]  ;;  %v22310_v35 = vld [vmem:[#allocation81_spill] sm:$0xff] }
 0x281   :  { %22293 = vst [vmem:[#allocation37_spill] sm:$0xff] %v20924_v50  ;;  %22294 = vst [vmem:[#allocation83_spill] sm:$0xff] %v20927_v54  ;;  %v20929_v0 = vadd.f32 %v2952_v9, %v1974_v52  ;;  %v20931_v48 = vadd.f32 %v3015_v17, %v2037_v59  ;;  %v1907_v5 = vadd.f32 %v22310_v35, %v22309_v28  ;;  %v20959_v17 = vsub.s32 3, %v20883_v14  ;;  %v22317_v35 = vld [vmem:[#allocation41_spill] sm:$0xff]  ;;  %v22318_v9 = vld [vmem:[#allocation87_spill] sm:$0xff] }
 0x282   :  { %22304 = vst [vmem:[#allocation85_spill] sm:$0xff] %v20941_v47  ;;  %v2954_v7 = vpop.f32.mrf.mxu0  ;;  %v3017_v31 = vpop.f32.mrf.mxu1  ;;  %v1854_v28 = vadd.f32 %v22316_v46, %v22315_v22  ;;  %v20974_v54 = vrot.slane %v3270_v23, %v20918_v1  ;;  %v20977_v14 = vrot.slane %v3270_v23, %v20921_v8  ;;  %v22321_v46 = vld [vmem:[#allocation43_spill] sm:$0xff]  ;;  %v22329_v47 = vld [vmem:[#allocation54_spill] sm:$0xff] }
 0x283   :  { %22295 = vst [vmem:[#allocation38_spill] sm:$0xff] %v20929_v0  ;;  %22296 = vst [vmem:[#allocation84_spill] sm:$0xff] %v20931_v48  ;;  %v20947_v52 = vadd.f32 %v2954_v7, %v1976_v33  ;;  %v20949_v59 = vadd.f32 %v3017_v31, %v2039_v6  ;;  %v1917_v48 = vadd.f32 %v22318_v9, %v22317_v35  ;;  %v22320_v9 = vld [vmem:[#allocation88_spill] sm:$0xff]  ;;  %v22322_v35 = vld [vmem:[#allocation89_spill] sm:$0xff] }
 0x284   :  { %v2956_v40 = vpop.f32.mrf.mxu0  ;;  %v3019_v21 = vpop.f32.mrf.mxu1  ;;  %22312 = vst [vmem:[#allocation95_spill] sm:$0xff] %v20959_v17  ;;  %v2023_v6 = vadd.f32 %v22322_v35, %v22321_v46  ;;  %v20997_v33 = vrot.slane %v3270_v23, %v20959_v17  ;;  %v22328_v46 = vld [vmem:[#allocation100_spill] sm:$0xff]  ;;  %v22333_v0 = vld [vmem:[#allocation102_spill] sm:$0xff]  ;;  %v22335_v50 = vld [vmem:[#allocation103_spill] sm:$0xff] }
 0x285   :  { %22305 = vst [vmem:[#allocation47_spill] sm:$0xff] %v20947_v52  ;;  %22306 = vst [vmem:[#allocation94_spill] sm:$0xff] %v20949_v59  ;;  %v20965_v7 = vadd.f32 %v2956_v40, %v1978_v27  ;;  %v20967_v31 = vadd.f32 %v3019_v21, %v2041_v18  ;;  %v20984_v18 = vrot.slane %v3340_v30, %v20918_v1  ;;  %v22319_v21 = vld [vmem:[#allocation42_spill] sm:$0xff]  ;;  %v22324_v27 = vld [vmem:[#allocation92_spill] sm:$0xff] }
 0x286   :  { %v20987_v40 = vrot.slane %v3340_v30, %v20921_v8  ;;  %v1960_v22 = vadd.f32 %v22320_v9, %v22319_v21  ;;  %v20994_v59 = vrot.slane %v3270_v23, %v20956_v45  ;;  %v22325_v1 = vld [vmem:[#allocation46_spill] sm:$0xff]  ;;  %v21004_v8 = vrot.slane %v3340_v30, %v20956_v45  ;;  %v22327_v9 = vld [vmem:[#allocation53_spill] sm:$0xff]  ;;  %v22337_v45 = vld [vmem:[#allocation104_spill] sm:$0xff] }
 0x287   :  { %22313 = vst [vmem:[#allocation49_spill] sm:$0xff] %v20965_v7  ;;  %22314 = vst [vmem:[#allocation96_spill] sm:$0xff] %v20967_v31  ;;  %v22323_v7 = vld [vmem:[#allocation45_spill] sm:$0xff]  ;;  %v2033_v60 = vadd.f32 %v22326_v58, %v22325_v1  ;;  %v21007_v21 = vrot.slane %v3340_v30, %v20959_v17  ;;  %v21011_v35 = vadd.f32 %v22328_v46, %v22327_v9  ;;  %v22340_v49 = vld [vmem:[#allocation59_spill] sm:$0xff] }
 0x288   :  { %v1970_v31 = vadd.f32 %v22324_v27, %v22323_v7  ;;  %v22330_v52 = vld [vmem:[#allocation101_spill] sm:$0xff]  ;;  %v2080_v7 = vadd.f32 %v22333_v0, %v22332_v39  ;;  %v22334_v27 = vld [vmem:[#allocation56_spill] sm:$0xff]  ;;  %v2084_v9 = vadd.f32 %v22341_v34, %v22340_v49  ;;  %v22343_v42 = vld [vmem:[#allocation107_spill] sm:$0xff] }
 0x289   :  { %v21015_v23 = vadd.f32 %v22330_v52, %v22329_v47  ;;  %v2143_v58 = vadd.f32 %v22335_v50, %v22334_v27  ;;  %v22336_v1 = vld [vmem:[#allocation57_spill] sm:$0xff]  ;;  %v22342_v46 = vld [vmem:[#allocation60_spill] sm:$0xff]  ;;  %v22346_v39 = vld [vmem:[#allocation62_spill] sm:$0xff] }
 0x28a   :  { %v2082_v26 = vadd.f32 %v22337_v45, %v22336_v1  ;;  %v22339_v30 = vld [vmem:[#allocation105_spill] sm:$0xff]  ;;  %v2147_v19 = vadd.f32 %v22343_v42, %v22342_v46  ;;  %v22345_v52 = vld [vmem:[#allocation108_spill] sm:$0xff]  ;;  %v22348_v50 = vld [vmem:[#allocation63_spill] sm:$0xff] }
 0x28b   :  { %22331 = vst [vmem:[#allocation50_spill] sm:$0xff] %v21015_v23  ;;  %v2145_v17 = vadd.f32 %v22339_v30, %v22338_v12  ;;  %v22344_v47 = vld [vmem:[#allocation61_spill] sm:$0xff]  ;;  %v22349_v27 = vld [vmem:[#allocation110_spill] sm:$0xff]  ;;  %v22351_v1 = vld [vmem:[#allocation64_spill] sm:$0xff] }
 0x28c   :  { %v21031_v62 = vadd.f32 %v22345_v52, %v22344_v47  ;;  %v22347_v0 = vld [vmem:[#allocation109_spill] sm:$0xff]  ;;  %v21039_v45 = vadd.f32 %v22349_v27, %v22348_v50  ;;  %v22352_v12 = vld [vmem:[#allocation111_spill] sm:$0xff]  ;;  %v22355_v49 = vld [vmem:[#allocation112_spill] sm:$0xff] }
 0x28d   :  { %v21035_v36 = vadd.f32 %v22347_v0, %v22346_v39  ;;  %v21043_v30 = vadd.f32 %v22352_v12, %v22351_v1  ;;  %v22354_v34 = vld [vmem:[#allocation65_spill] sm:$0xff]  ;;  %v22357_v42 = vld [vmem:[#allocation66_spill] sm:$0xff]  ;;  %v22360_v52 = vld [vmem:[#allocation67_spill] sm:$0xff] }
 0x28e   :  { %22350 = vst [vmem:[#allocation97_spill] sm:$0xff] %v21039_v45  ;;  %v21047_v38 = vadd.f32 %v22355_v49, %v22354_v34  ;;  %v22358_v46 = vld [vmem:[#allocation113_spill] sm:$0xff]  ;;  %v21055_v39 = vadd.f32 %v22361_v29, %v22360_v52  ;;  %v22363_v0 = vld [vmem:[#allocation68_spill] sm:$0xff]  ;;  %v22369_v12 = vld [vmem:[#allocation70_spill] sm:$0xff]  ;;  %v2958_v52 = vpop.f32.mrf.mxu0 }
 0x28f   :  { %22353 = vst [vmem:[#allocation132_spill] sm:$0xff] %v21043_v30  ;;  %v21051_v47 = vadd.f32 %v22358_v46, %v22357_v42  ;;  %v21059_v50 = vadd.f32 %v22364_v41, %v22363_v0  ;;  %v22366_v27 = vld [vmem:[#allocation69_spill] sm:$0xff]  ;;  %v22372_v49 = vld [vmem:[#allocation71_spill] sm:$0xff]  ;;  %v22375_v46 = vld [vmem:[#allocation72_spill] sm:$0xff] }
 0x290   :  { %22356 = vst [vmem:[#allocation51_spill] sm:$0xff] %v21047_v38  ;;  %22362 = vst [vmem:[#allocation52_spill] sm:$0xff] %v21055_v39  ;;  %v21063_v1 = vadd.f32 %v22367_v37, %v22366_v27  ;;  %v22370_v30 = vld [vmem:[#allocation117_spill] sm:$0xff]  ;;  %v22373_v38 = vld [vmem:[#allocation118_spill] sm:$0xff]  ;;  %v3021_v39 = vpop.f32.mrf.mxu1 }
 0x291   :  { %22359 = vst [vmem:[#allocation98_spill] sm:$0xff] %v21051_v47  ;;  %22365 = vst [vmem:[#allocation99_spill] sm:$0xff] %v21059_v50  ;;  %v21067_v34 = vadd.f32 %v22370_v30, %v22369_v12  ;;  %v21071_v42 = vadd.f32 %v22373_v38, %v22372_v49  ;;  %v22376_v47 = vld [vmem:[#allocation119_spill] sm:$0xff]  ;;  %v22378_v41 = vld [vmem:[#allocation73_spill] sm:$0xff] }
 0x292   :  { %22368 = vst [vmem:[#allocation133_spill] sm:$0xff] %v21063_v1  ;;  %v21075_v29 = vadd.f32 %v22376_v47, %v22375_v46  ;;  %v22379_v0 = vld [vmem:[#allocation120_spill] sm:$0xff]  ;;  %v22380_v37 = vld [vmem:[#allocation74_spill] sm:$0xff]  ;;  %v22381_v27 = vld [vmem:[#allocation121_spill] sm:$0xff] }
 0x293   :  { %22371 = vst [vmem:[#allocation134_spill] sm:$0xff] %v21067_v34  ;;  %22374 = vst [vmem:[#allocation34_spill] sm:$0xff] %v21071_v42  ;;  %v21079_v50 = vadd.f32 %v22379_v0, %v22378_v41  ;;  %v21083_v1 = vadd.f32 %v22381_v27, %v22380_v37  ;;  %v22382_v30 = vld [vmem:[#allocation75_spill] sm:$0xff]  ;;  %v22383_v12 = vld [vmem:[#allocation122_spill] sm:$0xff]  ;;  %v21102_v0 = vadd.f32 %v20827_v25, %v1960_v22  ;;  %v3058_v27 = vpop.f32.mrf.mxu0 }
 0x294   :  { %22377 = vst [vmem:[#allocation80_spill] sm:$0xff] %v21075_v29  ;;  %v21087_v34 = vadd.f32 %v22383_v12, %v22382_v30  ;;  %v22385_v38 = vld [vmem:[#allocation76_spill] sm:$0xff]  ;;  %v22386_v49 = vld [vmem:[#allocation123_spill] sm:$0xff]  ;;  %v22388_v47 = vld [vmem:[#allocation77_spill] sm:$0xff]  ;;  %v21105_v37 = vadd.f32 %v20829_v3, %v2023_v6  ;;  %v3121_v30 = vpop.f32.mrf.mxu1  ;;  %v21118_v25 = vadd.f32 %v20901_v63, %v1970_v31  ;;  %v21121_v3 = vadd.f32 %v20903_v32, %v2033_v60 }
 0x295   :  { %v21091_v42 = vadd.f32 %v22386_v49, %v22385_v38  ;;  %v22389_v46 = vld [vmem:[#allocation124_spill] sm:$0xff]  ;;  %v22391_v45 = vld [vmem:[#allocation78_spill] sm:$0xff]  ;;  %v22392_v23 = vld [vmem:[#allocation125_spill] sm:$0xff]  ;;  %v3060_v6 = vpop.f32.mrf.mxu0  ;;  %v21133_v63 = vadd.f32 %v20771_v15, %v1917_v48 }
 0x296   :  { %22384 = vst [vmem:[#allocation35_spill] sm:$0xff] %v21087_v34  ;;  %v21095_v29 = vadd.f32 %v22389_v46, %v22388_v47  ;;  %v21099_v41 = vadd.f32 %v22392_v23, %v22391_v45  ;;  %v22393_v12 = vld [vmem:[#allocation126_spill] sm:$0xff]  ;;  %v22394_v49 = vld [vmem:[#allocation127_spill] sm:$0xff]  ;;  %v3158_v47 = vadd.f32 %v3058_v27, %v2080_v7  ;;  %v3160_v46 = vadd.f32 %v3121_v30, %v2143_v58  ;;  %v3123_v22 = vpop.f32.mrf.mxu1 }
 0x297   :  { %22387 = vst [vmem:[#allocation81_spill] sm:$0xff] %v21091_v42  ;;  %v3163_v38 = vadd.f32 %v22393_v12, %v20803_v11  ;;  %v3165_v42 = vadd.f32 %v22394_v49, %v20875_v4  ;;  %v22396_v23 = vld [vmem:[#allocation131_spill] sm:$0xff]  ;;  %v22397_v11 = vmax.f32 %v20725_v61, %v20781_v57  ;;  %v22398_v7 = vmax.f32 %v20727_v51, %v20783_v43  ;;  %v3062_v31 = vpop.f32.mrf.mxu0 }
 0x298   :  { %22390 = vst [vmem:[#allocation40_spill] sm:$0xff] %v21095_v29  ;;  %v22395_v29 = vld [vmem:[#allocation130_spill] sm:$0xff]  ;;  %v21115_v45 = vadd.f32 %v22396_v23, %v1907_v5  ;;  %v3159_v58 = vadd.f32 %v3060_v6, %v2082_v26  ;;  %v21130_v5 = vadd.f32 %v20769_v56, %v1854_v28  ;;  %v3125_v27 = vpop.f32.mrf.mxu1  ;;  %v22399_v51 = vmax.f32 %v20729_v16, %v20797_v24 }
 0x299   :  { %v21112_v34 = vadd.f32 %v22395_v29, %v1844_v55  ;;  %v3246_v4 = vmax.f32 %v22397_v11, %v3158_v47  ;;  %v3248_v55 = vmax.f32 %v22398_v7, %v3160_v46  ;;  %v3161_v29 = vadd.f32 %v3123_v22, %v2145_v17 }
 0x29a   :  { %v3227_v60 = vmax.f32 %v3163_v38, %v21102_v0  ;;  %v3229_v32 = vmax.f32 %v3165_v42, %v21105_v37  ;;  %v3247_v43 = vmax.f32 %v22399_v51, %v3159_v58  ;;  %v22400_v56 = vmax.f32 %v20731_v2, %v20799_v10  ;;  %v3064_v42 = vpop.f32.mrf.mxu0  ;;  %v3127_v0 = vpop.f32.mrf.mxu1 }
 0x29b   :  { %v3292_v61 = vadd.f32 %v20974_v54, %v3246_v4  ;;  %v3294_v57 = vadd.f32 %v20977_v14, %v3248_v55  ;;  %v3235_v15 = vmax.f32 %v21112_v34, %v21118_v25  ;;  %v3237_v48 = vmax.f32 %v21115_v45, %v21121_v3  ;;  %v22405_v55 = vld [vmem:[#allocation132_spill] sm:$0xff]  ;;  %v22435_v34 = vld [vmem:[#allocation83_spill] sm:$0xff] }
 0x29c   :  { %v3249_v26 = vmax.f32 %v22400_v56, %v3161_v29  ;;  %v3170_v17 = vadd.f32 %v3062_v31, %v2084_v9  ;;  %v3172_v28 = vadd.f32 %v3125_v27, %v2147_v19  ;;  %v21152_v24 = vadd.f32 %v20994_v59, %v3247_v43  ;;  %v3068_v12 = vpop.f32.mrf.mxu0  ;;  %v3131_v38 = vpop.f32.mrf.mxu1  ;;  %v22406_v43 = vld [vmem:[#allocation137_spill] sm:$0xff]  ;;  %v22436_v25 = vld [vmem:[#allocation84_spill] sm:$0xff]  ;;  %v22438_v45 = vld [vmem:[#allocation39_spill] sm:$0xff] }
 0x29d   :  { %vm3316_vm0 = vcmp.gt.f32.partialorder %v3292_v61, 0.0  ;;  %v3362_v37 = vmul.f32 %v20984_v18, %v3292_v61  ;;  %vm3318_vm1 = vcmp.gt.f32.partialorder %v3294_v57, 0.0  ;;  %v3364_v16 = vmul.f32 %v20987_v40, %v3294_v57  ;;  %v22439_v3 = vld [vmem:[#allocation47_spill] sm:$0xff] }
 0x29e   :  { %v21155_v2 = vadd.f32 %v20997_v33, %v3249_v26  ;;  %v22401_v10 = vmax.f32 %v20807_v13, %v20815_v20  ;;  %v22402_v19 = vmax.f32 %v20809_v53, %v20817_v44  ;;  %v3171_v46 = vadd.f32 %v3064_v42, %v21031_v62  ;;  %v3070_v44 = vpop.f32.mrf.mxu0  ;;  %v3133_v22 = vpop.f32.mrf.mxu1  ;;  %v22403_v62 = vld [vmem:[#allocation50_spill] sm:$0xff]  ;;  %v22410_v26 = vld [vmem:[#allocation140_spill] sm:$0xff] }
 0x29f   :  { %v3386_v49 = vsel %vm3316_vm0, %v3292_v61, %v3362_v37  ;;  %v3388_v47 = vsel %vm3318_vm1, %v3294_v57, %v3364_v16  ;;  %v3173_v23 = vadd.f32 %v3127_v0, %v21035_v36  ;;  %v21167_v6 = vmul.f32 %v21004_v8, %v21152_v24  ;;  %v22404_v36 = vld [vmem:[#allocation97_spill] sm:$0xff]  ;;  %v22412_v37 = vld [vmem:[#allocation51_spill] sm:$0xff] }
 0x2a0   :  { %v3250_v30 = vmax.f32 %v22401_v10, %v3170_v17  ;;  %v3252_v9 = vmax.f32 %v22402_v19, %v3172_v28  ;;  %v21171_v13 = vmul.f32 %v21007_v21, %v21155_v2  ;;  %v21176_v11 = vadd.f32 %v2958_v52, %v21011_v35  ;;  %v3072_v27 = vpop.f32.mrf.mxu0  ;;  %v3135_v61 = vpop.f32.mrf.mxu1  ;;  %v22407_v35 = vld [vmem:[#allocation139_spill] sm:$0xff]  ;;  %v22413_v10 = vld [vmem:[#allocation98_spill] sm:$0xff] }
 0x2a1   :  { %v21179_v4 = vadd.f32 %v3021_v39, %v22403_v62  ;;  %v3182_v7 = vadd.f32 %v3068_v12, %v22404_v36  ;;  %v3184_v58 = vadd.f32 %v3131_v38, %v22405_v55  ;;  %v3251_v57 = vmax.f32 %v3227_v60, %v3171_v46  ;;  %v22409_v39 = vld [vmem:[#allocation138_spill] sm:$0xff]  ;;  %v22420_v55 = vld [vmem:[#allocation52_spill] sm:$0xff] }
 0x2a2   :  { %v3296_v20 = vadd.f32 %v20974_v54, %v3250_v30  ;;  %v3298_v53 = vadd.f32 %v20977_v14, %v3252_v9  ;;  %v3253_v51 = vmax.f32 %v3229_v32, %v3173_v23  ;;  %v22408_v52 = vmax.f32 %v22406_v43, %v22407_v35  ;;  %v3074_v19 = vpop.f32.mrf.mxu0  ;;  %v3137_v9 = vpop.f32.mrf.mxu1  ;;  %v22414_v46 = vld [vmem:[#allocation90_spill] sm:$0xff]  ;;  %v22415_v23 = vld [vmem:[#allocation91_spill] sm:$0xff] }
 0x2a3   :  { %v22411_v17 = vmax.f32 %v22409_v39, %v22410_v26  ;;  %v3183_v16 = vadd.f32 %v3070_v44, %v22412_v37  ;;  %v3185_v30 = vadd.f32 %v3133_v22, %v22413_v10  ;;  %v22416_v62 = vmax.f32 %v22414_v46, %v22415_v23  ;;  %v22423_v39 = vld [vmem:[#allocation129_spill] sm:$0xff] }
 0x2a4   :  { %vm3320_vm2 = vcmp.gt.f32.partialorder %v3296_v20, 0.0  ;;  %v3366_v29 = vmul.f32 %v20984_v18, %v3296_v20  ;;  %vm3322_vm3 = vcmp.gt.f32.partialorder %v3298_v53, 0.0  ;;  %v3368_v31 = vmul.f32 %v20987_v40, %v3298_v53  ;;  %v22428_v23 = vld [vmem:[#allocation133_spill] sm:$0xff] }
 0x2a5   :  { %v3254_v56 = vmax.f32 %v22408_v52, %v3182_v7  ;;  %v3256_v28 = vmax.f32 %v22411_v17, %v3184_v58  ;;  %v3255_v36 = vmax.f32 %v22416_v62, %v3183_v16  ;;  %v3194_v22 = vadd.f32 %v3072_v27, %v22420_v55  ;;  %v22421_v58 = vld [vmem:[#allocation99_spill] sm:$0xff] }
 0x2a6   :  { %v3390_v42 = vsel %vm3320_vm2, %v3296_v20, %v3366_v29  ;;  %v3392_v0 = vsel %vm3322_vm3, %v3298_v53, %v3368_v31  ;;  %v22417_v20 = vld [vmem:[#allocation44_spill] sm:$0xff]  ;;  %v22418_v53 = vld [vmem:[#allocation141_spill] sm:$0xff]  ;;  %v3196_v29 = vadd.f32 %v3135_v61, %v22421_v58  ;;  %v3141_v31 = vpop.f32.mrf.mxu1  ;;  %v22425_v17 = vld [vmem:[#allocation79_spill] sm:$0xff]  ;;  %v3195_v62 = vadd.f32 %v3074_v19, %v22428_v23 }
 0x2a7   :  { %v21193_v12 = vpack.c.bf16 %v3390_v42, %v3386_v49  ;;  %v21195_v60 = vpack.c.bf16 %v3392_v0, %v3388_v47  ;;  %v3300_v32 = vadd.f32 %v20974_v54, %v3254_v56  ;;  %v3302_v38 = vadd.f32 %v20977_v14, %v3256_v28  ;;  %v3078_v49 = vpop.f32.mrf.mxu0  ;;  %v22422_v56 = vld [vmem:[#allocation33_spill] sm:$0xff]  ;;  %v22426_v61 = vld [vmem:[#allocation142_spill] sm:$0xff] }
 0x2a8   :  { %v22419_v7 = vmax.f32 %v22417_v20, %v22418_v53  ;;  %v21210_v35 = vadd.f32 %v20994_v59, %v3255_v36  ;;  %v22424_v26 = vmax.f32 %v22422_v56, %v22423_v39  ;;  %v22427_v28 = vmax.f32 %v22425_v17, %v22426_v61  ;;  %v3143_v10 = vpop.f32.mrf.mxu1  ;;  %v22429_v36 = vld [vmem:[#allocation134_spill] sm:$0xff]  ;;  %v22441_v61 = vld [vmem:[#allocation85_spill] sm:$0xff] }
 0x2a9   :  { %vm3324_vm4 = vcmp.gt.f32.partialorder %v3300_v32, 0.0  ;;  %v3370_v47 = vmul.f32 %v20984_v18, %v3300_v32  ;;  %vm3326_vm5 = vcmp.gt.f32.partialorder %v3302_v38, 0.0  ;;  %v3372_v43 = vmul.f32 %v20987_v40, %v3302_v38  ;;  %v3080_v16 = vpop.f32.mrf.mxu0  ;;  %v22433_v56 = vld [vmem:[#allocation38_spill] sm:$0xff] }
 0x2aa   :  { %v3257_v44 = vmax.f32 %v22419_v7, %v3185_v30  ;;  %v3258_v27 = vmax.f32 %v22424_v26, %v3194_v22  ;;  %v3260_v37 = vmax.f32 %v22427_v28, %v3196_v29  ;;  %v3197_v20 = vadd.f32 %v3137_v9, %v22429_v36  ;;  %v3145_v22 = vpop.f32.mrf.mxu1  ;;  %v22442_v28 = vld [vmem:[#allocation94_spill] sm:$0xff] }
 0x2ab   :  { %v21221_v30 = vsel %vm3324_vm4, %v3300_v32, %v3370_v47  ;;  %v21223_v46 = vsel %vm3326_vm5, %v3302_v38, %v3372_v43  ;;  %v3243_v53 = vmax.f32 %v21130_v5, %v21176_v11  ;;  %v3245_v7 = vmax.f32 %v21133_v63, %v21179_v4  ;;  %v3082_v32 = vpop.f32.mrf.mxu0  ;;  %v22430_v63 = vld [vmem:[#allocation34_spill] sm:$0xff]  ;;  %v22431_v4 = vld [vmem:[#allocation80_spill] sm:$0xff]  ;;  %v22432_v43 = vld [vmem:[#allocation37_spill] sm:$0xff] }
 0x2ac   :  { %v21213_v52 = vadd.f32 %v20997_v33, %v3257_v44  ;;  %v21232_v44 = vpack.c.bf16 %v21221_v30, %v3390_v42  ;;  %v21235_v55 = vpack.c.bf16 %v21223_v46, %v3392_v0  ;;  %v3297_v38 = vadd.f32 %v20994_v59, %v3251_v57 }
 0x2ad   :  { %v21239_v19 = vadd.f32 %v20997_v33, %v3253_v51  ;;  %v21242_v9 = vadd.f32 %v20974_v54, %v3258_v27  ;;  %v21245_v5 = vadd.f32 %v20977_v14, %v3260_v37  ;;  %v3206_v11 = vadd.f32 %v3078_v49, %v22430_v63  ;;  %v3084_v47 = vpop.f32.mrf.mxu0 }
 0x2ae   :  { %v3208_v42 = vadd.f32 %v3141_v31, %v22431_v4  ;;  %v3207_v0 = vadd.f32 %v3080_v16, %v21079_v50  ;;  %v3209_v58 = vadd.f32 %v3143_v10, %v21083_v1  ;;  %v3371_v57 = vmul.f32 %v21004_v8, %v21210_v35  ;;  %v3147_v31 = vpop.f32.mrf.mxu1  ;;  %v22444_v10 = vld [vmem:[#allocation35_spill] sm:$0xff] }
 0x2af   :  { %v3373_v51 = vmul.f32 %v21007_v21, %v21213_v52  ;;  %v3259_v29 = vmax.f32 %v3235_v15, %v3195_v62  ;;  %v3261_v49 = vmax.f32 %v3237_v48, %v3197_v20  ;;  %v21263_v50 = vmul.f32 %v20984_v18, %v21242_v9  ;;  %v22445_v62 = vld [vmem:[#allocation81_spill] sm:$0xff] }
 0x2b0   :  { %v21267_v1 = vmul.f32 %v20987_v40, %v21245_v5  ;;  %v22434_v39 = vmax.f32 %v22432_v43, %v22433_v56  ;;  %v22437_v15 = vmax.f32 %v22435_v34, %v22436_v25  ;;  %v22440_v48 = vmax.f32 %v22438_v45, %v22439_v3  ;;  %v22448_v56 = vld [vmem:[#allocation49_spill] sm:$0xff]  ;;  %v22451_v34 = vld [vmem:[#allocation96_spill] sm:$0xff] }
 0x2b1   :  { %v22443_v37 = vmax.f32 %v22441_v61, %v22442_v28  ;;  %v3218_v23 = vadd.f32 %v3082_v32, %v22444_v10  ;;  %v3220_v36 = vadd.f32 %v3145_v22, %v22445_v62  ;;  %vm3328_vm6 = vcmp.gt.f32.partialorder %v21242_v9, 0.0  ;;  %v22450_v22 = vld [vmem:[#allocation136_spill] sm:$0xff] }
 0x2b2   :  { %v3262_v26 = vmax.f32 %v22434_v39, %v3206_v11  ;;  %v3264_v27 = vmax.f32 %v22437_v15, %v3208_v42  ;;  %v3263_v17 = vmax.f32 %v22440_v48, %v3207_v0  ;;  %v22446_v11 = vld [vmem:[#allocation40_spill] sm:$0xff]  ;;  %v3221_v42 = vadd.f32 %v3147_v31, %v21099_v41 }
 0x2b3   :  { %v3265_v16 = vmax.f32 %v22443_v37, %v3209_v58  ;;  %v3219_v4 = vadd.f32 %v3084_v47, %v22446_v11  ;;  %v22447_v58 = vld [vmem:[#allocation135_spill] sm:$0xff]  ;;  %v22452_v25 = vmax.f32 %v22450_v22, %v22451_v34  ;;  %vm3330_vm8 = vcmp.gt.f32.partialorder %v21245_v5, 0.0  ;;  %v18278_v37 = vld [vmem:[#allocation8 + $0xa58] ss:$24 sps:$4 sm:$0xff]  }
 0x2b4   :  { %v3308_v20 = vadd.f32 %v20974_v54, %v3262_v26  ;;  %v21286_v63 = vadd.f32 %v20977_v14, %v3264_v27  ;;  %v3309_v0 = vadd.f32 %v20994_v59, %v3263_v17  ;;  %v22449_v32 = vmax.f32 %v22447_v58, %v22448_v56  ;;  %v18292_v22 = vld [vmem:[#allocation8 + $0x9fc] ss:$24 sps:$4 sm:$0xff]  }
 0x2b5   :  { %v3311_v43 = vadd.f32 %v20997_v33, %v3265_v16  ;;  %v3268_v15 = vmax.f32 %v22452_v25, %v3220_v36  ;;  %v3305_v26 = vadd.f32 %v20994_v59, %v3259_v29  ;;  %v3307_v27 = vadd.f32 %v20997_v33, %v3261_v49  ;;  %v18283_v16 = vld [vmem:[#allocation8 + $0x72c] ss:$24 sps:$4 sm:$0xff]  }
 0x2b6   :  { %v3266_v39 = vmax.f32 %v22449_v32, %v3218_v23  ;;  %vm3332_vm7 = vcmp.gt.f32.partialorder %v3308_v20, 0.0  ;;  %v3378_v47 = vmul.f32 %v20984_v18, %v3308_v20  ;;  %vm3334_vm9 = vcmp.gt.f32.partialorder %v21286_v63, 0.0 }
 0x2b7   :  { %v3380_v41 = vmul.f32 %v20987_v40, %v21286_v63  ;;  %v3379_v31 = vmul.f32 %v21004_v8, %v3309_v0  ;;  %v21310_v3 = vadd.f32 %v20977_v14, %v3268_v15  ;;  %v3381_v29 = vmul.f32 %v21007_v21, %v3311_v43 }
 0x2b8   :  { %v21307_v45 = vadd.f32 %v20974_v54, %v3266_v39  ;;  %v3267_v49 = vmax.f32 %v3243_v53, %v3219_v4  ;;  %v3269_v48 = vmax.f32 %v3245_v7, %v3221_v42  ;;  %vm3325_vm10 = vcmp.gt.f32.partialorder %v21210_v35, 0.0 }
 0x2b9   :  { %v21321_v61 = vmul.f32 %v20987_v40, %v21310_v3  ;;  %vm3321_vm12 = vcmp.gt.f32.partialorder %v3297_v38, 0.0  ;;  %v3367_v53 = vmul.f32 %v21004_v8, %v3297_v38  ;;  %v3395_v7 = vsel %vm3325_vm10, %v21210_v35, %v3371_v57  ;;  %v18275_v40 = vld [vmem:[#allocation8 + $0x758] ss:$24 sps:$4 sm:$0xff]   ;;  %v18286_v57 = vld [vmem:[#allocation8 + $0xa2c] ss:$24 sps:$4 sm:$0xff]  }
 0x2ba   :  { %vm3336_vm11 = vcmp.gt.f32.partialorder %v21307_v45, 0.0  ;;  %v21317_v17 = vmul.f32 %v20984_v18, %v21307_v45  ;;  %v21324_v14 = vadd.f32 %v20994_v59, %v3267_v49  ;;  %v21327_v54 = vadd.f32 %v20997_v33, %v3269_v48  ;;  %v18301_v49 = vld [vmem:[#allocation8 + $0x69c] ss:$24 sps:$4 sm:$0xff]  }
 0x2bb   :  { %vm3323_vm13 = vcmp.gt.f32.partialorder %v21239_v19, 0.0  ;;  %vm3327_vm14 = vcmp.gt.f32.partialorder %v21213_v52, 0.0  ;;  %v3369_v18 = vmul.f32 %v21007_v21, %v21239_v19  ;;  %vm3329_vm15 = vcmp.gt.f32.partialorder %v3305_v26, 0.0  ;;  %v18304_v48 = vld [vmem:[#allocation8 + $0x99c] ss:$24 sps:$4 sm:$0xff]  }
 0x2bc   :  { %v3391_v28 = vsel %vm3321_vm12, %v3297_v38, %v3367_v53  ;;  %v3397_v59 = vsel %vm3327_vm14, %v21213_v52, %v3373_v51  ;;  %vm3333_vm0 = vcmp.gt.f32.partialorder %v3309_v0, 0.0  ;;  %v3375_v33 = vmul.f32 %v21004_v8, %v3305_v26  ;;  %v18281_v52 = vld [vmem:[#allocation8 + $0x728] ss:$24 sps:$4 sm:$0xff]  }
 0x2bd   :  { %v21337_v10 = vpack.c.bf16 %v3395_v7, %v3391_v28  ;;  %v3393_v35 = vsel %vm3323_vm13, %v21239_v19, %v3369_v18  ;;  %v3403_v23 = vsel %vm3333_vm0, %v3309_v0, %v3379_v31  ;;  %vm3331_vm1 = vcmp.gt.f32.partialorder %v3307_v27, 0.0  ;;  %v18293_v31 = vld [vmem:[#allocation8 + $0x6c8] ss:$24 sps:$4 sm:$0xff]   ;;  %v18313_v18 = vld [vmem:[#allocation8 + $0x63c] ss:$24 sps:$4 sm:$0xff]  }
 0x2be   :  { %v21340_v62 = vpack.c.bf16 %v3397_v59, %v3393_v35  ;;  %v3399_v36 = vsel %vm3329_vm15, %v3305_v26, %v3375_v33  ;;  %vm3335_vm2 = vcmp.gt.f32.partialorder %v3311_v43, 0.0  ;;  %v3377_v38 = vmul.f32 %v21007_v21, %v3307_v27  ;;  %v18295_v26 = vld [vmem:[#allocation8 + $0x6cc] ss:$24 sps:$4 sm:$0xff]   ;;  %v18305_v53 = vld [vmem:[#allocation8 + $0x668] ss:$24 sps:$4 sm:$0xff]  }
 0x2bf   :  { %4847 = vmatprep.mubr.bf16.mxu0 %v21337_v10  ;;  %v21344_v51 = vpack.c.bf16 %v3399_v36, %v3395_v7  ;;  %v21346_v11 = vpack.c.bf16 %v3403_v23, %v3399_v36  ;;  %v3405_v4 = vsel %vm3335_vm2, %v3311_v43, %v3381_v29  ;;  %v3398_v19 = vsel %vm3328_vm6, %v21242_v9, %v21263_v50  ;;  %v18284_v50 = vld [vmem:[#allocation8 + $0xa28] ss:$24 sps:$4 sm:$0xff]   ;;  %v18323_v36 = vld [vmem:[#allocation8 + $0x8d8] ss:$24 sps:$4 sm:$0xff]  }
 0x2c0   :  { %4900 = vmatprep.mubr.bf16.mxu1 %v21340_v62  ;;  %4848 = vmatmul.mubr.bf16.vlgmr.msra.gmra.mxu0 %v21232_v44  ;;  %v3401_v42 = vsel %vm3331_vm1, %v3307_v27, %v3377_v38  ;;  %v3402_v0 = vsel %vm3332_vm7, %v3308_v20, %v3378_v47  ;;  %v21356_v58 = vpack.c.bf16 %v3398_v19, %v21221_v30  ;;  %vm3317_vm3 = vcmp.gt.f32.partialorder %v21152_v24, 0.0  ;;  %v18289_v30 = vld [vmem:[#allocation8 + $0x6fc] ss:$24 sps:$4 sm:$0xff]   ;;  %v18308_v7 = vld [vmem:[#allocation8 + $0x968] ss:$24 sps:$4 sm:$0xff]  }
 0x2c1   :  { %4901 = vmatmul.mubr.bf16.vlgmr.msra.gmra.mxu1 %v21235_v55  ;;  %4922 = vmatpush1.bf16.msra.mxu0 %v18275_v40  ;;  %v21360_v43 = vpack.c.bf16 %v3401_v42, %v3397_v59  ;;  %v21362_v56 = vpack.c.bf16 %v3405_v4, %v3401_v42  ;;  %v21364_v9 = vpack.c.bf16 %v3402_v0, %v3398_v19  ;;  %vm3319_vm4 = vcmp.gt.f32.partialorder %v21155_v2, 0.0  ;;  %v18316_v40 = vld [vmem:[#allocation8 + $0x93c] ss:$24 sps:$4 sm:$0xff]   ;;  %v18314_v59 = vld [vmem:[#allocation8 + $0x938] ss:$24 sps:$4 sm:$0xff]  }
 0x2c2   :  { %vm3338_vm5 = vcmp.gt.f32.partialorder %v21310_v3, 0.0  ;;  %4975 = vmatpush1.bf16.msra.mxu1 %v18278_v37  ;;  %4923 = vmatprep.subr.bf16.mxu0 %v18283_v16  ;;  %v3400_v20 = vsel %vm3330_vm8, %v21245_v5, %v21267_v1  ;;  %v3404_v32 = vsel %vm3334_vm9, %v21286_v63, %v3380_v41  ;;  %v3387_v39 = vsel %vm3317_vm3, %v21152_v24, %v21167_v6  ;;  %v18287_v5 = vld [vmem:[#allocation8 + $0x6f8] ss:$24 sps:$4 sm:$0xff]   ;;  %v18319_v37 = vld [vmem:[#allocation8 + $0x60c] ss:$24 sps:$4 sm:$0xff]  }
 0x2c3   :  { %4976 = vmatprep.subr.bf16.mxu1 %v18286_v57  ;;  %4857 = vmatprep.mubr.bf16.mxu0 %v21346_v11  ;;  %v21379_v34 = vpack.c.bf16 %v3400_v20, %v21223_v46  ;;  %v21381_v25 = vpack.c.bf16 %v3404_v32, %v3400_v20  ;;  %v21383_v15 = vpack.c.bf16 %v3391_v28, %v3387_v39  ;;  %vm3337_vm6 = vcmp.gt.f32.partialorder %v21324_v14, 0.0  ;;  %v18290_v1 = vld [vmem:[#allocation8 + $0x9f8] ss:$24 sps:$4 sm:$0xff]   ;;  %v18322_v16 = vld [vmem:[#allocation8 + $0x90c] ss:$24 sps:$4 sm:$0xff]  }
 0x2c4   :  { %4910 = vmatprep.mubr.bf16.mxu1 %v21362_v56  ;;  %v3389_v24 = vsel %vm3319_vm4, %v21155_v2, %v21171_v13  ;;  %v3383_v6 = vmul.f32 %v21004_v8, %v21324_v14  ;;  %v3385_v46 = vmul.f32 %v21007_v21, %v21327_v54  ;;  %v3406_v63 = vsel %vm3336_vm11, %v21307_v45, %v21317_v17  ;;  %v18298_v21 = vld [vmem:[#allocation8 + $0x9cc] ss:$24 sps:$4 sm:$0xff]   ;;  %v18299_v17 = vld [vmem:[#allocation8 + $0x698] ss:$24 sps:$4 sm:$0xff]   ;;  %v18317_v33 = vld [vmem:[#allocation8 + $0x608] ss:$24 sps:$4 sm:$0xff]  }
 0x2c5   :  { %4924 = vmatpush1.bf16.msra.mxu0 %v18281_v52  ;;  %v21399_v27 = vpack.c.bf16 %v3393_v35, %v3389_v24  ;;  %vm3339_vm7 = vcmp.gt.f32.partialorder %v21327_v54, 0.0  ;;  %v21402_v47 = vpack.c.bf16 %v3406_v63, %v3402_v0  ;;  %v3408_v8 = vsel %vm3338_vm5, %v21310_v3, %v21321_v61  ;;  %v18296_v3 = vld [vmem:[#allocation8 + $0x9c8] ss:$24 sps:$4 sm:$0xff]   ;;  %v18302_v61 = vld [vmem:[#allocation8 + $0x998] ss:$24 sps:$4 sm:$0xff]  }
 0x2c6   :  { %4977 = vmatpush1.bf16.msra.mxu1 %v18284_v50  ;;  %4925 = vmatprep.subr.bf16.mxu0 %v18289_v30  ;;  %v3407_v2 = vsel %vm3337_vm6, %v21324_v14, %v3383_v6  ;;  %v3409_v13 = vsel %vm3339_vm7, %v21327_v54, %v3385_v46  ;;  %v21412_v41 = vpack.c.bf16 %v3408_v8, %v3404_v32  ;;  %v18307_v14 = vld [vmem:[#allocation8 + $0x66c] ss:$24 sps:$4 sm:$0xff]   ;;  %v18311_v28 = vld [vmem:[#allocation8 + $0x638] ss:$24 sps:$4 sm:$0xff]   ;;  %v18320_v35 = vld [vmem:[#allocation8 + $0x908] ss:$24 sps:$4 sm:$0xff]  }
 0x2c7   :  { %4978 = vmatprep.subr.bf16.mxu1 %v18292_v22  ;;  %v21414_v45 = vpack.c.bf16 %v3407_v2, %v3403_v23  ;;  %v21416_v29 = vpack.c.bf16 %v3409_v13, %v3405_v4  ;;  %v18310_v54 = vld [vmem:[#allocation8 + $0x96c] ss:$24 sps:$4 sm:$0xff]   ;;  %v18325_v57 = vld [vmem:[#allocation8 + $0x8dc] ss:$24 sps:$4 sm:$0xff]   ;;  %v18326_v38 = vld [vmem:[#allocation8 + $0xbd8] ss:$24 sps:$4 sm:$0xff]  }
 0x2c8   :  { %4858 = vmatmul.mubr.bf16.gmra.mxu0 %v21364_v9  ;;  %v18328_v23 = vld [vmem:[#allocation8 + $0xbdc] ss:$24 sps:$4 sm:$0xff]   ;;  %v18331_v52 = vld [vmem:[#allocation8 + $0x8ac] ss:$24 sps:$4 sm:$0xff]   ;;  %v18329_v19 = vld [vmem:[#allocation8 + $0x8a8] ss:$24 sps:$4 sm:$0xff]  }
 0x2c9   :  { %4911 = vmatmul.mubr.bf16.gmra.mxu1 %v21381_v25  ;;  %4926 = vmatpush1.bf16.msra.mxu0 %v18287_v5  ;;  %v18334_v4 = vld [vmem:[#allocation8 + $0xbac] ss:$24 sps:$4 sm:$0xff]   ;;  %v18332_v42 = vld [vmem:[#allocation8 + $0xba8] ss:$24 sps:$4 sm:$0xff]   ;;  %v18337_v0 = vld [vmem:[#allocation8 + $0x87c] ss:$24 sps:$4 sm:$0xff]  }
 0x2ca   :  { %4979 = vmatpush1.bf16.msra.mxu1 %v18290_v1  ;;  %4953 = vmatprep.mubr.bf16.mxu0 %v21337_v10  ;;  %v18340_v50 = vld [vmem:[#allocation8 + $0xb7c] ss:$24 sps:$4 sm:$0xff]   ;;  %v18335_v30 = vld [vmem:[#allocation8 + $0x878] ss:$24 sps:$4 sm:$0xff]   ;;  %v18343_v32 = vld [vmem:[#allocation8 + $0x84c] ss:$24 sps:$4 sm:$0xff]  }
 0x2cb   :  { %5006 = vmatprep.mubr.bf16.mxu1 %v21340_v62  ;;  %4927 = vmatprep.subr.bf16.mxu0 %v18295_v26  ;;  %v18338_v20 = vld [vmem:[#allocation8 + $0xb78] ss:$24 sps:$4 sm:$0xff]   ;;  %v18346_v39 = vld [vmem:[#allocation8 + $0xb4c] ss:$24 sps:$4 sm:$0xff]   ;;  %v18341_v22 = vld [vmem:[#allocation8 + $0x848] ss:$24 sps:$4 sm:$0xff]  }
 0x2cc   :  { %4980 = vmatprep.subr.bf16.mxu1 %v18298_v21  ;;  %v18344_v5 = vld [vmem:[#allocation8 + $0xb48] ss:$24 sps:$4 sm:$0xff]   ;;  %v18349_v1 = vld [vmem:[#allocation8 + $0x81c] ss:$24 sps:$4 sm:$0xff]   ;;  %v18347_v6 = vld [vmem:[#allocation8 + $0x818] ss:$24 sps:$4 sm:$0xff]  }
 0x2cd   :  { %4928 = vmatpush1.bf16.msra.mxu0 %v18293_v31  ;;  %v18352_v24 = vld [vmem:[#allocation8 + $0xb1c] ss:$24 sps:$4 sm:$0xff]   ;;  %v18350_v46 = vld [vmem:[#allocation8 + $0xb18] ss:$24 sps:$4 sm:$0xff]   ;;  %v18355_v63 = vld [vmem:[#allocation8 + $0x7ec] ss:$24 sps:$4 sm:$0xff]  }
 0x2ce   :  { %4981 = vmatpush1.bf16.msra.mxu1 %v18296_v3  ;;  %4929 = vmatprep.subr.bf16.mxu0 %v18301_v49  ;;  %v18358_v26 = vld [vmem:[#allocation8 + $0xaec] ss:$24 sps:$4 sm:$0xff]   ;;  %v18353_v8 = vld [vmem:[#allocation8 + $0x7e8] ss:$24 sps:$4 sm:$0xff]   ;;  %v18361_v2 = vld [vmem:[#allocation8 + $0x7bc] ss:$24 sps:$4 sm:$0xff]  }
 0x2cf   :  { %4982 = vmatprep.subr.bf16.mxu1 %v18304_v48  ;;  %v18356_v21 = vld [vmem:[#allocation8 + $0xae8] ss:$24 sps:$4 sm:$0xff]   ;;  %v18364_v13 = vld [vmem:[#allocation8 + $0xabc] ss:$24 sps:$4 sm:$0xff]   ;;  %v18359_v31 = vld [vmem:[#allocation8 + $0x7b8] ss:$24 sps:$4 sm:$0xff]  }
 0x2d0   :  { %v18362_v3 = vld [vmem:[#allocation8 + $0xab8] ss:$24 sps:$4 sm:$0xff]   ;;  %v18367_v49 = vld [vmem:[#allocation8 + $0x78c] ss:$24 sps:$4 sm:$0xff]  }
 0x2d1   :  { %4930 = vmatpush1.bf16.msra.mxu0 %v18299_v17  ;;  %v18370_v48 = vld [vmem:[#allocation8 + $0xa8c] ss:$24 sps:$4 sm:$0xff]   ;;  %v18365_v17 = vld [vmem:[#allocation8 + $0x788] ss:$24 sps:$4 sm:$0xff]  }
 0x2d2   :  { %4983 = vmatpush1.bf16.msra.mxu1 %v18302_v61  ;;  %4931 = vmatprep.subr.bf16.mxu0 %v18307_v14  ;;  %v18368_v61 = vld [vmem:[#allocation8 + $0xa88] ss:$24 sps:$4 sm:$0xff]   ;;  %v18373_v14 = vld [vmem:[#allocation8 + $0x764] ss:$24 sps:$4 sm:$0xff]  }
 0x2d3   :  { %4984 = vmatprep.subr.bf16.mxu1 %v18310_v54  ;;  %v18376_v54 = vld [vmem:[#allocation8 + $0xa64] ss:$24 sps:$4 sm:$0xff]  }
 0x2d5   :  { %4932 = vmatpush1.bf16.msra.mxu0 %v18305_v53  ;;  %v18371_v53 = vld [vmem:[#allocation8 + $0x760] ss:$24 sps:$4 sm:$0xff]  }
 0x2d6   :  { %4985 = vmatpush1.bf16.msra.mxu1 %v18308_v7  ;;  %4933 = vmatprep.subr.bf16.mxu0 %v18313_v18  ;;  %v18374_v7 = vld [vmem:[#allocation8 + $0xa60] ss:$24 sps:$4 sm:$0xff]   ;;  %v18379_v18 = vld [vmem:[#allocation8 + $0x734] ss:$24 sps:$4 sm:$0xff]  }
 0x2d7   :  { %4986 = vmatprep.subr.bf16.mxu1 %v18316_v40  ;;  %v18382_v40 = vld [vmem:[#allocation8 + $0xa34] ss:$24 sps:$4 sm:$0xff]  }
 0x2d9   :  { %4934 = vmatpush1.bf16.msra.mxu0 %v18311_v28  ;;  %v18377_v28 = vld [vmem:[#allocation8 + $0x730] ss:$24 sps:$4 sm:$0xff]  }
 0x2da   :  { %4987 = vmatpush1.bf16.msra.mxu1 %v18314_v59  ;;  %4935 = vmatprep.subr.bf16.mxu0 %v18319_v37  ;;  %v18380_v59 = vld [vmem:[#allocation8 + $0xa30] ss:$24 sps:$4 sm:$0xff]   ;;  %v18385_v37 = vld [vmem:[#allocation8 + $0x704] ss:$24 sps:$4 sm:$0xff]  }
 0x2db   :  { %4988 = vmatprep.subr.bf16.mxu1 %v18322_v16  ;;  %v18388_v16 = vld [vmem:[#allocation8 + $0xa04] ss:$24 sps:$4 sm:$0xff]  }
 0x2dd   :  { %4936 = vmatpush1.bf16.msra.mxu0 %v18317_v33  ;;  %v18383_v33 = vld [vmem:[#allocation8 + $0x700] ss:$24 sps:$4 sm:$0xff]  }
 0x2de   :  { %4989 = vmatpush1.bf16.msra.mxu1 %v18320_v35  ;;  %4937 = vmatprep.subr.bf16.mxu0 %v18325_v57  ;;  %v18386_v35 = vld [vmem:[#allocation8 + $0xa00] ss:$24 sps:$4 sm:$0xff]   ;;  %v18391_v57 = vld [vmem:[#allocation8 + $0x6d4] ss:$24 sps:$4 sm:$0xff]  }
 0x2df   :  { %4990 = vmatprep.subr.bf16.mxu1 %v18328_v23  ;;  %v18394_v23 = vld [vmem:[#allocation8 + $0x9d4] ss:$24 sps:$4 sm:$0xff]  }
 0x2e1   :  { %4938 = vmatpush2.bf16.msra.mxu0 %v18323_v36  ;;  %v18389_v36 = vld [vmem:[#allocation8 + $0x6d0] ss:$24 sps:$4 sm:$0xff]  }
 0x2e2   :  { %4991 = vmatpush2.bf16.msra.mxu1 %v18326_v38  ;;  %4939 = vmatprep.subr.bf16.mxu0 %v18331_v52  ;;  %v18392_v38 = vld [vmem:[#allocation8 + $0x9d0] ss:$24 sps:$4 sm:$0xff]   ;;  %v18397_v52 = vld [vmem:[#allocation8 + $0x6a4] ss:$24 sps:$4 sm:$0xff]  }
 0x2e3   :  { %4992 = vmatprep.subr.bf16.mxu1 %v18334_v4  ;;  %v18400_v4 = vld [vmem:[#allocation8 + $0x9a4] ss:$24 sps:$4 sm:$0xff]  }
 0x2e5   :  { %4940 = vmatpush2.bf16.msra.mxu0 %v18329_v19  ;;  %v18395_v19 = vld [vmem:[#allocation8 + $0x6a0] ss:$24 sps:$4 sm:$0xff]  }
 0x2e6   :  { %4993 = vmatpush2.bf16.msra.mxu1 %v18332_v42  ;;  %4941 = vmatprep.subr.bf16.mxu0 %v18337_v0  ;;  %v18398_v42 = vld [vmem:[#allocation8 + $0x9a0] ss:$24 sps:$4 sm:$0xff]   ;;  %v18403_v0 = vld [vmem:[#allocation8 + $0x674] ss:$24 sps:$4 sm:$0xff]  }
 0x2e7   :  { %4994 = vmatprep.subr.bf16.mxu1 %v18340_v50  ;;  %v18406_v50 = vld [vmem:[#allocation8 + $0x974] ss:$24 sps:$4 sm:$0xff]  }
 0x2e9   :  { %4942 = vmatpush2.bf16.msra.mxu0 %v18335_v30  ;;  %v18401_v30 = vld [vmem:[#allocation8 + $0x670] ss:$24 sps:$4 sm:$0xff]  }
 0x2ea   :  { %4995 = vmatpush2.bf16.msra.mxu1 %v18338_v20  ;;  %4943 = vmatprep.subr.bf16.mxu0 %v18343_v32  ;;  %v18404_v20 = vld [vmem:[#allocation8 + $0x970] ss:$24 sps:$4 sm:$0xff]   ;;  %v18412_v32 = vld [vmem:[#allocation8 + $0x944] ss:$24 sps:$4 sm:$0xff]  }
 0x2eb   :  { %4996 = vmatprep.subr.bf16.mxu1 %v18346_v39  ;;  %v18410_v39 = vld [vmem:[#allocation8 + $0x940] ss:$24 sps:$4 sm:$0xff]  }
 0x2ed   :  { %4944 = vmatpush2.bf16.msra.mxu0 %v18341_v22  ;;  %v18415_v22 = vld [vmem:[#allocation8 + $0x614] ss:$24 sps:$4 sm:$0xff]  }
 0x2ee   :  { %4997 = vmatpush2.bf16.msra.mxu1 %v18344_v5  ;;  %4945 = vmatprep.subr.bf16.mxu0 %v18349_v1  ;;  %v18418_v5 = vld [vmem:[#allocation8 + $0x914] ss:$24 sps:$4 sm:$0xff]   ;;  %v18413_v1 = vld [vmem:[#allocation8 + $0x610] ss:$24 sps:$4 sm:$0xff]  }
 0x2ef   :  { %4998 = vmatprep.subr.bf16.mxu1 %v18352_v24  ;;  %v18416_v24 = vld [vmem:[#allocation8 + $0x910] ss:$24 sps:$4 sm:$0xff]  }
 0x2f1   :  { %4946 = vmatpush2.bf16.msra.mxu0 %v18347_v6  ;;  %v18421_v6 = vld [vmem:[#allocation8 + $0x8e4] ss:$24 sps:$4 sm:$0xff]  }
 0x2f2   :  { %4999 = vmatpush2.bf16.msra.mxu1 %v18350_v46  ;;  %4947 = vmatprep.subr.bf16.mxu0 %v18355_v63  ;;  %v18424_v46 = vld [vmem:[#allocation8 + $0xbe4] ss:$24 sps:$4 sm:$0xff]   ;;  %v18419_v63 = vld [vmem:[#allocation8 + $0x8e0] ss:$24 sps:$4 sm:$0xff]  }
 0x2f3   :  { %5000 = vmatprep.subr.bf16.mxu1 %v18358_v26  ;;  %v18422_v26 = vld [vmem:[#allocation8 + $0xbe0] ss:$24 sps:$4 sm:$0xff]  }
 0x2f5   :  { %4948 = vmatpush2.bf16.msra.mxu0 %v18353_v8  ;;  %v18427_v8 = vld [vmem:[#allocation8 + $0x8b4] ss:$24 sps:$4 sm:$0xff]  }
 0x2f6   :  { %5001 = vmatpush2.bf16.msra.mxu1 %v18356_v21  ;;  %4949 = vmatprep.subr.bf16.mxu0 %v18361_v2  ;;  %v18430_v21 = vld [vmem:[#allocation8 + $0xbb4] ss:$24 sps:$4 sm:$0xff]   ;;  %v18425_v2 = vld [vmem:[#allocation8 + $0x8b0] ss:$24 sps:$4 sm:$0xff]  }
 0x2f7   :  { %5002 = vmatprep.subr.bf16.mxu1 %v18364_v13  ;;  %v18428_v13 = vld [vmem:[#allocation8 + $0xbb0] ss:$24 sps:$4 sm:$0xff]  }
 0x2f9   :  { %4950 = vmatpush2.bf16.msra.mxu0 %v18359_v31  ;;  %v18433_v31 = vld [vmem:[#allocation8 + $0x884] ss:$24 sps:$4 sm:$0xff]  }
 0x2fa   :  { %5003 = vmatpush2.bf16.msra.mxu1 %v18362_v3  ;;  %4951 = vmatprep.subr.bf16.mxu0 %v18367_v49  ;;  %v18436_v3 = vld [vmem:[#allocation8 + $0xb84] ss:$24 sps:$4 sm:$0xff]   ;;  %v18431_v49 = vld [vmem:[#allocation8 + $0x880] ss:$24 sps:$4 sm:$0xff]  }
 0x2fb   :  { %5004 = vmatprep.subr.bf16.mxu1 %v18370_v48  ;;  %v18434_v48 = vld [vmem:[#allocation8 + $0xb80] ss:$24 sps:$4 sm:$0xff]  }
 0x2fd   :  { %4952 = vmatpush2.bf16.msra.mxu0 %v18365_v17  ;;  %v18439_v17 = vld [vmem:[#allocation8 + $0x854] ss:$24 sps:$4 sm:$0xff]  }
 0x2fe   :  { %5005 = vmatpush2.bf16.msra.mxu1 %v18368_v61  ;;  %5027 = vmatprep.subr.bf16.mxu0 %v18373_v14  ;;  %v18442_v61 = vld [vmem:[#allocation8 + $0xb54] ss:$24 sps:$4 sm:$0xff]   ;;  %v18437_v14 = vld [vmem:[#allocation8 + $0x850] ss:$24 sps:$4 sm:$0xff]  }
 0x2ff   :  { %5080 = vmatprep.subr.bf16.mxu1 %v18376_v54  ;;  %v18440_v54 = vld [vmem:[#allocation8 + $0xb50] ss:$24 sps:$4 sm:$0xff]  }
 0x300   :  { %4954 = vmatmul.mubr.bf16.vlgmr.msra.gmra.mxu0 %v21232_v44 }
 0x301   :  { %5007 = vmatmul.mubr.bf16.vlgmr.msra.gmra.mxu1 %v21235_v55  ;;  %4963 = vmatprep.mubr.bf16.mxu0 %v21346_v11 }
 0x302   :  { %5016 = vmatprep.mubr.bf16.mxu1 %v21362_v56  ;;  %5028 = vmatpush1.bf16.msra.mxu0 %v18371_v53  ;;  %v18445_v53 = vld [vmem:[#allocation8 + $0x824] ss:$24 sps:$4 sm:$0xff]  }
 0x303   :  { %5081 = vmatpush1.bf16.msra.mxu1 %v18374_v7  ;;  %5029 = vmatprep.subr.bf16.mxu0 %v18379_v18  ;;  %v18448_v7 = vld [vmem:[#allocation8 + $0xb24] ss:$24 sps:$4 sm:$0xff]   ;;  %v18443_v18 = vld [vmem:[#allocation8 + $0x820] ss:$24 sps:$4 sm:$0xff]  }
 0x304   :  { %5082 = vmatprep.subr.bf16.mxu1 %v18382_v40  ;;  %v18446_v40 = vld [vmem:[#allocation8 + $0xb20] ss:$24 sps:$4 sm:$0xff]  }
 0x306   :  { %5030 = vmatpush1.bf16.msra.mxu0 %v18377_v28  ;;  %v18451_v28 = vld [vmem:[#allocation8 + $0x7f4] ss:$24 sps:$4 sm:$0xff]  }
 0x307   :  { %5083 = vmatpush1.bf16.msra.mxu1 %v18380_v59  ;;  %5031 = vmatprep.subr.bf16.mxu0 %v18385_v37  ;;  %v18454_v59 = vld [vmem:[#allocation8 + $0xaf4] ss:$24 sps:$4 sm:$0xff]   ;;  %v18449_v37 = vld [vmem:[#allocation8 + $0x7f0] ss:$24 sps:$4 sm:$0xff]  }
 0x308   :  { %4964 = vmatmul.mubr.bf16.gmra.mxu0 %v21364_v9  ;;  %5084 = vmatprep.subr.bf16.mxu1 %v18388_v16  ;;  %v18452_v16 = vld [vmem:[#allocation8 + $0xaf0] ss:$24 sps:$4 sm:$0xff]  }
 0x309   :  { %5017 = vmatmul.mubr.bf16.gmra.mxu1 %v21381_v25  ;;  %5059 = vmatprep.mubr.bf16.mxu0 %v21337_v10  ;;  %v18409_v10 = vld [vmem:[#allocation8 + $0x644] ss:$24 sps:$4 sm:$0xff]  }
 0x30a   :  { %5032 = vmatpush1.bf16.msra.mxu0 %v18383_v33  ;;  %5112 = vmatprep.mubr.bf16.mxu1 %v21340_v62  ;;  %v18407_v62 = vld [vmem:[#allocation8 + $0x640] ss:$24 sps:$4 sm:$0xff]   ;;  %v18457_v33 = vld [vmem:[#allocation8 + $0x7c4] ss:$24 sps:$4 sm:$0xff]  }
 0x30b   :  { %5085 = vmatpush1.bf16.msra.mxu1 %v18386_v35  ;;  %5033 = vmatprep.subr.bf16.mxu0 %v18391_v57  ;;  %v18460_v35 = vld [vmem:[#allocation8 + $0xac4] ss:$24 sps:$4 sm:$0xff]   ;;  %v18455_v57 = vld [vmem:[#allocation8 + $0x7c0] ss:$24 sps:$4 sm:$0xff]  }
 0x30c   :  { %5086 = vmatprep.subr.bf16.mxu1 %v18394_v23  ;;  %v18458_v23 = vld [vmem:[#allocation8 + $0xac0] ss:$24 sps:$4 sm:$0xff]  }
 0x30e   :  { %5034 = vmatpush1.bf16.msra.mxu0 %v18389_v36  ;;  %v18463_v36 = vld [vmem:[#allocation8 + $0x794] ss:$24 sps:$4 sm:$0xff]  }
 0x30f   :  { %5087 = vmatpush1.bf16.msra.mxu1 %v18392_v38  ;;  %5035 = vmatprep.subr.bf16.mxu0 %v18397_v52  ;;  %v18466_v38 = vld [vmem:[#allocation8 + $0xa94] ss:$24 sps:$4 sm:$0xff]   ;;  %v18461_v52 = vld [vmem:[#allocation8 + $0x790] ss:$24 sps:$4 sm:$0xff]  }
 0x310   :  { %5088 = vmatprep.subr.bf16.mxu1 %v18400_v4  ;;  %v18464_v4 = vld [vmem:[#allocation8 + $0xa90] ss:$24 sps:$4 sm:$0xff]  }
 0x312   :  { %5036 = vmatpush1.bf16.msra.mxu0 %v18395_v19  ;;  %v18469_v19 = vld [vmem:[#allocation8 + $0x154] ss:$24 sps:$4 sm:$0xff]  }
 0x313   :  { %5089 = vmatpush1.bf16.msra.mxu1 %v18398_v42  ;;  %5037 = vmatprep.subr.bf16.mxu0 %v18403_v0  ;;  %v18472_v42 = vld [vmem:[#allocation8 + $0x454] ss:$24 sps:$4 sm:$0xff]   ;;  %v18467_v0 = vld [vmem:[#allocation8 + $0x150] ss:$24 sps:$4 sm:$0xff]  }
 0x314   :  { %5090 = vmatprep.subr.bf16.mxu1 %v18406_v50  ;;  %v18470_v50 = vld [vmem:[#allocation8 + $0x450] ss:$24 sps:$4 sm:$0xff]  }
 0x316   :  { %5038 = vmatpush1.bf16.msra.mxu0 %v18401_v30  ;;  %v18475_v30 = vld [vmem:[#allocation8 + $0x124] ss:$24 sps:$4 sm:$0xff]  }
 0x317   :  { %5091 = vmatpush1.bf16.msra.mxu1 %v18404_v20  ;;  %5039 = vmatprep.subr.bf16.mxu0 %v18409_v10  ;;  %v18478_v20 = vld [vmem:[#allocation8 + $0x424] ss:$24 sps:$4 sm:$0xff]   ;;  %v18473_v10 = vld [vmem:[#allocation8 + $0x120] ss:$24 sps:$4 sm:$0xff]  }
 0x318   :  { %5092 = vmatprep.subr.bf16.mxu1 %v18412_v32  ;;  %v18476_v32 = vld [vmem:[#allocation8 + $0x420] ss:$24 sps:$4 sm:$0xff]  }
 0x31a   :  { %5040 = vmatpush1.bf16.msra.mxu0 %v18407_v62  ;;  %v18481_v62 = vld [vmem:[#allocation8 + $0xf4] ss:$24 sps:$4 sm:$0xff]  }
 0x31b   :  { %5093 = vmatpush1.bf16.msra.mxu1 %v18410_v39  ;;  %5041 = vmatprep.subr.bf16.mxu0 %v18415_v22  ;;  %v18484_v39 = vld [vmem:[#allocation8 + $0x3f4] ss:$24 sps:$4 sm:$0xff]   ;;  %v18479_v22 = vld [vmem:[#allocation8 + $0xf0] ss:$24 sps:$4 sm:$0xff]  }
 0x31c   :  { %5094 = vmatprep.subr.bf16.mxu1 %v18418_v5  ;;  %v18482_v5 = vld [vmem:[#allocation8 + $0x3f0] ss:$24 sps:$4 sm:$0xff]  }
 0x31e   :  { %5042 = vmatpush1.bf16.msra.mxu0 %v18413_v1  ;;  %v18487_v1 = vld [vmem:[#allocation8 + $0xc4] ss:$24 sps:$4 sm:$0xff]  }
 0x31f   :  { %5095 = vmatpush1.bf16.msra.mxu1 %v18416_v24  ;;  %5043 = vmatprep.subr.bf16.mxu0 %v18421_v6  ;;  %v18490_v24 = vld [vmem:[#allocation8 + $0x3c4] ss:$24 sps:$4 sm:$0xff]   ;;  %v18491_v6 = vld [vmem:[#allocation8 + $0x90] ss:$24 sps:$4 sm:$0xff]  }
 0x320   :  { %5096 = vmatprep.subr.bf16.mxu1 %v18424_v46  ;;  %v18494_v46 = vld [vmem:[#allocation8 + $0x390] ss:$24 sps:$4 sm:$0xff]  }
 0x322   :  { %5044 = vmatpush2.bf16.msra.mxu0 %v18419_v63  ;;  %v18499_v63 = vld [vmem:[#allocation8 + $0x64] ss:$24 sps:$4 sm:$0xff]  }
 0x323   :  { %5097 = vmatpush2.bf16.msra.mxu1 %v18422_v26  ;;  %5045 = vmatprep.subr.bf16.mxu0 %v18427_v8  ;;  %v18500_v26 = vld [vmem:[#allocation8 + $0x360] ss:$24 sps:$4 sm:$0xff]   ;;  %v18505_v8 = vld [vmem:[#allocation8 + $0x34] ss:$24 sps:$4 sm:$0xff]  }
 0x324   :  { %5098 = vmatprep.subr.bf16.mxu1 %v18430_v21  ;;  %v18508_v21 = vld [vmem:[#allocation8 + $0x334] ss:$24 sps:$4 sm:$0xff]  }
 0x326   :  { %5046 = vmatpush2.bf16.msra.mxu0 %v18425_v2  ;;  %v18503_v2 = vld [vmem:[#allocation8 + $0x30] ss:$24 sps:$4 sm:$0xff]  }
 0x327   :  { %5099 = vmatpush2.bf16.msra.mxu1 %v18428_v13  ;;  %5047 = vmatprep.subr.bf16.mxu0 %v18433_v31  ;;  %v18506_v13 = vld [vmem:[#allocation8 + $0x330] ss:$24 sps:$4 sm:$0xff]   ;;  %v18511_v31 = vld [vmem:[#allocation8 + $0x4] ss:$24 sps:$4 sm:$0xff]  }
 0x328   :  { %5100 = vmatprep.subr.bf16.mxu1 %v18436_v3  ;;  %v18514_v3 = vld [vmem:[#allocation8 + $0x304] ss:$24 sps:$4 sm:$0xff]  }
 0x32a   :  { %5048 = vmatpush2.bf16.msra.mxu0 %v18431_v49  ;;  %v18509_v49 = vld [vmem:[#allocation8] ss:$24 sps:$4 sm:$0xff]  }
 0x32b   :  { %5101 = vmatpush2.bf16.msra.mxu1 %v18434_v48  ;;  %5049 = vmatprep.subr.bf16.mxu0 %v18439_v17  ;;  %v18512_v48 = vld [vmem:[#allocation8 + $0x300] ss:$24 sps:$4 sm:$0xff]   ;;  %v18517_v17 = vld [vmem:[#allocation8 + $0x2d4] ss:$24 sps:$4 sm:$0xff]  }
 0x32c   :  { %5102 = vmatprep.subr.bf16.mxu1 %v18442_v61  ;;  %v18520_v61 = vld [vmem:[#allocation8 + $0x5d4] ss:$24 sps:$4 sm:$0xff]  }
 0x32e   :  { %5050 = vmatpush2.bf16.msra.mxu0 %v18437_v14  ;;  %v18515_v14 = vld [vmem:[#allocation8 + $0x2d0] ss:$24 sps:$4 sm:$0xff]  }
 0x32f   :  { %5103 = vmatpush2.bf16.msra.mxu1 %v18440_v54  ;;  %5051 = vmatprep.subr.bf16.mxu0 %v18445_v53  ;;  %v18518_v54 = vld [vmem:[#allocation8 + $0x5d0] ss:$24 sps:$4 sm:$0xff]   ;;  %v18523_v53 = vld [vmem:[#allocation8 + $0x2a4] ss:$24 sps:$4 sm:$0xff]  }
 0x330   :  { %5104 = vmatprep.subr.bf16.mxu1 %v18448_v7  ;;  %v18526_v7 = vld [vmem:[#allocation8 + $0x5a4] ss:$24 sps:$4 sm:$0xff]  }
 0x332   :  { %5052 = vmatpush2.bf16.msra.mxu0 %v18443_v18  ;;  %v18521_v18 = vld [vmem:[#allocation8 + $0x2a0] ss:$24 sps:$4 sm:$0xff]  }
 0x333   :  { %5105 = vmatpush2.bf16.msra.mxu1 %v18446_v40  ;;  %5053 = vmatprep.subr.bf16.mxu0 %v18451_v28  ;;  %v18524_v40 = vld [vmem:[#allocation8 + $0x5a0] ss:$24 sps:$4 sm:$0xff]   ;;  %v18529_v28 = vld [vmem:[#allocation8 + $0x274] ss:$24 sps:$4 sm:$0xff]  }
 0x334   :  { %5106 = vmatprep.subr.bf16.mxu1 %v18454_v59  ;;  %v18532_v59 = vld [vmem:[#allocation8 + $0x574] ss:$24 sps:$4 sm:$0xff]  }
 0x336   :  { %5054 = vmatpush2.bf16.msra.mxu0 %v18449_v37  ;;  %v18527_v37 = vld [vmem:[#allocation8 + $0x270] ss:$24 sps:$4 sm:$0xff]  }
 0x337   :  { %5107 = vmatpush2.bf16.msra.mxu1 %v18452_v16  ;;  %5055 = vmatprep.subr.bf16.mxu0 %v18457_v33  ;;  %v18530_v16 = vld [vmem:[#allocation8 + $0x570] ss:$24 sps:$4 sm:$0xff]   ;;  %v18535_v33 = vld [vmem:[#allocation8 + $0x244] ss:$24 sps:$4 sm:$0xff]  }
 0x338   :  { %5108 = vmatprep.subr.bf16.mxu1 %v18460_v35  ;;  %v18538_v35 = vld [vmem:[#allocation8 + $0x544] ss:$24 sps:$4 sm:$0xff]  }
 0x33a   :  { %5056 = vmatpush2.bf16.msra.mxu0 %v18455_v57  ;;  %v18533_v57 = vld [vmem:[#allocation8 + $0x240] ss:$24 sps:$4 sm:$0xff]  }
 0x33b   :  { %5109 = vmatpush2.bf16.msra.mxu1 %v18458_v23  ;;  %5057 = vmatprep.subr.bf16.mxu0 %v18463_v36  ;;  %v18536_v23 = vld [vmem:[#allocation8 + $0x540] ss:$24 sps:$4 sm:$0xff]   ;;  %v18541_v36 = vld [vmem:[#allocation8 + $0x214] ss:$24 sps:$4 sm:$0xff]  }
 0x33c   :  { %5110 = vmatprep.subr.bf16.mxu1 %v18466_v38  ;;  %v18544_v38 = vld [vmem:[#allocation8 + $0x514] ss:$24 sps:$4 sm:$0xff]  }
 0x33e   :  { %5058 = vmatpush2.bf16.msra.mxu0 %v18461_v52  ;;  %v18539_v52 = vld [vmem:[#allocation8 + $0x210] ss:$24 sps:$4 sm:$0xff]  }
 0x33f   :  { %5111 = vmatpush2.bf16.msra.mxu1 %v18464_v4  ;;  %6093 = vmatprep.subr.bf16.mxu0 %v18469_v19  ;;  %v18542_v4 = vld [vmem:[#allocation8 + $0x510] ss:$24 sps:$4 sm:$0xff]   ;;  %v18547_v19 = vld [vmem:[#allocation8 + $0x1e4] ss:$24 sps:$4 sm:$0xff]  }
 0x340   :  { %6146 = vmatprep.subr.bf16.mxu1 %v18472_v42  ;;  %v18550_v42 = vld [vmem:[#allocation8 + $0x4e4] ss:$24 sps:$4 sm:$0xff]  }
 0x341   :  { %5060 = vmatmul.mubr.bf16.vlgmr.msra.gmra.mxu0 %v21232_v44  ;;  %v18485_v44 = vld [vmem:[#allocation8 + $0xc0] ss:$24 sps:$4 sm:$0xff]  }
 0x342   :  { %5113 = vmatmul.mubr.bf16.vlgmr.msra.gmra.mxu1 %v21235_v55  ;;  %5069 = vmatprep.mubr.bf16.mxu0 %v21346_v11  ;;  %v18488_v55 = vld [vmem:[#allocation8 + $0x3c0] ss:$24 sps:$4 sm:$0xff]   ;;  %v18493_v11 = vld [vmem:[#allocation8 + $0x94] ss:$24 sps:$4 sm:$0xff]  }
 0x343   :  { %5122 = vmatprep.mubr.bf16.mxu1 %v21362_v56  ;;  %6094 = vmatpush1.bf16.msra.mxu0 %v18467_v0  ;;  %v18496_v56 = vld [vmem:[#allocation8 + $0x394] ss:$24 sps:$4 sm:$0xff]   ;;  %v18545_v0 = vld [vmem:[#allocation8 + $0x1e0] ss:$24 sps:$4 sm:$0xff]  }
 0x344   :  { %6147 = vmatpush1.bf16.msra.mxu1 %v18470_v50  ;;  %6095 = vmatprep.subr.bf16.mxu0 %v18475_v30  ;;  %v18548_v50 = vld [vmem:[#allocation8 + $0x4e0] ss:$24 sps:$4 sm:$0xff]   ;;  %v18553_v30 = vld [vmem:[#allocation8 + $0x1b4] ss:$24 sps:$4 sm:$0xff]  }
 0x345   :  { %6148 = vmatprep.subr.bf16.mxu1 %v18478_v20  ;;  %v18556_v20 = vld [vmem:[#allocation8 + $0x4b4] ss:$24 sps:$4 sm:$0xff]  }
 0x347   :  { %6096 = vmatpush1.bf16.msra.mxu0 %v18473_v10  ;;  %v18551_v10 = vld [vmem:[#allocation8 + $0x1b0] ss:$24 sps:$4 sm:$0xff]  }
 0x348   :  { %6149 = vmatpush1.bf16.msra.mxu1 %v18476_v32  ;;  %6097 = vmatprep.subr.bf16.mxu0 %v18481_v62  ;;  %v18554_v32 = vld [vmem:[#allocation8 + $0x4b0] ss:$24 sps:$4 sm:$0xff]   ;;  %v18559_v62 = vld [vmem:[#allocation8 + $0x184] ss:$24 sps:$4 sm:$0xff]  }
 0x349   :  { %5070 = vmatmul.mubr.bf16.gmra.mxu0 %v21364_v9  ;;  %6150 = vmatprep.subr.bf16.mxu1 %v18484_v39  ;;  %v18502_v9 = vld [vmem:[#allocation8 + $0x364] ss:$24 sps:$4 sm:$0xff]  }
 0x34a   :  { %5123 = vmatmul.mubr.bf16.gmra.mxu1 %v21381_v25  ;;  %6125 = vmatprep.mubr.bf16.mxu0 %v21383_v15  ;;  %v18497_v25 = vld [vmem:[#allocation8 + $0x60] ss:$24 sps:$4 sm:$0xff]   ;;  %v18562_v39 = vld [vmem:[#allocation8 + $0x484] ss:$24 sps:$4 sm:$0xff]  }
 0x34b   :  { %6098 = vmatpush1.bf16.msra.mxu0 %v18479_v22  ;;  %6178 = vmatprep.mubr.bf16.mxu1 %v21399_v27  ;;  %v18557_v22 = vld [vmem:[#allocation8 + $0x180] ss:$24 sps:$4 sm:$0xff]  }
 0x34c   :  { %6151 = vmatpush1.bf16.msra.mxu1 %v18482_v5  ;;  %6099 = vmatprep.subr.bf16.mxu0 %v18487_v1  ;;  %v18560_v5 = vld [vmem:[#allocation8 + $0x480] ss:$24 sps:$4 sm:$0xff]   ;;  %v18565_v1 = vld [vmem:[#allocation8 + $0x15c] ss:$24 sps:$4 sm:$0xff]  }
 0x34d   :  { %6152 = vmatprep.subr.bf16.mxu1 %v18490_v24  ;;  %v18568_v24 = vld [vmem:[#allocation8 + $0x45c] ss:$24 sps:$4 sm:$0xff]  }
 0x34f   :  { %6100 = vmatpush1.bf16.msra.mxu0 %v18485_v44  ;;  %v18563_v44 = vld [vmem:[#allocation8 + $0x158] ss:$24 sps:$4 sm:$0xff]  }
 0x350   :  { %6153 = vmatpush1.bf16.msra.mxu1 %v18488_v55  ;;  %6101 = vmatprep.subr.bf16.mxu0 %v18493_v11  ;;  %v18566_v11 = vld [vmem:[#allocation8 + $0x458] ss:$24 sps:$4 sm:$0xff]  }
 0x351   :  { %6154 = vmatprep.subr.bf16.mxu1 %v18496_v56 }
 0x353   :  { %6102 = vmatpush1.bf16.msra.mxu0 %v18491_v6  ;;  %v18571_v6 = vld [vmem:[#allocation8 + $0x12c] ss:$24 sps:$4 sm:$0xff]  }
 0x354   :  { %6155 = vmatpush1.bf16.msra.mxu1 %v18494_v46  ;;  %6103 = vmatprep.subr.bf16.mxu0 %v18499_v63 }
 0x355   :  { %6156 = vmatprep.subr.bf16.mxu1 %v18502_v9  ;;  %v18574_v9 = vld [vmem:[#allocation8 + $0x42c] ss:$24 sps:$4 sm:$0xff]  }
 0x357   :  { %6104 = vmatpush1.bf16.msra.mxu0 %v18497_v25 }
 0x358   :  { %6157 = vmatpush1.bf16.msra.mxu1 %v18500_v26  ;;  %6105 = vmatprep.subr.bf16.mxu0 %v18505_v8  ;;  %v18569_v8 = vld [vmem:[#allocation8 + $0x128] ss:$24 sps:$4 sm:$0xff]  }
 0x359   :  { %6158 = vmatprep.subr.bf16.mxu1 %v18508_v21 }
 0x35b   :  { %6106 = vmatpush1.bf16.msra.mxu0 %v18503_v2  ;;  %v18572_v2 = vld [vmem:[#allocation8 + $0x428] ss:$24 sps:$4 sm:$0xff]  }
 0x35c   :  { %6159 = vmatpush1.bf16.msra.mxu1 %v18506_v13  ;;  %6107 = vmatprep.subr.bf16.mxu0 %v18511_v31  ;;  %v18577_v31 = vld [vmem:[#allocation8 + $0xfc] ss:$24 sps:$4 sm:$0xff]  }
 0x35d   :  { %6160 = vmatprep.subr.bf16.mxu1 %v18514_v3 }
 0x35f   :  { %6108 = vmatpush1.bf16.msra.mxu0 %v18509_v49 }
 0x360   :  { %6161 = vmatpush1.bf16.msra.mxu1 %v18512_v48  ;;  %6109 = vmatprep.subr.bf16.mxu0 %v18517_v17  ;;  %v18580_v48 = vld [vmem:[#allocation8 + $0x3fc] ss:$24 sps:$4 sm:$0xff]  }
 0x361   :  { %6162 = vmatprep.subr.bf16.mxu1 %v18520_v61  ;;  %v18575_v61 = vld [vmem:[#allocation8 + $0xf8] ss:$24 sps:$4 sm:$0xff]  }
 0x363   :  { %6110 = vmatpush2.bf16.msra.mxu0 %v18515_v14 }
 0x364   :  { %6163 = vmatpush2.bf16.msra.mxu1 %v18518_v54  ;;  %6111 = vmatprep.subr.bf16.mxu0 %v18523_v53  ;;  %v18578_v54 = vld [vmem:[#allocation8 + $0x3f8] ss:$24 sps:$4 sm:$0xff]  }
 0x365   :  { %6164 = vmatprep.subr.bf16.mxu1 %v18526_v7  ;;  %v18583_v7 = vld [vmem:[#allocation8 + $0xcc] ss:$24 sps:$4 sm:$0xff]  }
 0x367   :  { %6112 = vmatpush2.bf16.msra.mxu0 %v18521_v18 }
 0x368   :  { %6165 = vmatpush2.bf16.msra.mxu1 %v18524_v40  ;;  %6113 = vmatprep.subr.bf16.mxu0 %v18529_v28  ;;  %v18586_v28 = vld [vmem:[#allocation8 + $0x3cc] ss:$24 sps:$4 sm:$0xff]  }
 0x369   :  { %6166 = vmatprep.subr.bf16.mxu1 %v18532_v59 }
 0x36b   :  { %6114 = vmatpush2.bf16.msra.mxu0 %v18527_v37 }
 0x36c   :  { %6167 = vmatpush2.bf16.msra.mxu1 %v18530_v16  ;;  %6115 = vmatprep.subr.bf16.mxu0 %v18535_v33  ;;  %v18581_v16 = vld [vmem:[#allocation8 + $0xc8] ss:$24 sps:$4 sm:$0xff]  }
 0x36d   :  { %6168 = vmatprep.subr.bf16.mxu1 %v18538_v35  ;;  %v18584_v35 = vld [vmem:[#allocation8 + $0x3c8] ss:$24 sps:$4 sm:$0xff]  }
 0x36f   :  { %6116 = vmatpush2.bf16.msra.mxu0 %v18533_v57 }
 0x370   :  { %6169 = vmatpush2.bf16.msra.mxu1 %v18536_v23  ;;  %6117 = vmatprep.subr.bf16.mxu0 %v18541_v36  ;;  %v18589_v23 = vld [vmem:[#allocation8 + $0x9c] ss:$24 sps:$4 sm:$0xff]  }
 0x371   :  { %6170 = vmatprep.subr.bf16.mxu1 %v18544_v38  ;;  %v18592_v38 = vld [vmem:[#allocation8 + $0x39c] ss:$24 sps:$4 sm:$0xff]  }
 0x373   :  { %6118 = vmatpush2.bf16.msra.mxu0 %v18539_v52  ;;  %v18587_v52 = vld [vmem:[#allocation8 + $0x98] ss:$24 sps:$4 sm:$0xff]  }
 0x374   :  { %6171 = vmatpush2.bf16.msra.mxu1 %v18542_v4  ;;  %6119 = vmatprep.subr.bf16.mxu0 %v18547_v19  ;;  %v18590_v4 = vld [vmem:[#allocation8 + $0x398] ss:$24 sps:$4 sm:$0xff]   ;;  %v18595_v19 = vld [vmem:[#allocation8 + $0x6c] ss:$24 sps:$4 sm:$0xff]  }
 0x375   :  { %6172 = vmatprep.subr.bf16.mxu1 %v18550_v42  ;;  %v18598_v42 = vld [vmem:[#allocation8 + $0x36c] ss:$24 sps:$4 sm:$0xff]  }
 0x377   :  { %6120 = vmatpush2.bf16.msra.mxu0 %v18545_v0  ;;  %v18593_v0 = vld [vmem:[#allocation8 + $0x68] ss:$24 sps:$4 sm:$0xff]  }
 0x378   :  { %6173 = vmatpush2.bf16.msra.mxu1 %v18548_v50  ;;  %6121 = vmatprep.subr.bf16.mxu0 %v18553_v30  ;;  %v18596_v50 = vld [vmem:[#allocation8 + $0x368] ss:$24 sps:$4 sm:$0xff]   ;;  %v18601_v30 = vld [vmem:[#allocation8 + $0x3c] ss:$24 sps:$4 sm:$0xff]  }
 0x379   :  { %6174 = vmatprep.subr.bf16.mxu1 %v18556_v20  ;;  %v18604_v20 = vld [vmem:[#allocation8 + $0x33c] ss:$24 sps:$4 sm:$0xff]  }
 0x37b   :  { %6122 = vmatpush2.bf16.msra.mxu0 %v18551_v10  ;;  %v18599_v10 = vld [vmem:[#allocation8 + $0x38] ss:$24 sps:$4 sm:$0xff]  }
 0x37c   :  { %6175 = vmatpush2.bf16.msra.mxu1 %v18554_v32  ;;  %6123 = vmatprep.subr.bf16.mxu0 %v18559_v62  ;;  %v18602_v32 = vld [vmem:[#allocation8 + $0x338] ss:$24 sps:$4 sm:$0xff]   ;;  %v18607_v62 = vld [vmem:[#allocation8 + $0xc] ss:$24 sps:$4 sm:$0xff]  }
 0x37d   :  { %6176 = vmatprep.subr.bf16.mxu1 %v18562_v39  ;;  %v18610_v39 = vld [vmem:[#allocation8 + $0x30c] ss:$24 sps:$4 sm:$0xff]  }
 0x37f   :  { %6124 = vmatpush2.bf16.msra.mxu0 %v18557_v22  ;;  %v18605_v22 = vld [vmem:[#allocation8 + $0x8] ss:$24 sps:$4 sm:$0xff]  }
 0x380   :  { %6177 = vmatpush2.bf16.msra.mxu1 %v18560_v5  ;;  %6199 = vmatprep.subr.bf16.mxu0 %v18565_v1  ;;  %v4849_v55 = vpop.f32.mrf.mxu0  ;;  %v18608_v5 = vld [vmem:[#allocation8 + $0x308] ss:$24 sps:$4 sm:$0xff]   ;;  %v18613_v1 = vld [vmem:[#allocation8 + $0x2dc] ss:$24 sps:$4 sm:$0xff]  }
 0x381   :  { %6252 = vmatprep.subr.bf16.mxu1 %v18568_v24  ;;  %v4902_v56 = vpop.f32.mrf.mxu1  ;;  %v18616_v24 = vld [vmem:[#allocation8 + $0x5dc] ss:$24 sps:$4 sm:$0xff]  }
 0x382   :  { %6126 = vmatmul.mubr.bf16.vlgmr.msra.gmra.mxu0 %v21193_v12  ;;  %v21439_v46 = vadd.f32 %v4902_v56, %v4849_v55  ;;  %v4851_v63 = vpop.f32.mrf.mxu0  ;;  %v18614_v55 = vld [vmem:[#allocation8 + $0x5d8] ss:$24 sps:$4 sm:$0xff]   ;;  %v18622_v56 = vld [vmem:[#allocation8 + $0x5ac] ss:$24 sps:$4 sm:$0xff]  }
 0x383   :  { %6179 = vmatmul.mubr.bf16.vlgmr.msra.gmra.mxu1 %v21195_v60  ;;  %6135 = vmatprep.mubr.bf16.mxu0 %v21344_v51  ;;  %v4904_v25 = vpop.f32.mrf.mxu1 }
 0x384   :  { %6188 = vmatprep.mubr.bf16.mxu1 %v21360_v43  ;;  %6200 = vmatpush1.bf16.msra.mxu0 %v18563_v44  ;;  %v21444_v26 = vadd.f32 %v4904_v25, %v4851_v63  ;;  %v4853_v21 = vpop.f32.mrf.mxu0  ;;  %v18611_v44 = vld [vmem:[#allocation8 + $0x2d8] ss:$24 sps:$4 sm:$0xff]   ;;  %v18620_v63 = vld [vmem:[#allocation8 + $0x5a8] ss:$24 sps:$4 sm:$0xff]   ;;  %v18628_v25 = vld [vmem:[#allocation8 + $0x57c] ss:$24 sps:$4 sm:$0xff]  }
 0x385   :  { %6253 = vmatpush1.bf16.msra.mxu1 %v18566_v11  ;;  %6201 = vmatprep.subr.bf16.mxu0 %v18571_v6  ;;  %v4906_v13 = vpop.f32.mrf.mxu1  ;;  %v18619_v11 = vld [vmem:[#allocation8 + $0x2ac] ss:$24 sps:$4 sm:$0xff]   ;;  %v18617_v6 = vld [vmem:[#allocation8 + $0x2a8] ss:$24 sps:$4 sm:$0xff]  }
 0x386   :  { %6254 = vmatprep.subr.bf16.mxu1 %v18574_v9  ;;  %v21446_v3 = vadd.f32 %v4906_v13, %v4853_v21  ;;  %v21448_v49 = vpop.f32.mrf.mxu0  ;;  %v18625_v9 = vld [vmem:[#allocation8 + $0x27c] ss:$24 sps:$4 sm:$0xff]   ;;  %v18626_v21 = vld [vmem:[#allocation8 + $0x578] ss:$24 sps:$4 sm:$0xff]   ;;  %v18634_v13 = vld [vmem:[#allocation8 + $0x54c] ss:$24 sps:$4 sm:$0xff]  }
 0x387   :  { %v21450_v17 = vpop.f32.mrf.mxu1 }
 0x388   :  { %6202 = vmatpush1.bf16.msra.mxu0 %v18569_v8  ;;  %v4859_v14 = vpop.f32.mrf.mxu0  ;;  %v18623_v8 = vld [vmem:[#allocation8 + $0x278] ss:$24 sps:$4 sm:$0xff]  }
 0x389   :  { %6255 = vmatpush1.bf16.msra.mxu1 %v18572_v2  ;;  %6203 = vmatprep.subr.bf16.mxu0 %v18577_v31  ;;  %v4912_v53 = vpop.f32.mrf.mxu1  ;;  %v18631_v2 = vld [vmem:[#allocation8 + $0x24c] ss:$24 sps:$4 sm:$0xff]   ;;  %v18629_v31 = vld [vmem:[#allocation8 + $0x248] ss:$24 sps:$4 sm:$0xff]  }
 0x38a   :  { %6136 = vmatmul.mubr.bf16.gmra.mxu0 %v21356_v58  ;;  %6256 = vmatprep.subr.bf16.mxu1 %v18580_v48  ;;  %v21453_v18 = vadd.f32 %v4912_v53, %v4859_v14  ;;  %v4861_v40 = vpop.f32.mrf.mxu0  ;;  %v18632_v48 = vld [vmem:[#allocation8 + $0x548] ss:$24 sps:$4 sm:$0xff]   ;;  %v18640_v14 = vld [vmem:[#allocation8 + $0x51c] ss:$24 sps:$4 sm:$0xff]   ;;  %v18638_v53 = vld [vmem:[#allocation8 + $0x518] ss:$24 sps:$4 sm:$0xff]  }
 0x38b   :  { %6189 = vmatmul.mubr.bf16.gmra.mxu1 %v21379_v34  ;;  %6231 = vmatprep.mubr.bf16.mxu0 %v21383_v15  ;;  %v4914_v59 = vpop.f32.mrf.mxu1 }
 0x38c   :  { %6204 = vmatpush1.bf16.msra.mxu0 %v18575_v61  ;;  %6284 = vmatprep.mubr.bf16.mxu1 %v21399_v27  ;;  %v21458_v37 = vadd.f32 %v4914_v59, %v4861_v40  ;;  %v4863_v33 = vpop.f32.mrf.mxu0  ;;  %v18637_v61 = vld [vmem:[#allocation8 + $0x21c] ss:$24 sps:$4 sm:$0xff]   ;;  %v18646_v40 = vld [vmem:[#allocation8 + $0x4ec] ss:$24 sps:$4 sm:$0xff]   ;;  %v18644_v59 = vld [vmem:[#allocation8 + $0x4e8] ss:$24 sps:$4 sm:$0xff]  }
 0x38d   :  { %6257 = vmatpush1.bf16.msra.mxu1 %v18578_v54  ;;  %6205 = vmatprep.subr.bf16.mxu0 %v18583_v7  ;;  %v4916_v57 = vpop.f32.mrf.mxu1  ;;  %v18635_v54 = vld [vmem:[#allocation8 + $0x218] ss:$24 sps:$4 sm:$0xff]   ;;  %v18643_v7 = vld [vmem:[#allocation8 + $0x1ec] ss:$24 sps:$4 sm:$0xff]  }
 0x38e   :  { %6258 = vmatprep.subr.bf16.mxu1 %v18586_v28  ;;  %v21460_v36 = vadd.f32 %v4916_v57, %v4863_v33  ;;  %v18641_v28 = vld [vmem:[#allocation8 + $0x1e8] ss:$24 sps:$4 sm:$0xff]   ;;  %v18652_v33 = vld [vmem:[#allocation8 + $0x4bc] ss:$24 sps:$4 sm:$0xff]   ;;  %v18650_v57 = vld [vmem:[#allocation8 + $0x4b8] ss:$24 sps:$4 sm:$0xff]  }
 0x390   :  { %6206 = vmatpush1.bf16.msra.mxu0 %v18581_v16  ;;  %v18649_v16 = vld [vmem:[#allocation8 + $0x1bc] ss:$24 sps:$4 sm:$0xff]  }
 0x391   :  { %6259 = vmatpush1.bf16.msra.mxu1 %v18584_v35  ;;  %6207 = vmatprep.subr.bf16.mxu0 %v18589_v23  ;;  %v18647_v35 = vld [vmem:[#allocation8 + $0x1b8] ss:$24 sps:$4 sm:$0xff]   ;;  %v18655_v23 = vld [vmem:[#allocation8 + $0x18c] ss:$24 sps:$4 sm:$0xff]  }
 0x392   :  { %6260 = vmatprep.subr.bf16.mxu1 %v18592_v38  ;;  %v18658_v38 = vld [vmem:[#allocation8 + $0x48c] ss:$24 sps:$4 sm:$0xff]  }
 0x394   :  { %6208 = vmatpush1.bf16.msra.mxu0 %v18587_v52  ;;  %v18653_v52 = vld [vmem:[#allocation8 + $0x188] ss:$24 sps:$4 sm:$0xff]  }
 0x395   :  { %6261 = vmatpush1.bf16.msra.mxu1 %v18590_v4  ;;  %6209 = vmatprep.subr.bf16.mxu0 %v18595_v19  ;;  %v18656_v4 = vld [vmem:[#allocation8 + $0x488] ss:$24 sps:$4 sm:$0xff]   ;;  %v18661_v19 = vld [vmem:[#allocation8 + $0x164] ss:$24 sps:$4 sm:$0xff]  }
 0x396   :  { %6262 = vmatprep.subr.bf16.mxu1 %v18598_v42  ;;  %v21462_v42 = vpop.f32.mrf.mxu0 }
 0x398   :  { %6210 = vmatpush1.bf16.msra.mxu0 %v18593_v0  ;;  %v18664_v0 = vld [vmem:[#allocation8 + $0x464] ss:$24 sps:$4 sm:$0xff]  }
 0x399   :  { %6263 = vmatpush1.bf16.msra.mxu1 %v18596_v50  ;;  %6211 = vmatprep.subr.bf16.mxu0 %v18601_v30  ;;  %v21464_v50 = vpop.f32.mrf.mxu1 }
 0x39a   :  { %6264 = vmatprep.subr.bf16.mxu1 %v18604_v20 }
 0x39c   :  { %6212 = vmatpush1.bf16.msra.mxu0 %v18599_v10  ;;  %v18659_v10 = vld [vmem:[#allocation8 + $0x160] ss:$24 sps:$4 sm:$0xff]  }
 0x39d   :  { %6265 = vmatpush1.bf16.msra.mxu1 %v18602_v32  ;;  %6213 = vmatprep.subr.bf16.mxu0 %v18607_v62  ;;  %v18662_v62 = vld [vmem:[#allocation8 + $0x460] ss:$24 sps:$4 sm:$0xff]  }
 0x39e   :  { %6266 = vmatprep.subr.bf16.mxu1 %v18610_v39 }
 0x3a0   :  { %6214 = vmatpush1.bf16.msra.mxu0 %v18605_v22  ;;  %v18667_v22 = vld [vmem:[#allocation8 + $0x134] ss:$24 sps:$4 sm:$0xff]  }
 0x3a1   :  { %6267 = vmatpush1.bf16.msra.mxu1 %v18608_v5  ;;  %6215 = vmatprep.subr.bf16.mxu0 %v18613_v1  ;;  %v18670_v1 = vld [vmem:[#allocation8 + $0x434] ss:$24 sps:$4 sm:$0xff]  }
 0x3a2   :  { %6268 = vmatprep.subr.bf16.mxu1 %v18616_v24 }
 0x3a4   :  { %6216 = vmatpush2.bf16.msra.mxu0 %v18611_v44 }
 0x3a5   :  { %6269 = vmatpush2.bf16.msra.mxu1 %v18614_v55  ;;  %6217 = vmatprep.subr.bf16.mxu0 %v18619_v11  ;;  %v18665_v11 = vld [vmem:[#allocation8 + $0x130] ss:$24 sps:$4 sm:$0xff]  }
 0x3a6   :  { %6270 = vmatprep.subr.bf16.mxu1 %v18622_v56 }
 0x3a8   :  { %6218 = vmatpush2.bf16.msra.mxu0 %v18617_v6  ;;  %v18668_v6 = vld [vmem:[#allocation8 + $0x430] ss:$24 sps:$4 sm:$0xff]  }
 0x3a9   :  { %6271 = vmatpush2.bf16.msra.mxu1 %v18620_v63  ;;  %6219 = vmatprep.subr.bf16.mxu0 %v18625_v9  ;;  %v18673_v9 = vld [vmem:[#allocation8 + $0x104] ss:$24 sps:$4 sm:$0xff]  }
 0x3aa   :  { %6272 = vmatprep.subr.bf16.mxu1 %v18628_v25 }
 0x3ac   :  { %6220 = vmatpush2.bf16.msra.mxu0 %v18623_v8  ;;  %v18676_v8 = vld [vmem:[#allocation8 + $0x404] ss:$24 sps:$4 sm:$0xff]  }
 0x3ad   :  { %6273 = vmatpush2.bf16.msra.mxu1 %v18626_v21  ;;  %6221 = vmatprep.subr.bf16.mxu0 %v18631_v2 }
 0x3ae   :  { %6274 = vmatprep.subr.bf16.mxu1 %v18634_v13  ;;  %v18671_v13 = vld [vmem:[#allocation8 + $0x100] ss:$24 sps:$4 sm:$0xff]  }
 0x3b0   :  { %6222 = vmatpush2.bf16.msra.mxu0 %v18629_v31 }
 0x3b1   :  { %6275 = vmatpush2.bf16.msra.mxu1 %v18632_v48  ;;  %6223 = vmatprep.subr.bf16.mxu0 %v18637_v61  ;;  %v18674_v48 = vld [vmem:[#allocation8 + $0x400] ss:$24 sps:$4 sm:$0xff]  }
 0x3b2   :  { %6276 = vmatprep.subr.bf16.mxu1 %v18640_v14  ;;  %v18679_v14 = vld [vmem:[#allocation8 + $0xd4] ss:$24 sps:$4 sm:$0xff]  }
 0x3b4   :  { %6224 = vmatpush2.bf16.msra.mxu0 %v18635_v54 }
 0x3b5   :  { %6277 = vmatpush2.bf16.msra.mxu1 %v18638_v53  ;;  %6225 = vmatprep.subr.bf16.mxu0 %v18643_v7  ;;  %v18682_v53 = vld [vmem:[#allocation8 + $0x3d4] ss:$24 sps:$4 sm:$0xff]  }
 0x3b6   :  { %6278 = vmatprep.subr.bf16.mxu1 %v18646_v40 }
 0x3b8   :  { %6226 = vmatpush2.bf16.msra.mxu0 %v18641_v28 }
 0x3b9   :  { %6279 = vmatpush2.bf16.msra.mxu1 %v18644_v59  ;;  %6227 = vmatprep.subr.bf16.mxu0 %v18649_v16  ;;  %v18677_v59 = vld [vmem:[#allocation8 + $0xd0] ss:$24 sps:$4 sm:$0xff]  }
 0x3ba   :  { %6280 = vmatprep.subr.bf16.mxu1 %v18652_v33  ;;  %v18680_v33 = vld [vmem:[#allocation8 + $0x3d0] ss:$24 sps:$4 sm:$0xff]  }
 0x3bc   :  { %6228 = vmatpush2.bf16.msra.mxu0 %v18647_v35  ;;  %v18685_v35 = vld [vmem:[#allocation8 + $0xa4] ss:$24 sps:$4 sm:$0xff]  }
 0x3bd   :  { %6281 = vmatpush2.bf16.msra.mxu1 %v18650_v57  ;;  %6229 = vmatprep.subr.bf16.mxu0 %v18655_v23  ;;  %v18688_v57 = vld [vmem:[#allocation8 + $0x3a4] ss:$24 sps:$4 sm:$0xff]   ;;  %v18683_v23 = vld [vmem:[#allocation8 + $0xa0] ss:$24 sps:$4 sm:$0xff]  }
 0x3be   :  { %6282 = vmatprep.subr.bf16.mxu1 %v18658_v38  ;;  %v18691_v38 = vld [vmem:[#allocation8 + $0x74] ss:$24 sps:$4 sm:$0xff]  }
 0x3c0   :  { %6230 = vmatpush2.bf16.msra.mxu0 %v18653_v52  ;;  %v4955_v30 = vpop.f32.mrf.mxu0  ;;  %v18694_v52 = vld [vmem:[#allocation8 + $0x374] ss:$24 sps:$4 sm:$0xff]  }
 0x3c1   :  { %6283 = vmatpush2.bf16.msra.mxu1 %v18656_v4  ;;  %v5008_v20 = vpop.f32.mrf.mxu1  ;;  %6305 = vmatprep.subr.bf16.mxu0 %v18661_v19  ;;  %v18692_v4 = vld [vmem:[#allocation8 + $0x370] ss:$24 sps:$4 sm:$0xff]   ;;  %v18697_v19 = vld [vmem:[#allocation8 + $0x44] ss:$24 sps:$4 sm:$0xff]  }
 0x3c2   :  { %v21466_v32 = vadd.f32 %v5008_v20, %v4955_v30  ;;  %6358 = vmatprep.subr.bf16.mxu1 %v18664_v0  ;;  %v4957_v39 = vpop.f32.mrf.mxu0  ;;  %v18700_v0 = vld [vmem:[#allocation8 + $0x344] ss:$24 sps:$4 sm:$0xff]   ;;  %v18695_v30 = vld [vmem:[#allocation8 + $0x40] ss:$24 sps:$4 sm:$0xff]  }
 0x3c3   :  { %6232 = vmatmul.mubr.bf16.vlgmr.msra.gmra.mxu0 %v21193_v12  ;;  %v5010_v5 = vpop.f32.mrf.mxu1  ;;  %v18698_v20 = vld [vmem:[#allocation8 + $0x340] ss:$24 sps:$4 sm:$0xff]  }
 0x3c4   :  { %6285 = vmatmul.mubr.bf16.vlgmr.msra.gmra.mxu1 %v21195_v60  ;;  %6241 = vmatprep.mubr.bf16.mxu0 %v21344_v51  ;;  %v21471_v24 = vadd.f32 %v5010_v5, %v4957_v39  ;;  %v4959_v44 = vpop.f32.mrf.mxu0  ;;  %v18701_v39 = vld [vmem:[#allocation8 + $0x10] ss:$24 sps:$4 sm:$0xff]   ;;  %v18709_v5 = vld [vmem:[#allocation8 + $0x2e4] ss:$24 sps:$4 sm:$0xff]  }
 0x3c5   :  { %6294 = vmatprep.mubr.bf16.mxu1 %v21360_v43  ;;  %6306 = vmatpush1.bf16.msra.mxu0 %v18659_v10  ;;  %v5012_v55 = vpop.f32.mrf.mxu1  ;;  %v18703_v10 = vld [vmem:[#allocation8 + $0x14] ss:$24 sps:$4 sm:$0xff]  }
 0x3c6   :  { %6359 = vmatpush1.bf16.msra.mxu1 %v18662_v62  ;;  %v21474_v56 = vadd.f32 %v5012_v55, %v4959_v44  ;;  %6307 = vmatprep.subr.bf16.mxu0 %v18667_v22  ;;  %v21476_v63 = vpop.f32.mrf.mxu0  ;;  %v18706_v62 = vld [vmem:[#allocation8 + $0x314] ss:$24 sps:$4 sm:$0xff]   ;;  %v18704_v22 = vld [vmem:[#allocation8 + $0x310] ss:$24 sps:$4 sm:$0xff]   ;;  %v18707_v44 = vld [vmem:[#allocation8 + $0x2e0] ss:$24 sps:$4 sm:$0xff]  }
 0x3c7   :  { %6360 = vmatprep.subr.bf16.mxu1 %v18670_v1  ;;  %v21478_v25 = vpop.f32.mrf.mxu1  ;;  %v18712_v1 = vld [vmem:[#allocation8 + $0x5e4] ss:$24 sps:$4 sm:$0xff]   ;;  %v18710_v55 = vld [vmem:[#allocation8 + $0x5e0] ss:$24 sps:$4 sm:$0xff]  }
 0x3c8   :  { %v4965_v21 = vpop.f32.mrf.mxu0 }
 0x3c9   :  { %6308 = vmatpush1.bf16.msra.mxu0 %v18665_v11  ;;  %v5018_v2 = vpop.f32.mrf.mxu1  ;;  %v18715_v11 = vld [vmem:[#allocation8 + $0x2b4] ss:$24 sps:$4 sm:$0xff]  }
 0x3ca   :  { %6361 = vmatpush1.bf16.msra.mxu1 %v18668_v6  ;;  %v21480_v31 = vadd.f32 %v5018_v2, %v4965_v21  ;;  %6309 = vmatprep.subr.bf16.mxu0 %v18673_v9  ;;  %v4967_v61 = vpop.f32.mrf.mxu0  ;;  %v18718_v6 = vld [vmem:[#allocation8 + $0x5b4] ss:$24 sps:$4 sm:$0xff]   ;;  %v18713_v9 = vld [vmem:[#allocation8 + $0x2b0] ss:$24 sps:$4 sm:$0xff]   ;;  %v18721_v21 = vld [vmem:[#allocation8 + $0x284] ss:$24 sps:$4 sm:$0xff]  }
 0x3cb   :  { %6242 = vmatmul.mubr.bf16.gmra.mxu0 %v21356_v58  ;;  %6362 = vmatprep.subr.bf16.mxu1 %v18676_v8  ;;  %v5020_v54 = vpop.f32.mrf.mxu1  ;;  %v18716_v8 = vld [vmem:[#allocation8 + $0x5b0] ss:$24 sps:$4 sm:$0xff]   ;;  %v18724_v2 = vld [vmem:[#allocation8 + $0x584] ss:$24 sps:$4 sm:$0xff]  }
 0x3cc   :  { %6295 = vmatmul.mubr.bf16.gmra.mxu1 %v21379_v34  ;;  %6337 = vmatprep.mubr.bf16.mxu0 %v21383_v15  ;;  %v21485_v7 = vadd.f32 %v5020_v54, %v4967_v61  ;;  %v4969_v40 = vpop.f32.mrf.mxu0  ;;  %v18686_v15 = vld [vmem:[#allocation8 + $0x3a0] ss:$24 sps:$4 sm:$0xff]   ;;  %v18727_v61 = vld [vmem:[#allocation8 + $0x254] ss:$24 sps:$4 sm:$0xff]   ;;  %v18725_v54 = vld [vmem:[#allocation8 + $0x250] ss:$24 sps:$4 sm:$0xff]  }
 0x3cd   :  { %6310 = vmatpush1.bf16.msra.mxu0 %v18671_v13  ;;  %6390 = vmatprep.mubr.bf16.mxu1 %v21399_v27  ;;  %v5022_v28 = vpop.f32.mrf.mxu1  ;;  %v18689_v27 = vld [vmem:[#allocation8 + $0x70] ss:$24 sps:$4 sm:$0xff]   ;;  %v18719_v13 = vld [vmem:[#allocation8 + $0x280] ss:$24 sps:$4 sm:$0xff]  }
 0x3ce   :  { %6363 = vmatpush1.bf16.msra.mxu1 %v18674_v48  ;;  %v21488_v16 = vadd.f32 %v5022_v28, %v4969_v40  ;;  %6311 = vmatprep.subr.bf16.mxu0 %v18679_v14  ;;  %v18722_v48 = vld [vmem:[#allocation8 + $0x580] ss:$24 sps:$4 sm:$0xff]   ;;  %v18730_v14 = vld [vmem:[#allocation8 + $0x554] ss:$24 sps:$4 sm:$0xff]   ;;  %v18733_v40 = vld [vmem:[#allocation8 + $0x224] ss:$24 sps:$4 sm:$0xff]  }
 0x3cf   :  { %6364 = vmatprep.subr.bf16.mxu1 %v18682_v53  ;;  %v18728_v53 = vld [vmem:[#allocation8 + $0x550] ss:$24 sps:$4 sm:$0xff]   ;;  %v18736_v28 = vld [vmem:[#allocation8 + $0x524] ss:$24 sps:$4 sm:$0xff]  }
 0x3d1   :  { %6312 = vmatpush1.bf16.msra.mxu0 %v18677_v59  ;;  %v18731_v59 = vld [vmem:[#allocation8 + $0x220] ss:$24 sps:$4 sm:$0xff]  }
 0x3d2   :  { %6365 = vmatpush1.bf16.msra.mxu1 %v18680_v33  ;;  %6313 = vmatprep.subr.bf16.mxu0 %v18685_v35  ;;  %v18734_v33 = vld [vmem:[#allocation8 + $0x520] ss:$24 sps:$4 sm:$0xff]   ;;  %v18739_v35 = vld [vmem:[#allocation8 + $0x1f4] ss:$24 sps:$4 sm:$0xff]  }
 0x3d3   :  { %6366 = vmatprep.subr.bf16.mxu1 %v18688_v57  ;;  %v18742_v57 = vld [vmem:[#allocation8 + $0x4f4] ss:$24 sps:$4 sm:$0xff]  }
 0x3d5   :  { %6314 = vmatpush1.bf16.msra.mxu0 %v18683_v23  ;;  %v18737_v23 = vld [vmem:[#allocation8 + $0x1f0] ss:$24 sps:$4 sm:$0xff]  }
 0x3d6   :  { %6367 = vmatpush1.bf16.msra.mxu1 %v18686_v15  ;;  %6315 = vmatprep.subr.bf16.mxu0 %v18691_v38  ;;  %v18740_v15 = vld [vmem:[#allocation8 + $0x4f0] ss:$24 sps:$4 sm:$0xff]   ;;  %v18745_v38 = vld [vmem:[#allocation8 + $0x1c4] ss:$24 sps:$4 sm:$0xff]  }
 0x3d7   :  { %6368 = vmatprep.subr.bf16.mxu1 %v18694_v52  ;;  %v18748_v52 = vld [vmem:[#allocation8 + $0x4c4] ss:$24 sps:$4 sm:$0xff]  }
 0x3d9   :  { %6316 = vmatpush1.bf16.msra.mxu0 %v18689_v27  ;;  %v18743_v27 = vld [vmem:[#allocation8 + $0x1c0] ss:$24 sps:$4 sm:$0xff]  }
 0x3da   :  { %6369 = vmatpush1.bf16.msra.mxu1 %v18692_v4  ;;  %6317 = vmatprep.subr.bf16.mxu0 %v18697_v19  ;;  %v18746_v4 = vld [vmem:[#allocation8 + $0x4c0] ss:$24 sps:$4 sm:$0xff]   ;;  %v18751_v19 = vld [vmem:[#allocation8 + $0x194] ss:$24 sps:$4 sm:$0xff]  }
 0x3db   :  { %6370 = vmatprep.subr.bf16.mxu1 %v18700_v0  ;;  %v18754_v0 = vld [vmem:[#allocation8 + $0x494] ss:$24 sps:$4 sm:$0xff]  }
 0x3dd   :  { %6318 = vmatpush1.bf16.msra.mxu0 %v18695_v30  ;;  %v18749_v30 = vld [vmem:[#allocation8 + $0x190] ss:$24 sps:$4 sm:$0xff]  }
 0x3de   :  { %6371 = vmatpush1.bf16.msra.mxu1 %v18698_v20  ;;  %6319 = vmatprep.subr.bf16.mxu0 %v18703_v10  ;;  %v18752_v20 = vld [vmem:[#allocation8 + $0x490] ss:$24 sps:$4 sm:$0xff]   ;;  %v18757_v10 = vld [vmem:[#allocation8 + $0xd54] ss:$24 sps:$4 sm:$0xff]  }
 0x3df   :  { %6372 = vmatprep.subr.bf16.mxu1 %v18706_v62  ;;  %v21490_v62 = vpop.f32.mrf.mxu0 }
 0x3e1   :  { %6320 = vmatpush1.bf16.msra.mxu0 %v18701_v39  ;;  %v18760_v39 = vld [vmem:[#allocation8 + $0x1054] ss:$24 sps:$4 sm:$0xff]  }
 0x3e2   :  { %6373 = vmatpush1.bf16.msra.mxu1 %v18704_v22  ;;  %6321 = vmatprep.subr.bf16.mxu0 %v18709_v5  ;;  %v21492_v22 = vpop.f32.mrf.mxu1 }
 0x3e3   :  { %6374 = vmatprep.subr.bf16.mxu1 %v18712_v1 }
 0x3e5   :  { %6322 = vmatpush2.bf16.msra.mxu0 %v18707_v44  ;;  %v18755_v44 = vld [vmem:[#allocation8 + $0xd50] ss:$24 sps:$4 sm:$0xff]  }
 0x3e6   :  { %6375 = vmatpush2.bf16.msra.mxu1 %v18710_v55  ;;  %6323 = vmatprep.subr.bf16.mxu0 %v18715_v11  ;;  %v18758_v11 = vld [vmem:[#allocation8 + $0x1050] ss:$24 sps:$4 sm:$0xff]  }
 0x3e7   :  { %6376 = vmatprep.subr.bf16.mxu1 %v18718_v6 }
 0x3e9   :  { %6324 = vmatpush2.bf16.msra.mxu0 %v18713_v9  ;;  %v18763_v9 = vld [vmem:[#allocation8 + $0xd24] ss:$24 sps:$4 sm:$0xff]  }
 0x3ea   :  { %6377 = vmatpush2.bf16.msra.mxu1 %v18716_v8  ;;  %6325 = vmatprep.subr.bf16.mxu0 %v18721_v21  ;;  %v18766_v21 = vld [vmem:[#allocation8 + $0x1024] ss:$24 sps:$4 sm:$0xff]  }
 0x3eb   :  { %6378 = vmatprep.subr.bf16.mxu1 %v18724_v2 }
 0x3ed   :  { %6326 = vmatpush2.bf16.msra.mxu0 %v18719_v13 }
 0x3ee   :  { %6379 = vmatpush2.bf16.msra.mxu1 %v18722_v48  ;;  %6327 = vmatprep.subr.bf16.mxu0 %v18727_v61  ;;  %v18761_v61 = vld [vmem:[#allocation8 + $0xd20] ss:$24 sps:$4 sm:$0xff]  }
 0x3ef   :  { %6380 = vmatprep.subr.bf16.mxu1 %v18730_v14 }
 0x3f1   :  { %6328 = vmatpush2.bf16.msra.mxu0 %v18725_v54  ;;  %v18764_v54 = vld [vmem:[#allocation8 + $0x1020] ss:$24 sps:$4 sm:$0xff]  }
 0x3f2   :  { %6381 = vmatpush2.bf16.msra.mxu1 %v18728_v53  ;;  %6329 = vmatprep.subr.bf16.mxu0 %v18733_v40  ;;  %v18769_v53 = vld [vmem:[#allocation8 + $0xcf4] ss:$24 sps:$4 sm:$0xff]  }
 0x3f3   :  { %6382 = vmatprep.subr.bf16.mxu1 %v18736_v28  ;;  %v18772_v40 = vld [vmem:[#allocation8 + $0xff4] ss:$24 sps:$4 sm:$0xff]  }
 0x3f5   :  { %6330 = vmatpush2.bf16.msra.mxu0 %v18731_v59 }
 0x3f6   :  { %6383 = vmatpush2.bf16.msra.mxu1 %v18734_v33  ;;  %6331 = vmatprep.subr.bf16.mxu0 %v18739_v35  ;;  %v18767_v33 = vld [vmem:[#allocation8 + $0xcf0] ss:$24 sps:$4 sm:$0xff]  }
 0x3f7   :  { %6384 = vmatprep.subr.bf16.mxu1 %v18742_v57  ;;  %v18770_v57 = vld [vmem:[#allocation8 + $0xff0] ss:$24 sps:$4 sm:$0xff]  }
 0x3f9   :  { %6332 = vmatpush2.bf16.msra.mxu0 %v18737_v23 }
 0x3fa   :  { %6385 = vmatpush2.bf16.msra.mxu1 %v18740_v15  ;;  %6333 = vmatprep.subr.bf16.mxu0 %v18745_v38  ;;  %v18775_v15 = vld [vmem:[#allocation8 + $0xcc4] ss:$24 sps:$4 sm:$0xff]  }
 0x3fb   :  { %6386 = vmatprep.subr.bf16.mxu1 %v18748_v52  ;;  %v18778_v52 = vld [vmem:[#allocation8 + $0xfc4] ss:$24 sps:$4 sm:$0xff]  }
 0x3fd   :  { %6334 = vmatpush2.bf16.msra.mxu0 %v18743_v27 }
 0x3fe   :  { %6387 = vmatpush2.bf16.msra.mxu1 %v18746_v4  ;;  %6335 = vmatprep.subr.bf16.mxu0 %v18751_v19 }
 0x3ff   :  { %6388 = vmatprep.subr.bf16.mxu1 %v18754_v0  ;;  %v18773_v0 = vld [vmem:[#allocation8 + $0xcc0] ss:$24 sps:$4 sm:$0xff]  }
 0x401   :  { %6336 = vmatpush2.bf16.msra.mxu0 %v18749_v30  ;;  %v5061_v5 = vpop.f32.mrf.mxu0 }
 0x402   :  { %6389 = vmatpush2.bf16.msra.mxu1 %v18752_v20  ;;  %v5114_v1 = vpop.f32.mrf.mxu1  ;;  %7588 = vmatprep.subr.bf16.mxu0 %v18757_v10  ;;  %v18776_v20 = vld [vmem:[#allocation8 + $0xfc0] ss:$24 sps:$4 sm:$0xff]   ;;  %v18781_v10 = vld [vmem:[#allocation8 + $0xc94] ss:$24 sps:$4 sm:$0xff]  }
 0x403   :  { %v21494_v55 = vadd.f32 %v5114_v1, %v5061_v5  ;;  %7641 = vmatprep.subr.bf16.mxu1 %v18760_v39  ;;  %v5063_v6 = vpop.f32.mrf.mxu0  ;;  %v18784_v39 = vld [vmem:[#allocation8 + $0xf94] ss:$24 sps:$4 sm:$0xff]   ;;  %v18779_v5 = vld [vmem:[#allocation8 + $0xc90] ss:$24 sps:$4 sm:$0xff]  }
 0x404   :  { %6338 = vmatmul.mubr.bf16.vlgmr.msra.gmra.mxu0 %v21193_v12  ;;  %v5116_v8 = vpop.f32.mrf.mxu1  ;;  %v18782_v1 = vld [vmem:[#allocation8 + $0xf90] ss:$24 sps:$4 sm:$0xff]  }
 0x405   :  { %6391 = vmatmul.mubr.bf16.vlgmr.msra.gmra.mxu1 %v21195_v60  ;;  %6347 = vmatprep.mubr.bf16.mxu0 %v21344_v51  ;;  %v21499_v2 = vadd.f32 %v5116_v8, %v5063_v6  ;;  %v5065_v13 = vpop.f32.mrf.mxu0  ;;  %v18785_v6 = vld [vmem:[#allocation8 + $0xc60] ss:$24 sps:$4 sm:$0xff]   ;;  %v18793_v8 = vld [vmem:[#allocation8 + $0xc34] ss:$24 sps:$4 sm:$0xff]  }
 0x406   :  { %6400 = vmatprep.mubr.bf16.mxu1 %v21360_v43  ;;  %7589 = vmatpush1.bf16.msra.mxu0 %v18755_v44  ;;  %v5118_v48 = vpop.f32.mrf.mxu1  ;;  %v18787_v44 = vld [vmem:[#allocation8 + $0xc64] ss:$24 sps:$4 sm:$0xff]  }
 0x407   :  { %7642 = vmatpush1.bf16.msra.mxu1 %v18758_v11  ;;  %v21502_v14 = vadd.f32 %v5118_v48, %v5065_v13  ;;  %7590 = vmatprep.subr.bf16.mxu0 %v18763_v9  ;;  %v21504_v12 = vpop.f32.mrf.mxu0  ;;  %v18790_v11 = vld [vmem:[#allocation8 + $0xf64] ss:$24 sps:$4 sm:$0xff]   ;;  %v18788_v9 = vld [vmem:[#allocation8 + $0xf60] ss:$24 sps:$4 sm:$0xff]   ;;  %v18791_v13 = vld [vmem:[#allocation8 + $0xc30] ss:$24 sps:$4 sm:$0xff]  }
 0x408   :  { %7643 = vmatprep.subr.bf16.mxu1 %v18766_v21  ;;  %v21506_v60 = vpop.f32.mrf.mxu1  ;;  %v18796_v21 = vld [vmem:[#allocation8 + $0xf34] ss:$24 sps:$4 sm:$0xff]   ;;  %v18794_v48 = vld [vmem:[#allocation8 + $0xf30] ss:$24 sps:$4 sm:$0xff]  }
 0x409   :  { %v5071_v28 = vpop.f32.mrf.mxu0 }
 0x40a   :  { %7591 = vmatpush1.bf16.msra.mxu0 %v18761_v61  ;;  %v5124_v59 = vpop.f32.mrf.mxu1  ;;  %v18799_v61 = vld [vmem:[#allocation8 + $0xc04] ss:$24 sps:$4 sm:$0xff]  }
 0x40b   :  { %7644 = vmatpush1.bf16.msra.mxu1 %v18764_v54  ;;  %v21508_v35 = vadd.f32 %v5124_v59, %v5071_v28  ;;  %7592 = vmatprep.subr.bf16.mxu0 %v18769_v53  ;;  %v5073_v23 = vpop.f32.mrf.mxu0  ;;  %v18802_v54 = vld [vmem:[#allocation8 + $0xf04] ss:$24 sps:$4 sm:$0xff]   ;;  %v18797_v53 = vld [vmem:[#allocation8 + $0xc00] ss:$24 sps:$4 sm:$0xff]   ;;  %v18805_v28 = vld [vmem:[#allocation8 + $0xed4] ss:$24 sps:$4 sm:$0xff]  }
 0x40c   :  { %6348 = vmatmul.mubr.bf16.gmra.mxu0 %v21356_v58  ;;  %7645 = vmatprep.subr.bf16.mxu1 %v18772_v40  ;;  %v5126_v38 = vpop.f32.mrf.mxu1  ;;  %v18800_v40 = vld [vmem:[#allocation8 + $0xf00] ss:$24 sps:$4 sm:$0xff]   ;;  %v18808_v59 = vld [vmem:[#allocation8 + $0x11d4] ss:$24 sps:$4 sm:$0xff]  }
 0x40d   :  { %6401 = vmatmul.mubr.bf16.gmra.mxu1 %v21379_v34  ;;  %7620 = vmatprep.mubr.bf16.mxu0 %v21344_v51  ;;  %v21513_v27 = vadd.f32 %v5126_v38, %v5073_v23  ;;  %v5075_v4 = vpop.f32.mrf.mxu0  ;;  %v18811_v23 = vld [vmem:[#allocation8 + $0xea4] ss:$24 sps:$4 sm:$0xff]   ;;  %v18809_v38 = vld [vmem:[#allocation8 + $0xea0] ss:$24 sps:$4 sm:$0xff]  }
 0x40e   :  { %7593 = vmatpush1.bf16.msra.mxu0 %v18767_v33  ;;  %7673 = vmatprep.mubr.bf16.mxu1 %v21360_v43  ;;  %v5128_v19 = vpop.f32.mrf.mxu1  ;;  %v18803_v33 = vld [vmem:[#allocation8 + $0xed0] ss:$24 sps:$4 sm:$0xff]  }
 0x40f   :  { %22453 = vst [vmem:[#allocation86_spill] sm:$0xff] %v21513_v27  ;;  %7646 = vmatpush1.bf16.msra.mxu1 %v18770_v57  ;;  %v21516_v30 = vadd.f32 %v5128_v19, %v5075_v4  ;;  %7594 = vmatprep.subr.bf16.mxu0 %v18775_v15  ;;  %v18806_v57 = vld [vmem:[#allocation8 + $0x11d0] ss:$24 sps:$4 sm:$0xff]   ;;  %v18814_v15 = vld [vmem:[#allocation8 + $0x11a4] ss:$24 sps:$4 sm:$0xff]  }
 0x410   :  { %7647 = vmatprep.subr.bf16.mxu1 %v18778_v52  ;;  %v18812_v52 = vld [vmem:[#allocation8 + $0x11a0] ss:$24 sps:$4 sm:$0xff]   ;;  %v18817_v4 = vld [vmem:[#allocation8 + $0xe74] ss:$24 sps:$4 sm:$0xff]  }
 0x411   :  { %22454 = vst [vmem:[#allocation41_spill] sm:$0xff] %v21516_v30  ;;  %v18820_v19 = vld [vmem:[#allocation8 + $0x1174] ss:$24 sps:$4 sm:$0xff]  }
 0x412   :  { %7595 = vmatpush1.bf16.msra.mxu0 %v18773_v0  ;;  %v18815_v0 = vld [vmem:[#allocation8 + $0xe70] ss:$24 sps:$4 sm:$0xff]  }
 0x413   :  { %7648 = vmatpush1.bf16.msra.mxu1 %v18776_v20  ;;  %7596 = vmatprep.subr.bf16.mxu0 %v18781_v10  ;;  %v18818_v20 = vld [vmem:[#allocation8 + $0x1170] ss:$24 sps:$4 sm:$0xff]   ;;  %v18823_v10 = vld [vmem:[#allocation8 + $0xe44] ss:$24 sps:$4 sm:$0xff]  }
 0x414   :  { %7649 = vmatprep.subr.bf16.mxu1 %v18784_v39  ;;  %v18826_v39 = vld [vmem:[#allocation8 + $0x1144] ss:$24 sps:$4 sm:$0xff]  }
 0x416   :  { %7597 = vmatpush1.bf16.msra.mxu0 %v18779_v5  ;;  %v18821_v5 = vld [vmem:[#allocation8 + $0xe40] ss:$24 sps:$4 sm:$0xff]  }
 0x417   :  { %7650 = vmatpush1.bf16.msra.mxu1 %v18782_v1  ;;  %7598 = vmatprep.subr.bf16.mxu0 %v18787_v44  ;;  %v18824_v1 = vld [vmem:[#allocation8 + $0x1140] ss:$24 sps:$4 sm:$0xff]   ;;  %v18829_v44 = vld [vmem:[#allocation8 + $0xe14] ss:$24 sps:$4 sm:$0xff]  }
 0x418   :  { %7651 = vmatprep.subr.bf16.mxu1 %v18790_v11  ;;  %v18832_v11 = vld [vmem:[#allocation8 + $0x1114] ss:$24 sps:$4 sm:$0xff]  }
 0x41a   :  { %7599 = vmatpush1.bf16.msra.mxu0 %v18785_v6  ;;  %v18827_v6 = vld [vmem:[#allocation8 + $0xe10] ss:$24 sps:$4 sm:$0xff]  }
 0x41b   :  { %7652 = vmatpush1.bf16.msra.mxu1 %v18788_v9  ;;  %7600 = vmatprep.subr.bf16.mxu0 %v18793_v8  ;;  %v18830_v9 = vld [vmem:[#allocation8 + $0x1110] ss:$24 sps:$4 sm:$0xff]   ;;  %v18835_v8 = vld [vmem:[#allocation8 + $0xde4] ss:$24 sps:$4 sm:$0xff]  }
 0x41c   :  { %7653 = vmatprep.subr.bf16.mxu1 %v18796_v21  ;;  %v18838_v21 = vld [vmem:[#allocation8 + $0x10e4] ss:$24 sps:$4 sm:$0xff]  }
 0x41e   :  { %7601 = vmatpush1.bf16.msra.mxu0 %v18791_v13  ;;  %v18833_v13 = vld [vmem:[#allocation8 + $0xde0] ss:$24 sps:$4 sm:$0xff]  }
 0x41f   :  { %7654 = vmatpush1.bf16.msra.mxu1 %v18794_v48  ;;  %7602 = vmatprep.subr.bf16.mxu0 %v18799_v61  ;;  %v18836_v48 = vld [vmem:[#allocation8 + $0x10e0] ss:$24 sps:$4 sm:$0xff]   ;;  %v18841_v61 = vld [vmem:[#allocation8 + $0xdb4] ss:$24 sps:$4 sm:$0xff]  }
 0x420   :  { %7655 = vmatprep.subr.bf16.mxu1 %v18802_v54  ;;  %v18844_v54 = vld [vmem:[#allocation8 + $0x10b4] ss:$24 sps:$4 sm:$0xff]  }
 0x422   :  { %7603 = vmatpush1.bf16.msra.mxu0 %v18797_v53  ;;  %v18839_v53 = vld [vmem:[#allocation8 + $0xdb0] ss:$24 sps:$4 sm:$0xff]  }
 0x423   :  { %7656 = vmatpush1.bf16.msra.mxu1 %v18800_v40  ;;  %7604 = vmatprep.subr.bf16.mxu0 %v18805_v28  ;;  %v18842_v40 = vld [vmem:[#allocation8 + $0x10b0] ss:$24 sps:$4 sm:$0xff]   ;;  %v18847_v28 = vld [vmem:[#allocation8 + $0xd84] ss:$24 sps:$4 sm:$0xff]  }
 0x424   :  { %7657 = vmatprep.subr.bf16.mxu1 %v18808_v59  ;;  %v18850_v59 = vld [vmem:[#allocation8 + $0x1084] ss:$24 sps:$4 sm:$0xff]  }
 0x426   :  { %7605 = vmatpush2.bf16.msra.mxu0 %v18803_v33  ;;  %v18845_v33 = vld [vmem:[#allocation8 + $0xd80] ss:$24 sps:$4 sm:$0xff]  }
 0x427   :  { %7658 = vmatpush2.bf16.msra.mxu1 %v18806_v57  ;;  %7606 = vmatprep.subr.bf16.mxu0 %v18811_v23  ;;  %v18848_v57 = vld [vmem:[#allocation8 + $0x1080] ss:$24 sps:$4 sm:$0xff]   ;;  %v18853_v23 = vld [vmem:[#allocation8 + $0xd5c] ss:$24 sps:$4 sm:$0xff]  }
 0x428   :  { %7659 = vmatprep.subr.bf16.mxu1 %v18814_v15  ;;  %v21518_v15 = vpop.f32.mrf.mxu0 }
 0x429   :  { %22455 = vst [vmem:[#allocation87_spill] sm:$0xff] %v21518_v15 }
 0x42a   :  { %7607 = vmatpush2.bf16.msra.mxu0 %v18809_v38  ;;  %v18856_v38 = vld [vmem:[#allocation8 + $0x105c] ss:$24 sps:$4 sm:$0xff]  }
 0x42b   :  { %7660 = vmatpush2.bf16.msra.mxu1 %v18812_v52  ;;  %7608 = vmatprep.subr.bf16.mxu0 %v18817_v4  ;;  %v21520_v52 = vpop.f32.mrf.mxu1 }
 0x42c   :  { %7661 = vmatprep.subr.bf16.mxu1 %v18820_v19  ;;  %22456 = vst [vmem:[#allocation42_spill] sm:$0xff] %v21520_v52 }
 0x42e   :  { %7609 = vmatpush2.bf16.msra.mxu0 %v18815_v0 }
 0x42f   :  { %7662 = vmatpush2.bf16.msra.mxu1 %v18818_v20  ;;  %7610 = vmatprep.subr.bf16.mxu0 %v18823_v10  ;;  %v18851_v20 = vld [vmem:[#allocation8 + $0xd58] ss:$24 sps:$4 sm:$0xff]  }
 0x430   :  { %7663 = vmatprep.subr.bf16.mxu1 %v18826_v39  ;;  %v18854_v10 = vld [vmem:[#allocation8 + $0x1058] ss:$24 sps:$4 sm:$0xff]  }
 0x432   :  { %7611 = vmatpush2.bf16.msra.mxu0 %v18821_v5  ;;  %v18859_v5 = vld [vmem:[#allocation8 + $0xd2c] ss:$24 sps:$4 sm:$0xff]  }
 0x433   :  { %7664 = vmatpush2.bf16.msra.mxu1 %v18824_v1  ;;  %7612 = vmatprep.subr.bf16.mxu0 %v18829_v44 }
 0x434   :  { %7665 = vmatprep.subr.bf16.mxu1 %v18832_v11 }
 0x436   :  { %7613 = vmatpush2.bf16.msra.mxu0 %v18827_v6  ;;  %v18862_v6 = vld [vmem:[#allocation8 + $0x102c] ss:$24 sps:$4 sm:$0xff]  }
 0x437   :  { %7666 = vmatpush2.bf16.msra.mxu1 %v18830_v9  ;;  %7614 = vmatprep.subr.bf16.mxu0 %v18835_v8  ;;  %v4909_v9 = vadd.f32 %v21450_v17, %v21448_v49  ;;  %v18868_v49 = vld [vmem:[#allocation8 + $0xffc] ss:$24 sps:$4 sm:$0xff]  }
 0x438   :  { %7667 = vmatprep.subr.bf16.mxu1 %v18838_v21 }
 0x43a   :  { %7615 = vmatpush2.bf16.msra.mxu0 %v18833_v13 }
 0x43b   :  { %7668 = vmatpush2.bf16.msra.mxu1 %v18836_v48  ;;  %7616 = vmatprep.subr.bf16.mxu0 %v18841_v61  ;;  %v18857_v48 = vld [vmem:[#allocation8 + $0xd28] ss:$24 sps:$4 sm:$0xff]  }
 0x43c   :  { %7669 = vmatprep.subr.bf16.mxu1 %v18844_v54  ;;  %v18865_v54 = vld [vmem:[#allocation8 + $0xcfc] ss:$24 sps:$4 sm:$0xff]  }
 0x43e   :  { %7617 = vmatpush2.bf16.msra.mxu0 %v18839_v53 }
 0x43f   :  { %7670 = vmatpush2.bf16.msra.mxu1 %v18842_v40  ;;  %7618 = vmatprep.subr.bf16.mxu0 %v18847_v28 }
 0x440   :  { %7671 = vmatprep.subr.bf16.mxu1 %v18850_v59 }
 0x442   :  { %7619 = vmatpush2.bf16.msra.mxu0 %v18845_v33  ;;  %v6127_v4 = vpop.f32.mrf.mxu0 }
 0x443   :  { %7672 = vmatpush2.bf16.msra.mxu1 %v18848_v57  ;;  %v6128_v19 = vadd.f32 %v6127_v4, %v21439_v46  ;;  %v6180_v0 = vpop.f32.mrf.mxu1  ;;  %7694 = vmatprep.subr.bf16.mxu0 %v18853_v23  ;;  %v18863_v57 = vld [vmem:[#allocation8 + $0xcf8] ss:$24 sps:$4 sm:$0xff]   ;;  %v18871_v4 = vld [vmem:[#allocation8 + $0xccc] ss:$24 sps:$4 sm:$0xff]  }
 0x444   :  { %7747 = vmatprep.subr.bf16.mxu1 %v18856_v38  ;;  %v6129_v39 = vpop.f32.mrf.mxu0  ;;  %v18866_v23 = vld [vmem:[#allocation8 + $0xff8] ss:$24 sps:$4 sm:$0xff]  }
 0x445   :  { %v21523_v1 = vadd.f32 %v6180_v0, %v6128_v19  ;;  %7621 = vmatmul.mubr.bf16.vlgmr.msra.gmra.mxu0 %v21356_v58  ;;  %v6130_v44 = vadd.f32 %v6129_v39, %v21444_v26  ;;  %v6182_v11 = vpop.f32.mrf.mxu1  ;;  %v18860_v26 = vld [vmem:[#allocation8 + $0x1028] ss:$24 sps:$4 sm:$0xff]   ;;  %v4919_v39 = vadd.f32 %v21464_v50, %v21462_v42 }
 0x446   :  { %7674 = vmatmul.mubr.bf16.vlgmr.msra.gmra.mxu1 %v21379_v34  ;;  %7630 = vmatprep.mubr.bf16.mxu0 %v21414_v45  ;;  %v6131_v46 = vpop.f32.mrf.mxu0 }
 0x447   :  { %7683 = vmatprep.mubr.bf16.mxu1 %v21416_v29  ;;  %7695 = vmatpush1.bf16.msra.mxu0 %v18851_v20  ;;  %v21532_v8 = vadd.f32 %v6182_v11, %v6130_v44  ;;  %v6132_v21 = vadd.f32 %v6131_v46, %v21446_v3  ;;  %v6184_v13 = vpop.f32.mrf.mxu1 }
 0x448   :  { %7748 = vmatpush1.bf16.msra.mxu1 %v18854_v10  ;;  %7696 = vmatprep.subr.bf16.mxu0 %v18859_v5  ;;  %v6133_v61 = vpop.f32.mrf.mxu0  ;;  %v18874_v10 = vld [vmem:[#allocation8 + $0xfcc] ss:$24 sps:$4 sm:$0xff]  }
 0x449   :  { %v21535_v53 = vadd.f32 %v6184_v13, %v6132_v21  ;;  %7749 = vmatprep.subr.bf16.mxu1 %v18862_v6  ;;  %v6134_v40 = vadd.f32 %v6133_v61, %v4909_v9  ;;  %v6186_v28 = vpop.f32.mrf.mxu1  ;;  %v18869_v6 = vld [vmem:[#allocation8 + $0xcc8] ss:$24 sps:$4 sm:$0xff]   ;;  %v18877_v9 = vld [vmem:[#allocation8 + $0xc9c] ss:$24 sps:$4 sm:$0xff]   ;;  %v18883_v61 = vld [vmem:[#allocation8 + $0xc6c] ss:$24 sps:$4 sm:$0xff]  }
 0x44a   :  { %v6137_v17 = vpop.f32.mrf.mxu0 }
 0x44b   :  { %7697 = vmatpush1.bf16.msra.mxu0 %v18857_v48  ;;  %v21537_v59 = vadd.f32 %v6186_v28, %v6134_v40  ;;  %v6138_v33 = vadd.f32 %v6137_v17, %v21453_v18  ;;  %v6190_v3 = vpop.f32.mrf.mxu1  ;;  %v18880_v48 = vld [vmem:[#allocation8 + $0xf9c] ss:$24 sps:$4 sm:$0xff]   ;;  %v18881_v40 = vld [vmem:[#allocation8 + $0xc68] ss:$24 sps:$4 sm:$0xff]  }
 0x44c   :  { %7750 = vmatpush1.bf16.msra.mxu1 %v18860_v26  ;;  %7698 = vmatprep.subr.bf16.mxu0 %v18865_v54  ;;  %v6139_v38 = vpop.f32.mrf.mxu0  ;;  %v18875_v26 = vld [vmem:[#allocation8 + $0xc98] ss:$24 sps:$4 sm:$0xff]   ;;  %v18886_v54 = vld [vmem:[#allocation8 + $0xf6c] ss:$24 sps:$4 sm:$0xff]   ;;  %v18884_v28 = vld [vmem:[#allocation8 + $0xf68] ss:$24 sps:$4 sm:$0xff]  }
 0x44d   :  { %22457 = vst [vmem:[#allocation88_spill] sm:$0xff] %v21537_v59  ;;  %v21540_v19 = vadd.f32 %v6190_v3, %v6138_v33  ;;  %7631 = vmatmul.mubr.bf16.gmra.mxu0 %v21402_v47  ;;  %7751 = vmatprep.subr.bf16.mxu1 %v18868_v49  ;;  %v6140_v0 = vadd.f32 %v6139_v38, %v21458_v37  ;;  %v6192_v20 = vpop.f32.mrf.mxu1  ;;  %v18872_v37 = vld [vmem:[#allocation8 + $0xfc8] ss:$24 sps:$4 sm:$0xff]   ;;  %v18889_v49 = vld [vmem:[#allocation8 + $0xc3c] ss:$24 sps:$4 sm:$0xff]  }
 0x44e   :  { %7684 = vmatmul.mubr.bf16.gmra.mxu1 %v21412_v41  ;;  %7726 = vmatprep.mubr.bf16.mxu0 %v21344_v51  ;;  %v6141_v18 = vpop.f32.mrf.mxu0  ;;  %v18892_v17 = vld [vmem:[#allocation8 + $0xf3c] ss:$24 sps:$4 sm:$0xff]   ;;  %v18887_v33 = vld [vmem:[#allocation8 + $0xc38] ss:$24 sps:$4 sm:$0xff]   ;;  %v18893_v38 = vld [vmem:[#allocation8 + $0xc08] ss:$24 sps:$4 sm:$0xff]  }
 0x44f   :  { %7699 = vmatpush1.bf16.msra.mxu0 %v18863_v57  ;;  %7779 = vmatprep.mubr.bf16.mxu1 %v21360_v43  ;;  %v21549_v5 = vadd.f32 %v6192_v20, %v6140_v0  ;;  %v6142_v44 = vadd.f32 %v6141_v18, %v21460_v36  ;;  %v6194_v11 = vpop.f32.mrf.mxu1  ;;  %v18878_v36 = vld [vmem:[#allocation8 + $0xf98] ss:$24 sps:$4 sm:$0xff]   ;;  %v18895_v57 = vld [vmem:[#allocation8 + $0xc0c] ss:$24 sps:$4 sm:$0xff]   ;;  %v18901_v0 = vld [vmem:[#allocation8 + $0xedc] ss:$24 sps:$4 sm:$0xff]  }
 0x450   :  { %7752 = vmatpush1.bf16.msra.mxu1 %v18866_v23  ;;  %7700 = vmatprep.subr.bf16.mxu0 %v18871_v4  ;;  %v6143_v46 = vpop.f32.mrf.mxu0  ;;  %v18890_v3 = vld [vmem:[#allocation8 + $0xf38] ss:$24 sps:$4 sm:$0xff]   ;;  %v18898_v23 = vld [vmem:[#allocation8 + $0xf0c] ss:$24 sps:$4 sm:$0xff]   ;;  %v18896_v4 = vld [vmem:[#allocation8 + $0xf08] ss:$24 sps:$4 sm:$0xff]  }
 0x451   :  { %v21552_v21 = vadd.f32 %v6194_v11, %v6142_v44  ;;  %7753 = vmatprep.subr.bf16.mxu1 %v18874_v10  ;;  %v6144_v13 = vadd.f32 %v6143_v46, %v4919_v39  ;;  %v6196_v42 = vpop.f32.mrf.mxu1  ;;  %v18904_v20 = vld [vmem:[#allocation8 + $0x11dc] ss:$24 sps:$4 sm:$0xff]   ;;  %v18899_v10 = vld [vmem:[#allocation8 + $0xed8] ss:$24 sps:$4 sm:$0xff]   ;;  %v18907_v39 = vld [vmem:[#allocation8 + $0xeac] ss:$24 sps:$4 sm:$0xff]  }
 0x452   :  { %v18902_v18 = vld [vmem:[#allocation8 + $0x11d8] ss:$24 sps:$4 sm:$0xff]   ;;  %v18910_v44 = vld [vmem:[#allocation8 + $0x11ac] ss:$24 sps:$4 sm:$0xff]   ;;  %v18905_v11 = vld [vmem:[#allocation8 + $0xea8] ss:$24 sps:$4 sm:$0xff]  }
 0x453   :  { %7701 = vmatpush1.bf16.msra.mxu0 %v18869_v6  ;;  %v21554_v50 = vadd.f32 %v6196_v42, %v6144_v13  ;;  %v18908_v6 = vld [vmem:[#allocation8 + $0x11a8] ss:$24 sps:$4 sm:$0xff]   ;;  %v18916_v46 = vld [vmem:[#allocation8 + $0x117c] ss:$24 sps:$4 sm:$0xff]   ;;  %v18914_v13 = vld [vmem:[#allocation8 + $0x1178] ss:$24 sps:$4 sm:$0xff]  }
 0x454   :  { %7754 = vmatpush1.bf16.msra.mxu1 %v18872_v37  ;;  %7702 = vmatprep.subr.bf16.mxu0 %v18877_v9  ;;  %v18913_v37 = vld [vmem:[#allocation8 + $0xe7c] ss:$24 sps:$4 sm:$0xff]   ;;  %v18911_v9 = vld [vmem:[#allocation8 + $0xe78] ss:$24 sps:$4 sm:$0xff]   ;;  %v18922_v42 = vld [vmem:[#allocation8 + $0x114c] ss:$24 sps:$4 sm:$0xff]  }
 0x455   :  { %22458 = vst [vmem:[#allocation43_spill] sm:$0xff] %v21554_v50  ;;  %7755 = vmatprep.subr.bf16.mxu1 %v18880_v48  ;;  %v18919_v48 = vld [vmem:[#allocation8 + $0xe4c] ss:$24 sps:$4 sm:$0xff]  }
 0x457   :  { %7703 = vmatpush1.bf16.msra.mxu0 %v18875_v26  ;;  %v18917_v26 = vld [vmem:[#allocation8 + $0xe48] ss:$24 sps:$4 sm:$0xff]  }
 0x458   :  { %7756 = vmatpush1.bf16.msra.mxu1 %v18878_v36  ;;  %7704 = vmatprep.subr.bf16.mxu0 %v18883_v61  ;;  %v18920_v36 = vld [vmem:[#allocation8 + $0x1148] ss:$24 sps:$4 sm:$0xff]   ;;  %v18925_v61 = vld [vmem:[#allocation8 + $0xe1c] ss:$24 sps:$4 sm:$0xff]  }
 0x459   :  { %7757 = vmatprep.subr.bf16.mxu1 %v18886_v54  ;;  %v18928_v54 = vld [vmem:[#allocation8 + $0x111c] ss:$24 sps:$4 sm:$0xff]  }
 0x45b   :  { %7705 = vmatpush1.bf16.msra.mxu0 %v18881_v40  ;;  %v18923_v40 = vld [vmem:[#allocation8 + $0xe18] ss:$24 sps:$4 sm:$0xff]  }
 0x45c   :  { %7758 = vmatpush1.bf16.msra.mxu1 %v18884_v28  ;;  %7706 = vmatprep.subr.bf16.mxu0 %v18889_v49  ;;  %v18926_v28 = vld [vmem:[#allocation8 + $0x1118] ss:$24 sps:$4 sm:$0xff]   ;;  %v18931_v49 = vld [vmem:[#allocation8 + $0xdec] ss:$24 sps:$4 sm:$0xff]  }
 0x45d   :  { %7759 = vmatprep.subr.bf16.mxu1 %v18892_v17  ;;  %v18934_v17 = vld [vmem:[#allocation8 + $0x10ec] ss:$24 sps:$4 sm:$0xff]  }
 0x45f   :  { %7707 = vmatpush1.bf16.msra.mxu0 %v18887_v33  ;;  %v18929_v33 = vld [vmem:[#allocation8 + $0xde8] ss:$24 sps:$4 sm:$0xff]  }
 0x460   :  { %7760 = vmatpush1.bf16.msra.mxu1 %v18890_v3  ;;  %7708 = vmatprep.subr.bf16.mxu0 %v18895_v57  ;;  %v18932_v3 = vld [vmem:[#allocation8 + $0x10e8] ss:$24 sps:$4 sm:$0xff]   ;;  %v18937_v57 = vld [vmem:[#allocation8 + $0xdbc] ss:$24 sps:$4 sm:$0xff]  }
 0x461   :  { %7761 = vmatprep.subr.bf16.mxu1 %v18898_v23  ;;  %v18940_v23 = vld [vmem:[#allocation8 + $0x10bc] ss:$24 sps:$4 sm:$0xff]  }
 0x463   :  { %7709 = vmatpush1.bf16.msra.mxu0 %v18893_v38  ;;  %v18935_v38 = vld [vmem:[#allocation8 + $0xdb8] ss:$24 sps:$4 sm:$0xff]  }
 0x464   :  { %7762 = vmatpush1.bf16.msra.mxu1 %v18896_v4  ;;  %7710 = vmatprep.subr.bf16.mxu0 %v18901_v0  ;;  %v18938_v4 = vld [vmem:[#allocation8 + $0x10b8] ss:$24 sps:$4 sm:$0xff]   ;;  %v18943_v0 = vld [vmem:[#allocation8 + $0xd8c] ss:$24 sps:$4 sm:$0xff]  }
 0x465   :  { %7763 = vmatprep.subr.bf16.mxu1 %v18904_v20  ;;  %v18946_v20 = vld [vmem:[#allocation8 + $0x108c] ss:$24 sps:$4 sm:$0xff]  }
 0x467   :  { %7711 = vmatpush2.bf16.msra.mxu0 %v18899_v10  ;;  %v18941_v10 = vld [vmem:[#allocation8 + $0xd88] ss:$24 sps:$4 sm:$0xff]  }
 0x468   :  { %7764 = vmatpush2.bf16.msra.mxu1 %v18902_v18  ;;  %7712 = vmatprep.subr.bf16.mxu0 %v18907_v39  ;;  %v18944_v18 = vld [vmem:[#allocation8 + $0x1088] ss:$24 sps:$4 sm:$0xff]   ;;  %v18949_v39 = vld [vmem:[#allocation8 + $0xd64] ss:$24 sps:$4 sm:$0xff]  }
 0x469   :  { %7765 = vmatprep.subr.bf16.mxu1 %v18910_v44  ;;  %v18952_v44 = vld [vmem:[#allocation8 + $0x1064] ss:$24 sps:$4 sm:$0xff]  }
 0x46b   :  { %7713 = vmatpush2.bf16.msra.mxu0 %v18905_v11  ;;  %v18947_v11 = vld [vmem:[#allocation8 + $0xd60] ss:$24 sps:$4 sm:$0xff]  }
 0x46c   :  { %7766 = vmatpush2.bf16.msra.mxu1 %v18908_v6  ;;  %7714 = vmatprep.subr.bf16.mxu0 %v18913_v37  ;;  %v18950_v6 = vld [vmem:[#allocation8 + $0x1060] ss:$24 sps:$4 sm:$0xff]   ;;  %v18955_v37 = vld [vmem:[#allocation8 + $0xd34] ss:$24 sps:$4 sm:$0xff]  }
 0x46d   :  { %7767 = vmatprep.subr.bf16.mxu1 %v18916_v46  ;;  %v18958_v46 = vld [vmem:[#allocation8 + $0x1034] ss:$24 sps:$4 sm:$0xff]  }
 0x46f   :  { %7715 = vmatpush2.bf16.msra.mxu0 %v18911_v9  ;;  %v18953_v9 = vld [vmem:[#allocation8 + $0xd30] ss:$24 sps:$4 sm:$0xff]  }
 0x470   :  { %7768 = vmatpush2.bf16.msra.mxu1 %v18914_v13  ;;  %7716 = vmatprep.subr.bf16.mxu0 %v18919_v48  ;;  %v18956_v13 = vld [vmem:[#allocation8 + $0x1030] ss:$24 sps:$4 sm:$0xff]   ;;  %v18961_v48 = vld [vmem:[#allocation8 + $0xd04] ss:$24 sps:$4 sm:$0xff]  }
 0x471   :  { %7769 = vmatprep.subr.bf16.mxu1 %v18922_v42  ;;  %v18964_v42 = vld [vmem:[#allocation8 + $0x1004] ss:$24 sps:$4 sm:$0xff]  }
 0x473   :  { %7717 = vmatpush2.bf16.msra.mxu0 %v18917_v26  ;;  %v18959_v26 = vld [vmem:[#allocation8 + $0xd00] ss:$24 sps:$4 sm:$0xff]  }
 0x474   :  { %7770 = vmatpush2.bf16.msra.mxu1 %v18920_v36  ;;  %7718 = vmatprep.subr.bf16.mxu0 %v18925_v61  ;;  %v18962_v36 = vld [vmem:[#allocation8 + $0x1000] ss:$24 sps:$4 sm:$0xff]   ;;  %v18967_v61 = vld [vmem:[#allocation8 + $0xcd4] ss:$24 sps:$4 sm:$0xff]  }
 0x475   :  { %7771 = vmatprep.subr.bf16.mxu1 %v18928_v54  ;;  %v18970_v54 = vld [vmem:[#allocation8 + $0xfd4] ss:$24 sps:$4 sm:$0xff]  }
 0x477   :  { %7719 = vmatpush2.bf16.msra.mxu0 %v18923_v40  ;;  %v18965_v40 = vld [vmem:[#allocation8 + $0xcd0] ss:$24 sps:$4 sm:$0xff]  }
 0x478   :  { %7772 = vmatpush2.bf16.msra.mxu1 %v18926_v28  ;;  %7720 = vmatprep.subr.bf16.mxu0 %v18931_v49  ;;  %v18968_v28 = vld [vmem:[#allocation8 + $0xfd0] ss:$24 sps:$4 sm:$0xff]   ;;  %v18973_v49 = vld [vmem:[#allocation8 + $0xca4] ss:$24 sps:$4 sm:$0xff]  }
 0x479   :  { %7773 = vmatprep.subr.bf16.mxu1 %v18934_v17  ;;  %v18976_v17 = vld [vmem:[#allocation8 + $0xfa4] ss:$24 sps:$4 sm:$0xff]  }
 0x47b   :  { %7721 = vmatpush2.bf16.msra.mxu0 %v18929_v33  ;;  %v18971_v33 = vld [vmem:[#allocation8 + $0xca0] ss:$24 sps:$4 sm:$0xff]  }
 0x47c   :  { %7774 = vmatpush2.bf16.msra.mxu1 %v18932_v3  ;;  %7722 = vmatprep.subr.bf16.mxu0 %v18937_v57  ;;  %v18974_v3 = vld [vmem:[#allocation8 + $0xfa0] ss:$24 sps:$4 sm:$0xff]   ;;  %v18979_v57 = vld [vmem:[#allocation8 + $0xc74] ss:$24 sps:$4 sm:$0xff]  }
 0x47d   :  { %7775 = vmatprep.subr.bf16.mxu1 %v18940_v23  ;;  %v18982_v23 = vld [vmem:[#allocation8 + $0xf74] ss:$24 sps:$4 sm:$0xff]  }
 0x47f   :  { %7723 = vmatpush2.bf16.msra.mxu0 %v18935_v38  ;;  %v18985_v38 = vld [vmem:[#allocation8 + $0xc44] ss:$24 sps:$4 sm:$0xff]  }
 0x480   :  { %7776 = vmatpush2.bf16.msra.mxu1 %v18938_v4  ;;  %7724 = vmatprep.subr.bf16.mxu0 %v18943_v0  ;;  %v18988_v4 = vld [vmem:[#allocation8 + $0xf44] ss:$24 sps:$4 sm:$0xff]   ;;  %v18983_v0 = vld [vmem:[#allocation8 + $0xc40] ss:$24 sps:$4 sm:$0xff]  }
 0x481   :  { %7777 = vmatprep.subr.bf16.mxu1 %v18946_v20  ;;  %v18986_v20 = vld [vmem:[#allocation8 + $0xf40] ss:$24 sps:$4 sm:$0xff]  }
 0x483   :  { %7725 = vmatpush2.bf16.msra.mxu0 %v18941_v10  ;;  %v18991_v10 = vld [vmem:[#allocation8 + $0xc14] ss:$24 sps:$4 sm:$0xff]  }
 0x484   :  { %7778 = vmatpush2.bf16.msra.mxu1 %v18944_v18  ;;  %7800 = vmatprep.subr.bf16.mxu0 %v18949_v39  ;;  %v18994_v18 = vld [vmem:[#allocation8 + $0xf14] ss:$24 sps:$4 sm:$0xff]   ;;  %v18989_v39 = vld [vmem:[#allocation8 + $0xc10] ss:$24 sps:$4 sm:$0xff]  }
 0x485   :  { %7853 = vmatprep.subr.bf16.mxu1 %v18952_v44  ;;  %v18992_v44 = vld [vmem:[#allocation8 + $0xf10] ss:$24 sps:$4 sm:$0xff]  }
 0x486   :  { %7727 = vmatmul.mubr.bf16.vlgmr.msra.gmra.mxu0 %v21356_v58 }
 0x487   :  { %7780 = vmatmul.mubr.bf16.vlgmr.msra.gmra.mxu1 %v21379_v34  ;;  %7736 = vmatprep.mubr.bf16.mxu0 %v21414_v45 }
 0x488   :  { %7789 = vmatprep.mubr.bf16.mxu1 %v21416_v29  ;;  %7801 = vmatpush1.bf16.msra.mxu0 %v18947_v11  ;;  %v18997_v11 = vld [vmem:[#allocation8 + $0xee4] ss:$24 sps:$4 sm:$0xff]  }
 0x489   :  { %7854 = vmatpush1.bf16.msra.mxu1 %v18950_v6  ;;  %7802 = vmatprep.subr.bf16.mxu0 %v18955_v37  ;;  %v19000_v6 = vld [vmem:[#allocation8 + $0x11e4] ss:$24 sps:$4 sm:$0xff]   ;;  %v18995_v37 = vld [vmem:[#allocation8 + $0xee0] ss:$24 sps:$4 sm:$0xff]  }
 0x48a   :  { %7855 = vmatprep.subr.bf16.mxu1 %v18958_v46  ;;  %v18998_v46 = vld [vmem:[#allocation8 + $0x11e0] ss:$24 sps:$4 sm:$0xff]  }
 0x48c   :  { %7803 = vmatpush1.bf16.msra.mxu0 %v18953_v9  ;;  %v19003_v9 = vld [vmem:[#allocation8 + $0xeb4] ss:$24 sps:$4 sm:$0xff]  }
 0x48d   :  { %7856 = vmatpush1.bf16.msra.mxu1 %v18956_v13  ;;  %7804 = vmatprep.subr.bf16.mxu0 %v18961_v48  ;;  %v19006_v13 = vld [vmem:[#allocation8 + $0x11b4] ss:$24 sps:$4 sm:$0xff]   ;;  %v19001_v48 = vld [vmem:[#allocation8 + $0xeb0] ss:$24 sps:$4 sm:$0xff]  }
 0x48e   :  { %7737 = vmatmul.mubr.bf16.gmra.mxu0 %v21402_v47  ;;  %7857 = vmatprep.subr.bf16.mxu1 %v18964_v42  ;;  %v19004_v42 = vld [vmem:[#allocation8 + $0x11b0] ss:$24 sps:$4 sm:$0xff]  }
 0x48f   :  { %7790 = vmatmul.mubr.bf16.gmra.mxu1 %v21412_v41  ;;  %7832 = vmatprep.mubr.bf16.mxu0 %v21344_v51  ;;  %v18977_v51 = vld [vmem:[#allocation8 + $0xc70] ss:$24 sps:$4 sm:$0xff]  }
 0x490   :  { %7805 = vmatpush1.bf16.msra.mxu0 %v18959_v26  ;;  %7885 = vmatprep.mubr.bf16.mxu1 %v21360_v43  ;;  %v18980_v43 = vld [vmem:[#allocation8 + $0xf70] ss:$24 sps:$4 sm:$0xff]   ;;  %v19009_v26 = vld [vmem:[#allocation8 + $0xe84] ss:$24 sps:$4 sm:$0xff]  }
 0x491   :  { %7858 = vmatpush1.bf16.msra.mxu1 %v18962_v36  ;;  %7806 = vmatprep.subr.bf16.mxu0 %v18967_v61  ;;  %v19012_v36 = vld [vmem:[#allocation8 + $0x1184] ss:$24 sps:$4 sm:$0xff]   ;;  %v19007_v61 = vld [vmem:[#allocation8 + $0xe80] ss:$24 sps:$4 sm:$0xff]  }
 0x492   :  { %7859 = vmatprep.subr.bf16.mxu1 %v18970_v54  ;;  %v19010_v54 = vld [vmem:[#allocation8 + $0x1180] ss:$24 sps:$4 sm:$0xff]  }
 0x494   :  { %7807 = vmatpush1.bf16.msra.mxu0 %v18965_v40  ;;  %v19015_v40 = vld [vmem:[#allocation8 + $0xe54] ss:$24 sps:$4 sm:$0xff]  }
 0x495   :  { %7860 = vmatpush1.bf16.msra.mxu1 %v18968_v28  ;;  %7808 = vmatprep.subr.bf16.mxu0 %v18973_v49  ;;  %v19018_v28 = vld [vmem:[#allocation8 + $0x1154] ss:$24 sps:$4 sm:$0xff]   ;;  %v19013_v49 = vld [vmem:[#allocation8 + $0xe50] ss:$24 sps:$4 sm:$0xff]  }
 0x496   :  { %7861 = vmatprep.subr.bf16.mxu1 %v18976_v17  ;;  %v19016_v17 = vld [vmem:[#allocation8 + $0x1150] ss:$24 sps:$4 sm:$0xff]  }
 0x498   :  { %7809 = vmatpush1.bf16.msra.mxu0 %v18971_v33  ;;  %v19021_v33 = vld [vmem:[#allocation8 + $0xe24] ss:$24 sps:$4 sm:$0xff]  }
 0x499   :  { %7862 = vmatpush1.bf16.msra.mxu1 %v18974_v3  ;;  %7810 = vmatprep.subr.bf16.mxu0 %v18979_v57  ;;  %v19024_v3 = vld [vmem:[#allocation8 + $0x1124] ss:$24 sps:$4 sm:$0xff]   ;;  %v19019_v57 = vld [vmem:[#allocation8 + $0xe20] ss:$24 sps:$4 sm:$0xff]  }
 0x49a   :  { %7863 = vmatprep.subr.bf16.mxu1 %v18982_v23  ;;  %v19022_v23 = vld [vmem:[#allocation8 + $0x1120] ss:$24 sps:$4 sm:$0xff]  }
 0x49c   :  { %7811 = vmatpush1.bf16.msra.mxu0 %v18977_v51  ;;  %v19027_v51 = vld [vmem:[#allocation8 + $0xdf4] ss:$24 sps:$4 sm:$0xff]  }
 0x49d   :  { %7864 = vmatpush1.bf16.msra.mxu1 %v18980_v43  ;;  %7812 = vmatprep.subr.bf16.mxu0 %v18985_v38  ;;  %v19030_v43 = vld [vmem:[#allocation8 + $0x10f4] ss:$24 sps:$4 sm:$0xff]   ;;  %v19025_v38 = vld [vmem:[#allocation8 + $0xdf0] ss:$24 sps:$4 sm:$0xff]  }
 0x49e   :  { %7865 = vmatprep.subr.bf16.mxu1 %v18988_v4  ;;  %v19028_v4 = vld [vmem:[#allocation8 + $0x10f0] ss:$24 sps:$4 sm:$0xff]  }
 0x4a0   :  { %7813 = vmatpush1.bf16.msra.mxu0 %v18983_v0  ;;  %v19033_v0 = vld [vmem:[#allocation8 + $0xdc4] ss:$24 sps:$4 sm:$0xff]  }
 0x4a1   :  { %7866 = vmatpush1.bf16.msra.mxu1 %v18986_v20  ;;  %7814 = vmatprep.subr.bf16.mxu0 %v18991_v10  ;;  %v19036_v20 = vld [vmem:[#allocation8 + $0x10c4] ss:$24 sps:$4 sm:$0xff]   ;;  %v19031_v10 = vld [vmem:[#allocation8 + $0xdc0] ss:$24 sps:$4 sm:$0xff]  }
 0x4a2   :  { %7867 = vmatprep.subr.bf16.mxu1 %v18994_v18  ;;  %v19034_v18 = vld [vmem:[#allocation8 + $0x10c0] ss:$24 sps:$4 sm:$0xff]  }
 0x4a4   :  { %7815 = vmatpush1.bf16.msra.mxu0 %v18989_v39  ;;  %v19039_v39 = vld [vmem:[#allocation8 + $0xd94] ss:$24 sps:$4 sm:$0xff]  }
 0x4a5   :  { %7868 = vmatpush1.bf16.msra.mxu1 %v18992_v44  ;;  %7816 = vmatprep.subr.bf16.mxu0 %v18997_v11  ;;  %v19042_v44 = vld [vmem:[#allocation8 + $0x1094] ss:$24 sps:$4 sm:$0xff]   ;;  %v19037_v11 = vld [vmem:[#allocation8 + $0xd90] ss:$24 sps:$4 sm:$0xff]  }
 0x4a6   :  { %7869 = vmatprep.subr.bf16.mxu1 %v19000_v6  ;;  %v19040_v6 = vld [vmem:[#allocation8 + $0x1090] ss:$24 sps:$4 sm:$0xff]  }
 0x4a8   :  { %7817 = vmatpush2.bf16.msra.mxu0 %v18995_v37  ;;  %v8082_v37 = vld [vmem:[#allocation13 + $0x1c0] sm:$0xff] }
 0x4a9   :  { %7870 = vmatpush2.bf16.msra.mxu1 %v18998_v46  ;;  %7818 = vmatprep.subr.bf16.mxu0 %v19003_v9  ;;  %v8086_v46 = vld [vmem:[#allocation13 + $0x1e0] sm:$0xff] }
 0x4aa   :  { %7871 = vmatprep.subr.bf16.mxu1 %v19006_v13  ;;  %v8074_v9 = vld [vmem:[#allocation13 + $0x180] sm:$0xff]  ;;  %v16743_v13 = vcombine.low %v8082_v37, %v8086_v46 }
 0x4ac   :  { %7819 = vmatpush2.bf16.msra.mxu0 %v19001_v48  ;;  %v16744_v48 = vcombine.high %v8082_v37, %v8086_v46  ;;  %v8042_v46 = vld [vmem:[#allocation13 + $0x80] sm:$0xff] }
 0x4ad   :  { %7872 = vmatpush2.bf16.msra.mxu1 %v19004_v42  ;;  %7820 = vmatprep.subr.bf16.mxu0 %v19009_v26  ;;  %v8078_v42 = vld [vmem:[#allocation13 + $0x1a0] sm:$0xff] }
 0x4ae   :  { %7873 = vmatprep.subr.bf16.mxu1 %v19012_v36  ;;  %v8210_v26 = vld [vmem:[#allocation13 + $0x5c0] sm:$0xff] }
 0x4af   :  { %v8214_v36 = vld [vmem:[#allocation13 + $0x5e0] sm:$0xff] }
 0x4b0   :  { %7821 = vmatpush2.bf16.msra.mxu0 %v19007_v61  ;;  %v16736_v61 = vcombine.high %v8074_v9, %v8078_v42 }
 0x4b1   :  { %7874 = vmatpush2.bf16.msra.mxu1 %v19010_v54  ;;  %7822 = vmatprep.subr.bf16.mxu0 %v19015_v40  ;;  %v16872_v54 = vcombine.high %v8210_v26, %v8214_v36  ;;  %v8070_v40 = vld [vmem:[#allocation13 + $0x160] sm:$0xff] }
 0x4b2   :  { %7875 = vmatprep.subr.bf16.mxu1 %v19018_v28  ;;  %v8194_v28 = vld [vmem:[#allocation13 + $0x540] sm:$0xff] }
 0x4b4   :  { %7823 = vmatpush2.bf16.msra.mxu0 %v19013_v49  ;;  %v8198_v49 = vld [vmem:[#allocation13 + $0x560] sm:$0xff] }
 0x4b5   :  { %7876 = vmatpush2.bf16.msra.mxu1 %v19016_v17  ;;  %7824 = vmatprep.subr.bf16.mxu0 %v19021_v33 }
 0x4b6   :  { %7877 = vmatprep.subr.bf16.mxu1 %v19024_v3  ;;  %v8058_v3 = vld [vmem:[#allocation13 + $0x100] sm:$0xff] }
 0x4b8   :  { %7825 = vmatpush2.bf16.msra.mxu0 %v19019_v57  ;;  %v8062_v57 = vld [vmem:[#allocation13 + $0x120] sm:$0xff] }
 0x4b9   :  { %7878 = vmatpush2.bf16.msra.mxu1 %v19022_v23  ;;  %7826 = vmatprep.subr.bf16.mxu0 %v19027_v51  ;;  %v16856_v23 = vcombine.high %v8194_v28, %v8198_v49  ;;  %v8186_v51 = vld [vmem:[#allocation13 + $0x500] sm:$0xff] }
 0x4ba   :  { %7879 = vmatprep.subr.bf16.mxu1 %v19030_v43  ;;  %v8190_v43 = vld [vmem:[#allocation13 + $0x520] sm:$0xff] }
 0x4bb   :  { %v16847_v37 = vcombine.low %v8186_v51, %v8190_v43 }
 0x4bc   :  { %7827 = vmatpush2.bf16.msra.mxu0 %v19025_v38 }
 0x4bd   :  { %7880 = vmatpush2.bf16.msra.mxu1 %v19028_v4  ;;  %7828 = vmatprep.subr.bf16.mxu0 %v19033_v0  ;;  %v16720_v4 = vcombine.high %v8058_v3, %v8062_v57  ;;  %v16855_v0 = vcombine.low %v8194_v28, %v8198_v49 }
 0x4be   :  { %7881 = vmatprep.subr.bf16.mxu1 %v19036_v20  ;;  %v8050_v20 = vld [vmem:[#allocation13 + $0xc0] sm:$0xff] }
 0x4c0   :  { %7829 = vmatpush2.bf16.msra.mxu0 %v19031_v10  ;;  %v8054_v10 = vld [vmem:[#allocation13 + $0xe0] sm:$0xff] }
 0x4c1   :  { %7882 = vmatpush2.bf16.msra.mxu1 %v19034_v18  ;;  %7830 = vmatprep.subr.bf16.mxu0 %v19039_v39  ;;  %v16848_v18 = vcombine.high %v8186_v51, %v8190_v43  ;;  %v8178_v39 = vld [vmem:[#allocation13 + $0x4c0] sm:$0xff] }
 0x4c2   :  { %7883 = vmatprep.subr.bf16.mxu1 %v19042_v44  ;;  %v8182_v44 = vld [vmem:[#allocation13 + $0x4e0] sm:$0xff] }
 0x4c3   :  { %v8154_v51 = vld [vmem:[#allocation13 + $0x400] sm:$0xff] }
 0x4c4   :  { %7831 = vmatpush2.bf16.msra.mxu0 %v19037_v11  ;;  %v16719_v11 = vcombine.low %v8058_v3, %v8062_v57  ;;  %v8030_v3 = vld [vmem:[#allocation13 + $0x20] sm:$0xff] }
 0x4c5   :  { %7884 = vmatpush2.bf16.msra.mxu1 %v19040_v6  ;;  %11140 = vmatprep.subr.bf16.mxu0 %v16744_v48  ;;  %v16712_v6 = vcombine.high %v8050_v20, %v8054_v10  ;;  %v8170_v48 = vld [vmem:[#allocation13 + $0x480] sm:$0xff] }
 0x4c6   :  { %11181 = vmatprep.subr.bf16.mxu1 %v16872_v54  ;;  %v8034_v54 = vld [vmem:[#allocation13 + $0x40] sm:$0xff] }
 0x4c7   :  { %7833 = vmatmul.mubr.bf16.vlgmr.msra.gmra.mxu0 %v21356_v58  ;;  %v16871_v58 = vcombine.low %v8210_v26, %v8214_v36  ;;  %v16711_v26 = vcombine.low %v8050_v20, %v8054_v10  ;;  %v8158_v43 = vld [vmem:[#allocation13 + $0x420] sm:$0xff] }
 0x4c8   :  { %7886 = vmatmul.mubr.bf16.vlgmr.msra.gmra.mxu1 %v21379_v34  ;;  %7842 = vmatprep.mubr.bf16.mxu0 %v21414_v45  ;;  %v8066_v34 = vld [vmem:[#allocation13 + $0x140] sm:$0xff] }
 0x4c9   :  { %7895 = vmatprep.mubr.bf16.mxu1 %v21416_v29  ;;  %v8202_v45 = vld [vmem:[#allocation13 + $0x580] sm:$0xff]  ;;  %11141 = vmatpush1.bf16.msra.mxu0 %v16743_v13  ;;  %v16728_v17 = vcombine.high %v8066_v34, %v8070_v40  ;;  %v16727_v38 = vcombine.low %v8066_v34, %v8070_v40  ;;  %v16840_v13 = vcombine.high %v8178_v39, %v8182_v44 }
 0x4ca   :  { %v8206_v29 = vld [vmem:[#allocation13 + $0x5a0] sm:$0xff]  ;;  %11142 = vmatprep.subr.bf16.mxu0 %v16736_v61  ;;  %11182 = vmatpush1.bf16.msra.mxu1 %v16871_v58  ;;  %v16839_v61 = vcombine.low %v8178_v39, %v8182_v44  ;;  %v21570_v58 = vpop.f32.mrf.mxu0  ;;  %v16816_v39 = vcombine.high %v8154_v51, %v8158_v43 }
 0x4cb   :  { %v16863_v33 = vcombine.low %v8202_v45, %v8206_v29  ;;  %v8038_v34 = vld [vmem:[#allocation13 + $0x60] sm:$0xff] }
 0x4cc   :  { %v16696_v28 = vcombine.high %v8034_v54, %v8038_v34  ;;  %v8146_v10 = vld [vmem:[#allocation13 + $0x3c0] sm:$0xff] }
 0x4cf   :  { %7843 = vmatmul.mubr.bf16.gmra.mxu0 %v21402_v47  ;;  %v16735_v47 = vcombine.low %v8074_v9, %v8078_v42  ;;  %v8046_v9 = vld [vmem:[#allocation13 + $0xa0] sm:$0xff] }
 0x4d0   :  { %7896 = vmatmul.mubr.bf16.gmra.mxu1 %v21412_v41  ;;  %v16864_v41 = vcombine.high %v8202_v45, %v8206_v29  ;;  %v8174_v42 = vld [vmem:[#allocation13 + $0x4a0] sm:$0xff]  ;;  %v16704_v36 = vcombine.high %v8042_v46, %v8046_v9  ;;  %v21572_v45 = vpop.f32.mrf.mxu1 }
 0x4d1   :  { %11143 = vmatpush1.bf16.msra.mxu0 %v16735_v47  ;;  %v16832_v40 = vcombine.high %v8170_v48, %v8174_v42  ;;  %v8162_v29 = vld [vmem:[#allocation13 + $0x440] sm:$0xff]  ;;  %v16831_v49 = vcombine.low %v8170_v48, %v8174_v42 }
 0x4d2   :  { %11183 = vmatprep.subr.bf16.mxu1 %v16864_v41  ;;  %11144 = vmatprep.subr.bf16.mxu0 %v16728_v17  ;;  %v8166_v47 = vld [vmem:[#allocation13 + $0x460] sm:$0xff]  ;;  %v16703_v41 = vcombine.low %v8042_v46, %v8046_v9  ;;  %v21574_v17 = vpop.f32.mrf.mxu0  ;;  %v16815_v9 = vcombine.low %v8154_v51, %v8158_v43 }
 0x4d3   :  { %11184 = vmatpush1.bf16.msra.mxu1 %v16863_v33  ;;  %v8026_v33 = vld [vmem:[#allocation13] sm:$0xff]  ;;  %v16824_v57 = vcombine.high %v8162_v29, %v8166_v47 }
 0x4d4   :  { %11185 = vmatprep.subr.bf16.mxu1 %v16856_v23  ;;  %v21576_v23 = vpop.f32.mrf.mxu1  ;;  %v21578_v20 = vpop.f32.mrf.mxu0  ;;  %v8138_v48 = vld [vmem:[#allocation13 + $0x380] sm:$0xff] }
 0x4d5   :  { %11145 = vmatpush1.bf16.msra.mxu0 %v16727_v38  ;;  %v16695_v38 = vcombine.low %v8034_v54, %v8038_v34  ;;  %v8142_v42 = vld [vmem:[#allocation13 + $0x3a0] sm:$0xff] }
 0x4d6   :  { %11146 = vmatprep.subr.bf16.mxu0 %v16720_v4  ;;  %v16688_v4 = vcombine.high %v8026_v33, %v8030_v3  ;;  %v21580_v44 = vpop.f32.mrf.mxu1  ;;  %v16800_v54 = vcombine.high %v8138_v48, %v8142_v42 }
 0x4d7   :  { %11186 = vmatpush1.bf16.msra.mxu1 %v16855_v0  ;;  %v16823_v0 = vcombine.low %v8162_v29, %v8166_v47  ;;  %v16799_v47 = vcombine.low %v8138_v48, %v8142_v42 }
 0x4d8   :  { %11187 = vmatprep.subr.bf16.mxu1 %v16848_v18  ;;  %v8150_v18 = vld [vmem:[#allocation13 + $0x3e0] sm:$0xff] }
 0x4d9   :  { %11147 = vmatpush1.bf16.msra.mxu0 %v16719_v11  ;;  %v8274_v11 = vld [vmem:[#allocation13 + $0x7c0] sm:$0xff]  ;;  %v16808_v46 = vcombine.high %v8146_v10, %v8150_v18 }
 0x4da   :  { %11148 = vmatprep.subr.bf16.mxu0 %v16712_v6  ;;  %v8278_v6 = vld [vmem:[#allocation13 + $0x7e0] sm:$0xff] }
 0x4db   :  { %11188 = vmatpush1.bf16.msra.mxu1 %v16847_v37  ;;  %v16687_v37 = vcombine.low %v8026_v33, %v8030_v3  ;;  %v16935_v34 = vcombine.low %v8274_v11, %v8278_v6  ;;  %v8130_v33 = vld [vmem:[#allocation13 + $0x340] sm:$0xff] }
 0x4dc   :  { %11189 = vmatprep.subr.bf16.mxu1 %v16840_v13  ;;  %v21582_v13 = vpop.f32.mrf.mxu0  ;;  %v8134_v3 = vld [vmem:[#allocation13 + $0x360] sm:$0xff] }
 0x4dd   :  { %11149 = vmatpush1.bf16.msra.mxu0 %v16711_v26  ;;  %v16936_v26 = vcombine.high %v8274_v11, %v8278_v6  ;;  %v16792_v43 = vcombine.high %v8130_v33, %v8134_v3  ;;  %v8126_v11 = vld [vmem:[#allocation13 + $0x320] sm:$0xff] }
 0x4de   :  { %11150 = vmatprep.subr.bf16.mxu0 %v16704_v36  ;;  %v21584_v36 = vpop.f32.mrf.mxu1  ;;  %v8258_v6 = vld [vmem:[#allocation13 + $0x740] sm:$0xff] }
 0x4df   :  { %11190 = vmatpush1.bf16.msra.mxu1 %v16839_v61  ;;  %22459 = vst [vmem:[#allocation89_spill] sm:$0xff] %v21584_v36  ;;  %v16807_v61 = vcombine.low %v8146_v10, %v8150_v18 }
 0x4e0   :  { %11191 = vmatprep.subr.bf16.mxu1 %v16832_v40  ;;  %v21586_v40 = vpop.f32.mrf.mxu0  ;;  %v21588_v29 = vpop.f32.mrf.mxu1 }
 0x4e1   :  { %11151 = vmatpush1.bf16.msra.mxu0 %v16703_v41 }
 0x4e2   :  { %11152 = vmatprep.subr.bf16.mxu0 %v16696_v28  ;;  %v21590_v41 = vpop.f32.mrf.mxu0  ;;  %v21592_v28 = vpop.f32.mrf.mxu1 }
 0x4e3   :  { %11192 = vmatpush1.bf16.msra.mxu1 %v16831_v49 }
 0x4e4   :  { %11193 = vmatprep.subr.bf16.mxu1 %v16824_v57  ;;  %v21594_v49 = vpop.f32.mrf.mxu0  ;;  %v8266_v57 = vld [vmem:[#allocation13 + $0x780] sm:$0xff]  ;;  %v21596_v51 = vpop.f32.mrf.mxu1 }
 0x4e5   :  { %11153 = vmatpush1.bf16.msra.mxu0 %v16695_v38  ;;  %v8270_v38 = vld [vmem:[#allocation13 + $0x7a0] sm:$0xff] }
 0x4e6   :  { %11154 = vmatprep.subr.bf16.mxu0 %v16688_v4  ;;  %v16791_v4 = vcombine.low %v8130_v33, %v8134_v3  ;;  %v16928_v10 = vcombine.high %v8266_v57, %v8270_v38  ;;  %v21598_v18 = vpop.f32.mrf.mxu0  ;;  %v8250_v33 = vld [vmem:[#allocation13 + $0x700] sm:$0xff] }
 0x4e7   :  { %11194 = vmatpush1.bf16.msra.mxu1 %v16823_v0  ;;  %v16927_v0 = vcombine.low %v8266_v57, %v8270_v38  ;;  %v8254_v57 = vld [vmem:[#allocation13 + $0x720] sm:$0xff] }
 0x4e8   :  { %11195 = vmatprep.subr.bf16.mxu1 %v16816_v39  ;;  %v8122_v39 = vld [vmem:[#allocation13 + $0x300] sm:$0xff]  ;;  %v21602_v48 = vpop.f32.mrf.mxu0 }
 0x4e9   :  { %11155 = vmatpush1.bf16.msra.mxu0 %v16687_v37  ;;  %v21600_v37 = vpop.f32.mrf.mxu1  ;;  %v16783_v42 = vcombine.low %v8122_v39, %v8126_v11 }
 0x4ea   :  { %11156 = vmatprep.subr.bf16.mxu0 %v16808_v46  ;;  %22460 = vst [vmem:[#allocation45_spill] sm:$0xff] %v21600_v37  ;;  %v16784_v46 = vcombine.high %v8122_v39, %v8126_v11  ;;  %v8106_v39 = vld [vmem:[#allocation13 + $0x280] sm:$0xff] }
 0x4eb   :  { %11196 = vmatpush1.bf16.msra.mxu1 %v16815_v9  ;;  %v8262_v9 = vld [vmem:[#allocation13 + $0x760] sm:$0xff] }
 0x4ec   :  { %11197 = vmatprep.subr.bf16.mxu1 %v16936_v26  ;;  %v16919_v26 = vcombine.low %v8258_v6, %v8262_v9  ;;  %v8110_v11 = vld [vmem:[#allocation13 + $0x2a0] sm:$0xff] }
 0x4ed   :  { %11157 = vmatpush2.bf16.msra.mxu0 %v16807_v61  ;;  %v16920_v61 = vcombine.high %v8258_v6, %v8262_v9  ;;  %v8242_v6 = vld [vmem:[#allocation13 + $0x6c0] sm:$0xff] }
 0x4ee   :  { %11158 = vmatprep.subr.bf16.mxu0 %v16800_v54  ;;  %v21604_v54 = vpop.f32.mrf.mxu1  ;;  %v8246_v9 = vld [vmem:[#allocation13 + $0x6e0] sm:$0xff] }
 0x4ef   :  { %11198 = vmatpush2.bf16.msra.mxu1 %v16935_v34  ;;  %22461 = vst [vmem:[#allocation92_spill] sm:$0xff] %v21604_v54  ;;  %v8114_v34 = vld [vmem:[#allocation13 + $0x2c0] sm:$0xff]  ;;  %v16904_v50 = vcombine.high %v8242_v6, %v8246_v9 }
 0x4f0   :  { %11199 = vmatprep.subr.bf16.mxu1 %v16928_v10  ;;  %v21608_v10 = vpop.f32.mrf.mxu1 }
 0x4f1   :  { %11159 = vmatpush2.bf16.msra.mxu0 %v16799_v47  ;;  %v8118_v47 = vld [vmem:[#allocation13 + $0x2e0] sm:$0xff]  ;;  %22462 = vst [vmem:[#allocation46_spill] sm:$0xff] %v21608_v10 }
 0x4f2   :  { %11160 = vmatprep.subr.bf16.mxu0 %v16792_v43  ;;  %v16776_v3 = vcombine.high %v8114_v34, %v8118_v47  ;;  %v21606_v43 = vpop.f32.mrf.mxu0  ;;  %v16775_v38 = vcombine.low %v8114_v34, %v8118_v47  ;;  %v21612_v59 = vpop.f32.mrf.mxu1  ;;  %v8098_v34 = vld [vmem:[#allocation13 + $0x240] sm:$0xff] }
 0x4f3   :  { %11200 = vmatpush2.bf16.msra.mxu1 %v16927_v0  ;;  %v16912_v0 = vcombine.high %v8250_v33, %v8254_v57  ;;  %22463 = vst [vmem:[#allocation93_spill] sm:$0xff] %v21612_v59  ;;  %v8102_v47 = vld [vmem:[#allocation13 + $0x260] sm:$0xff] }
 0x4f4   :  { %11201 = vmatprep.subr.bf16.mxu1 %v16920_v61  ;;  %v16903_v61 = vcombine.low %v8242_v6, %v8246_v9  ;;  %v21616_v10 = vpop.f32.mrf.mxu1 }
 0x4f5   :  { %11161 = vmatpush2.bf16.msra.mxu0 %v16791_v4  ;;  %v16911_v4 = vcombine.low %v8250_v33, %v8254_v57  ;;  %v8234_v33 = vld [vmem:[#allocation13 + $0x680] sm:$0xff]  ;;  %22464 = vst [vmem:[#allocation53_spill] sm:$0xff] %v21616_v10  ;;  %v6236_v10 = vadd.f32 %v21574_v17, %v21471_v24 }
 0x4f6   :  { %11162 = vmatprep.subr.bf16.mxu0 %v16784_v46  ;;  %v16768_v46 = vcombine.high %v8106_v39, %v8110_v11  ;;  %v8238_v57 = vld [vmem:[#allocation13 + $0x6a0] sm:$0xff]  ;;  %v21620_v54 = vpop.f32.mrf.mxu1 }
 0x4f7   :  { %11202 = vmatpush2.bf16.msra.mxu1 %v16919_v26  ;;  %v16767_v26 = vcombine.low %v8106_v39, %v8110_v11  ;;  %v16896_v30 = vcombine.high %v8234_v33, %v8238_v57  ;;  %v8090_v39 = vld [vmem:[#allocation13 + $0x200] sm:$0xff]  ;;  %22466 = vst [vmem:[#allocation54_spill] sm:$0xff] %v21620_v54 }
 0x4f8   :  { %11203 = vmatprep.subr.bf16.mxu1 %v16912_v0  ;;  %v16895_v0 = vcombine.low %v8234_v33, %v8238_v57  ;;  %v8094_v11 = vld [vmem:[#allocation13 + $0x220] sm:$0xff] }
 0x4f9   :  { %11163 = vmatpush2.bf16.msra.mxu0 %v16783_v42  ;;  %v21610_v42 = vpop.f32.mrf.mxu0  ;;  %v16752_v6 = vcombine.high %v8090_v39, %v8094_v11 }
 0x4fa   :  { %11164 = vmatprep.subr.bf16.mxu0 %v16776_v3  ;;  %v16760_v3 = vcombine.high %v8098_v34, %v8102_v47 }
 0x4fb   :  { %11204 = vmatpush2.bf16.msra.mxu1 %v16911_v4  ;;  %v16759_v4 = vcombine.low %v8098_v34, %v8102_v47  ;;  %v8218_v34 = vld [vmem:[#allocation13 + $0x600] sm:$0xff] }
 0x4fc   :  { %11205 = vmatprep.subr.bf16.mxu1 %v16904_v50  ;;  %v8226_v50 = vld [vmem:[#allocation13 + $0x640] sm:$0xff] }
 0x4fd   :  { %11165 = vmatpush2.bf16.msra.mxu0 %v16775_v38  ;;  %v21614_v38 = vpop.f32.mrf.mxu0  ;;  %v8222_v47 = vld [vmem:[#allocation13 + $0x620] sm:$0xff] }
 0x4fe   :  { %11166 = vmatprep.subr.bf16.mxu0 %v16768_v46  ;;  %v8230_v46 = vld [vmem:[#allocation13 + $0x660] sm:$0xff]  ;;  %v16880_v33 = vcombine.high %v8218_v34, %v8222_v47 }
 0x4ff   :  { %11206 = vmatpush2.bf16.msra.mxu1 %v16903_v61  ;;  %v21618_v9 = vpop.f32.mrf.mxu0  ;;  %v16887_v61 = vcombine.low %v8226_v50, %v8230_v46  ;;  %v16888_v59 = vcombine.high %v8226_v50, %v8230_v46  ;;  %v21636_v50 = vld [vmem:[#allocation13 + $0xde0] sm:$0xff] }
 0x500   :  { %11207 = vmatprep.subr.bf16.mxu1 %v16896_v30  ;;  %22465 = vst [vmem:[#allocation100_spill] sm:$0xff] %v21618_v9  ;;  %v21622_v30 = vld [vmem:[#allocation13 + $0x9c0] sm:$0xff]  ;;  %22472 = vst [vmem:[#allocation57_spill] sm:$0xff] %v21636_v50 }
 0x501   :  { %11167 = vmatpush2.bf16.msra.mxu0 %v16767_v26  ;;  %v16751_v26 = vcombine.low %v8090_v39, %v8094_v11  ;;  %22467 = vst [vmem:[#allocation101_spill] sm:$0xff] %v21622_v30  ;;  %v21626_v57 = vpop.f32.mrf.mxu0  ;;  %v21632_v11 = vpop.f32.mrf.mxu1 }
 0x502   :  { %11168 = vmatprep.subr.bf16.mxu0 %v16760_v3  ;;  %v21624_v3 = vld [vmem:[#allocation13 + $0x9e0] sm:$0xff]  ;;  %22469 = vst [vmem:[#allocation102_spill] sm:$0xff] %v21626_v57  ;;  %22470 = vst [vmem:[#allocation56_spill] sm:$0xff] %v21632_v11 }
 0x503   :  { %11208 = vmatpush2.bf16.msra.mxu1 %v16895_v0  ;;  %22468 = vst [vmem:[#allocation55_spill] sm:$0xff] %v21624_v3  ;;  %v17000_v39 = vcombine.high %v21622_v30, %v21624_v3 }
 0x504   :  { %11209 = vmatprep.subr.bf16.mxu1 %v16888_v59  ;;  %v21634_v59 = vld [vmem:[#allocation13 + $0xdc0] sm:$0xff] }
 0x505   :  { %11169 = vmatpush2.bf16.msra.mxu0 %v16759_v4  ;;  %v16879_v4 = vcombine.low %v8218_v34, %v8222_v47  ;;  %22471 = vst [vmem:[#allocation103_spill] sm:$0xff] %v21634_v59 }
 0x506   :  { %11170 = vmatprep.subr.bf16.mxu0 %v16752_v6  ;;  %v21638_v6 = vpop.f32.mrf.mxu0 }
 0x507   :  { %11210 = vmatpush2.bf16.msra.mxu1 %v16887_v61  ;;  %22473 = vst [vmem:[#allocation104_spill] sm:$0xff] %v21638_v6  ;;  %v21644_v61 = vpop.f32.mrf.mxu1 }
 0x508   :  { %11211 = vmatprep.subr.bf16.mxu1 %v16880_v33  ;;  %22474 = vst [vmem:[#allocation58_spill] sm:$0xff] %v21644_v61  ;;  %v21646_v34 = vpop.f32.mrf.mxu0 }
 0x509   :  { %11171 = vmatpush2.bf16.msra.mxu0 %v16751_v26  ;;  %v17128_v26 = vcombine.high %v21634_v59, %v21636_v50  ;;  %22475 = vst [vmem:[#allocation105_spill] sm:$0xff] %v21646_v34  ;;  %v21648_v47 = vpop.f32.mrf.mxu1  ;;  %v6234_v34 = vadd.f32 %v21570_v58, %v21466_v32  ;;  %v6289_v32 = vadd.f32 %v21576_v23, %v6236_v10 }
 0x50a   :  { %11222 = vmatprep.subr.bf16.mxu0 %v17000_v39  ;;  %22476 = vst [vmem:[#allocation59_spill] sm:$0xff] %v21648_v47  ;;  %v7622_v33 = vpop.f32.mrf.mxu0 }
 0x50b   :  { %11212 = vmatpush2.bf16.msra.mxu1 %v16879_v4  ;;  %v7675_v39 = vpop.f32.mrf.mxu1  ;;  %v6287_v36 = vadd.f32 %v21572_v45, %v6234_v34 }
 0x50c   :  { %11263 = vmatprep.subr.bf16.mxu1 %v17128_v26  ;;  %v7624_v4 = vpop.f32.mrf.mxu0  ;;  %v7676_v27 = vadd.f32 %v7675_v39, %v7622_v33 }
 0x50d   :  { %v7677_v0 = vpop.f32.mrf.mxu1 }
 0x50e   :  { %v7626_v3 = vpop.f32.mrf.mxu0  ;;  %v7678_v52 = vadd.f32 %v7677_v0, %v7624_v4 }
 0x50f   :  { %v7679_v30 = vpop.f32.mrf.mxu1 }
 0x510   :  { %v21650_v11 = vpop.f32.mrf.mxu0  ;;  %v7680_v24 = vadd.f32 %v7679_v30, %v7626_v3 }
 0x511   :  { %22477 = vst [vmem:[#allocation106_spill] sm:$0xff] %v21650_v11  ;;  %v21652_v54 = vpop.f32.mrf.mxu1 }
 0x512   :  { %22478 = vst [vmem:[#allocation60_spill] sm:$0xff] %v21652_v54  ;;  %v7632_v46 = vpop.f32.mrf.mxu0  ;;  %v6238_v54 = vadd.f32 %v21578_v20, %v21474_v56  ;;  %v6244_v56 = vadd.f32 %v21586_v40, %v21480_v31  ;;  %v21675_v20 = vadd.f32 %v7678_v52, %v21532_v8  ;;  %v6248_v40 = vadd.f32 %v21594_v49, %v21488_v16 }
 0x513   :  { %v7685_v6 = vpop.f32.mrf.mxu1 }
 0x514   :  { %v7634_v50 = vpop.f32.mrf.mxu0  ;;  %v6301_v49 = vadd.f32 %v21596_v51, %v6248_v40 }
 0x515   :  { %v7687_v59 = vpop.f32.mrf.mxu1 }
 0x516   :  { %v7636_v61 = vpop.f32.mrf.mxu0  ;;  %v7688_v30 = vadd.f32 %v7687_v59, %v7634_v50 }
 0x517   :  { %v7689_v26 = vpop.f32.mrf.mxu1 }
 0x518   :  { %v21656_v47 = vpop.f32.mrf.mxu0  ;;  %v21703_v59 = vadd.f32 %v7688_v30, %v21549_v5  ;;  %v5015_v5 = vadd.f32 %v21478_v25, %v21476_v63  ;;  %v7974_v30 = vld [vmem:[#allocation11] sm:$0x3] }
 0x519   :  { %22479 = vst [vmem:[#allocation107_spill] sm:$0xff] %v21656_v47  ;;  %v21660_v57 = vpop.f32.mrf.mxu1  ;;  %v21667_v47 = vadd.f32 %v7676_v27, %v21523_v1 }
 0x51a   :  { %22480 = vst [vmem:[#allocation61_spill] sm:$0xff] %v21660_v57  ;;  %v6291_v57 = vadd.f32 %v21580_v44, %v6238_v54  ;;  %v21684_v44 = vadd.f32 %v7680_v24, %v21535_v53  ;;  %v7686_v54 = vadd.f32 %v7685_v6, %v7632_v46  ;;  %v6340_v24 = vadd.f32 %v21602_v48, %v21494_v55  ;;  %v22485_v55 = vld [vmem:[#allocation45_spill] sm:$0xff] }
 0x546   :  { %v7728_v11 = vpop.f32.mrf.mxu0 }
 0x547   :  { %v7781_v37 = vpop.f32.mrf.mxu1 }
 0x548   :  { %v7782_v15 = vadd.f32 %v7781_v37, %v7728_v11  ;;  %v7730_v9 = vpop.f32.mrf.mxu0  ;;  %v21697_v11 = vadd.f32 %v7686_v54, %v21540_v19 }
 0x549   :  { %v7783_v58 = vpop.f32.mrf.mxu1 }
 0x54a   :  { %v21669_v17 = vadd.f32 %v7782_v15, %v6287_v36  ;;  %v7784_v33 = vadd.f32 %v7783_v58, %v7730_v9  ;;  %v7732_v39 = vpop.f32.mrf.mxu0  ;;  %v6246_v15 = vadd.f32 %v21590_v41, %v21485_v7  ;;  %v6297_v9 = vadd.f32 %v21588_v29, %v6244_v56  ;;  %v22483_v56 = vld [vmem:[#allocation42_spill] sm:$0xff] }
 0x54b   :  { %v7785_v45 = vpop.f32.mrf.mxu1 }
 0x54c   :  { %v7930_v23 = vmax.f32 %v21667_v47, %v21669_v17  ;;  %v21679_v37 = vadd.f32 %v7784_v33, %v6289_v32  ;;  %v7786_v27 = vadd.f32 %v7785_v45, %v7732_v39  ;;  %v7734_v1 = vpop.f32.mrf.mxu0  ;;  %v6299_v3 = vadd.f32 %v21592_v28, %v6246_v15  ;;  %v22484_v45 = vld [vmem:[#allocation89_spill] sm:$0xff]  ;;  %v22486_v15 = vld [vmem:[#allocation86_spill] sm:$0xff] }
 0x54d   :  { %v7787_v36 = vpop.f32.mrf.mxu1  ;;  %v5121_v32 = vadd.f32 %v21506_v60, %v21504_v12  ;;  %v6342_v33 = vadd.f32 %v21606_v43, %v21499_v2  ;;  %v6344_v39 = vadd.f32 %v21610_v42, %v21502_v14  ;;  %v22487_v2 = vld [vmem:[#allocation102_spill] sm:$0xff]  ;;  %v7946_v14 = vld [vmem:[#allocation10] sm:$0x3]  ;;  %v22488_v42 = vld [vmem:[#allocation92_spill] sm:$0xff] }
 0x54e   :  { %v7931_v31 = vmax.f32 %v21675_v20, %v21679_v37  ;;  %v21688_v52 = vadd.f32 %v7786_v27, %v6291_v57  ;;  %v7738_v8 = vpop.f32.mrf.mxu0  ;;  %v7690_v57 = vadd.f32 %v7689_v26, %v7636_v61  ;;  %v5025_v26 = vadd.f32 %v21492_v22, %v21490_v62  ;;  %v22481_v22 = vld [vmem:[#allocation100_spill] sm:$0xff] }
 0x54f   :  { %v7791_v10 = vpop.f32.mrf.mxu1  ;;  %v6346_v25 = vadd.f32 %v21614_v38, %v5121_v32  ;;  %v6350_v12 = vadd.f32 %v22481_v22, %v21508_v35  ;;  %v6352_v43 = vadd.f32 %v22487_v2, %v22486_v15  ;;  %v22489_v38 = vld [vmem:[#allocation46_spill] sm:$0xff]  ;;  %v22502_v15 = vld [vmem:[#allocation48_spill] sm:$0xff] }
 0x550   :  { %v7932_v7 = vmax.f32 %v21684_v44, %v21688_v52  ;;  %v7792_v41 = vadd.f32 %v7791_v10, %v7738_v8  ;;  %v7740_v53 = vpop.f32.mrf.mxu0  ;;  %v21710_v19 = vadd.f32 %v7690_v57, %v21552_v21  ;;  %v6240_v21 = vadd.f32 %v21582_v13, %v5015_v5  ;;  %v22482_v13 = vld [vmem:[#allocation87_spill] sm:$0xff]  ;;  %v22490_v10 = vld [vmem:[#allocation93_spill] sm:$0xff]  ;;  %v22493_v57 = vld [vmem:[#allocation104_spill] sm:$0xff] }
 0x551   :  { %v7793_v0 = vpop.f32.mrf.mxu1  ;;  %v6250_v58 = vadd.f32 %v21598_v18, %v5025_v26  ;;  %v5131_v18 = vadd.f32 %v22483_v56, %v22482_v13  ;;  %v6393_v8 = vadd.f32 %v22488_v42, %v6340_v24  ;;  %v6395_v40 = vadd.f32 %v22489_v38, %v6342_v33  ;;  %v22495_v5 = vld [vmem:[#allocation54_spill] sm:$0xff]  ;;  %v22499_v13 = vld [vmem:[#allocation60_spill] sm:$0xff]  ;;  %v22500_v56 = vld [vmem:[#allocation107_spill] sm:$0xff] }
 0x552   :  { %v21699_v6 = vadd.f32 %v7792_v41, %v6297_v9  ;;  %v7794_v46 = vadd.f32 %v7793_v0, %v7740_v53  ;;  %v7742_v16 = vpop.f32.mrf.mxu0  ;;  %v6293_v27 = vadd.f32 %v22484_v45, %v6240_v21  ;;  %v6397_v9 = vadd.f32 %v22490_v10, %v6344_v39  ;;  %v22491_v53 = vld [vmem:[#allocation53_spill] sm:$0xff]  ;;  %v22496_v21 = vld [vmem:[#allocation36_spill] sm:$0xff]  ;;  %v22503_v38 = vld [vmem:[#allocation58_spill] sm:$0xff] }
 0x553   :  { %v7795_v29 = vpop.f32.mrf.mxu1  ;;  %v6303_v48 = vadd.f32 %v22485_v55, %v6250_v58  ;;  %v22492_v0 = vld [vmem:[#allocation41_spill] sm:$0xff]  ;;  %v6403_v26 = vadd.f32 %v22495_v5, %v6350_v12  ;;  %v21750_v58 = vrot.slane %v7946_v14, %v22496_v21  ;;  %v22497_v39 = vld [vmem:[#allocation56_spill] sm:$0xff]  ;;  %v21764_v2 = vrot.slane %v7946_v14, %v22502_v15  ;;  %v22506_v5 = vld [vmem:[#allocation43_spill] sm:$0xff] }
 0x554   :  { %v7934_v50 = vmax.f32 %v21697_v11, %v21699_v6  ;;  %v21707_v34 = vadd.f32 %v7794_v46, %v6299_v3  ;;  %v7796_v28 = vadd.f32 %v7795_v29, %v7742_v16  ;;  %v7744_v63 = vpop.f32.mrf.mxu0  ;;  %v6399_v3 = vadd.f32 %v22491_v53, %v6346_v25  ;;  %v22494_v16 = vld [vmem:[#allocation105_spill] sm:$0xff]  ;;  %v21766_v42 = vld [vmem:[#allocation13 + $0x980] sm:$0xff] }
 0x555   :  { %v7797_v62 = vpop.f32.mrf.mxu1  ;;  %v6354_v46 = vadd.f32 %v22493_v57, %v22492_v0  ;;  %v7788_v29 = vadd.f32 %v7787_v36, %v7734_v1  ;;  %v6405_v22 = vadd.f32 %v22497_v39, %v6352_v43  ;;  %v22501_v45 = vld [vmem:[#allocation61_spill] sm:$0xff]  ;;  %v21773_v0 = vrot.slane %v7974_v30, %v22502_v15 }
 0x556   :  { %v7935_v61 = vmax.f32 %v21703_v59, %v21707_v34  ;;  %v21714_v4 = vadd.f32 %v7796_v28, %v6301_v49  ;;  %v6356_v49 = vadd.f32 %v22494_v16, %v5131_v18  ;;  %v7692_v55 = vadd.f32 %v22501_v45, %v22500_v56  ;;  %v22505_v16 = vld [vmem:[#allocation88_spill] sm:$0xff] }
 0x557   :  { %v21758_v18 = vrot.slane %v7974_v30, %v22496_v21  ;;  %v6407_v10 = vadd.f32 %v22503_v38, %v6354_v46  ;;  %v7915_v53 = vadd.f32 %v7788_v29, %v6293_v27  ;;  %v21809_v38 = vld [vmem:[#allocation13 + $0x960] sm:$0xff] }
 0x558   :  { %v7936_v51 = vmax.f32 %v21710_v19, %v21714_v4  ;;  %v21781_v46 = vadd.f32 %v7692_v55, %v22506_v5 }
 0x587   :  { %v7834_v60 = vpop.f32.mrf.mxu0 }
 0x588   :  { %v7887_v54 = vpop.f32.mrf.mxu1 }
 0x589   :  { %v7888_v35 = vadd.f32 %v7887_v54, %v7834_v60  ;;  %v7836_v41 = vpop.f32.mrf.mxu0  ;;  %v22498_v60 = vld [vmem:[#allocation106_spill] sm:$0xff] }
 0x58a   :  { %v7889_v28 = vpop.f32.mrf.mxu1  ;;  %v7682_v25 = vadd.f32 %v22499_v13, %v22498_v60 }
 0x58b   :  { %v7910_v32 = vadd.f32 %v7888_v35, %v6393_v8  ;;  %v7890_v24 = vadd.f32 %v7889_v28, %v7836_v41  ;;  %v7838_v33 = vpop.f32.mrf.mxu0  ;;  %v21768_v8 = vld [vmem:[#allocation13 + $0x9a0] sm:$0xff] }
 0x58c   :  { %v7891_v1 = vpop.f32.mrf.mxu1  ;;  %v22504_v35 = vld [vmem:[#allocation59_spill] sm:$0xff]  ;;  %v7913_v28 = vadd.f32 %v7682_v25, %v22505_v16  ;;  %v16992_v30 = vcombine.high %v21766_v42, %v21768_v8 }
 0x58d   :  { %v7938_v36 = vmax.f32 %v7930_v23, %v7910_v32  ;;  %v7911_v12 = vadd.f32 %v7890_v24, %v6395_v40  ;;  %v7892_v54 = vadd.f32 %v7891_v1, %v7838_v33  ;;  %v7840_v43 = vpop.f32.mrf.mxu0  ;;  %v6409_v41 = vadd.f32 %v22504_v35, %v6356_v49 }
 0x58e   :  { %v7893_v47 = vpop.f32.mrf.mxu1  ;;  %v7798_v49 = vadd.f32 %v7797_v62, %v7744_v63  ;;  %v16991_v63 = vcombine.low %v21766_v42, %v21768_v8  ;;  %v8306_v8 = vld [vmem:[#allocation13 + $0x8c0] sm:$0xff] }
 0x58f   :  { %v7958_v17 = vadd.f32 %v21750_v58, %v7938_v36  ;;  %v7939_v23 = vmax.f32 %v7931_v31, %v7911_v12  ;;  %v7916_v14 = vadd.f32 %v7892_v54, %v6397_v9  ;;  %v7894_v40 = vadd.f32 %v7893_v47, %v7840_v43  ;;  %v7844_v57 = vpop.f32.mrf.mxu0  ;;  %v21807_v43 = vld [vmem:[#allocation13 + $0x940] sm:$0xff] }
 0x590   :  { %v7897_v27 = vpop.f32.mrf.mxu1  ;;  %v7933_v31 = vmax.f32 %v7913_v28, %v7915_v53  ;;  %v7927_v25 = vadd.f32 %v7798_v49, %v6303_v48  ;;  %v22508_v28 = vld [vmem:[#allocation55_spill] sm:$0xff] }
 0x591   :  { %vm7966_vm8 = vcmp.gt.f32.partialorder %v7958_v17, 0.0  ;;  %v7986_v29 = vmul.f32 %v21758_v18, %v7958_v17  ;;  %v7959_v32 = vadd.f32 %v21764_v2, %v7939_v23  ;;  %v7940_v20 = vmax.f32 %v7932_v7, %v7916_v14  ;;  %v7846_v37 = vpop.f32.mrf.mxu0  ;;  %v8318_v49 = vld [vmem:[#allocation13 + $0x920] sm:$0xff] }
 0x592   :  { %v7917_v9 = vadd.f32 %v7894_v40, %v6399_v3  ;;  %v7898_v24 = vadd.f32 %v7897_v27, %v7844_v57  ;;  %v7899_v33 = vpop.f32.mrf.mxu1  ;;  %v7937_v23 = vmax.f32 %v21781_v46, %v7927_v25  ;;  %v16984_v57 = vcombine.high %v21807_v43, %v21809_v38  ;;  %v8314_v46 = vld [vmem:[#allocation13 + $0x900] sm:$0xff] }
 0x593   :  { %v7994_v62 = vsel %vm7966_vm8, %v7958_v17, %v7986_v29  ;;  %vm7967_vm9 = vcmp.gt.f32.partialorder %v7959_v32, 0.0  ;;  %v7987_v39 = vmul.f32 %v21773_v0, %v7959_v32  ;;  %v7960_v60 = vadd.f32 %v21750_v58, %v7940_v20  ;;  %v7848_v13 = vpop.f32.mrf.mxu0 }
 0x594   :  { %8002 = vst [vmem:[%s22107_s15] sm:$0xff] %v7994_v62  ;;  %v7941_v44 = vmax.f32 %v7933_v31, %v7917_v9  ;;  %v7922_v52 = vadd.f32 %v7898_v24, %v6403_v26  ;;  %v7900_v7 = vadd.f32 %v7899_v33, %v7846_v37  ;;  %v7901_v3 = vpop.f32.mrf.mxu1  ;;  %v21811_v17 = vpack.c.bf16 %v7994_v62, %v7994_v62  ;;  %v8450_v37 = vld [vmem:[#allocation13 + $0xd40] sm:$0xff] }
 0x595   :  { %v7995_v56 = vsel %vm7967_vm9, %v7959_v32, %v7987_v39  ;;  %vm7968_vm10 = vcmp.gt.f32.partialorder %v7960_v60, 0.0  ;;  %v7988_v45 = vmul.f32 %v21758_v18, %v7960_v60  ;;  %v7902_v55 = vadd.f32 %v7901_v3, %v7848_v13  ;;  %v7850_v1 = vpop.f32.mrf.mxu0  ;;  %v8454_v31 = vld [vmem:[#allocation13 + $0xd60] sm:$0xff]  ;;  %v22511_v39 = vld [vmem:[#allocation57_spill] sm:$0xff] }
 0x596   :  { %8003 = vst [vmem:[%s22107_s15 + $0x8] sm:$0xff] %v7995_v56  ;;  %v7961_v48 = vadd.f32 %v21764_v2, %v7941_v44  ;;  %v7942_v36 = vmax.f32 %v7934_v50, %v7922_v52  ;;  %v7923_v12 = vadd.f32 %v7900_v7, %v6405_v22  ;;  %v7903_v26 = vpop.f32.mrf.mxu1  ;;  %v21805_v54 = vpack.c.bf16 %v7995_v56, %v7995_v56  ;;  %v8458_v22 = vld [vmem:[#allocation13 + $0xd80] sm:$0xff] }
 0x597   :  { %v7996_v35 = vsel %vm7968_vm10, %v7960_v60, %v7988_v45  ;;  %v7928_v53 = vadd.f32 %v7902_v55, %v6407_v10  ;;  %v7904_v47 = vadd.f32 %v7903_v26, %v7850_v1  ;;  %v8462_v10 = vld [vmem:[#allocation13 + $0xda0] sm:$0xff]  ;;  %v16983_v20 = vcombine.low %v21807_v43, %v21809_v38 }
 0x598   :  { %8004 = vst [vmem:[%s22107_s15 + $0x10] sm:$0xff] %v7996_v35  ;;  %vm7969_vm11 = vcmp.gt.f32.partialorder %v7961_v48, 0.0  ;;  %v7989_v11 = vmul.f32 %v21773_v0, %v7961_v48  ;;  %v7962_v6 = vadd.f32 %v21750_v58, %v7942_v36  ;;  %v7943_v50 = vmax.f32 %v7935_v61, %v7923_v12  ;;  %11172 = vmatprep.mubr.bf16.mxu0 %v21805_v54  ;;  %v22507_v61 = vld [vmem:[#allocation101_spill] sm:$0xff]  ;;  %v22510_v62 = vld [vmem:[#allocation103_spill] sm:$0xff] }
 0x599   :  { %v7944_v14 = vmax.f32 %v7936_v51, %v7928_v53  ;;  %v7929_v40 = vadd.f32 %v7904_v47, %v6409_v41  ;;  %11173 = vmatmul.mubr.bf16.vlgmr.msra.gmra.mxu0 %v21811_v17  ;;  %v22509_v5 = vcombine.low %v22507_v61, %v22508_v28  ;;  %v17120_v41 = vcombine.high %v8458_v22, %v8462_v10  ;;  %v8446_v44 = vld [vmem:[#allocation13 + $0xd20] sm:$0xff] }
 0x59a   :  { %v7997_v16 = vsel %vm7969_vm11, %v7961_v48, %v7989_v11  ;;  %vm7970_vm12 = vcmp.gt.f32.partialorder %v7962_v6, 0.0  ;;  %v7990_v59 = vmul.f32 %v21758_v18, %v7962_v6  ;;  %v7963_v34 = vadd.f32 %v21764_v2, %v7943_v50  ;;  %v8298_v55 = vld [vmem:[#allocation13 + $0x880] sm:$0xff] }
 0x59b   :  { %11223 = vmatpush1.bf16.msra.mxu0 %v22509_v5  ;;  %8005 = vst [vmem:[%s22107_s15 + $0x18] sm:$0xff] %v7997_v16  ;;  %v7964_v19 = vadd.f32 %v21750_v58, %v7944_v14  ;;  %v7945_v4 = vmax.f32 %v7937_v23, %v7929_v40  ;;  %v21838_v51 = vpack.c.bf16 %v7997_v16, %v7997_v16  ;;  %v8302_v1 = vld [vmem:[#allocation13 + $0x8a0] sm:$0xff] }
 0x59c   :  { %11224 = vmatprep.subr.bf16.mxu0 %v16992_v30  ;;  %v21840_v27 = vsel %vm7970_vm12, %v7962_v6, %v7990_v59  ;;  %vm7971_vm13 = vcmp.gt.f32.partialorder %v7963_v34, 0.0  ;;  %v7991_v29 = vmul.f32 %v21773_v0, %v7963_v34  ;;  %v21843_v32 = vpack.c.bf16 %v7996_v35, %v7996_v35  ;;  %v8434_v48 = vld [vmem:[#allocation13 + $0xcc0] sm:$0xff] }
 0x59d   :  { %8006 = vst [vmem:[%s22107_s15 + $0x20] sm:$0xff] %v21840_v27  ;;  %vm7972_vm14 = vcmp.gt.f32.partialorder %v7964_v19, 0.0  ;;  %v7992_v58 = vmul.f32 %v21758_v18, %v7964_v19  ;;  %v7965_v30 = vadd.f32 %v21764_v2, %v7945_v4  ;;  %11213 = vmatprep.mubr.bf16.mxu1 %v21838_v51  ;;  %v17119_v24 = vcombine.low %v8458_v22, %v8462_v10  ;;  %v8438_v36 = vld [vmem:[#allocation13 + $0xce0] sm:$0xff] }
 0x59e   :  { %v7999_v9 = vsel %vm7971_vm13, %v7963_v34, %v7991_v29  ;;  %11214 = vmatmul.mubr.bf16.vlgmr.msra.gmra.mxu1 %v21843_v32  ;;  %v16976_v33 = vcombine.high %v8314_v46, %v8318_v49  ;;  %v22512_v60 = vcombine.low %v22510_v62, %v22511_v39  ;;  %v17112_v42 = vcombine.high %v8450_v37, %v8454_v31  ;;  %v8290_v35 = vld [vmem:[#allocation13 + $0x840] sm:$0xff] }
 0x59f   :  { %11225 = vmatpush1.bf16.msra.mxu0 %v16991_v63  ;;  %8007 = vst [vmem:[%s22107_s15 + $0x28] sm:$0xff] %v7999_v9  ;;  %v21861_v18 = vsel %vm7972_vm14, %v7964_v19, %v7992_v58  ;;  %vm7973_vm15 = vcmp.gt.f32.partialorder %v7965_v30, 0.0  ;;  %v7993_v2 = vmul.f32 %v21773_v0, %v7965_v30  ;;  %v21867_v13 = vpack.c.bf16 %v7999_v9, %v7999_v9  ;;  %v8310_v63 = vld [vmem:[#allocation13 + $0x8e0] sm:$0xff] }
 0x5a0   :  { %11264 = vmatpush1.bf16.msra.mxu1 %v22512_v60  ;;  %11226 = vmatprep.subr.bf16.mxu0 %v16984_v57  ;;  %8008 = vst [vmem:[%s22107_s15 + $0x30] sm:$0xff] %v21861_v18  ;;  %v8442_v0 = vld [vmem:[#allocation13 + $0xd00] sm:$0xff]  ;;  %v16975_v52 = vcombine.low %v8314_v46, %v8318_v49  ;;  %v17111_v3 = vcombine.low %v8450_v37, %v8454_v31 }
 0x5a1   :  { %11265 = vmatprep.subr.bf16.mxu1 %v17120_v41  ;;  %v8001_v25 = vsel %vm7973_vm15, %v7965_v30, %v7993_v2  ;;  %11254 = vmatprep.mubr.bf16.mxu0 %v21867_v13  ;;  %v16968_v56 = vcombine.high %v8306_v8, %v8310_v63  ;;  %v17104_v45 = vcombine.high %v8442_v0, %v8446_v44  ;;  %v8294_v53 = vld [vmem:[#allocation13 + $0x860] sm:$0xff] }
 0x5a2   :  { %8009 = vst [vmem:[%s22107_s15 + $0x38] sm:$0xff] %v8001_v25  ;;  %v21877_v7 = vpack.c.bf16 %v8001_v25, %v8001_v25  ;;  %v16967_v12 = vcombine.low %v8306_v8, %v8310_v63  ;;  %v17103_v26 = vcombine.low %v8442_v0, %v8446_v44  ;;  %v16960_v43 = vcombine.high %v8298_v55, %v8302_v1  ;;  %v8426_v47 = vld [vmem:[#allocation13 + $0xc80] sm:$0xff] }
 0x5a3   :  { %11227 = vmatpush1.bf16.msra.mxu0 %v16983_v20  ;;  %v17096_v38 = vcombine.high %v8434_v48, %v8438_v36  ;;  %v8430_v11 = vld [vmem:[#allocation13 + $0xca0] sm:$0xff]  ;;  %v16959_v6 = vcombine.low %v8298_v55, %v8302_v1  ;;  %v17095_v50 = vcombine.low %v8434_v48, %v8438_v36  ;;  %v16952_v22 = vcombine.high %v8290_v35, %v8294_v53 }
 0x5a4   :  { %11266 = vmatpush1.bf16.msra.mxu1 %v17119_v24  ;;  %11228 = vmatprep.subr.bf16.mxu0 %v16976_v33  ;;  %v17088_v10 = vcombine.high %v8426_v47, %v8430_v11  ;;  %v8282_v23 = vld [vmem:[#allocation13 + $0x800] sm:$0xff]  ;;  %v16951_v16 = vcombine.low %v8290_v35, %v8294_v53  ;;  %v17087_v59 = vcombine.low %v8426_v47, %v8430_v11 }
 0x5a5   :  { %11267 = vmatprep.subr.bf16.mxu1 %v17112_v42  ;;  %11295 = vmatprep.mubr.bf16.mxu1 %v21877_v7  ;;  %v8286_v14 = vld [vmem:[#allocation13 + $0x820] sm:$0xff] }
 0x5a6   :  { %v8418_v40 = vld [vmem:[#allocation13 + $0xc40] sm:$0xff]  ;;  %v16944_v34 = vcombine.high %v8282_v23, %v8286_v14  ;;  %v16943_v41 = vcombine.low %v8282_v23, %v8286_v14 }
 0x5a7   :  { %11229 = vmatpush1.bf16.msra.mxu0 %v16975_v52  ;;  %v8422_v57 = vld [vmem:[#allocation13 + $0xc60] sm:$0xff] }
 0x5a8   :  { %11268 = vmatpush1.bf16.msra.mxu1 %v17111_v3  ;;  %11230 = vmatprep.subr.bf16.mxu0 %v16968_v56  ;;  %v17080_v61 = vcombine.high %v8418_v40, %v8422_v57  ;;  %v8402_v28 = vld [vmem:[#allocation13 + $0xbc0] sm:$0xff]  ;;  %v17079_v46 = vcombine.low %v8418_v40, %v8422_v57 }
 0x5a9   :  { %11269 = vmatprep.subr.bf16.mxu1 %v17104_v45  ;;  %v8406_v5 = vld [vmem:[#allocation13 + $0xbe0] sm:$0xff] }
 0x5aa   :  { %v8410_v19 = vld [vmem:[#allocation13 + $0xc00] sm:$0xff]  ;;  %v17064_v49 = vcombine.high %v8402_v28, %v8406_v5  ;;  %v17063_v31 = vcombine.low %v8402_v28, %v8406_v5 }
 0x5ab   :  { %11231 = vmatpush1.bf16.msra.mxu0 %v16967_v12  ;;  %v8414_v4 = vld [vmem:[#allocation13 + $0xc20] sm:$0xff] }
 0x5ac   :  { %11270 = vmatpush1.bf16.msra.mxu1 %v17103_v26  ;;  %11232 = vmatprep.subr.bf16.mxu0 %v16960_v43  ;;  %v17072_v29 = vcombine.high %v8410_v19, %v8414_v4  ;;  %v8394_v58 = vld [vmem:[#allocation13 + $0xb80] sm:$0xff]  ;;  %v17071_v9 = vcombine.low %v8410_v19, %v8414_v4 }
 0x5ad   :  { %11271 = vmatprep.subr.bf16.mxu1 %v17096_v38  ;;  %v8398_v30 = vld [vmem:[#allocation13 + $0xba0] sm:$0xff] }
 0x5ae   :  { %v8530_v20 = vld [vmem:[#allocation13 + $0xfc0] sm:$0xff]  ;;  %v17056_v24 = vcombine.high %v8394_v58, %v8398_v30  ;;  %v17055_v42 = vcombine.low %v8394_v58, %v8398_v30 }
 0x5af   :  { %11233 = vmatpush1.bf16.msra.mxu0 %v16959_v6  ;;  %v8534_v37 = vld [vmem:[#allocation13 + $0xfe0] sm:$0xff] }
 0x5b0   :  { %11272 = vmatpush1.bf16.msra.mxu1 %v17095_v50  ;;  %11234 = vmatprep.subr.bf16.mxu0 %v16952_v22  ;;  %v17192_v33 = vcombine.high %v8530_v20, %v8534_v37  ;;  %v8386_v2 = vld [vmem:[#allocation13 + $0xb40] sm:$0xff]  ;;  %v17191_v8 = vcombine.low %v8530_v20, %v8534_v37  ;;  %v8083_v20 = vld [vmem:[#allocation13 + $0x1c8] sm:$0xff] }
 0x5b1   :  { %11273 = vmatprep.subr.bf16.mxu1 %v17088_v10  ;;  %v8390_v62 = vld [vmem:[#allocation13 + $0xb60] sm:$0xff]  ;;  %v8087_v37 = vld [vmem:[#allocation13 + $0x1e8] sm:$0xff] }
 0x5b2   :  { %v8522_v39 = vld [vmem:[#allocation13 + $0xf80] sm:$0xff]  ;;  %v17048_v63 = vcombine.high %v8386_v2, %v8390_v62  ;;  %v17047_v56 = vcombine.low %v8386_v2, %v8390_v62  ;;  %v16746_v2 = vcombine.high %v8083_v20, %v8087_v37 }
 0x5b3   :  { %11235 = vmatpush1.bf16.msra.mxu0 %v16951_v16  ;;  %v8526_v60 = vld [vmem:[#allocation13 + $0xfa0] sm:$0xff] }
 0x5b4   :  { %11274 = vmatpush1.bf16.msra.mxu1 %v17087_v59  ;;  %11236 = vmatprep.subr.bf16.mxu0 %v16944_v34  ;;  %v17184_v25 = vcombine.high %v8522_v39, %v8526_v60  ;;  %v8378_v0 = vld [vmem:[#allocation13 + $0xb00] sm:$0xff]  ;;  %v17183_v45 = vcombine.low %v8522_v39, %v8526_v60  ;;  %v8075_v39 = vld [vmem:[#allocation13 + $0x188] sm:$0xff] }
 0x5b5   :  { %11275 = vmatprep.subr.bf16.mxu1 %v17080_v61  ;;  %v8382_v44 = vld [vmem:[#allocation13 + $0xb20] sm:$0xff]  ;;  %v8079_v60 = vld [vmem:[#allocation13 + $0x1a8] sm:$0xff] }
 0x5b6   :  { %v8514_v52 = vld [vmem:[#allocation13 + $0xf40] sm:$0xff]  ;;  %v17040_v55 = vcombine.high %v8378_v0, %v8382_v44  ;;  %v17039_v43 = vcombine.low %v8378_v0, %v8382_v44  ;;  %v16738_v44 = vcombine.high %v8075_v39, %v8079_v60 }
 0x5b7   :  { %11237 = vmatpush1.bf16.msra.mxu0 %v16943_v41  ;;  %v8518_v3 = vld [vmem:[#allocation13 + $0xf60] sm:$0xff] }
 0x5b8   :  { %11276 = vmatpush1.bf16.msra.mxu1 %v17079_v46  ;;  %11238 = vmatprep.subr.bf16.mxu0 %v17064_v49  ;;  %v17176_v1 = vcombine.high %v8514_v52, %v8518_v3  ;;  %v8370_v48 = vld [vmem:[#allocation13 + $0xac0] sm:$0xff]  ;;  %v17175_v38 = vcombine.low %v8514_v52, %v8518_v3  ;;  %v8067_v3 = vld [vmem:[#allocation13 + $0x148] sm:$0xff] }
 0x5b9   :  { %11277 = vmatprep.subr.bf16.mxu1 %v17072_v29  ;;  %v8374_v36 = vld [vmem:[#allocation13 + $0xae0] sm:$0xff] }
 0x5ba   :  { %v8506_v12 = vld [vmem:[#allocation13 + $0xf00] sm:$0xff]  ;;  %v17032_v35 = vcombine.high %v8370_v48, %v8374_v36  ;;  %v17031_v22 = vcombine.low %v8370_v48, %v8374_v36 }
 0x5bb   :  { %11239 = vmatpush2.bf16.msra.mxu0 %v17063_v31  ;;  %v8510_v26 = vld [vmem:[#allocation13 + $0xf20] sm:$0xff] }
 0x5bc   :  { %11278 = vmatpush1.bf16.msra.mxu1 %v17071_v9  ;;  %11240 = vmatprep.subr.bf16.mxu0 %v17056_v24  ;;  %v17168_v53 = vcombine.high %v8506_v12, %v8510_v26  ;;  %v8362_v47 = vld [vmem:[#allocation13 + $0xa80] sm:$0xff]  ;;  %v17167_v10 = vcombine.low %v8506_v12, %v8510_v26  ;;  %v8059_v26 = vld [vmem:[#allocation13 + $0x108] sm:$0xff] }
 0x5bd   :  { %11279 = vmatprep.subr.bf16.mxu1 %v17192_v33  ;;  %v8366_v11 = vld [vmem:[#allocation13 + $0xaa0] sm:$0xff] }
 0x5be   :  { %v8498_v6 = vld [vmem:[#allocation13 + $0xec0] sm:$0xff]  ;;  %v17024_v23 = vcombine.high %v8362_v47, %v8366_v11  ;;  %v17023_v34 = vcombine.low %v8362_v47, %v8366_v11 }
 0x5bf   :  { %11241 = vmatpush2.bf16.msra.mxu0 %v17055_v42  ;;  %v8502_v50 = vld [vmem:[#allocation13 + $0xee0] sm:$0xff]  ;;  %v8211_v42 = vld [vmem:[#allocation13 + $0x5c8] sm:$0xff] }
 0x5c0   :  { %11280 = vmatpush2.bf16.msra.mxu1 %v17191_v8  ;;  %11242 = vmatprep.subr.bf16.mxu0 %v17048_v63  ;;  %v17160_v14 = vcombine.high %v8498_v6, %v8502_v50  ;;  %v8354_v40 = vld [vmem:[#allocation13 + $0xa40] sm:$0xff]  ;;  %v17159_v61 = vcombine.low %v8498_v6, %v8502_v50  ;;  %v8215_v8 = vld [vmem:[#allocation13 + $0x5e8] sm:$0xff]  ;;  %v16745_v63 = vcombine.low %v8083_v20, %v8087_v37 }
 0x5c1   :  { %11281 = vmatprep.subr.bf16.mxu1 %v17184_v25  ;;  %v8358_v57 = vld [vmem:[#allocation13 + $0xa60] sm:$0xff]  ;;  %v21882_v25 = vpack.c.bf16 %v21840_v27, %v21840_v27  ;;  %v16874_v52 = vcombine.high %v8211_v42, %v8215_v8  ;;  %v16873_v48 = vcombine.low %v8211_v42, %v8215_v8  ;;  %v21888_v27 = vpack.c.bf16 %v21861_v18, %v21861_v18  ;;  %v8051_v6 = vld [vmem:[#allocation13 + $0xc8] sm:$0xff] }
 0x5c2   :  { %v8490_v16 = vld [vmem:[#allocation13 + $0xe80] sm:$0xff]  ;;  %v17016_v28 = vcombine.high %v8354_v40, %v8358_v57  ;;  %v17015_v49 = vcombine.low %v8354_v40, %v8358_v57  ;;  %v8055_v50 = vld [vmem:[#allocation13 + $0xe8] sm:$0xff] }
 0x5c3   :  { %11243 = vmatpush2.bf16.msra.mxu0 %v17047_v56  ;;  %v8494_v59 = vld [vmem:[#allocation13 + $0xea0] sm:$0xff]  ;;  %v8071_v56 = vld [vmem:[#allocation13 + $0x168] sm:$0xff]  ;;  %v16714_v40 = vcombine.high %v8051_v6, %v8055_v50 }
 0x5c4   :  { %11282 = vmatpush2.bf16.msra.mxu1 %v17183_v45  ;;  %11244 = vmatprep.subr.bf16.mxu0 %v17040_v55  ;;  %v17152_v5 = vcombine.high %v8490_v16, %v8494_v59  ;;  %v8346_v19 = vld [vmem:[#allocation13 + $0xa00] sm:$0xff]  ;;  %v17151_v29 = vcombine.low %v8490_v16, %v8494_v59  ;;  %v8203_v45 = vld [vmem:[#allocation13 + $0x588] sm:$0xff]  ;;  %v16730_v36 = vcombine.high %v8067_v3, %v8071_v56 }
 0x5c5   :  { %11283 = vmatprep.subr.bf16.mxu1 %v17176_v1  ;;  %v8350_v4 = vld [vmem:[#allocation13 + $0xa20] sm:$0xff]  ;;  %v8207_v55 = vld [vmem:[#allocation13 + $0x5a8] sm:$0xff]  ;;  %v16737_v1 = vcombine.low %v8075_v39, %v8079_v60 }
 0x5c6   :  { %v8482_v41 = vld [vmem:[#allocation13 + $0xe40] sm:$0xff]  ;;  %v17008_v58 = vcombine.high %v8346_v19, %v8350_v4  ;;  %v17007_v24 = vcombine.low %v8346_v19, %v8350_v4  ;;  %v16866_v12 = vcombine.high %v8203_v45, %v8207_v55  ;;  %v16865_v47 = vcombine.low %v8203_v45, %v8207_v55  ;;  %v8043_v16 = vld [vmem:[#allocation13 + $0x88] sm:$0xff] }
 0x5c7   :  { %11245 = vmatpush2.bf16.msra.mxu0 %v17039_v43  ;;  %v8486_v46 = vld [vmem:[#allocation13 + $0xe60] sm:$0xff]  ;;  %v8063_v43 = vld [vmem:[#allocation13 + $0x128] sm:$0xff] }
 0x5c8   :  { %11284 = vmatpush2.bf16.msra.mxu1 %v17175_v38  ;;  %11246 = vmatprep.subr.bf16.mxu0 %v17032_v35  ;;  %v17144_v30 = vcombine.high %v8482_v41, %v8486_v46  ;;  %v8474_v31 = vld [vmem:[#allocation13 + $0xe00] sm:$0xff]  ;;  %v17143_v33 = vcombine.low %v8482_v41, %v8486_v46  ;;  %v8195_v38 = vld [vmem:[#allocation13 + $0x548] sm:$0xff]  ;;  %v16722_v11 = vcombine.high %v8059_v26, %v8063_v43 }
 0x5c9   :  { %11285 = vmatprep.subr.bf16.mxu1 %v17168_v53  ;;  %v8478_v9 = vld [vmem:[#allocation13 + $0xe20] sm:$0xff]  ;;  %v8199_v35 = vld [vmem:[#allocation13 + $0x568] sm:$0xff]  ;;  %v16729_v53 = vcombine.low %v8067_v3, %v8071_v56 }
 0x5ca   :  { %v17136_v62 = vcombine.high %v8474_v31, %v8478_v9  ;;  %v17135_v0 = vcombine.low %v8474_v31, %v8478_v9  ;;  %v16858_v18 = vcombine.high %v8195_v38, %v8199_v35  ;;  %v8047_v59 = vld [vmem:[#allocation13 + $0xa8] sm:$0xff] }
 0x5cb   :  { %11247 = vmatpush2.bf16.msra.mxu0 %v17031_v22  ;;  %v8187_v22 = vld [vmem:[#allocation13 + $0x508] sm:$0xff]  ;;  %v16706_v19 = vcombine.high %v8043_v16, %v8047_v59 }
 0x5cc   :  { %11286 = vmatpush2.bf16.msra.mxu1 %v17167_v10  ;;  %11248 = vmatprep.subr.bf16.mxu0 %v17024_v23  ;;  %v8191_v10 = vld [vmem:[#allocation13 + $0x528] sm:$0xff]  ;;  %v16721_v23 = vcombine.low %v8059_v26, %v8063_v43 }
 0x5cd   :  { %11287 = vmatprep.subr.bf16.mxu1 %v17160_v14  ;;  %v16857_v14 = vcombine.low %v8195_v38, %v8199_v35  ;;  %v16850_v57 = vcombine.high %v8187_v22, %v8191_v10  ;;  %v8035_v41 = vld [vmem:[#allocation13 + $0x48] sm:$0xff] }
 0x5ce   :  { %v8039_v46 = vld [vmem:[#allocation13 + $0x68] sm:$0xff] }
 0x5cf   :  { %11249 = vmatpush2.bf16.msra.mxu0 %v17023_v34  ;;  %v8179_v34 = vld [vmem:[#allocation13 + $0x4c8] sm:$0xff]  ;;  %v16698_v20 = vcombine.high %v8035_v41, %v8039_v46 }
 0x5d0   :  { %11288 = vmatpush2.bf16.msra.mxu1 %v17159_v61  ;;  %11250 = vmatprep.subr.bf16.mxu0 %v17016_v28  ;;  %v8183_v61 = vld [vmem:[#allocation13 + $0x4e8] sm:$0xff]  ;;  %v16713_v28 = vcombine.low %v8051_v6, %v8055_v50 }
 0x5d1   :  { %11289 = vmatprep.subr.bf16.mxu1 %v17152_v5  ;;  %v16849_v5 = vcombine.low %v8187_v22, %v8191_v10  ;;  %v16842_v4 = vcombine.high %v8179_v34, %v8183_v61  ;;  %v8027_v31 = vld [vmem:[#allocation13 + $0x8] sm:$0xff] }
 0x5d2   :  { %v8031_v9 = vld [vmem:[#allocation13 + $0x28] sm:$0xff] }
 0x5d3   :  { %11251 = vmatpush2.bf16.msra.mxu0 %v17015_v49  ;;  %v8171_v49 = vld [vmem:[#allocation13 + $0x488] sm:$0xff]  ;;  %v16690_v39 = vcombine.high %v8027_v31, %v8031_v9 }
 0x5d4   :  { %11290 = vmatpush2.bf16.msra.mxu1 %v17151_v29  ;;  %11252 = vmatprep.subr.bf16.mxu0 %v17008_v58  ;;  %v8175_v29 = vld [vmem:[#allocation13 + $0x4a8] sm:$0xff]  ;;  %v16705_v58 = vcombine.low %v8043_v16, %v8047_v59 }
 0x5d5   :  { %11291 = vmatprep.subr.bf16.mxu1 %v17144_v30  ;;  %v16841_v30 = vcombine.low %v8179_v34, %v8183_v61  ;;  %v16834_v37 = vcombine.high %v8171_v49, %v8175_v29  ;;  %v8147_v42 = vld [vmem:[#allocation13 + $0x3c8] sm:$0xff] }
 0x5d6   :  { %v8151_v8 = vld [vmem:[#allocation13 + $0x3e8] sm:$0xff] }
 0x5d7   :  { %11253 = vmatpush2.bf16.msra.mxu0 %v17007_v24  ;;  %v8163_v24 = vld [vmem:[#allocation13 + $0x448] sm:$0xff]  ;;  %v16810_v3 = vcombine.high %v8147_v42, %v8151_v8 }
 0x5d8   :  { %11292 = vmatpush2.bf16.msra.mxu1 %v17143_v33  ;;  %11304 = vmatprep.subr.bf16.mxu0 %v16746_v2  ;;  %v8167_v33 = vld [vmem:[#allocation13 + $0x468] sm:$0xff]  ;;  %v16697_v2 = vcombine.low %v8035_v41, %v8039_v46 }
 0x5d9   :  { %11293 = vmatprep.subr.bf16.mxu1 %v17136_v62  ;;  %v16833_v62 = vcombine.low %v8171_v49, %v8175_v29  ;;  %v16826_v60 = vcombine.high %v8163_v24, %v8167_v33  ;;  %v8139_v45 = vld [vmem:[#allocation13 + $0x388] sm:$0xff] }
 0x5da   :  { %11255 = vmatmul.mubr.bf16.vlgmr.msra.gmra.mxu0 %v21882_v25  ;;  %v8143_v55 = vld [vmem:[#allocation13 + $0x3a8] sm:$0xff] }
 0x5db   :  { %11305 = vmatpush1.bf16.msra.mxu0 %v16745_v63  ;;  %11336 = vmatprep.mubr.bf16.mxu0 %v21805_v54  ;;  %v8155_v63 = vld [vmem:[#allocation13 + $0x408] sm:$0xff]  ;;  %v16802_v26 = vcombine.high %v8139_v45, %v8143_v55 }
 0x5dc   :  { %11294 = vmatpush2.bf16.msra.mxu1 %v17135_v0  ;;  %11306 = vmatprep.subr.bf16.mxu0 %v16738_v44  ;;  %v8159_v0 = vld [vmem:[#allocation13 + $0x428] sm:$0xff]  ;;  %v16689_v44 = vcombine.low %v8027_v31, %v8031_v9 }
 0x5dd   :  { %11345 = vmatprep.subr.bf16.mxu1 %v16874_v52  ;;  %v16825_v52 = vcombine.low %v8163_v24, %v8167_v33  ;;  %v16818_v56 = vcombine.high %v8155_v63, %v8159_v0  ;;  %v8131_v38 = vld [vmem:[#allocation13 + $0x348] sm:$0xff] }
 0x5de   :  { %v8135_v35 = vld [vmem:[#allocation13 + $0x368] sm:$0xff] }
 0x5df   :  { %11296 = vmatmul.mubr.bf16.vlgmr.msra.gmra.mxu1 %v21888_v27  ;;  %11307 = vmatpush1.bf16.msra.mxu0 %v16737_v1  ;;  %v8275_v1 = vld [vmem:[#allocation13 + $0x7c8] sm:$0xff]  ;;  %v16794_v6 = vcombine.high %v8131_v38, %v8135_v35 }
 0x5e0   :  { %11346 = vmatpush1.bf16.msra.mxu1 %v16873_v48  ;;  %11377 = vmatprep.mubr.bf16.mxu1 %v21838_v51  ;;  %v8279_v48 = vld [vmem:[#allocation13 + $0x7e8] sm:$0xff] }
 0x5e1   :  { %11308 = vmatprep.subr.bf16.mxu0 %v16730_v36  ;;  %11347 = vmatprep.subr.bf16.mxu1 %v16866_v12  ;;  %v16809_v36 = vcombine.low %v8147_v42, %v8151_v8  ;;  %v16817_v12 = vcombine.low %v8155_v63, %v8159_v0  ;;  %v16938_v43 = vcombine.high %v8275_v1, %v8279_v48  ;;  %v8123_v22 = vld [vmem:[#allocation13 + $0x308] sm:$0xff] }
 0x5e2   :  { %v8127_v10 = vld [vmem:[#allocation13 + $0x328] sm:$0xff] }
 0x5e3   :  { %11309 = vmatpush1.bf16.msra.mxu0 %v16729_v53  ;;  %v8267_v53 = vld [vmem:[#allocation13 + $0x788] sm:$0xff]  ;;  %v16786_v16 = vcombine.high %v8123_v22, %v8127_v10 }
 0x5e4   :  { %11348 = vmatpush1.bf16.msra.mxu1 %v16865_v47  ;;  %11310 = vmatprep.subr.bf16.mxu0 %v16722_v11  ;;  %v8271_v47 = vld [vmem:[#allocation13 + $0x7a8] sm:$0xff]  ;;  %v16801_v11 = vcombine.low %v8139_v45, %v8143_v55 }
 0x5e5   :  { %11349 = vmatprep.subr.bf16.mxu1 %v16858_v18  ;;  %v16937_v18 = vcombine.low %v8275_v1, %v8279_v48  ;;  %v16930_v50 = vcombine.high %v8267_v53, %v8271_v47  ;;  %v8115_v34 = vld [vmem:[#allocation13 + $0x2c8] sm:$0xff] }
 0x5e6   :  { %v8119_v61 = vld [vmem:[#allocation13 + $0x2e8] sm:$0xff] }
 0x5e7   :  { %11311 = vmatpush1.bf16.msra.mxu0 %v16721_v23  ;;  %v8259_v23 = vld [vmem:[#allocation13 + $0x748] sm:$0xff]  ;;  %v16778_v41 = vcombine.high %v8115_v34, %v8119_v61 }
 0x5e8   :  { %11350 = vmatpush1.bf16.msra.mxu1 %v16857_v14  ;;  %11312 = vmatprep.subr.bf16.mxu0 %v16714_v40  ;;  %v8263_v14 = vld [vmem:[#allocation13 + $0x768] sm:$0xff]  ;;  %v16793_v40 = vcombine.low %v8131_v38, %v8135_v35 }
 0x5e9   :  { %11351 = vmatprep.subr.bf16.mxu1 %v16850_v57  ;;  %v16929_v57 = vcombine.low %v8267_v53, %v8271_v47  ;;  %v16922_v59 = vcombine.high %v8259_v23, %v8263_v14  ;;  %v8107_v49 = vld [vmem:[#allocation13 + $0x288] sm:$0xff] }
 0x5ea   :  { %v8111_v29 = vld [vmem:[#allocation13 + $0x2a8] sm:$0xff] }
 0x5eb   :  { %11313 = vmatpush1.bf16.msra.mxu0 %v16713_v28  ;;  %v8251_v28 = vld [vmem:[#allocation13 + $0x708] sm:$0xff]  ;;  %v16770_v31 = vcombine.high %v8107_v49, %v8111_v29 }
 0x5ec   :  { %11352 = vmatpush1.bf16.msra.mxu1 %v16849_v5  ;;  %11314 = vmatprep.subr.bf16.mxu0 %v16706_v19  ;;  %v8255_v5 = vld [vmem:[#allocation13 + $0x728] sm:$0xff]  ;;  %v16785_v19 = vcombine.low %v8123_v22, %v8127_v10 }
 0x5ed   :  { %11353 = vmatprep.subr.bf16.mxu1 %v16842_v4  ;;  %v16921_v4 = vcombine.low %v8259_v23, %v8263_v14  ;;  %v16914_v46 = vcombine.high %v8251_v28, %v8255_v5  ;;  %v8099_v24 = vld [vmem:[#allocation13 + $0x248] sm:$0xff] }
 0x5ee   :  { %v8103_v33 = vld [vmem:[#allocation13 + $0x268] sm:$0xff] }
 0x5ef   :  { %11315 = vmatpush1.bf16.msra.mxu0 %v16705_v58  ;;  %v8243_v58 = vld [vmem:[#allocation13 + $0x6c8] sm:$0xff]  ;;  %v16762_v42 = vcombine.high %v8099_v24, %v8103_v33 }
 0x5f0   :  { %11354 = vmatpush1.bf16.msra.mxu1 %v16841_v30  ;;  %11316 = vmatprep.subr.bf16.mxu0 %v16698_v20  ;;  %v8247_v30 = vld [vmem:[#allocation13 + $0x6e8] sm:$0xff]  ;;  %v16777_v20 = vcombine.low %v8115_v34, %v8119_v61 }
 0x5f1   :  { %11355 = vmatprep.subr.bf16.mxu1 %v16834_v37  ;;  %v16913_v37 = vcombine.low %v8251_v28, %v8255_v5  ;;  %v16906_v9 = vcombine.high %v8243_v58, %v8247_v30  ;;  %v8091_v63 = vld [vmem:[#allocation13 + $0x208] sm:$0xff] }
 0x5f2   :  { %v8095_v0 = vld [vmem:[#allocation13 + $0x228] sm:$0xff] }
 0x5f3   :  { %11317 = vmatpush1.bf16.msra.mxu0 %v16697_v2  ;;  %v8235_v2 = vld [vmem:[#allocation13 + $0x688] sm:$0xff]  ;;  %v16754_v45 = vcombine.high %v8091_v63, %v8095_v0 }
 0x5f4   :  { %11356 = vmatpush1.bf16.msra.mxu1 %v16833_v62  ;;  %11318 = vmatprep.subr.bf16.mxu0 %v16690_v39  ;;  %v8239_v62 = vld [vmem:[#allocation13 + $0x6a8] sm:$0xff]  ;;  %v16769_v39 = vcombine.low %v8107_v49, %v8111_v29 }
 0x5f5   :  { %11357 = vmatprep.subr.bf16.mxu1 %v16826_v60  ;;  %v16905_v60 = vcombine.low %v8243_v58, %v8247_v30  ;;  %v16898_v8 = vcombine.high %v8235_v2, %v8239_v62  ;;  %v8339_v1 = vld [vmem:[#allocation13 + $0x9c8] sm:$0xff] }
 0x5f6   :  { %v8343_v48 = vld [vmem:[#allocation13 + $0x9e8] sm:$0xff] }
 0x5f7   :  { %11319 = vmatpush1.bf16.msra.mxu0 %v16689_v44  ;;  %v8227_v44 = vld [vmem:[#allocation13 + $0x648] sm:$0xff]  ;;  %v17002_v38 = vcombine.high %v8339_v1, %v8343_v48 }
 0x5f8   :  { %11358 = vmatpush1.bf16.msra.mxu1 %v16825_v52  ;;  %11320 = vmatprep.subr.bf16.mxu0 %v16810_v3  ;;  %v8231_v52 = vld [vmem:[#allocation13 + $0x668] sm:$0xff]  ;;  %v16761_v3 = vcombine.low %v8099_v24, %v8103_v33 }
 0x5f9   :  { %11359 = vmatprep.subr.bf16.mxu1 %v16818_v56  ;;  %v16897_v56 = vcombine.low %v8235_v2, %v8239_v62  ;;  %v16890_v55 = vcombine.high %v8227_v44, %v8231_v52  ;;  %v8331_v53 = vld [vmem:[#allocation13 + $0x988] sm:$0xff] }
 0x5fa   :  { %v8335_v47 = vld [vmem:[#allocation13 + $0x9a8] sm:$0xff] }
 0x5fb   :  { %11321 = vmatpush2.bf16.msra.mxu0 %v16809_v36  ;;  %v8219_v36 = vld [vmem:[#allocation13 + $0x608] sm:$0xff]  ;;  %v16994_v22 = vcombine.high %v8331_v53, %v8335_v47 }
 0x5fc   :  { %11360 = vmatpush1.bf16.msra.mxu1 %v16817_v12  ;;  %11322 = vmatprep.subr.bf16.mxu0 %v16802_v26  ;;  %v8223_v12 = vld [vmem:[#allocation13 + $0x628] sm:$0xff]  ;;  %v16753_v26 = vcombine.low %v8091_v63, %v8095_v0 }
 0x5fd   :  { %11361 = vmatprep.subr.bf16.mxu1 %v16938_v43  ;;  %v16889_v43 = vcombine.low %v8227_v44, %v8231_v52  ;;  %v16882_v35 = vcombine.high %v8219_v36, %v8223_v12  ;;  %v8323_v23 = vld [vmem:[#allocation13 + $0x948] sm:$0xff] }
 0x5fe   :  { %v8327_v14 = vld [vmem:[#allocation13 + $0x968] sm:$0xff] }
 0x5ff   :  { %11323 = vmatpush2.bf16.msra.mxu0 %v16801_v11  ;;  %v8467_v11 = vld [vmem:[#allocation13 + $0xdc8] sm:$0xff]  ;;  %v16986_v34 = vcombine.high %v8323_v23, %v8327_v14 }
 0x600   :  { %11362 = vmatpush2.bf16.msra.mxu1 %v16937_v18  ;;  %11324 = vmatprep.subr.bf16.mxu0 %v16794_v6  ;;  %v8471_v18 = vld [vmem:[#allocation13 + $0xde8] sm:$0xff]  ;;  %v17001_v6 = vcombine.low %v8339_v1, %v8343_v48 }
 0x601   :  { %11363 = vmatprep.subr.bf16.mxu1 %v16930_v50  ;;  %v16881_v50 = vcombine.low %v8219_v36, %v8223_v12  ;;  %v17130_v10 = vcombine.high %v8467_v11, %v8471_v18  ;;  %v8315_v28 = vld [vmem:[#allocation13 + $0x908] sm:$0xff] }
 0x602   :  { %v8319_v5 = vld [vmem:[#allocation13 + $0x928] sm:$0xff] }
 0x603   :  { %11325 = vmatpush2.bf16.msra.mxu0 %v16793_v40  ;;  %v8459_v40 = vld [vmem:[#allocation13 + $0xd88] sm:$0xff]  ;;  %v16978_v49 = vcombine.high %v8315_v28, %v8319_v5 }
 0x604   :  { %11364 = vmatpush2.bf16.msra.mxu1 %v16929_v57  ;;  %11326 = vmatprep.subr.bf16.mxu0 %v16786_v16  ;;  %v8463_v57 = vld [vmem:[#allocation13 + $0xda8] sm:$0xff]  ;;  %v16993_v16 = vcombine.low %v8331_v53, %v8335_v47 }
 0x605   :  { %11365 = vmatprep.subr.bf16.mxu1 %v16922_v59  ;;  %v17129_v59 = vcombine.low %v8467_v11, %v8471_v18  ;;  %v17122_v61 = vcombine.high %v8459_v40, %v8463_v57  ;;  %v8307_v58 = vld [vmem:[#allocation13 + $0x8c8] sm:$0xff] }
 0x606   :  { %v8311_v30 = vld [vmem:[#allocation13 + $0x8e8] sm:$0xff] }
 0x607   :  { %11327 = vmatpush2.bf16.msra.mxu0 %v16785_v19  ;;  %v8451_v19 = vld [vmem:[#allocation13 + $0xd48] sm:$0xff]  ;;  %v16970_v24 = vcombine.high %v8307_v58, %v8311_v30 }
 0x608   :  { %11366 = vmatpush2.bf16.msra.mxu1 %v16921_v4  ;;  %11328 = vmatprep.subr.bf16.mxu0 %v16778_v41  ;;  %v8455_v4 = vld [vmem:[#allocation13 + $0xd68] sm:$0xff]  ;;  %v16985_v41 = vcombine.low %v8323_v23, %v8327_v14 }
 0x609   :  { %11367 = vmatprep.subr.bf16.mxu1 %v16914_v46  ;;  %v17121_v46 = vcombine.low %v8459_v40, %v8463_v57  ;;  %v17114_v29 = vcombine.high %v8451_v19, %v8455_v4  ;;  %v8299_v2 = vld [vmem:[#allocation13 + $0x888] sm:$0xff] }
 0x60a   :  { %v8303_v62 = vld [vmem:[#allocation13 + $0x8a8] sm:$0xff] }
 0x60b   :  { %11329 = vmatpush2.bf16.msra.mxu0 %v16777_v20  ;;  %v8443_v20 = vld [vmem:[#allocation13 + $0xd08] sm:$0xff]  ;;  %v16962_v63 = vcombine.high %v8299_v2, %v8303_v62 }
 0x60c   :  { %11368 = vmatpush2.bf16.msra.mxu1 %v16913_v37  ;;  %11330 = vmatprep.subr.bf16.mxu0 %v16770_v31  ;;  %v8447_v37 = vld [vmem:[#allocation13 + $0xd28] sm:$0xff]  ;;  %v16977_v31 = vcombine.low %v8315_v28, %v8319_v5 }
 0x60d   :  { %11369 = vmatprep.subr.bf16.mxu1 %v16906_v9  ;;  %v17113_v9 = vcombine.low %v8451_v19, %v8455_v4  ;;  %v17106_v33 = vcombine.high %v8443_v20, %v8447_v37  ;;  %v8291_v44 = vld [vmem:[#allocation13 + $0x848] sm:$0xff] }
 0x60e   :  { %v8295_v52 = vld [vmem:[#allocation13 + $0x868] sm:$0xff] }
 0x60f   :  { %11331 = vmatpush2.bf16.msra.mxu0 %v16769_v39  ;;  %v8435_v39 = vld [vmem:[#allocation13 + $0xcc8] sm:$0xff]  ;;  %v16954_v1 = vcombine.high %v8291_v44, %v8295_v52 }
 0x610   :  { %11370 = vmatpush2.bf16.msra.mxu1 %v16905_v60  ;;  %11332 = vmatprep.subr.bf16.mxu0 %v16762_v42  ;;  %v8439_v60 = vld [vmem:[#allocation13 + $0xce8] sm:$0xff]  ;;  %v16969_v42 = vcombine.low %v8307_v58, %v8311_v30 }
 0x611   :  { %11371 = vmatprep.subr.bf16.mxu1 %v16898_v8  ;;  %v17105_v8 = vcombine.low %v8443_v20, %v8447_v37  ;;  %v17098_v0 = vcombine.high %v8435_v39, %v8439_v60  ;;  %v8283_v36 = vld [vmem:[#allocation13 + $0x808] sm:$0xff] }
 0x612   :  { %v8287_v12 = vld [vmem:[#allocation13 + $0x828] sm:$0xff] }
 0x613   :  { %11333 = vmatpush2.bf16.msra.mxu0 %v16761_v3  ;;  %v8427_v3 = vld [vmem:[#allocation13 + $0xc88] sm:$0xff]  ;;  %v16946_v53 = vcombine.high %v8283_v36, %v8287_v12 }
 0x614   :  { %11372 = vmatpush2.bf16.msra.mxu1 %v16897_v56  ;;  %11334 = vmatprep.subr.bf16.mxu0 %v16754_v45  ;;  %v8431_v56 = vld [vmem:[#allocation13 + $0xca8] sm:$0xff]  ;;  %v16961_v45 = vcombine.low %v8299_v2, %v8303_v62 }
 0x615   :  { %11373 = vmatprep.subr.bf16.mxu1 %v16890_v55  ;;  %v17097_v55 = vcombine.low %v8435_v39, %v8439_v60  ;;  %v17090_v48 = vcombine.high %v8427_v3, %v8431_v56  ;;  %v8403_v11 = vld [vmem:[#allocation13 + $0xbc8] sm:$0xff] }
 0x616   :  { %v8407_v18 = vld [vmem:[#allocation13 + $0xbe8] sm:$0xff] }
 0x617   :  { %11335 = vmatpush2.bf16.msra.mxu0 %v16753_v26  ;;  %v8419_v26 = vld [vmem:[#allocation13 + $0xc48] sm:$0xff]  ;;  %v17066_v23 = vcombine.high %v8403_v11, %v8407_v18 }
 0x618   :  { %11374 = vmatpush2.bf16.msra.mxu1 %v16889_v43  ;;  %11386 = vmatprep.subr.bf16.mxu0 %v17002_v38  ;;  %v8423_v43 = vld [vmem:[#allocation13 + $0xc68] sm:$0xff]  ;;  %v16953_v38 = vcombine.low %v8291_v44, %v8295_v52 }
 0x619   :  { %11375 = vmatprep.subr.bf16.mxu1 %v16882_v35  ;;  %v17089_v35 = vcombine.low %v8427_v3, %v8431_v56  ;;  %v17082_v47 = vcombine.high %v8419_v26, %v8423_v43  ;;  %v8395_v40 = vld [vmem:[#allocation13 + $0xb88] sm:$0xff] }
 0x61a   :  { %11337 = vmatmul.mubr.bf16.vlgmr.msra.gmra.mxu0 %v21811_v17  ;;  %v8399_v57 = vld [vmem:[#allocation13 + $0xba8] sm:$0xff] }
 0x61b   :  { %11387 = vmatpush1.bf16.msra.mxu0 %v17001_v6  ;;  %11418 = vmatprep.mubr.bf16.mxu0 %v21867_v13  ;;  %v8411_v6 = vld [vmem:[#allocation13 + $0xc08] sm:$0xff]  ;;  %v17058_v28 = vcombine.high %v8395_v40, %v8399_v57 }
 0x61c   :  { %11376 = vmatpush2.bf16.msra.mxu1 %v16881_v50  ;;  %11388 = vmatprep.subr.bf16.mxu0 %v16994_v22  ;;  %v8415_v50 = vld [vmem:[#allocation13 + $0xc28] sm:$0xff]  ;;  %v16945_v22 = vcombine.low %v8283_v36, %v8287_v12 }
 0x61d   :  { %11427 = vmatprep.subr.bf16.mxu1 %v17130_v10  ;;  %v17081_v10 = vcombine.low %v8419_v26, %v8423_v43  ;;  %v17074_v14 = vcombine.high %v8411_v6, %v8415_v50  ;;  %v8387_v19 = vld [vmem:[#allocation13 + $0xb48] sm:$0xff] }
 0x61e   :  { %v8391_v4 = vld [vmem:[#allocation13 + $0xb68] sm:$0xff] }
 0x61f   :  { %11378 = vmatmul.mubr.bf16.vlgmr.msra.gmra.mxu1 %v21843_v32  ;;  %11389 = vmatpush1.bf16.msra.mxu0 %v16993_v16  ;;  %v8531_v16 = vld [vmem:[#allocation13 + $0xfc8] sm:$0xff]  ;;  %v17050_v58 = vcombine.high %v8387_v19, %v8391_v4 }
 0x620   :  { %11428 = vmatpush1.bf16.msra.mxu1 %v17129_v59  ;;  %11459 = vmatprep.mubr.bf16.mxu1 %v21877_v7  ;;  %v8535_v59 = vld [vmem:[#allocation13 + $0xfe8] sm:$0xff] }
 0x621   :  { %11390 = vmatprep.subr.bf16.mxu0 %v16986_v34  ;;  %11429 = vmatprep.subr.bf16.mxu1 %v17122_v61  ;;  %v17065_v34 = vcombine.low %v8403_v11, %v8407_v18  ;;  %v17073_v61 = vcombine.low %v8411_v6, %v8415_v50  ;;  %v17194_v5 = vcombine.high %v8531_v16, %v8535_v59  ;;  %v8379_v20 = vld [vmem:[#allocation13 + $0xb08] sm:$0xff] }
 0x622   :  { %v8383_v37 = vld [vmem:[#allocation13 + $0xb28] sm:$0xff] }
 0x623   :  { %11391 = vmatpush1.bf16.msra.mxu0 %v16985_v41  ;;  %v8523_v41 = vld [vmem:[#allocation13 + $0xf88] sm:$0xff]  ;;  %v17042_v2 = vcombine.high %v8379_v20, %v8383_v37 }
 0x624   :  { %11430 = vmatpush1.bf16.msra.mxu1 %v17121_v46  ;;  %11392 = vmatprep.subr.bf16.mxu0 %v16978_v49  ;;  %v8527_v46 = vld [vmem:[#allocation13 + $0xfa8] sm:$0xff]  ;;  %v17057_v49 = vcombine.low %v8395_v40, %v8399_v57 }
 0x625   :  { %11431 = vmatprep.subr.bf16.mxu1 %v17114_v29  ;;  %v17193_v29 = vcombine.low %v8531_v16, %v8535_v59  ;;  %v17186_v30 = vcombine.high %v8523_v41, %v8527_v46  ;;  %v8371_v39 = vld [vmem:[#allocation13 + $0xac8] sm:$0xff]  ;;  %v8084_v16 = vld [vmem:[#allocation13 + $0x1d0] sm:$0xff] }
 0x626   :  { %v8375_v60 = vld [vmem:[#allocation13 + $0xae8] sm:$0xff]  ;;  %v8088_v59 = vld [vmem:[#allocation13 + $0x1f0] sm:$0xff] }
 0x627   :  { %11393 = vmatpush1.bf16.msra.mxu0 %v16977_v31  ;;  %v8515_v31 = vld [vmem:[#allocation13 + $0xf48] sm:$0xff]  ;;  %v17034_v44 = vcombine.high %v8371_v39, %v8375_v60 }
 0x628   :  { %11432 = vmatpush1.bf16.msra.mxu1 %v17113_v9  ;;  %11394 = vmatprep.subr.bf16.mxu0 %v16970_v24  ;;  %v8519_v9 = vld [vmem:[#allocation13 + $0xf68] sm:$0xff]  ;;  %v17049_v24 = vcombine.low %v8387_v19, %v8391_v4  ;;  %v16748_v19 = vcombine.high %v8084_v16, %v8088_v59 }
 0x629   :  { %11433 = vmatprep.subr.bf16.mxu1 %v17106_v33  ;;  %v17185_v33 = vcombine.low %v8523_v41, %v8527_v46  ;;  %v17178_v62 = vcombine.high %v8515_v31, %v8519_v9  ;;  %v8363_v3 = vld [vmem:[#allocation13 + $0xa88] sm:$0xff]  ;;  %v8076_v41 = vld [vmem:[#allocation13 + $0x190] sm:$0xff] }
 0x62a   :  { %v8367_v56 = vld [vmem:[#allocation13 + $0xaa8] sm:$0xff]  ;;  %v8080_v46 = vld [vmem:[#allocation13 + $0x1b0] sm:$0xff] }
 0x62b   :  { %11395 = vmatpush1.bf16.msra.mxu0 %v16969_v42  ;;  %v8507_v42 = vld [vmem:[#allocation13 + $0xf08] sm:$0xff]  ;;  %v17026_v36 = vcombine.high %v8363_v3, %v8367_v56 }
 0x62c   :  { %11434 = vmatpush1.bf16.msra.mxu1 %v17105_v8  ;;  %11396 = vmatprep.subr.bf16.mxu0 %v16962_v63  ;;  %v8511_v8 = vld [vmem:[#allocation13 + $0xf28] sm:$0xff]  ;;  %v17041_v63 = vcombine.low %v8379_v20, %v8383_v37  ;;  %v16740_v37 = vcombine.high %v8076_v41, %v8080_v46 }
 0x62d   :  { %11435 = vmatprep.subr.bf16.mxu1 %v17098_v0  ;;  %v17177_v0 = vcombine.low %v8515_v31, %v8519_v9  ;;  %v17170_v52 = vcombine.high %v8507_v42, %v8511_v8  ;;  %v8355_v26 = vld [vmem:[#allocation13 + $0xa48] sm:$0xff]  ;;  %v8068_v9 = vld [vmem:[#allocation13 + $0x150] sm:$0xff] }
 0x62e   :  { %v8359_v43 = vld [vmem:[#allocation13 + $0xa68] sm:$0xff] }
 0x62f   :  { %11397 = vmatpush1.bf16.msra.mxu0 %v16961_v45  ;;  %v8499_v45 = vld [vmem:[#allocation13 + $0xec8] sm:$0xff]  ;;  %v17018_v11 = vcombine.high %v8355_v26, %v8359_v43 }
 0x630   :  { %11436 = vmatpush1.bf16.msra.mxu1 %v17097_v55  ;;  %11398 = vmatprep.subr.bf16.mxu0 %v16954_v1  ;;  %v8503_v55 = vld [vmem:[#allocation13 + $0xee8] sm:$0xff]  ;;  %v17033_v1 = vcombine.low %v8371_v39, %v8375_v60  ;;  %v8208_v39 = vld [vmem:[#allocation13 + $0x5b0] sm:$0xff]  ;;  %v16739_v60 = vcombine.low %v8076_v41, %v8080_v46 }
 0x631   :  { %11437 = vmatprep.subr.bf16.mxu1 %v17090_v48  ;;  %v17169_v48 = vcombine.low %v8507_v42, %v8511_v8  ;;  %v17162_v12 = vcombine.high %v8499_v45, %v8503_v55  ;;  %v8347_v6 = vld [vmem:[#allocation13 + $0xa08] sm:$0xff]  ;;  %v8036_v46 = vld [vmem:[#allocation13 + $0x50] sm:$0xff] }
 0x632   :  { %v8351_v50 = vld [vmem:[#allocation13 + $0xa28] sm:$0xff] }
 0x633   :  { %11399 = vmatpush1.bf16.msra.mxu0 %v16953_v38  ;;  %v8491_v38 = vld [vmem:[#allocation13 + $0xe88] sm:$0xff]  ;;  %v17010_v40 = vcombine.high %v8347_v6, %v8351_v50 }
 0x634   :  { %11438 = vmatpush1.bf16.msra.mxu1 %v17089_v35  ;;  %11400 = vmatprep.subr.bf16.mxu0 %v16946_v53  ;;  %v8495_v35 = vld [vmem:[#allocation13 + $0xea8] sm:$0xff]  ;;  %v17025_v53 = vcombine.low %v8363_v3, %v8367_v56  ;;  %v8064_v3 = vld [vmem:[#allocation13 + $0x130] sm:$0xff] }
 0x635   :  { %11439 = vmatprep.subr.bf16.mxu1 %v17082_v47  ;;  %v17161_v47 = vcombine.low %v8499_v45, %v8503_v55  ;;  %v17154_v18 = vcombine.high %v8491_v38, %v8495_v35  ;;  %v8196_v55 = vld [vmem:[#allocation13 + $0x550] sm:$0xff] }
 0x637   :  { %11401 = vmatpush1.bf16.msra.mxu0 %v16945_v22  ;;  %v8483_v22 = vld [vmem:[#allocation13 + $0xe48] sm:$0xff] }
 0x638   :  { %11440 = vmatpush1.bf16.msra.mxu1 %v17081_v10  ;;  %11402 = vmatprep.subr.bf16.mxu0 %v17066_v23  ;;  %v8487_v10 = vld [vmem:[#allocation13 + $0xe68] sm:$0xff]  ;;  %v17017_v23 = vcombine.low %v8355_v26, %v8359_v43 }
 0x639   :  { %11441 = vmatprep.subr.bf16.mxu1 %v17074_v14  ;;  %v17153_v14 = vcombine.low %v8491_v38, %v8495_v35  ;;  %v17146_v57 = vcombine.high %v8483_v22, %v8487_v10 }
 0x63b   :  { %11403 = vmatpush2.bf16.msra.mxu0 %v17065_v34  ;;  %v8475_v34 = vld [vmem:[#allocation13 + $0xe08] sm:$0xff] }
 0x63c   :  { %11442 = vmatpush1.bf16.msra.mxu1 %v17073_v61  ;;  %11404 = vmatprep.subr.bf16.mxu0 %v17058_v28  ;;  %v8479_v61 = vld [vmem:[#allocation13 + $0xe28] sm:$0xff]  ;;  %v17009_v28 = vcombine.low %v8347_v6, %v8351_v50  ;;  %v8188_v50 = vld [vmem:[#allocation13 + $0x510] sm:$0xff] }
 0x63d   :  { %11443 = vmatprep.subr.bf16.mxu1 %v17194_v5  ;;  %v17145_v5 = vcombine.low %v8483_v22, %v8487_v10  ;;  %v17138_v4 = vcombine.high %v8475_v34, %v8479_v61  ;;  %v17137_v20 = vcombine.low %v8475_v34, %v8479_v61  ;;  %v8192_v22 = vld [vmem:[#allocation13 + $0x530] sm:$0xff] }
 0x63e   :  { %v8048_v34 = vld [vmem:[#allocation13 + $0xb0] sm:$0xff] }
 0x63f   :  { %11405 = vmatpush2.bf16.msra.mxu0 %v17057_v49  ;;  %v8212_v49 = vld [vmem:[#allocation13 + $0x5d0] sm:$0xff] }
 0x640   :  { %11444 = vmatpush2.bf16.msra.mxu1 %v17193_v29  ;;  %11406 = vmatprep.subr.bf16.mxu0 %v17050_v58  ;;  %v8216_v29 = vld [vmem:[#allocation13 + $0x5f0] sm:$0xff]  ;;  %v16747_v58 = vcombine.low %v8084_v16, %v8088_v59  ;;  %v16852_v16 = vcombine.high %v8188_v50, %v8192_v22 }
 0x641   :  { %11445 = vmatprep.subr.bf16.mxu1 %v17186_v30  ;;  %v21896_v30 = vld [vmem:[#allocation14] sm:$0xff]  ;;  %v16876_v31 = vcombine.high %v8212_v49, %v8216_v29  ;;  %v8044_v59 = vld [vmem:[#allocation13 + $0x90] sm:$0xff] }
 0x642   :  { %v8547_v42 = vrot.slane %v21896_v30, %v22502_v15  ;;  %v8180_v61 = vld [vmem:[#allocation13 + $0x4d0] sm:$0xff] }
 0x643   :  { %11407 = vmatpush2.bf16.msra.mxu0 %v17049_v24  ;;  %v8543_v24 = vrot.slane %v21896_v30, %v22496_v21 }
 0x644   :  { %11446 = vmatpush2.bf16.msra.mxu1 %v17185_v33  ;;  %11408 = vmatprep.subr.bf16.mxu0 %v17042_v2  ;;  %v8072_v2 = vld [vmem:[#allocation13 + $0x170] sm:$0xff] }
 0x645   :  { %11447 = vmatprep.subr.bf16.mxu1 %v17178_v62  ;;  %v8204_v62 = vld [vmem:[#allocation13 + $0x590] sm:$0xff] }
 0x647   :  { %11409 = vmatpush2.bf16.msra.mxu0 %v17041_v63  ;;  %v16875_v63 = vcombine.low %v8212_v49, %v8216_v29  ;;  %v8040_v49 = vld [vmem:[#allocation13 + $0x70] sm:$0xff] }
 0x648   :  { %11448 = vmatpush2.bf16.msra.mxu1 %v17177_v0  ;;  %11410 = vmatprep.subr.bf16.mxu0 %v17034_v44  ;;  %v16732_v0 = vcombine.high %v8068_v9, %v8072_v2  ;;  %v16868_v44 = vcombine.high %v8204_v62, %v8208_v39  ;;  %v8172_v29 = vld [vmem:[#allocation13 + $0x490] sm:$0xff] }
 0x649   :  { %11449 = vmatprep.subr.bf16.mxu1 %v17170_v52  ;;  %v8060_v52 = vld [vmem:[#allocation13 + $0x110] sm:$0xff] }
 0x64a   :  { %v16724_v35 = vcombine.high %v8060_v52, %v8064_v3 }
 0x64b   :  { %11411 = vmatpush2.bf16.msra.mxu0 %v17033_v1  ;;  %v8200_v1 = vld [vmem:[#allocation13 + $0x570] sm:$0xff] }
 0x64c   :  { %11450 = vmatpush2.bf16.msra.mxu1 %v17169_v48  ;;  %11412 = vmatprep.subr.bf16.mxu0 %v17026_v36  ;;  %v16731_v36 = vcombine.low %v8068_v9, %v8072_v2  ;;  %v8164_v2 = vld [vmem:[#allocation13 + $0x450] sm:$0xff] }
 0x64d   :  { %11451 = vmatprep.subr.bf16.mxu1 %v17162_v12  ;;  %v16867_v12 = vcombine.low %v8204_v62, %v8208_v39  ;;  %v8168_v62 = vld [vmem:[#allocation13 + $0x470] sm:$0xff]  ;;  %v16699_v39 = vcombine.low %v8036_v46, %v8040_v49 }
 0x64f   :  { %11413 = vmatpush2.bf16.msra.mxu0 %v17025_v53 }
 0x650   :  { %11452 = vmatpush2.bf16.msra.mxu1 %v17161_v47  ;;  %11414 = vmatprep.subr.bf16.mxu0 %v17018_v11  ;;  %v16860_v47 = vcombine.high %v8196_v55, %v8200_v1  ;;  %v8052_v11 = vld [vmem:[#allocation13 + $0xd0] sm:$0xff] }
 0x651   :  { %11453 = vmatprep.subr.bf16.mxu1 %v17154_v18  ;;  %v8056_v18 = vld [vmem:[#allocation13 + $0xf0] sm:$0xff] }
 0x653   :  { %11415 = vmatpush2.bf16.msra.mxu0 %v17017_v23  ;;  %v16723_v23 = vcombine.low %v8060_v52, %v8064_v3  ;;  %v8160_v52 = vld [vmem:[#allocation13 + $0x430] sm:$0xff] }
 0x654   :  { %11454 = vmatpush2.bf16.msra.mxu1 %v17153_v14  ;;  %11416 = vmatprep.subr.bf16.mxu0 %v17010_v40  ;;  %v16859_v14 = vcombine.low %v8196_v55, %v8200_v1  ;;  %v16716_v40 = vcombine.high %v8052_v11, %v8056_v18  ;;  %v8140_v1 = vld [vmem:[#allocation13 + $0x390] sm:$0xff] }
 0x655   :  { %11455 = vmatprep.subr.bf16.mxu1 %v17146_v57 }
 0x657   :  { %11417 = vmatpush2.bf16.msra.mxu0 %v17009_v28  ;;  %v8184_v28 = vld [vmem:[#allocation13 + $0x4f0] sm:$0xff] }
 0x658   :  { %11456 = vmatpush2.bf16.msra.mxu1 %v17145_v5  ;;  %11468 = vmatprep.subr.bf16.mxu0 %v16748_v19  ;;  %v16715_v5 = vcombine.low %v8052_v11, %v8056_v18  ;;  %v16851_v19 = vcombine.low %v8188_v50, %v8192_v22  ;;  %v16844_v41 = vcombine.high %v8180_v61, %v8184_v28  ;;  %v8136_v11 = vld [vmem:[#allocation13 + $0x370] sm:$0xff] }
 0x659   :  { %11457 = vmatprep.subr.bf16.mxu1 %v17138_v4  ;;  %v11174_v33 = vpop.f32.mrf.mxu0  ;;  %v16708_v4 = vcombine.high %v8044_v59, %v8048_v34  ;;  %v8268_v18 = vld [vmem:[#allocation13 + $0x790] sm:$0xff] }
 0x65a   :  { %11419 = vmatmul.mubr.bf16.vlgmr.msra.gmra.mxu0 %v21882_v25  ;;  %v11175_v56 = vadd.f32 %v11174_v33, %v8543_v24  ;;  %v8028_v24 = vld [vmem:[#allocation13 + $0x10] sm:$0xff] }
 0x65b   :  { %11469 = vmatpush1.bf16.msra.mxu0 %v16747_v58  ;;  %11500 = vmatprep.mubr.bf16.mxu0 %v21805_v54  ;;  %v11176_v8 = vpop.f32.mrf.mxu0  ;;  %v8176_v58 = vld [vmem:[#allocation13 + $0x4b0] sm:$0xff] }
 0x65c   :  { %11458 = vmatpush2.bf16.msra.mxu1 %v17137_v20  ;;  %11470 = vmatprep.subr.bf16.mxu0 %v16740_v37  ;;  %v11177_v26 = vadd.f32 %v11176_v8, %v8547_v42  ;;  %v16707_v20 = vcombine.low %v8044_v59, %v8048_v34  ;;  %v16843_v37 = vcombine.low %v8180_v61, %v8184_v28  ;;  %v8032_v33 = vld [vmem:[#allocation13 + $0x30] sm:$0xff] }
 0x65d   :  { %11509 = vmatprep.subr.bf16.mxu1 %v16876_v31  ;;  %v11178_v45 = vpop.f32.mrf.mxu0  ;;  %v16700_v31 = vcombine.high %v8036_v46, %v8040_v49  ;;  %v16836_v9 = vcombine.high %v8172_v29, %v8176_v58  ;;  %v16692_v42 = vcombine.high %v8028_v24, %v8032_v33  ;;  %v16828_v8 = vcombine.high %v8164_v2, %v8168_v62  ;;  %v8272_v50 = vld [vmem:[#allocation13 + $0x7b0] sm:$0xff] }
 0x65e   :  { %v11215_v48 = vpop.f32.mrf.mxu1  ;;  %v16691_v3 = vcombine.low %v8028_v24, %v8032_v33  ;;  %v8264_v59 = vld [vmem:[#allocation13 + $0x770] sm:$0xff]  ;;  %v16931_v61 = vcombine.low %v8268_v18, %v8272_v50 }
 0x65f   :  { %11460 = vmatmul.mubr.bf16.vlgmr.msra.gmra.mxu1 %v21888_v27  ;;  %11471 = vmatpush1.bf16.msra.mxu0 %v16739_v60  ;;  %v21905_v43 = vadd.f32 %v11215_v48, %v11175_v56  ;;  %v11179_v38 = vpop.f32.mrf.mxu0  ;;  %v16835_v60 = vcombine.low %v8172_v29, %v8176_v58  ;;  %v16827_v56 = vcombine.low %v8164_v2, %v8168_v62  ;;  %v8144_v48 = vld [vmem:[#allocation13 + $0x3b0] sm:$0xff] }
 0x660   :  { %11510 = vmatpush1.bf16.msra.mxu1 %v16875_v63  ;;  %11541 = vmatprep.mubr.bf16.mxu1 %v21838_v51  ;;  %v11217_v53 = vpop.f32.mrf.mxu1  ;;  %v8148_v63 = vld [vmem:[#allocation13 + $0x3d0] sm:$0xff]  ;;  %v16803_v22 = vcombine.low %v8140_v1, %v8144_v48 }
 0x661   :  { %11472 = vmatprep.subr.bf16.mxu0 %v16732_v0  ;;  %11511 = vmatprep.subr.bf16.mxu1 %v16868_v44  ;;  %v21908_v6 = vadd.f32 %v11217_v53, %v11177_v26  ;;  %v8152_v0 = vld [vmem:[#allocation13 + $0x3f0] sm:$0xff] }
 0x662   :  { %v11219_v10 = vpop.f32.mrf.mxu1  ;;  %v8156_v44 = vld [vmem:[#allocation13 + $0x410] sm:$0xff]  ;;  %v16812_v45 = vcombine.high %v8148_v63, %v8152_v0  ;;  %v16811_v26 = vcombine.low %v8148_v63, %v8152_v0 }
 0x663   :  { %11473 = vmatpush1.bf16.msra.mxu0 %v16731_v36  ;;  %v16820_v55 = vcombine.high %v8156_v44, %v8160_v52  ;;  %v8276_v36 = vld [vmem:[#allocation13 + $0x7d0] sm:$0xff]  ;;  %v16819_v38 = vcombine.low %v8156_v44, %v8160_v52 }
 0x664   :  { %11512 = vmatpush1.bf16.msra.mxu1 %v16867_v12  ;;  %11474 = vmatprep.subr.bf16.mxu0 %v16724_v35  ;;  %v11220_v57 = vpop.f32.mrf.mxu1  ;;  %v8280_v12 = vld [vmem:[#allocation13 + $0x7f0] sm:$0xff]  ;;  %v16804_v35 = vcombine.high %v8140_v1, %v8144_v48 }
 0x665   :  { %11513 = vmatprep.subr.bf16.mxu1 %v16860_v47  ;;  %v16940_v53 = vcombine.high %v8276_v36, %v8280_v12  ;;  %v8132_v47 = vld [vmem:[#allocation13 + $0x350] sm:$0xff]  ;;  %v16939_v10 = vcombine.low %v8276_v36, %v8280_v12 }
 0x666   :  { %v8128_v57 = vld [vmem:[#allocation13 + $0x330] sm:$0xff]  ;;  %v16795_v34 = vcombine.low %v8132_v47, %v8136_v11 }
 0x667   :  { %11475 = vmatpush1.bf16.msra.mxu0 %v16723_v23  ;;  %v16796_v23 = vcombine.high %v8132_v47, %v8136_v11  ;;  %v8256_v46 = vld [vmem:[#allocation13 + $0x730] sm:$0xff] }
 0x668   :  { %11514 = vmatpush1.bf16.msra.mxu1 %v16859_v14  ;;  %11476 = vmatprep.subr.bf16.mxu0 %v16716_v40  ;;  %v16932_v14 = vcombine.high %v8268_v18, %v8272_v50  ;;  %v8124_v40 = vld [vmem:[#allocation13 + $0x310] sm:$0xff] }
 0x669   :  { %11515 = vmatprep.subr.bf16.mxu1 %v16852_v16  ;;  %v8260_v16 = vld [vmem:[#allocation13 + $0x750] sm:$0xff]  ;;  %v16788_v28 = vcombine.high %v8124_v40, %v8128_v57  ;;  %v16787_v49 = vcombine.low %v8124_v40, %v8128_v57 }
 0x66a   :  { %v16923_v29 = vcombine.low %v8260_v16, %v8264_v59  ;;  %v8248_v24 = vld [vmem:[#allocation13 + $0x6f0] sm:$0xff] }
 0x66b   :  { %11477 = vmatpush1.bf16.msra.mxu0 %v16715_v5  ;;  %v16924_v5 = vcombine.high %v8260_v16, %v8264_v59  ;;  %v8240_v63 = vld [vmem:[#allocation13 + $0x6b0] sm:$0xff] }
 0x66c   :  { %11516 = vmatpush1.bf16.msra.mxu1 %v16851_v19  ;;  %11478 = vmatprep.subr.bf16.mxu0 %v16708_v4  ;;  %v8116_v19 = vld [vmem:[#allocation13 + $0x2d0] sm:$0xff] }
 0x66d   :  { %11517 = vmatprep.subr.bf16.mxu1 %v16844_v41  ;;  %v8120_v4 = vld [vmem:[#allocation13 + $0x2f0] sm:$0xff] }
 0x66e   :  { %v8252_v41 = vld [vmem:[#allocation13 + $0x710] sm:$0xff]  ;;  %v16780_v58 = vcombine.high %v8116_v19, %v8120_v4  ;;  %v16779_v33 = vcombine.low %v8116_v19, %v8120_v4 }
 0x66f   :  { %11479 = vmatpush1.bf16.msra.mxu0 %v16707_v20  ;;  %v16916_v20 = vcombine.high %v8252_v41, %v8256_v46  ;;  %v16915_v2 = vcombine.low %v8252_v41, %v8256_v46  ;;  %v8232_v1 = vld [vmem:[#allocation13 + $0x670] sm:$0xff] }
 0x670   :  { %11518 = vmatpush1.bf16.msra.mxu1 %v16843_v37  ;;  %11480 = vmatprep.subr.bf16.mxu0 %v16700_v31  ;;  %v8108_v37 = vld [vmem:[#allocation13 + $0x290] sm:$0xff] }
 0x671   :  { %11519 = vmatprep.subr.bf16.mxu1 %v16836_v9  ;;  %v8112_v31 = vld [vmem:[#allocation13 + $0x2b0] sm:$0xff] }
 0x672   :  { %v8244_v9 = vld [vmem:[#allocation13 + $0x6d0] sm:$0xff]  ;;  %v16772_v62 = vcombine.high %v8108_v37, %v8112_v31  ;;  %v16771_v0 = vcombine.low %v8108_v37, %v8112_v31 }
 0x673   :  { %11481 = vmatpush1.bf16.msra.mxu0 %v16699_v39  ;;  %v16908_v39 = vcombine.high %v8244_v9, %v8248_v24  ;;  %v16907_v44 = vcombine.low %v8244_v9, %v8248_v24  ;;  %v8224_v47 = vld [vmem:[#allocation13 + $0x630] sm:$0xff] }
 0x674   :  { %11520 = vmatpush1.bf16.msra.mxu1 %v16835_v60  ;;  %11482 = vmatprep.subr.bf16.mxu0 %v16692_v42  ;;  %v8100_v60 = vld [vmem:[#allocation13 + $0x250] sm:$0xff] }
 0x675   :  { %11521 = vmatprep.subr.bf16.mxu1 %v16828_v8  ;;  %v8104_v42 = vld [vmem:[#allocation13 + $0x270] sm:$0xff] }
 0x676   :  { %v8236_v8 = vld [vmem:[#allocation13 + $0x690] sm:$0xff]  ;;  %v16764_v52 = vcombine.high %v8100_v60, %v8104_v42  ;;  %v16763_v48 = vcombine.low %v8100_v60, %v8104_v42 }
 0x677   :  { %11483 = vmatpush1.bf16.msra.mxu0 %v16691_v3  ;;  %v16900_v3 = vcombine.high %v8236_v8, %v8240_v63  ;;  %v16899_v36 = vcombine.low %v8236_v8, %v8240_v63  ;;  %v8472_v40 = vld [vmem:[#allocation13 + $0xdf0] sm:$0xff] }
 0x678   :  { %11522 = vmatpush1.bf16.msra.mxu1 %v16827_v56  ;;  %11484 = vmatprep.subr.bf16.mxu0 %v16812_v45  ;;  %v8092_v56 = vld [vmem:[#allocation13 + $0x210] sm:$0xff] }
 0x679   :  { %11523 = vmatprep.subr.bf16.mxu1 %v16820_v55  ;;  %v8096_v45 = vld [vmem:[#allocation13 + $0x230] sm:$0xff] }
 0x67a   :  { %v8228_v55 = vld [vmem:[#allocation13 + $0x650] sm:$0xff]  ;;  %v16756_v12 = vcombine.high %v8092_v56, %v8096_v45  ;;  %v16755_v11 = vcombine.low %v8092_v56, %v8096_v45 }
 0x67b   :  { %11485 = vmatpush2.bf16.msra.mxu0 %v16811_v26  ;;  %v16892_v26 = vcombine.high %v8228_v55, %v8232_v1  ;;  %v16891_v18 = vcombine.low %v8228_v55, %v8232_v1  ;;  %v8460_v19 = vld [vmem:[#allocation13 + $0xd90] sm:$0xff] }
 0x67c   :  { %11524 = vmatpush1.bf16.msra.mxu1 %v16819_v38  ;;  %11486 = vmatprep.subr.bf16.mxu0 %v16804_v35  ;;  %v8340_v38 = vld [vmem:[#allocation13 + $0x9d0] sm:$0xff] }
 0x67d   :  { %11525 = vmatprep.subr.bf16.mxu1 %v16940_v53  ;;  %v8344_v35 = vld [vmem:[#allocation13 + $0x9f0] sm:$0xff] }
 0x67e   :  { %v8220_v53 = vld [vmem:[#allocation13 + $0x610] sm:$0xff]  ;;  %v17004_v50 = vcombine.high %v8340_v38, %v8344_v35  ;;  %v17003_v57 = vcombine.low %v8340_v38, %v8344_v35 }
 0x67f   :  { %11487 = vmatpush2.bf16.msra.mxu0 %v16803_v22  ;;  %v16884_v22 = vcombine.high %v8220_v53, %v8224_v47  ;;  %v16883_v16 = vcombine.low %v8220_v53, %v8224_v47  ;;  %v8464_v4 = vld [vmem:[#allocation13 + $0xdb0] sm:$0xff] }
 0x680   :  { %11526 = vmatpush2.bf16.msra.mxu1 %v16939_v10  ;;  %11488 = vmatprep.subr.bf16.mxu0 %v16796_v23  ;;  %v8332_v10 = vld [vmem:[#allocation13 + $0x990] sm:$0xff]  ;;  %v17124_v37 = vcombine.high %v8460_v19, %v8464_v4 }
 0x681   :  { %11527 = vmatprep.subr.bf16.mxu1 %v16932_v14  ;;  %v8336_v23 = vld [vmem:[#allocation13 + $0x9b0] sm:$0xff] }
 0x682   :  { %v8468_v14 = vld [vmem:[#allocation13 + $0xdd0] sm:$0xff]  ;;  %v16996_v59 = vcombine.high %v8332_v10, %v8336_v23  ;;  %v16995_v46 = vcombine.low %v8332_v10, %v8336_v23 }
 0x683   :  { %11489 = vmatpush2.bf16.msra.mxu0 %v16795_v34  ;;  %v17132_v34 = vcombine.high %v8468_v14, %v8472_v40  ;;  %v8316_v31 = vld [vmem:[#allocation13 + $0x910] sm:$0xff] }
 0x684   :  { %11528 = vmatpush2.bf16.msra.mxu1 %v16931_v61  ;;  %11490 = vmatprep.subr.bf16.mxu0 %v16788_v28  ;;  %v8324_v61 = vld [vmem:[#allocation13 + $0x950] sm:$0xff] }
 0x685   :  { %11529 = vmatprep.subr.bf16.mxu1 %v16924_v5  ;;  %v8328_v5 = vld [vmem:[#allocation13 + $0x970] sm:$0xff] }
 0x686   :  { %v8320_v9 = vld [vmem:[#allocation13 + $0x930] sm:$0xff] }
 0x687   :  { %11491 = vmatpush2.bf16.msra.mxu0 %v16787_v49  ;;  %v16980_v42 = vcombine.high %v8316_v31, %v8320_v9  ;;  %v8448_v56 = vld [vmem:[#allocation13 + $0xd30] sm:$0xff]  ;;  %v16979_v55 = vcombine.low %v8316_v31, %v8320_v9 }
 0x688   :  { %11530 = vmatpush2.bf16.msra.mxu1 %v16923_v29  ;;  %11492 = vmatprep.subr.bf16.mxu0 %v16780_v58  ;;  %v17131_v29 = vcombine.low %v8468_v14, %v8472_v40  ;;  %v8304_v38 = vld [vmem:[#allocation13 + $0x8b0] sm:$0xff] }
 0x689   :  { %11531 = vmatprep.subr.bf16.mxu1 %v16916_v20  ;;  %v16988_v20 = vcombine.high %v8324_v61, %v8328_v5  ;;  %v8436_v35 = vld [vmem:[#allocation13 + $0xcd0] sm:$0xff] }
 0x68a   :  { %v8440_v53 = vld [vmem:[#allocation13 + $0xcf0] sm:$0xff] }
 0x68b   :  { %11493 = vmatpush2.bf16.msra.mxu0 %v16779_v33  ;;  %v8452_v33 = vld [vmem:[#allocation13 + $0xd50] sm:$0xff] }
 0x68c   :  { %11532 = vmatpush2.bf16.msra.mxu1 %v16915_v2  ;;  %11494 = vmatprep.subr.bf16.mxu0 %v16772_v62  ;;  %v8456_v2 = vld [vmem:[#allocation13 + $0xd70] sm:$0xff] }
 0x68d   :  { %11533 = vmatprep.subr.bf16.mxu1 %v16908_v39  ;;  %v17116_v63 = vcombine.high %v8452_v33, %v8456_v2  ;;  %v17115_v1 = vcombine.low %v8452_v33, %v8456_v2  ;;  %v8296_v10 = vld [vmem:[#allocation13 + $0x870] sm:$0xff] }
 0x68e   :  { %v8428_v23 = vld [vmem:[#allocation13 + $0xc90] sm:$0xff] }
 0x68f   :  { %11495 = vmatpush2.bf16.msra.mxu0 %v16771_v0  ;;  %v8308_v0 = vld [vmem:[#allocation13 + $0x8d0] sm:$0xff] }
 0x690   :  { %11534 = vmatpush2.bf16.msra.mxu1 %v16907_v44  ;;  %11496 = vmatprep.subr.bf16.mxu0 %v16764_v52  ;;  %v8312_v44 = vld [vmem:[#allocation13 + $0x8f0] sm:$0xff] }
 0x691   :  { %11535 = vmatprep.subr.bf16.mxu1 %v16900_v3  ;;  %v8444_v3 = vld [vmem:[#allocation13 + $0xd10] sm:$0xff]  ;;  %v16971_v47 = vcombine.low %v8308_v0, %v8312_v44 }
 0x692   :  { %v8432_v14 = vld [vmem:[#allocation13 + $0xcb0] sm:$0xff] }
 0x693   :  { %11497 = vmatpush2.bf16.msra.mxu0 %v16763_v48  ;;  %v16972_v48 = vcombine.high %v8308_v0, %v8312_v44  ;;  %v8396_v33 = vld [vmem:[#allocation13 + $0xb90] sm:$0xff] }
 0x694   :  { %11536 = vmatpush2.bf16.msra.mxu1 %v16899_v36  ;;  %11498 = vmatprep.subr.bf16.mxu0 %v16756_v12  ;;  %v17108_v12 = vcombine.high %v8444_v3, %v8448_v56  ;;  %v8400_v2 = vld [vmem:[#allocation13 + $0xbb0] sm:$0xff] }
 0x695   :  { %11537 = vmatprep.subr.bf16.mxu1 %v16892_v26  ;;  %v8300_v26 = vld [vmem:[#allocation13 + $0x890] sm:$0xff] }
 0x696   :  { %v16963_v40 = vcombine.low %v8300_v26, %v8304_v38  ;;  %v8392_v0 = vld [vmem:[#allocation13 + $0xb70] sm:$0xff] }
 0x697   :  { %11499 = vmatpush2.bf16.msra.mxu0 %v16755_v11  ;;  %v17107_v11 = vcombine.low %v8444_v3, %v8448_v56  ;;  %v8524_v44 = vld [vmem:[#allocation13 + $0xf90] sm:$0xff]  ;;  %v17059_v56 = vcombine.low %v8396_v33, %v8400_v2 }
 0x698   :  { %11538 = vmatpush2.bf16.msra.mxu1 %v16891_v18  ;;  %11550 = vmatprep.subr.bf16.mxu0 %v17004_v50  ;;  %v16964_v18 = vcombine.high %v8300_v26, %v8304_v38  ;;  %v17100_v50 = vcombine.high %v8436_v35, %v8440_v53  ;;  %v8528_v3 = vld [vmem:[#allocation13 + $0xfb0] sm:$0xff] }
 0x699   :  { %11539 = vmatprep.subr.bf16.mxu1 %v16884_v22  ;;  %v8292_v22 = vld [vmem:[#allocation13 + $0x850] sm:$0xff] }
 0x69a   :  { %v11256_v28 = vpop.f32.mrf.mxu0  ;;  %11501 = vmatmul.mubr.bf16.vlgmr.msra.gmra.mxu0 %v21811_v17  ;;  %v8520_v26 = vld [vmem:[#allocation13 + $0xf70] sm:$0xff] }
 0x69b   :  { %v11257_v41 = vadd.f32 %v11256_v28, %v21905_v43  ;;  %11551 = vmatpush1.bf16.msra.mxu0 %v17003_v57  ;;  %11582 = vmatprep.mubr.bf16.mxu0 %v21867_v13  ;;  %v16987_v43 = vcombine.low %v8324_v61, %v8328_v5  ;;  %v17099_v57 = vcombine.low %v8436_v35, %v8440_v53  ;;  %v8288_v61 = vld [vmem:[#allocation13 + $0x830] sm:$0xff] }
 0x69c   :  { %11540 = vmatpush2.bf16.msra.mxu1 %v16883_v16  ;;  %v11258_v49 = vpop.f32.mrf.mxu0  ;;  %11552 = vmatprep.subr.bf16.mxu0 %v16996_v59  ;;  %v16956_v16 = vcombine.high %v8292_v22, %v8296_v10  ;;  %v17092_v59 = vcombine.high %v8428_v23, %v8432_v14  ;;  %v8420_v28 = vld [vmem:[#allocation13 + $0xc50] sm:$0xff]  ;;  %v17187_v35 = vcombine.low %v8524_v44, %v8528_v3 }
 0x69d   :  { %v11259_v58 = vadd.f32 %v11258_v49, %v21908_v6  ;;  %11591 = vmatprep.subr.bf16.mxu1 %v17132_v34  ;;  %v17123_v6 = vcombine.low %v8460_v19, %v8464_v4  ;;  %v8284_v34 = vld [vmem:[#allocation13 + $0x810] sm:$0xff]  ;;  %v16955_v19 = vcombine.low %v8292_v22, %v8296_v10  ;;  %v17091_v4 = vcombine.low %v8428_v23, %v8432_v14 }
 0x69e   :  { %v11260_v24 = vpop.f32.mrf.mxu0  ;;  %v8424_v5 = vld [vmem:[#allocation13 + $0xc70] sm:$0xff] }
 0x69f   :  { %v11297_v62 = vpop.f32.mrf.mxu1  ;;  %11542 = vmatmul.mubr.bf16.vlgmr.msra.gmra.mxu1 %v21843_v32  ;;  %11553 = vmatpush1.bf16.msra.mxu0 %v16995_v46  ;;  %v17084_v46 = vcombine.high %v8420_v28, %v8424_v5  ;;  %v8404_v49 = vld [vmem:[#allocation13 + $0xbd0] sm:$0xff]  ;;  %v17083_v31 = vcombine.low %v8420_v28, %v8424_v5 }
 0x6a0   :  { %v21915_v39 = vadd.f32 %v11297_v62, %v11257_v41  ;;  %11592 = vmatpush1.bf16.msra.mxu1 %v17131_v29  ;;  %11623 = vmatprep.mubr.bf16.mxu1 %v21877_v7  ;;  %v11261_v60 = vpop.f32.mrf.mxu0  ;;  %v16948_v41 = vcombine.high %v8284_v34, %v8288_v61  ;;  %v8408_v29 = vld [vmem:[#allocation13 + $0xbf0] sm:$0xff] }
 0x6a1   :  { %v11299_v8 = vpop.f32.mrf.mxu1  ;;  %11554 = vmatprep.subr.bf16.mxu0 %v16988_v20  ;;  %11593 = vmatprep.subr.bf16.mxu1 %v17124_v37  ;;  %v8416_v20 = vld [vmem:[#allocation13 + $0xc30] sm:$0xff]  ;;  %v16947_v37 = vcombine.low %v8284_v34, %v8288_v61  ;;  %v17068_v9 = vcombine.high %v8404_v49, %v8408_v29  ;;  %v17067_v60 = vcombine.low %v8404_v49, %v8408_v29 }
 0x6a2   :  { %v21918_v52 = vadd.f32 %v11299_v8, %v11259_v58  ;;  %v8412_v58 = vld [vmem:[#allocation13 + $0xc10] sm:$0xff]  ;;  %vm11796_vm13 = vcmp.gt.f32.partialorder %v21915_v39, 0.0 }
 0x6a3   :  { %v11301_v45 = vpop.f32.mrf.mxu1  ;;  %11555 = vmatpush1.bf16.msra.mxu0 %v16987_v43  ;;  %v17076_v24 = vcombine.high %v8412_v58, %v8416_v20  ;;  %v8532_v62 = vld [vmem:[#allocation13 + $0xfd0] sm:$0xff] }
 0x6a4   :  { %11594 = vmatpush1.bf16.msra.mxu1 %v17123_v6  ;;  %11556 = vmatprep.subr.bf16.mxu0 %v16980_v42  ;;  %v8536_v43 = vld [vmem:[#allocation13 + $0xff0] sm:$0xff]  ;;  %v17075_v6 = vcombine.low %v8412_v58, %v8416_v20  ;;  %v17060_v42 = vcombine.high %v8396_v33, %v8400_v2  ;;  %vm11797_vm11 = vcmp.gt.f32.partialorder %v21918_v52, 0.0 }
 0x6a5   :  { %v11302_v36 = vpop.f32.mrf.mxu1  ;;  %11595 = vmatprep.subr.bf16.mxu1 %v17116_v63  ;;  %v17196_v8 = vcombine.high %v8532_v62, %v8536_v43  ;;  %v8388_v63 = vld [vmem:[#allocation13 + $0xb50] sm:$0xff]  ;;  %v17195_v45 = vcombine.low %v8532_v62, %v8536_v43 }
 0x6a6   :  { %v8384_v36 = vld [vmem:[#allocation13 + $0xb30] sm:$0xff]  ;;  %v17051_v38 = vcombine.low %v8388_v63, %v8392_v0 }
 0x6a7   :  { %11557 = vmatpush1.bf16.msra.mxu0 %v16979_v55  ;;  %v17052_v55 = vcombine.high %v8388_v63, %v8392_v0  ;;  %v8512_v22 = vld [vmem:[#allocation13 + $0xf30] sm:$0xff] }
 0x6a8   :  { %11596 = vmatpush1.bf16.msra.mxu1 %v17115_v1  ;;  %11558 = vmatprep.subr.bf16.mxu0 %v16972_v48  ;;  %v17188_v1 = vcombine.high %v8524_v44, %v8528_v3  ;;  %v8380_v48 = vld [vmem:[#allocation13 + $0xb10] sm:$0xff] }
 0x6a9   :  { %11597 = vmatprep.subr.bf16.mxu1 %v17108_v12  ;;  %v8516_v12 = vld [vmem:[#allocation13 + $0xf50] sm:$0xff]  ;;  %v17044_v53 = vcombine.high %v8380_v48, %v8384_v36  ;;  %v17043_v10 = vcombine.low %v8380_v48, %v8384_v36  ;;  %v8217_v48 = vld [vmem:[#allocation13 + $0x5f8] sm:$0xff] }
 0x6aa   :  { %v17179_v23 = vcombine.low %v8516_v12, %v8520_v26  ;;  %v8504_v34 = vld [vmem:[#allocation13 + $0xef0] sm:$0xff] }
 0x6ab   :  { %11559 = vmatpush1.bf16.msra.mxu0 %v16971_v47  ;;  %v17180_v47 = vcombine.high %v8516_v12, %v8520_v26  ;;  %v8496_v49 = vld [vmem:[#allocation13 + $0xeb0] sm:$0xff] }
 0x6ac   :  { %11598 = vmatpush1.bf16.msra.mxu1 %v17107_v11  ;;  %11560 = vmatprep.subr.bf16.mxu0 %v16964_v18  ;;  %v8372_v11 = vld [vmem:[#allocation13 + $0xad0] sm:$0xff] }
 0x6ad   :  { %11599 = vmatprep.subr.bf16.mxu1 %v17100_v50  ;;  %v8376_v18 = vld [vmem:[#allocation13 + $0xaf0] sm:$0xff] }
 0x6ae   :  { %v8508_v50 = vld [vmem:[#allocation13 + $0xf10] sm:$0xff]  ;;  %v17036_v14 = vcombine.high %v8372_v11, %v8376_v18  ;;  %v17035_v61 = vcombine.low %v8372_v11, %v8376_v18  ;;  %v8073_v18 = vld [vmem:[#allocation13 + $0x178] sm:$0xff] }
 0x6af   :  { %11561 = vmatpush1.bf16.msra.mxu0 %v16963_v40  ;;  %v17172_v40 = vcombine.high %v8508_v50, %v8512_v22  ;;  %v17171_v28 = vcombine.low %v8508_v50, %v8512_v22  ;;  %v8488_v33 = vld [vmem:[#allocation13 + $0xe70] sm:$0xff]  ;;  %v8205_v50 = vld [vmem:[#allocation13 + $0x598] sm:$0xff] }
 0x6b0   :  { %11600 = vmatpush1.bf16.msra.mxu1 %v17099_v57  ;;  %11562 = vmatprep.subr.bf16.mxu0 %v16956_v16  ;;  %v8364_v57 = vld [vmem:[#allocation13 + $0xa90] sm:$0xff]  ;;  %v8209_v22 = vld [vmem:[#allocation13 + $0x5b8] sm:$0xff] }
 0x6b1   :  { %11601 = vmatprep.subr.bf16.mxu1 %v17092_v59  ;;  %v8368_v16 = vld [vmem:[#allocation13 + $0xab0] sm:$0xff] }
 0x6b2   :  { %v8500_v59 = vld [vmem:[#allocation13 + $0xed0] sm:$0xff]  ;;  %v17028_v5 = vcombine.high %v8364_v57, %v8368_v16  ;;  %v17027_v29 = vcombine.low %v8364_v57, %v8368_v16 }
 0x6b3   :  { %11563 = vmatpush1.bf16.msra.mxu0 %v16955_v19  ;;  %v17164_v19 = vcombine.high %v8500_v59, %v8504_v34  ;;  %v17163_v58 = vcombine.low %v8500_v59, %v8504_v34  ;;  %v8480_v63 = vld [vmem:[#allocation13 + $0xe30] sm:$0xff]  ;;  %v16870_v59 = vcombine.high %v8205_v50, %v8209_v22  ;;  %v8061_v34 = vld [vmem:[#allocation13 + $0x118] sm:$0xff] }
 0x6b4   :  { %11602 = vmatpush1.bf16.msra.mxu1 %v17091_v4  ;;  %11564 = vmatprep.subr.bf16.mxu0 %v16948_v41  ;;  %v8356_v4 = vld [vmem:[#allocation13 + $0xa50] sm:$0xff] }
 0x6b5   :  { %11603 = vmatprep.subr.bf16.mxu1 %v17084_v46  ;;  %v8360_v41 = vld [vmem:[#allocation13 + $0xa70] sm:$0xff] }
 0x6b6   :  { %v8492_v46 = vld [vmem:[#allocation13 + $0xe90] sm:$0xff]  ;;  %v17020_v20 = vcombine.high %v8356_v4, %v8360_v41  ;;  %v17019_v2 = vcombine.low %v8356_v4, %v8360_v41  ;;  %v8201_v4 = vld [vmem:[#allocation13 + $0x578] sm:$0xff] }
 0x6b7   :  { %11565 = vmatpush1.bf16.msra.mxu0 %v16947_v37  ;;  %v17156_v37 = vcombine.high %v8492_v46, %v8496_v49  ;;  %v17155_v62 = vcombine.low %v8492_v46, %v8496_v49  ;;  %v16869_v46 = vcombine.low %v8205_v50, %v8209_v22  ;;  %v8165_v50 = vld [vmem:[#allocation13 + $0x458] sm:$0xff] }
 0x6b8   :  { %11604 = vmatpush1.bf16.msra.mxu1 %v17083_v31  ;;  %11566 = vmatprep.subr.bf16.mxu0 %v17068_v9  ;;  %v8348_v31 = vld [vmem:[#allocation13 + $0xa10] sm:$0xff]  ;;  %v8169_v22 = vld [vmem:[#allocation13 + $0x478] sm:$0xff] }
 0x6b9   :  { %11605 = vmatprep.subr.bf16.mxu1 %v17076_v24  ;;  %v8352_v9 = vld [vmem:[#allocation13 + $0xa30] sm:$0xff] }
 0x6ba   :  { %v8484_v24 = vld [vmem:[#allocation13 + $0xe50] sm:$0xff]  ;;  %v17012_v43 = vcombine.high %v8348_v31, %v8352_v9  ;;  %v17011_v0 = vcombine.low %v8348_v31, %v8352_v9  ;;  %v8053_v31 = vld [vmem:[#allocation13 + $0xd8] sm:$0xff] }
 0x6bb   :  { %11567 = vmatpush2.bf16.msra.mxu0 %v17067_v60  ;;  %v17148_v60 = vcombine.high %v8484_v24, %v8488_v33  ;;  %v17147_v44 = vcombine.low %v8484_v24, %v8488_v33  ;;  %v8057_v9 = vld [vmem:[#allocation13 + $0xf8] sm:$0xff] }
 0x6bc   :  { %11606 = vmatpush1.bf16.msra.mxu1 %v17075_v6  ;;  %11568 = vmatprep.subr.bf16.mxu0 %v17060_v42  ;;  %v8085_v6 = vld [vmem:[#allocation13 + $0x1d8] sm:$0xff] }
 0x6bd   :  { %11607 = vmatprep.subr.bf16.mxu1 %v17196_v8  ;;  %v8089_v42 = vld [vmem:[#allocation13 + $0x1f8] sm:$0xff]  ;;  %v8476_v8 = vld [vmem:[#allocation13 + $0xe10] sm:$0xff] }
 0x6be   :  { %v16750_v3 = vcombine.high %v8085_v6, %v8089_v42  ;;  %v16749_v36 = vcombine.low %v8085_v6, %v8089_v42  ;;  %v17139_v12 = vcombine.low %v8476_v8, %v8480_v63  ;;  %v8189_v33 = vld [vmem:[#allocation13 + $0x518] sm:$0xff]  ;;  %v16718_v6 = vcombine.high %v8053_v31, %v8057_v9 }
 0x6bf   :  { %11569 = vmatpush2.bf16.msra.mxu0 %v17059_v56  ;;  %v17140_v56 = vcombine.high %v8476_v8, %v8480_v63  ;;  %v8045_v8 = vld [vmem:[#allocation13 + $0x98] sm:$0xff] }
 0x6c0   :  { %11608 = vmatpush2.bf16.msra.mxu1 %v17195_v45  ;;  %11570 = vmatprep.subr.bf16.mxu0 %v17052_v55  ;;  %v8077_v45 = vld [vmem:[#allocation13 + $0x198] sm:$0xff] }
 0x6c1   :  { %11609 = vmatprep.subr.bf16.mxu1 %v17188_v1  ;;  %v8081_v55 = vld [vmem:[#allocation13 + $0x1b8] sm:$0xff] }
 0x6c2   :  { %v8213_v1 = vld [vmem:[#allocation13 + $0x5d8] sm:$0xff]  ;;  %v16742_v26 = vcombine.high %v8077_v45, %v8081_v55 }
 0x6c3   :  { %11571 = vmatpush2.bf16.msra.mxu0 %v17051_v38  ;;  %v16878_v38 = vcombine.high %v8213_v1, %v8217_v48  ;;  %v16877_v57 = vcombine.low %v8213_v1, %v8217_v48  ;;  %v8049_v63 = vld [vmem:[#allocation13 + $0xb8] sm:$0xff] }
 0x6c4   :  { %11610 = vmatpush2.bf16.msra.mxu1 %v17187_v35  ;;  %11572 = vmatprep.subr.bf16.mxu0 %v17044_v53  ;;  %v8069_v35 = vld [vmem:[#allocation13 + $0x158] sm:$0xff] }
 0x6c5   :  { %11611 = vmatprep.subr.bf16.mxu1 %v17180_v47  ;;  %v22513_v53 = vld [vmem:[#allocation82_spill] sm:$0xff]  ;;  %v16734_v16 = vcombine.high %v8069_v35, %v8073_v18 }
 0x6c6   :  { %v8551_v47 = vrot.slane %v21896_v30, %v22513_v53  ;;  %v8037_v1 = vld [vmem:[#allocation13 + $0x58] sm:$0xff] }
 0x6c7   :  { %11573 = vmatpush2.bf16.msra.mxu0 %v17043_v10  ;;  %v16741_v10 = vcombine.low %v8077_v45, %v8081_v55  ;;  %v16710_v45 = vcombine.high %v8045_v8, %v8049_v63  ;;  %v8041_v48 = vld [vmem:[#allocation13 + $0x78] sm:$0xff] }
 0x6c8   :  { %11612 = vmatpush2.bf16.msra.mxu1 %v17179_v23  ;;  %11574 = vmatprep.subr.bf16.mxu0 %v17036_v14  ;;  %v22514_v23 = vld [vmem:[#allocation95_spill] sm:$0xff] }
 0x6c9   :  { %11613 = vmatprep.subr.bf16.mxu1 %v17172_v40  ;;  %v8555_v14 = vrot.slane %v21896_v30, %v22514_v23 }
 0x6cb   :  { %11575 = vmatpush2.bf16.msra.mxu0 %v17035_v61  ;;  %v8065_v61 = vld [vmem:[#allocation13 + $0x138] sm:$0xff] }
 0x6cc   :  { %11614 = vmatpush2.bf16.msra.mxu1 %v17171_v28  ;;  %11576 = vmatprep.subr.bf16.mxu0 %v17028_v5 }
 0x6cd   :  { %11615 = vmatprep.subr.bf16.mxu1 %v17164_v19  ;;  %v8197_v19 = vld [vmem:[#allocation13 + $0x558] sm:$0xff] }
 0x6cf   :  { %11577 = vmatpush2.bf16.msra.mxu0 %v17027_v29 }
 0x6d0   :  { %11616 = vmatpush2.bf16.msra.mxu1 %v17163_v58  ;;  %11578 = vmatprep.subr.bf16.mxu0 %v17020_v20  ;;  %v16726_v58 = vcombine.high %v8061_v34, %v8065_v61 }
 0x6d1   :  { %11617 = vmatprep.subr.bf16.mxu1 %v17156_v37  ;;  %v16862_v37 = vcombine.high %v8197_v19, %v8201_v4 }
 0x6d3   :  { %11579 = vmatpush2.bf16.msra.mxu0 %v17019_v2  ;;  %v8193_v2 = vld [vmem:[#allocation13 + $0x538] sm:$0xff] }
 0x6d4   :  { %11618 = vmatpush2.bf16.msra.mxu1 %v17155_v62  ;;  %11580 = vmatprep.subr.bf16.mxu0 %v17012_v43  ;;  %v16725_v43 = vcombine.low %v8061_v34, %v8065_v61  ;;  %v16854_v42 = vcombine.high %v8189_v33, %v8193_v2  ;;  %v8157_v34 = vld [vmem:[#allocation13 + $0x418] sm:$0xff] }
 0x6d5   :  { %11619 = vmatprep.subr.bf16.mxu1 %v17148_v60  ;;  %v16861_v60 = vcombine.low %v8197_v19, %v8201_v4  ;;  %v8161_v61 = vld [vmem:[#allocation13 + $0x438] sm:$0xff] }
 0x6d6   :  { %v16822_v4 = vcombine.high %v8157_v34, %v8161_v61 }
 0x6d7   :  { %11581 = vmatpush2.bf16.msra.mxu0 %v17011_v0  ;;  %v8181_v0 = vld [vmem:[#allocation13 + $0x4d8] sm:$0xff] }
 0x6d8   :  { %11620 = vmatpush2.bf16.msra.mxu1 %v17147_v44  ;;  %11632 = vmatprep.subr.bf16.mxu0 %v16750_v3  ;;  %v8185_v44 = vld [vmem:[#allocation13 + $0x4f8] sm:$0xff]  ;;  %v16717_v3 = vcombine.low %v8053_v31, %v8057_v9 }
 0x6d9   :  { %11621 = vmatprep.subr.bf16.mxu1 %v17140_v56  ;;  %v16853_v56 = vcombine.low %v8189_v33, %v8193_v2  ;;  %v16846_v55 = vcombine.high %v8181_v0, %v8185_v44  ;;  %v8133_v31 = vld [vmem:[#allocation13 + $0x358] sm:$0xff] }
 0x6da   :  { %v11338_v11 = vpop.f32.mrf.mxu0  ;;  %11583 = vmatmul.mubr.bf16.vlgmr.msra.gmra.mxu0 %v21882_v25  ;;  %v8137_v9 = vld [vmem:[#allocation13 + $0x378] sm:$0xff] }
 0x6db   :  { %11633 = vmatpush1.bf16.msra.mxu0 %v16749_v36  ;;  %11664 = vmatprep.mubr.bf16.mxu0 %v21805_v54  ;;  %v11339_v28 = vadd.f32 %v11338_v11, %v8551_v47  ;;  %v16733_v54 = vcombine.low %v8069_v35, %v8073_v18  ;;  %v8173_v36 = vld [vmem:[#allocation13 + $0x498] sm:$0xff]  ;;  %v16702_v35 = vcombine.high %v8037_v1, %v8041_v48 }
 0x6dc   :  { %11622 = vmatpush2.bf16.msra.mxu1 %v17139_v12  ;;  %v11340_v40 = vpop.f32.mrf.mxu0  ;;  %11634 = vmatprep.subr.bf16.mxu0 %v16742_v26  ;;  %v8177_v12 = vld [vmem:[#allocation13 + $0x4b8] sm:$0xff]  ;;  %v16709_v26 = vcombine.low %v8045_v8, %v8049_v63 }
 0x6dd   :  { %11673 = vmatprep.subr.bf16.mxu1 %v16878_v38  ;;  %v11341_v49 = vadd.f32 %v11340_v40, %v8555_v14  ;;  %v16845_v38 = vcombine.low %v8181_v0, %v8185_v44  ;;  %v16838_v47 = vcombine.high %v8173_v36, %v8177_v12  ;;  %v8029_v11 = vld [vmem:[#allocation13 + $0x18] sm:$0xff]  ;;  %v16837_v14 = vcombine.low %v8173_v36, %v8177_v12 }
 0x6de   :  { %v11342_v5 = vpop.f32.mrf.mxu0  ;;  %v8033_v18 = vld [vmem:[#allocation13 + $0x38] sm:$0xff]  ;;  %v16797_v0 = vcombine.low %v8133_v31, %v8137_v9 }
 0x6df   :  { %v11379_v41 = vpop.f32.mrf.mxu1  ;;  %11624 = vmatmul.mubr.bf16.vlgmr.msra.gmra.mxu1 %v21888_v27  ;;  %11635 = vmatpush1.bf16.msra.mxu0 %v16741_v10  ;;  %v16701_v10 = vcombine.low %v8037_v1, %v8041_v48  ;;  %v16694_v40 = vcombine.high %v8029_v11, %v8033_v18  ;;  %v16829_v5 = vcombine.low %v8165_v50, %v8169_v22  ;;  %v8269_v33 = vld [vmem:[#allocation13 + $0x798] sm:$0xff] }
 0x6e0   :  { %v21927_v30 = vadd.f32 %v11379_v41, %v11339_v28  ;;  %11674 = vmatpush1.bf16.msra.mxu1 %v16877_v57  ;;  %11705 = vmatprep.mubr.bf16.mxu1 %v21838_v51  ;;  %v11343_v29 = vpop.f32.mrf.mxu0  ;;  %v16830_v57 = vcombine.high %v8165_v50, %v8169_v22  ;;  %v16693_v28 = vcombine.low %v8029_v11, %v8033_v18  ;;  %v8141_v41 = vld [vmem:[#allocation13 + $0x398] sm:$0xff] }
 0x6e1   :  { %v11381_v20 = vpop.f32.mrf.mxu1  ;;  %11636 = vmatprep.subr.bf16.mxu0 %v16734_v16  ;;  %11675 = vmatprep.subr.bf16.mxu1 %v16870_v59  ;;  %v8149_v16 = vld [vmem:[#allocation13 + $0x3d8] sm:$0xff] }
 0x6e2   :  { %v21930_v24 = vadd.f32 %v11381_v20, %v11341_v49  ;;  %v8153_v59 = vld [vmem:[#allocation13 + $0x3f8] sm:$0xff] }
 0x6e3   :  { %v11383_v62 = vpop.f32.mrf.mxu1  ;;  %11637 = vmatpush1.bf16.msra.mxu0 %v16733_v54  ;;  %v16814_v19 = vcombine.high %v8149_v16, %v8153_v59  ;;  %v8145_v54 = vld [vmem:[#allocation13 + $0x3b8] sm:$0xff]  ;;  %v16813_v29 = vcombine.low %v8149_v16, %v8153_v59 }
 0x6e4   :  { %11676 = vmatpush1.bf16.msra.mxu1 %v16869_v46  ;;  %11638 = vmatprep.subr.bf16.mxu0 %v16726_v58  ;;  %v8277_v46 = vld [vmem:[#allocation13 + $0x7d8] sm:$0xff]  ;;  %v16821_v58 = vcombine.low %v8157_v34, %v8161_v61  ;;  %v16806_v20 = vcombine.high %v8141_v41, %v8145_v54  ;;  %v16805_v62 = vcombine.low %v8141_v41, %v8145_v54 }
 0x6e5   :  { %v11384_v51 = vpop.f32.mrf.mxu1  ;;  %11677 = vmatprep.subr.bf16.mxu1 %v16862_v37  ;;  %v8281_v49 = vld [vmem:[#allocation13 + $0x7f8] sm:$0xff] }
 0x6e6   :  { %v16942_v37 = vcombine.high %v8277_v46, %v8281_v49  ;;  %v8273_v2 = vld [vmem:[#allocation13 + $0x7b8] sm:$0xff] }
 0x6e7   :  { %11639 = vmatpush1.bf16.msra.mxu0 %v16725_v43  ;;  %v16941_v43 = vcombine.low %v8277_v46, %v8281_v49  ;;  %v8125_v51 = vld [vmem:[#allocation13 + $0x318] sm:$0xff]  ;;  %v16933_v44 = vcombine.low %v8269_v33, %v8273_v2 }
 0x6e8   :  { %11678 = vmatpush1.bf16.msra.mxu1 %v16861_v60  ;;  %11640 = vmatprep.subr.bf16.mxu0 %v16718_v6  ;;  %v16798_v60 = vcombine.high %v8133_v31, %v8137_v9  ;;  %v16934_v6 = vcombine.high %v8269_v33, %v8273_v2  ;;  %v8261_v8 = vld [vmem:[#allocation13 + $0x758] sm:$0xff] }
 0x6e9   :  { %11679 = vmatprep.subr.bf16.mxu1 %v16854_v42  ;;  %v8129_v42 = vld [vmem:[#allocation13 + $0x338] sm:$0xff] }
 0x6ea   :  { %v8265_v63 = vld [vmem:[#allocation13 + $0x778] sm:$0xff]  ;;  %v16789_v36 = vcombine.low %v8125_v51, %v8129_v42 }
 0x6eb   :  { %11641 = vmatpush1.bf16.msra.mxu0 %v16717_v3  ;;  %v16790_v3 = vcombine.high %v8125_v51, %v8129_v42  ;;  %v8253_v1 = vld [vmem:[#allocation13 + $0x718] sm:$0xff]  ;;  %v16925_v12 = vcombine.low %v8261_v8, %v8265_v63 }
 0x6ec   :  { %11680 = vmatpush1.bf16.msra.mxu1 %v16853_v56  ;;  %11642 = vmatprep.subr.bf16.mxu0 %v16710_v45  ;;  %v16926_v56 = vcombine.high %v8261_v8, %v8265_v63  ;;  %v8117_v45 = vld [vmem:[#allocation13 + $0x2d8] sm:$0xff] }
 0x6ed   :  { %11681 = vmatprep.subr.bf16.mxu1 %v16846_v55  ;;  %v8121_v55 = vld [vmem:[#allocation13 + $0x2f8] sm:$0xff] }
 0x6ee   :  { %v8257_v48 = vld [vmem:[#allocation13 + $0x738] sm:$0xff]  ;;  %v16781_v50 = vcombine.low %v8117_v45, %v8121_v55 }
 0x6ef   :  { %11643 = vmatpush1.bf16.msra.mxu0 %v16709_v26  ;;  %v16782_v26 = vcombine.high %v8117_v45, %v8121_v55  ;;  %v8245_v11 = vld [vmem:[#allocation13 + $0x6d8] sm:$0xff]  ;;  %v16917_v22 = vcombine.low %v8253_v1, %v8257_v48 }
 0x6f0   :  { %11682 = vmatpush1.bf16.msra.mxu1 %v16845_v38  ;;  %11644 = vmatprep.subr.bf16.mxu0 %v16702_v35  ;;  %v16918_v38 = vcombine.high %v8253_v1, %v8257_v48  ;;  %v8109_v35 = vld [vmem:[#allocation13 + $0x298] sm:$0xff] }
 0x6f1   :  { %11683 = vmatprep.subr.bf16.mxu1 %v16838_v47  ;;  %v8113_v47 = vld [vmem:[#allocation13 + $0x2b8] sm:$0xff] }
 0x6f2   :  { %v8249_v18 = vld [vmem:[#allocation13 + $0x6f8] sm:$0xff]  ;;  %v16773_v34 = vcombine.low %v8109_v35, %v8113_v47 }
 0x6f3   :  { %11645 = vmatpush1.bf16.msra.mxu0 %v16701_v10  ;;  %v16774_v10 = vcombine.high %v8109_v35, %v8113_v47  ;;  %v8237_v16 = vld [vmem:[#allocation13 + $0x698] sm:$0xff]  ;;  %v16909_v61 = vcombine.low %v8245_v11, %v8249_v18 }
 0x6f4   :  { %11684 = vmatpush1.bf16.msra.mxu1 %v16837_v14  ;;  %11646 = vmatprep.subr.bf16.mxu0 %v16694_v40  ;;  %v16910_v14 = vcombine.high %v8245_v11, %v8249_v18  ;;  %v8101_v40 = vld [vmem:[#allocation13 + $0x258] sm:$0xff] }
 0x6f5   :  { %11685 = vmatprep.subr.bf16.mxu1 %v16830_v57  ;;  %v8105_v57 = vld [vmem:[#allocation13 + $0x278] sm:$0xff] }
 0x6f6   :  { %v8241_v59 = vld [vmem:[#allocation13 + $0x6b8] sm:$0xff]  ;;  %v16765_v46 = vcombine.low %v8101_v40, %v8105_v57 }
 0x6f7   :  { %11647 = vmatpush1.bf16.msra.mxu0 %v16693_v28  ;;  %v16766_v28 = vcombine.high %v8101_v40, %v8105_v57  ;;  %v8229_v41 = vld [vmem:[#allocation13 + $0x658] sm:$0xff]  ;;  %v16901_v49 = vcombine.low %v8237_v16, %v8241_v59 }
 0x6f8   :  { %11686 = vmatpush1.bf16.msra.mxu1 %v16829_v5  ;;  %11648 = vmatprep.subr.bf16.mxu0 %v16814_v19  ;;  %v16902_v5 = vcombine.high %v8237_v16, %v8241_v59  ;;  %v8093_v19 = vld [vmem:[#allocation13 + $0x218] sm:$0xff] }
 0x6f9   :  { %11687 = vmatprep.subr.bf16.mxu1 %v16822_v4  ;;  %v8097_v4 = vld [vmem:[#allocation13 + $0x238] sm:$0xff] }
 0x6fa   :  { %v8233_v54 = vld [vmem:[#allocation13 + $0x678] sm:$0xff]  ;;  %v16757_v33 = vcombine.low %v8093_v19, %v8097_v4 }
 0x6fb   :  { %11649 = vmatpush2.bf16.msra.mxu0 %v16813_v29  ;;  %v16758_v29 = vcombine.high %v8093_v19, %v8097_v4  ;;  %v8221_v31 = vld [vmem:[#allocation13 + $0x618] sm:$0xff]  ;;  %v16893_v2 = vcombine.low %v8229_v41, %v8233_v54 }
 0x6fc   :  { %11688 = vmatpush1.bf16.msra.mxu1 %v16821_v58  ;;  %11650 = vmatprep.subr.bf16.mxu0 %v16806_v20  ;;  %v16894_v58 = vcombine.high %v8229_v41, %v8233_v54  ;;  %v8341_v20 = vld [vmem:[#allocation13 + $0x9d8] sm:$0xff] }
 0x6fd   :  { %11689 = vmatprep.subr.bf16.mxu1 %v16942_v37  ;;  %v8345_v37 = vld [vmem:[#allocation13 + $0x9f8] sm:$0xff] }
 0x6fe   :  { %v8225_v9 = vld [vmem:[#allocation13 + $0x638] sm:$0xff]  ;;  %v17005_v8 = vcombine.low %v8341_v20, %v8345_v37 }
 0x6ff   :  { %11651 = vmatpush2.bf16.msra.mxu0 %v16805_v62  ;;  %v17006_v62 = vcombine.high %v8341_v20, %v8345_v37  ;;  %v8469_v51 = vld [vmem:[#allocation13 + $0xdd8] sm:$0xff]  ;;  %v16885_v63 = vcombine.low %v8221_v31, %v8225_v9 }
 0x700   :  { %11690 = vmatpush2.bf16.msra.mxu1 %v16941_v43  ;;  %11652 = vmatprep.subr.bf16.mxu0 %v16798_v60  ;;  %v16886_v43 = vcombine.high %v8221_v31, %v8225_v9  ;;  %v8333_v60 = vld [vmem:[#allocation13 + $0x998] sm:$0xff] }
 0x701   :  { %11691 = vmatprep.subr.bf16.mxu1 %v16934_v6  ;;  %v8337_v6 = vld [vmem:[#allocation13 + $0x9b8] sm:$0xff] }
 0x702   :  { %v8473_v42 = vld [vmem:[#allocation13 + $0xdf8] sm:$0xff] }
 0x703   :  { %11653 = vmatpush2.bf16.msra.mxu0 %v16797_v0  ;;  %v16998_v0 = vcombine.high %v8333_v60, %v8337_v6  ;;  %v8329_v45 = vld [vmem:[#allocation13 + $0x978] sm:$0xff] }
 0x704   :  { %11692 = vmatpush2.bf16.msra.mxu1 %v16933_v44  ;;  %11654 = vmatprep.subr.bf16.mxu0 %v16790_v3  ;;  %v17134_v44 = vcombine.high %v8469_v51, %v8473_v42  ;;  %v8325_v3 = vld [vmem:[#allocation13 + $0x958] sm:$0xff] }
 0x705   :  { %11693 = vmatprep.subr.bf16.mxu1 %v16926_v56  ;;  %v8461_v55 = vld [vmem:[#allocation13 + $0xd98] sm:$0xff]  ;;  %v16990_v35 = vcombine.high %v8325_v3, %v8329_v45 }
 0x706   :  { %v8465_v1 = vld [vmem:[#allocation13 + $0xdb8] sm:$0xff] }
 0x707   :  { %11655 = vmatpush2.bf16.msra.mxu0 %v16789_v36  ;;  %v16997_v36 = vcombine.low %v8333_v60, %v8337_v6  ;;  %v17126_v47 = vcombine.high %v8461_v55, %v8465_v1  ;;  %v8317_v11 = vld [vmem:[#allocation13 + $0x918] sm:$0xff] }
 0x708   :  { %11694 = vmatpush2.bf16.msra.mxu1 %v16925_v12  ;;  %11656 = vmatprep.subr.bf16.mxu0 %v16782_v26  ;;  %v17133_v26 = vcombine.low %v8469_v51, %v8473_v42  ;;  %v8309_v59 = vld [vmem:[#allocation13 + $0x8d8] sm:$0xff] }
 0x709   :  { %11695 = vmatprep.subr.bf16.mxu1 %v16918_v38 }
 0x70b   :  { %11657 = vmatpush2.bf16.msra.mxu0 %v16781_v50  ;;  %v8453_v50 = vld [vmem:[#allocation13 + $0xd58] sm:$0xff] }
 0x70c   :  { %11696 = vmatpush2.bf16.msra.mxu1 %v16917_v22  ;;  %11658 = vmatprep.subr.bf16.mxu0 %v16774_v10  ;;  %v8457_v22 = vld [vmem:[#allocation13 + $0xd78] sm:$0xff] }
 0x70d   :  { %11697 = vmatprep.subr.bf16.mxu1 %v16910_v14  ;;  %v17118_v16 = vcombine.high %v8453_v50, %v8457_v22  ;;  %v17117_v4 = vcombine.low %v8453_v50, %v8457_v22  ;;  %v8537_v50 = vld [vmem:[#allocation13 + $0xff8] sm:$0xff] }
 0x70f   :  { %11659 = vmatpush2.bf16.msra.mxu0 %v16773_v34  ;;  %v8313_v34 = vld [vmem:[#allocation13 + $0x8f8] sm:$0xff] }
 0x710   :  { %11698 = vmatpush2.bf16.msra.mxu1 %v16909_v61  ;;  %11660 = vmatprep.subr.bf16.mxu0 %v16766_v28  ;;  %v8445_v28 = vld [vmem:[#allocation13 + $0xd18] sm:$0xff]  ;;  %v16973_v20 = vcombine.low %v8309_v59, %v8313_v34 }
 0x711   :  { %11699 = vmatprep.subr.bf16.mxu1 %v16902_v5 }
 0x713   :  { %11661 = vmatpush2.bf16.msra.mxu0 %v16765_v46  ;;  %v8301_v46 = vld [vmem:[#allocation13 + $0x898] sm:$0xff] }
 0x714   :  { %11700 = vmatpush2.bf16.msra.mxu1 %v16901_v49  ;;  %11662 = vmatprep.subr.bf16.mxu0 %v16758_v29  ;;  %v8305_v49 = vld [vmem:[#allocation13 + $0x8b8] sm:$0xff] }
 0x715   :  { %11701 = vmatprep.subr.bf16.mxu1 %v16894_v58  ;;  %v8437_v29 = vld [vmem:[#allocation13 + $0xcd8] sm:$0xff]  ;;  %v16966_v31 = vcombine.high %v8301_v46, %v8305_v49  ;;  %v16965_v60 = vcombine.low %v8301_v46, %v8305_v49 }
 0x716   :  { %v8441_v58 = vld [vmem:[#allocation13 + $0xcf8] sm:$0xff] }
 0x717   :  { %11663 = vmatpush2.bf16.msra.mxu0 %v16757_v33  ;;  %v17102_v9 = vcombine.high %v8437_v29, %v8441_v58  ;;  %v8293_v33 = vld [vmem:[#allocation13 + $0x858] sm:$0xff]  ;;  %v17101_v6 = vcombine.low %v8437_v29, %v8441_v58 }
 0x718   :  { %11702 = vmatpush2.bf16.msra.mxu1 %v16893_v2  ;;  %11714 = vmatprep.subr.bf16.mxu0 %v17006_v62  ;;  %v8297_v2 = vld [vmem:[#allocation13 + $0x878] sm:$0xff] }
 0x719   :  { %11703 = vmatprep.subr.bf16.mxu1 %v16886_v43  ;;  %v8429_v62 = vld [vmem:[#allocation13 + $0xc98] sm:$0xff]  ;;  %v16958_v51 = vcombine.high %v8293_v33, %v8297_v2 }
 0x71a   :  { %v11420_v56 = vpop.f32.mrf.mxu0  ;;  %11665 = vmatmul.mubr.bf16.vlgmr.msra.gmra.mxu0 %v21811_v17  ;;  %v8321_v17 = vld [vmem:[#allocation13 + $0x938] sm:$0xff] }
 0x71b   :  { %v11421_v48 = vadd.f32 %v11420_v56, %v21927_v30  ;;  %11715 = vmatpush1.bf16.msra.mxu0 %v17005_v8  ;;  %11746 = vmatprep.mubr.bf16.mxu0 %v21867_v13  ;;  %v16989_v13 = vcombine.low %v8325_v3, %v8329_v45  ;;  %v16982_v40 = vcombine.high %v8317_v11, %v8321_v17  ;;  %v8433_v43 = vld [vmem:[#allocation13 + $0xcb8] sm:$0xff] }
 0x71c   :  { %11704 = vmatpush2.bf16.msra.mxu1 %v16885_v63  ;;  %v11422_v12 = vpop.f32.mrf.mxu0  ;;  %11716 = vmatprep.subr.bf16.mxu0 %v16998_v0  ;;  %v16981_v19 = vcombine.low %v8317_v11, %v8321_v17  ;;  %v17094_v42 = vcombine.high %v8429_v62, %v8433_v43  ;;  %v8285_v8 = vld [vmem:[#allocation13 + $0x818] sm:$0xff]  ;;  %v16957_v3 = vcombine.low %v8293_v33, %v8297_v2 }
 0x71d   :  { %v11423_v38 = vadd.f32 %v11422_v12, %v21930_v24  ;;  %11755 = vmatprep.subr.bf16.mxu1 %v17134_v44  ;;  %v17125_v24 = vcombine.low %v8461_v55, %v8465_v1  ;;  %v8289_v63 = vld [vmem:[#allocation13 + $0x838] sm:$0xff]  ;;  %v17093_v56 = vcombine.low %v8429_v62, %v8433_v43 }
 0x71e   :  { %v11424_v18 = vpop.f32.mrf.mxu0  ;;  %v8421_v0 = vld [vmem:[#allocation13 + $0xc58] sm:$0xff]  ;;  %v16950_v45 = vcombine.high %v8285_v8, %v8289_v63 }
 0x71f   :  { %v11461_v10 = vpop.f32.mrf.mxu1  ;;  %11706 = vmatmul.mubr.bf16.vlgmr.msra.gmra.mxu1 %v21843_v32  ;;  %11717 = vmatpush1.bf16.msra.mxu0 %v16997_v36  ;;  %v8449_v32 = vld [vmem:[#allocation13 + $0xd38] sm:$0xff] }
 0x720   :  { %v21937_v30 = vadd.f32 %v11461_v10, %v11421_v48  ;;  %11756 = vmatpush1.bf16.msra.mxu1 %v17133_v26  ;;  %11787 = vmatprep.mubr.bf16.mxu1 %v21877_v7  ;;  %v11425_v14 = vpop.f32.mrf.mxu0  ;;  %v16974_v7 = vcombine.high %v8309_v59, %v8313_v34  ;;  %v17110_v54 = vcombine.high %v8445_v28, %v8449_v32  ;;  %v8425_v44 = vld [vmem:[#allocation13 + $0xc78] sm:$0xff] }
 0x721   :  { %v11463_v57 = vpop.f32.mrf.mxu1  ;;  %11718 = vmatprep.subr.bf16.mxu0 %v16990_v35  ;;  %11757 = vmatprep.subr.bf16.mxu1 %v17126_v47  ;;  %v17109_v37 = vcombine.low %v8445_v28, %v8449_v32  ;;  %v17086_v55 = vcombine.high %v8421_v0, %v8425_v44  ;;  %v8405_v1 = vld [vmem:[#allocation13 + $0xbd8] sm:$0xff]  ;;  %v16949_v26 = vcombine.low %v8285_v8, %v8289_v63 }
 0x722   :  { %v21940_v61 = vadd.f32 %v11463_v57, %v11423_v38  ;;  %v8409_v48 = vld [vmem:[#allocation13 + $0xbf8] sm:$0xff]  ;;  %v17085_v38 = vcombine.low %v8421_v0, %v8425_v44  ;;  %vm11798_vm15 = vcmp.gt.f32.partialorder %v21937_v30, 0.0 }
 0x723   :  { %v11465_v5 = vpop.f32.mrf.mxu1  ;;  %11719 = vmatpush1.bf16.msra.mxu0 %v16989_v13  ;;  %v8413_v36 = vld [vmem:[#allocation13 + $0xc18] sm:$0xff]  ;;  %v17070_v35 = vcombine.high %v8405_v1, %v8409_v48  ;;  %v17069_v22 = vcombine.low %v8405_v1, %v8409_v48 }
 0x724   :  { %11758 = vmatpush1.bf16.msra.mxu1 %v17125_v24  ;;  %11720 = vmatprep.subr.bf16.mxu0 %v16982_v40  ;;  %v8417_v12 = vld [vmem:[#allocation13 + $0xc38] sm:$0xff]  ;;  %vm11799_vm14 = vcmp.gt.f32.partialorder %v21940_v61, 0.0 }
 0x725   :  { %v11466_v41 = vpop.f32.mrf.mxu1  ;;  %11759 = vmatprep.subr.bf16.mxu1 %v17118_v16  ;;  %v17078_v47 = vcombine.high %v8413_v36, %v8417_v12  ;;  %v8397_v11 = vld [vmem:[#allocation13 + $0xb98] sm:$0xff]  ;;  %v17077_v10 = vcombine.low %v8413_v36, %v8417_v12 }
 0x726   :  { %v8401_v17 = vld [vmem:[#allocation13 + $0xbb8] sm:$0xff] }
 0x727   :  { %11721 = vmatpush1.bf16.msra.mxu0 %v16981_v19  ;;  %v8533_v18 = vld [vmem:[#allocation13 + $0xfd8] sm:$0xff]  ;;  %v17062_v13 = vcombine.high %v8397_v11, %v8401_v17  ;;  %v17061_v59 = vcombine.low %v8397_v11, %v8401_v17 }
 0x728   :  { %11760 = vmatpush1.bf16.msra.mxu1 %v17117_v4  ;;  %11722 = vmatprep.subr.bf16.mxu0 %v16974_v7  ;;  %v17198_v14 = vcombine.high %v8533_v18, %v8537_v50  ;;  %v8389_v24 = vld [vmem:[#allocation13 + $0xb58] sm:$0xff]  ;;  %v17197_v34 = vcombine.low %v8533_v18, %v8537_v50 }
 0x729   :  { %11761 = vmatprep.subr.bf16.mxu1 %v17110_v54  ;;  %v8393_v40 = vld [vmem:[#allocation13 + $0xb78] sm:$0xff] }
 0x72a   :  { %v8525_v57 = vld [vmem:[#allocation13 + $0xf98] sm:$0xff]  ;;  %v17054_v28 = vcombine.high %v8389_v24, %v8393_v40  ;;  %v17053_v41 = vcombine.low %v8389_v24, %v8393_v40  ;;  %v19043_v24 = vld [vmem:[#allocation17 + $0xe0] ss:$16 sps:$4 sm:$0xff]  }
 0x72b   :  { %11723 = vmatpush1.bf16.msra.mxu0 %v16973_v20  ;;  %v8529_v16 = vld [vmem:[#allocation13 + $0xfb8] sm:$0xff] }
 0x72c   :  { %11762 = vmatpush1.bf16.msra.mxu1 %v17109_v37  ;;  %11724 = vmatprep.subr.bf16.mxu0 %v16966_v31  ;;  %v17190_v32 = vcombine.high %v8525_v57, %v8529_v16  ;;  %v8381_v5 = vld [vmem:[#allocation13 + $0xb18] sm:$0xff]  ;;  %v17189_v54 = vcombine.low %v8525_v57, %v8529_v16  ;;  %v19048_v57 = vld [vmem:[#allocation17 + $0xc4] ss:$16 sps:$4 sm:$0xff]  }
 0x72d   :  { %11763 = vmatprep.subr.bf16.mxu1 %v17102_v9  ;;  %v8385_v19 = vld [vmem:[#allocation13 + $0xb38] sm:$0xff] }
 0x72e   :  { %v8517_v4 = vld [vmem:[#allocation13 + $0xf58] sm:$0xff]  ;;  %v17046_v46 = vcombine.high %v8381_v5, %v8385_v19  ;;  %v17045_v31 = vcombine.low %v8381_v5, %v8385_v19  ;;  %v19049_v19 = vld [vmem:[#allocation17 + $0xa0] ss:$16 sps:$4 sm:$0xff]  }
 0x72f   :  { %11725 = vmatpush1.bf16.msra.mxu0 %v16965_v60  ;;  %v8521_v7 = vld [vmem:[#allocation13 + $0xf78] sm:$0xff] }
 0x730   :  { %11764 = vmatpush1.bf16.msra.mxu1 %v17101_v6  ;;  %11726 = vmatprep.subr.bf16.mxu0 %v16958_v51  ;;  %v17182_v49 = vcombine.high %v8517_v4, %v8521_v7  ;;  %v8373_v29 = vld [vmem:[#allocation13 + $0xad8] sm:$0xff]  ;;  %v17181_v9 = vcombine.low %v8517_v4, %v8521_v7  ;;  %v19054_v7 = vld [vmem:[#allocation17 + $0x84] ss:$16 sps:$4 sm:$0xff]  }
 0x731   :  { %11765 = vmatprep.subr.bf16.mxu1 %v17094_v42  ;;  %v8377_v58 = vld [vmem:[#allocation13 + $0xaf8] sm:$0xff] }
 0x732   :  { %v8509_v20 = vld [vmem:[#allocation13 + $0xf18] sm:$0xff]  ;;  %v17038_v33 = vcombine.high %v8373_v29, %v8377_v58  ;;  %v17037_v51 = vcombine.low %v8373_v29, %v8377_v58  ;;  %v19055_v29 = vld [vmem:[#allocation17 + $0x60] ss:$16 sps:$4 sm:$0xff]  }
 0x733   :  { %11727 = vmatpush1.bf16.msra.mxu0 %v16957_v3  ;;  %v8513_v37 = vld [vmem:[#allocation13 + $0xf38] sm:$0xff]  ;;  %v19139_v58 = vld [vmem:[#allocation17 + $0x2e0] ss:$16 sps:$4 sm:$0xff]  }
 0x734   :  { %11766 = vmatpush1.bf16.msra.mxu1 %v17093_v56  ;;  %11728 = vmatprep.subr.bf16.mxu0 %v16950_v45  ;;  %v17174_v2 = vcombine.high %v8509_v20, %v8513_v37  ;;  %v8365_v62 = vld [vmem:[#allocation13 + $0xa98] sm:$0xff]  ;;  %v17173_v42 = vcombine.low %v8509_v20, %v8513_v37  ;;  %v19141_v20 = vld [vmem:[#allocation17 + $0x2e4] ss:$16 sps:$4 sm:$0xff]  }
 0x735   :  { %11767 = vmatprep.subr.bf16.mxu1 %v17086_v55  ;;  %v8369_v43 = vld [vmem:[#allocation13 + $0xab8] sm:$0xff]  ;;  %v19060_v37 = vld [vmem:[#allocation17 + $0x44] ss:$16 sps:$4 sm:$0xff]  }
 0x736   :  { %v8501_v60 = vld [vmem:[#allocation13 + $0xed8] sm:$0xff]  ;;  %v17030_v8 = vcombine.high %v8365_v62, %v8369_v43  ;;  %v17029_v45 = vcombine.low %v8365_v62, %v8369_v43  ;;  %v19145_v62 = vld [vmem:[#allocation17 + $0x2a0] ss:$16 sps:$4 sm:$0xff]  }
 0x737   :  { %11729 = vmatpush1.bf16.msra.mxu0 %v16949_v26  ;;  %v8505_v6 = vld [vmem:[#allocation13 + $0xef8] sm:$0xff]  ;;  %v19061_v43 = vld [vmem:[#allocation17 + $0x20] ss:$16 sps:$4 sm:$0xff]  }
 0x738   :  { %11768 = vmatpush1.bf16.msra.mxu1 %v17085_v38  ;;  %11730 = vmatprep.subr.bf16.mxu0 %v17070_v35  ;;  %v17166_v63 = vcombine.high %v8501_v60, %v8505_v6  ;;  %v8357_v0 = vld [vmem:[#allocation13 + $0xa58] sm:$0xff]  ;;  %v17165_v55 = vcombine.low %v8501_v60, %v8505_v6  ;;  %v19150_v60 = vld [vmem:[#allocation17 + $0x284] ss:$16 sps:$4 sm:$0xff]  }
 0x739   :  { %11769 = vmatprep.subr.bf16.mxu1 %v17078_v47  ;;  %v8361_v44 = vld [vmem:[#allocation13 + $0xa78] sm:$0xff]  ;;  %v19066_v6 = vld [vmem:[#allocation17 + $0x4] ss:$16 sps:$4 sm:$0xff]  }
 0x73a   :  { %v8493_v3 = vld [vmem:[#allocation13 + $0xe98] sm:$0xff]  ;;  %v17022_v1 = vcombine.high %v8357_v0, %v8361_v44  ;;  %v17021_v35 = vcombine.low %v8357_v0, %v8361_v44  ;;  %v19151_v0 = vld [vmem:[#allocation17 + $0x260] ss:$16 sps:$4 sm:$0xff]  }
 0x73b   :  { %11731 = vmatpush2.bf16.msra.mxu0 %v17069_v22  ;;  %v8497_v56 = vld [vmem:[#allocation13 + $0xeb8] sm:$0xff]  ;;  %v19067_v44 = vld [vmem:[#allocation17 + $0x1e0] ss:$16 sps:$4 sm:$0xff]  }
 0x73c   :  { %11770 = vmatpush1.bf16.msra.mxu1 %v17077_v10  ;;  %11732 = vmatprep.subr.bf16.mxu0 %v17062_v13  ;;  %v17158_v48 = vcombine.high %v8493_v3, %v8497_v56  ;;  %v8349_v36 = vld [vmem:[#allocation13 + $0xa18] sm:$0xff]  ;;  %v17157_v47 = vcombine.low %v8493_v3, %v8497_v56  ;;  %v19045_v13 = vld [vmem:[#allocation17 + $0xe4] ss:$16 sps:$4 sm:$0xff]  }
 0x73d   :  { %11771 = vmatprep.subr.bf16.mxu1 %v17198_v14  ;;  %v8353_v12 = vld [vmem:[#allocation13 + $0xa38] sm:$0xff]  ;;  %v19156_v3 = vld [vmem:[#allocation17 + $0x244] ss:$16 sps:$4 sm:$0xff]  }
 0x73e   :  { %v8485_v26 = vld [vmem:[#allocation13 + $0xe58] sm:$0xff]  ;;  %v17014_v11 = vcombine.high %v8349_v36, %v8353_v12  ;;  %v17013_v22 = vcombine.low %v8349_v36, %v8353_v12  ;;  %v19072_v56 = vld [vmem:[#allocation17 + $0x1c4] ss:$16 sps:$4 sm:$0xff]   ;;  %v19157_v36 = vld [vmem:[#allocation17 + $0x220] ss:$16 sps:$4 sm:$0xff]  }
 0x73f   :  { %11733 = vmatpush2.bf16.msra.mxu0 %v17061_v59  ;;  %v8489_v38 = vld [vmem:[#allocation13 + $0xe78] sm:$0xff]  ;;  %v19046_v59 = vld [vmem:[#allocation17 + $0xc0] ss:$16 sps:$4 sm:$0xff]  }
 0x740   :  { %11772 = vmatpush2.bf16.msra.mxu1 %v17197_v34  ;;  %11734 = vmatprep.subr.bf16.mxu0 %v17054_v28  ;;  %v17150_v17 = vcombine.high %v8485_v26, %v8489_v38  ;;  %v8477_v18 = vld [vmem:[#allocation13 + $0xe18] sm:$0xff]  ;;  %v17149_v10 = vcombine.low %v8485_v26, %v8489_v38  ;;  %v19051_v28 = vld [vmem:[#allocation17 + $0xa4] ss:$16 sps:$4 sm:$0xff]   ;;  %v19073_v12 = vld [vmem:[#allocation17 + $0x1a0] ss:$16 sps:$4 sm:$0xff]  }
 0x741   :  { %11773 = vmatprep.subr.bf16.mxu1 %v17190_v32  ;;  %v8481_v50 = vld [vmem:[#allocation13 + $0xe38] sm:$0xff]  ;;  %v19162_v26 = vld [vmem:[#allocation17 + $0x204] ss:$16 sps:$4 sm:$0xff]  }
 0x742   :  { %v17142_v14 = vcombine.high %v8477_v18, %v8481_v50  ;;  %v17141_v40 = vcombine.low %v8477_v18, %v8481_v50  ;;  %v19078_v38 = vld [vmem:[#allocation17 + $0x184] ss:$16 sps:$4 sm:$0xff]   ;;  %v19163_v18 = vld [vmem:[#allocation17 + $0x3e0] ss:$16 sps:$4 sm:$0xff]  }
 0x743   :  { %11735 = vmatpush2.bf16.msra.mxu0 %v17053_v41  ;;  %v19079_v50 = vld [vmem:[#allocation17 + $0x160] ss:$16 sps:$4 sm:$0xff]  }
 0x744   :  { %11774 = vmatpush2.bf16.msra.mxu1 %v17189_v54  ;;  %11736 = vmatprep.subr.bf16.mxu0 %v17046_v46  ;;  %v19052_v54 = vld [vmem:[#allocation17 + $0x80] ss:$16 sps:$4 sm:$0xff]   ;;  %v19057_v46 = vld [vmem:[#allocation17 + $0x64] ss:$16 sps:$4 sm:$0xff]  }
 0x745   :  { %11775 = vmatprep.subr.bf16.mxu1 %v17182_v49 }
 0x747   :  { %11737 = vmatpush2.bf16.msra.mxu0 %v17045_v31  ;;  %v19144_v31 = vld [vmem:[#allocation17 + $0x2c4] ss:$16 sps:$4 sm:$0xff]  }
 0x748   :  { %11776 = vmatpush2.bf16.msra.mxu1 %v17181_v9  ;;  %11738 = vmatprep.subr.bf16.mxu0 %v17038_v33  ;;  %v19058_v9 = vld [vmem:[#allocation17 + $0x40] ss:$16 sps:$4 sm:$0xff]   ;;  %v19147_v33 = vld [vmem:[#allocation17 + $0x2a4] ss:$16 sps:$4 sm:$0xff]  }
 0x749   :  { %11777 = vmatprep.subr.bf16.mxu1 %v17174_v2  ;;  %v19063_v2 = vld [vmem:[#allocation17 + $0x24] ss:$16 sps:$4 sm:$0xff]  }
 0x74b   :  { %11739 = vmatpush2.bf16.msra.mxu0 %v17037_v51  ;;  %v19148_v51 = vld [vmem:[#allocation17 + $0x280] ss:$16 sps:$4 sm:$0xff]  }
 0x74c   :  { %11778 = vmatpush2.bf16.msra.mxu1 %v17173_v42  ;;  %11740 = vmatprep.subr.bf16.mxu0 %v17030_v8  ;;  %v19064_v42 = vld [vmem:[#allocation17] ss:$16 sps:$4 sm:$0xff]   ;;  %v19153_v8 = vld [vmem:[#allocation17 + $0x264] ss:$16 sps:$4 sm:$0xff]  }
 0x74d   :  { %11779 = vmatprep.subr.bf16.mxu1 %v17166_v63  ;;  %v19069_v63 = vld [vmem:[#allocation17 + $0x1e4] ss:$16 sps:$4 sm:$0xff]  }
 0x74f   :  { %11741 = vmatpush2.bf16.msra.mxu0 %v17029_v45  ;;  %v19154_v45 = vld [vmem:[#allocation17 + $0x240] ss:$16 sps:$4 sm:$0xff]  }
 0x750   :  { %11780 = vmatpush2.bf16.msra.mxu1 %v17165_v55  ;;  %11742 = vmatprep.subr.bf16.mxu0 %v17022_v1  ;;  %v19070_v55 = vld [vmem:[#allocation17 + $0x1c0] ss:$16 sps:$4 sm:$0xff]   ;;  %v19159_v1 = vld [vmem:[#allocation17 + $0x224] ss:$16 sps:$4 sm:$0xff]  }
 0x751   :  { %11781 = vmatprep.subr.bf16.mxu1 %v17158_v48  ;;  %v19075_v48 = vld [vmem:[#allocation17 + $0x1a4] ss:$16 sps:$4 sm:$0xff]  }
 0x753   :  { %11743 = vmatpush2.bf16.msra.mxu0 %v17021_v35  ;;  %v19160_v35 = vld [vmem:[#allocation17 + $0x200] ss:$16 sps:$4 sm:$0xff]  }
 0x754   :  { %11782 = vmatpush2.bf16.msra.mxu1 %v17157_v47  ;;  %11744 = vmatprep.subr.bf16.mxu0 %v17014_v11  ;;  %v19076_v47 = vld [vmem:[#allocation17 + $0x180] ss:$16 sps:$4 sm:$0xff]   ;;  %v19165_v11 = vld [vmem:[#allocation17 + $0x3e4] ss:$16 sps:$4 sm:$0xff]  }
 0x755   :  { %11783 = vmatprep.subr.bf16.mxu1 %v17150_v17  ;;  %v19081_v17 = vld [vmem:[#allocation17 + $0x164] ss:$16 sps:$4 sm:$0xff]  }
 0x757   :  { %11745 = vmatpush2.bf16.msra.mxu0 %v17013_v22  ;;  %v19168_v22 = vld [vmem:[#allocation17 + $0x3c4] ss:$16 sps:$4 sm:$0xff]  }
 0x758   :  { %11784 = vmatpush2.bf16.msra.mxu1 %v17149_v10  ;;  %12656 = vmatprep.subr.bf16.mxu0 %v19045_v13  ;;  %v19084_v10 = vld [vmem:[#allocation17 + $0x144] ss:$16 sps:$4 sm:$0xff]   ;;  %v19166_v13 = vld [vmem:[#allocation17 + $0x3c0] ss:$16 sps:$4 sm:$0xff]  }
 0x759   :  { %11785 = vmatprep.subr.bf16.mxu1 %v17142_v14  ;;  %v19082_v14 = vld [vmem:[#allocation17 + $0x140] ss:$16 sps:$4 sm:$0xff]  }
 0x75a   :  { %v21942_v16 = vpop.f32.mrf.mxu0  ;;  %11747 = vmatmul.mubr.bf16.vlgmr.msra.gmra.mxu0 %v21882_v25 }
 0x75b   :  { %12657 = vmatpush1.bf16.msra.mxu0 %v19043_v24  ;;  %v19171_v24 = vld [vmem:[#allocation17 + $0x3a4] ss:$16 sps:$4 sm:$0xff]  }
 0x75c   :  { %11786 = vmatpush2.bf16.msra.mxu1 %v17141_v40  ;;  %v21945_v34 = vpop.f32.mrf.mxu0  ;;  %12658 = vmatprep.subr.bf16.mxu0 %v19048_v57  ;;  %v19087_v40 = vld [vmem:[#allocation17 + $0x124] ss:$16 sps:$4 sm:$0xff]   ;;  %v19169_v57 = vld [vmem:[#allocation17 + $0x3a0] ss:$16 sps:$4 sm:$0xff]  }
 0x75d   :  { %12697 = vmatprep.subr.bf16.mxu1 %v19141_v20  ;;  %v19175_v20 = vld [vmem:[#allocation17 + $0x360] ss:$16 sps:$4 sm:$0xff]  }
 0x75e   :  { %v11506_v32 = vpop.f32.mrf.mxu0 }
 0x75f   :  { %v21947_v5 = vpop.f32.mrf.mxu1  ;;  %11788 = vmatmul.mubr.bf16.vlgmr.msra.gmra.mxu1 %v21888_v27  ;;  %12659 = vmatpush1.bf16.msra.mxu0 %v19046_v59  ;;  %v19142_v27 = vld [vmem:[#allocation17 + $0x2c0] ss:$16 sps:$4 sm:$0xff]   ;;  %v19090_v32 = vld [vmem:[#allocation17 + $0x104] ss:$16 sps:$4 sm:$0xff]  }
 0x760   :  { %v11507_v4 = vpop.f32.mrf.mxu0  ;;  %12660 = vmatprep.subr.bf16.mxu0 %v19051_v28  ;;  %12698 = vmatpush1.bf16.msra.mxu1 %v19139_v58  ;;  %v19085_v59 = vld [vmem:[#allocation17 + $0x120] ss:$16 sps:$4 sm:$0xff]   ;;  %v19174_v28 = vld [vmem:[#allocation17 + $0x384] ss:$16 sps:$4 sm:$0xff]  }
 0x761   :  { %v21950_v41 = vpop.f32.mrf.mxu1  ;;  %12699 = vmatprep.subr.bf16.mxu1 %v19144_v31 }
 0x763   :  { %v11547_v25 = vpop.f32.mrf.mxu1  ;;  %12661 = vmatpush1.bf16.msra.mxu0 %v19049_v19  ;;  %v22515_v19 = vld [vmem:[#allocation128_spill] sm:$0xff] }
 0x764   :  { %12662 = vmatprep.subr.bf16.mxu0 %v19054_v7  ;;  %12700 = vmatpush1.bf16.msra.mxu1 %v19142_v27  ;;  %v8558_v4 = vsub.s32 4, %v22515_v19  ;;  %v19172_v7 = vld [vmem:[#allocation17 + $0x380] ss:$16 sps:$4 sm:$0xff]  }
 0x765   :  { %v11548_v49 = vpop.f32.mrf.mxu1  ;;  %12701 = vmatprep.subr.bf16.mxu1 %v19147_v33  ;;  %v19088_v25 = vld [vmem:[#allocation17 + $0x100] ss:$16 sps:$4 sm:$0xff]  }
 0x766   :  { %v19093_v49 = vld [vmem:[#allocation17 + $0xec] ss:$16 sps:$4 sm:$0xff]  }
 0x767   :  { %12663 = vmatpush1.bf16.msra.mxu0 %v19052_v54  ;;  %v19177_v54 = vld [vmem:[#allocation17 + $0x364] ss:$16 sps:$4 sm:$0xff]  }
 0x768   :  { %12664 = vmatprep.subr.bf16.mxu0 %v19057_v46  ;;  %12702 = vmatpush1.bf16.msra.mxu1 %v19145_v62  ;;  %v8562_v46 = vsub.s32 5, %v22515_v19  ;;  %v21961_v62 = vld [vmem:[#allocation16] sm:$0xff] }
 0x769   :  { %12703 = vmatprep.subr.bf16.mxu1 %v19150_v60  ;;  %v19180_v60 = vld [vmem:[#allocation17 + $0x344] ss:$16 sps:$4 sm:$0xff]  }
 0x76b   :  { %12665 = vmatpush1.bf16.msra.mxu0 %v19055_v29  ;;  %v21954_v29 = vld [vmem:[#allocation14] sm:$0xff] }
 0x76c   :  { %12666 = vmatprep.subr.bf16.mxu0 %v19060_v37  ;;  %12704 = vmatpush1.bf16.msra.mxu1 %v19148_v51  ;;  %v8559_v58 = vrot.slane %v21954_v29, %v8558_v4  ;;  %v8563_v37 = vrot.slane %v21954_v29, %v8562_v46 }
 0x76d   :  { %12705 = vmatprep.subr.bf16.mxu1 %v19153_v8 }
 0x76e   :  { %v11503_v27 = vadd.f32 %v21942_v16, %v8559_v58  ;;  %v11829_v16 = vrot.slane %v21961_v62, %v8562_v46  ;;  %v19120_v46 = vld [vmem:[#allocation17 + $0x1cc] ss:$16 sps:$4 sm:$0xff]  }
 0x76f   :  { %12667 = vmatpush1.bf16.msra.mxu0 %v19058_v9  ;;  %v11505_v9 = vadd.f32 %v21945_v34, %v8563_v37  ;;  %v19123_v58 = vld [vmem:[#allocation17 + $0x1ac] ss:$16 sps:$4 sm:$0xff]  }
 0x770   :  { %12668 = vmatprep.subr.bf16.mxu0 %v19063_v2  ;;  %12706 = vmatpush1.bf16.msra.mxu1 %v19151_v0  ;;  %v11544_v33 = vadd.f32 %v21947_v5, %v11503_v27  ;;  %v19126_v37 = vld [vmem:[#allocation17 + $0x18c] ss:$16 sps:$4 sm:$0xff]   ;;  %v19124_v27 = vld [vmem:[#allocation17 + $0x188] ss:$16 sps:$4 sm:$0xff]  }
 0x771   :  { %12707 = vmatprep.subr.bf16.mxu1 %v19156_v3  ;;  %v11546_v51 = vadd.f32 %v21950_v41, %v11505_v9  ;;  %v19127_v9 = vld [vmem:[#allocation17 + $0x168] ss:$16 sps:$4 sm:$0xff]  }
 0x773   :  { %12669 = vmatpush1.bf16.msra.mxu0 %v19061_v43  ;;  %v19178_v43 = vld [vmem:[#allocation17 + $0x340] ss:$16 sps:$4 sm:$0xff]  }
 0x774   :  { %12670 = vmatprep.subr.bf16.mxu0 %v19066_v6  ;;  %12708 = vmatpush1.bf16.msra.mxu1 %v19154_v45  ;;  %v11825_v6 = vrot.slane %v21961_v62, %v8558_v4  ;;  %v19114_v4 = vld [vmem:[#allocation17 + $0xc] ss:$16 sps:$4 sm:$0xff]  }
 0x775   :  { %12709 = vmatprep.subr.bf16.mxu1 %v19159_v1  ;;  %v19183_v1 = vld [vmem:[#allocation17 + $0x324] ss:$16 sps:$4 sm:$0xff]  }
 0x777   :  { %12671 = vmatpush1.bf16.msra.mxu0 %v19064_v42 }
 0x778   :  { %12672 = vmatprep.subr.bf16.mxu0 %v19069_v63  ;;  %12710 = vmatpush1.bf16.msra.mxu1 %v19157_v36  ;;  %v19181_v36 = vld [vmem:[#allocation17 + $0x320] ss:$16 sps:$4 sm:$0xff]  }
 0x779   :  { %12711 = vmatprep.subr.bf16.mxu1 %v19162_v26 }
 0x77b   :  { %12673 = vmatpush2.bf16.msra.mxu0 %v19067_v44 }
 0x77c   :  { %12674 = vmatprep.subr.bf16.mxu0 %v19072_v56  ;;  %12712 = vmatpush1.bf16.msra.mxu1 %v19160_v35  ;;  %v19091_v35 = vld [vmem:[#allocation17 + $0xe8] ss:$16 sps:$4 sm:$0xff]  }
 0x77d   :  { %12713 = vmatprep.subr.bf16.mxu1 %v19165_v11  ;;  %v19096_v11 = vld [vmem:[#allocation17 + $0xcc] ss:$16 sps:$4 sm:$0xff]  }
 0x77f   :  { %12675 = vmatpush2.bf16.msra.mxu0 %v19070_v55 }
 0x780   :  { %12676 = vmatprep.subr.bf16.mxu0 %v19075_v48  ;;  %12714 = vmatpush2.bf16.msra.mxu1 %v19163_v18  ;;  %v19189_v18 = vld [vmem:[#allocation17 + $0x2ec] ss:$16 sps:$4 sm:$0xff]  }
 0x781   :  { %12715 = vmatprep.subr.bf16.mxu1 %v19168_v22  ;;  %v19099_v22 = vld [vmem:[#allocation17 + $0xac] ss:$16 sps:$4 sm:$0xff]  }
 0x783   :  { %12677 = vmatpush2.bf16.msra.mxu0 %v19073_v12  ;;  %v19186_v12 = vld [vmem:[#allocation17 + $0x304] ss:$16 sps:$4 sm:$0xff]  }
 0x784   :  { %12678 = vmatprep.subr.bf16.mxu0 %v19078_v38  ;;  %12716 = vmatpush2.bf16.msra.mxu1 %v19166_v13  ;;  %v19102_v13 = vld [vmem:[#allocation17 + $0x8c] ss:$16 sps:$4 sm:$0xff]  }
 0x785   :  { %12717 = vmatprep.subr.bf16.mxu1 %v19171_v24  ;;  %v19105_v24 = vld [vmem:[#allocation17 + $0x6c] ss:$16 sps:$4 sm:$0xff]  }
 0x787   :  { %12679 = vmatpush2.bf16.msra.mxu0 %v19076_v47 }
 0x788   :  { %12680 = vmatprep.subr.bf16.mxu0 %v19081_v17  ;;  %12718 = vmatpush2.bf16.msra.mxu1 %v19169_v57  ;;  %v19184_v17 = vld [vmem:[#allocation17 + $0x300] ss:$16 sps:$4 sm:$0xff]   ;;  %v19108_v57 = vld [vmem:[#allocation17 + $0x4c] ss:$16 sps:$4 sm:$0xff]  }
 0x789   :  { %12719 = vmatprep.subr.bf16.mxu1 %v19174_v28  ;;  %v19111_v28 = vld [vmem:[#allocation17 + $0x2c] ss:$16 sps:$4 sm:$0xff]  }
 0x78b   :  { %12681 = vmatpush2.bf16.msra.mxu0 %v19079_v50  ;;  %v19094_v50 = vld [vmem:[#allocation17 + $0xc8] ss:$16 sps:$4 sm:$0xff]  }
 0x78c   :  { %12682 = vmatprep.subr.bf16.mxu0 %v19084_v10  ;;  %12720 = vmatpush2.bf16.msra.mxu1 %v19172_v7  ;;  %v19097_v10 = vld [vmem:[#allocation17 + $0xa8] ss:$16 sps:$4 sm:$0xff]  }
 0x78d   :  { %12721 = vmatprep.subr.bf16.mxu1 %v19177_v54  ;;  %v19112_v7 = vld [vmem:[#allocation17 + $0x8] ss:$16 sps:$4 sm:$0xff]  }
 0x78e   :  { %v19115_v54 = vld [vmem:[#allocation17 + $0x1e8] ss:$16 sps:$4 sm:$0xff]  }
 0x78f   :  { %12683 = vmatpush2.bf16.msra.mxu0 %v19082_v14  ;;  %v19100_v14 = vld [vmem:[#allocation17 + $0x88] ss:$16 sps:$4 sm:$0xff]  }
 0x790   :  { %12684 = vmatprep.subr.bf16.mxu0 %v19087_v40  ;;  %12722 = vmatpush2.bf16.msra.mxu1 %v19175_v20  ;;  %v19103_v40 = vld [vmem:[#allocation17 + $0x68] ss:$16 sps:$4 sm:$0xff]  }
 0x791   :  { %12723 = vmatprep.subr.bf16.mxu1 %v19180_v60  ;;  %v19121_v20 = vld [vmem:[#allocation17 + $0x1a8] ss:$16 sps:$4 sm:$0xff]  }
 0x793   :  { %12685 = vmatpush2.bf16.msra.mxu0 %v19085_v59  ;;  %v19106_v59 = vld [vmem:[#allocation17 + $0x48] ss:$16 sps:$4 sm:$0xff]  }
 0x794   :  { %12686 = vmatprep.subr.bf16.mxu0 %v19090_v32  ;;  %12724 = vmatpush2.bf16.msra.mxu1 %v19178_v43  ;;  %v19109_v32 = vld [vmem:[#allocation17 + $0x28] ss:$16 sps:$4 sm:$0xff]  }
 0x795   :  { %12725 = vmatprep.subr.bf16.mxu1 %v19183_v1  ;;  %v19130_v43 = vld [vmem:[#allocation17 + $0x148] ss:$16 sps:$4 sm:$0xff]  }
 0x797   :  { %12687 = vmatpush2.bf16.msra.mxu0 %v19088_v25  ;;  %v19117_v25 = vld [vmem:[#allocation17 + $0x1ec] ss:$16 sps:$4 sm:$0xff]  }
 0x798   :  { %12738 = vmatprep.subr.bf16.mxu0 %v19093_v49  ;;  %12726 = vmatpush2.bf16.msra.mxu1 %v19181_v36  ;;  %v19118_v49 = vld [vmem:[#allocation17 + $0x1c8] ss:$16 sps:$4 sm:$0xff]  }
 0x799   :  { %12727 = vmatprep.subr.bf16.mxu1 %v19186_v12 }
 0x79a   :  { %v11584_v31 = vpop.f32.mrf.mxu0 }
 0x79b   :  { %v11585_v42 = vadd.f32 %v11584_v31, %v11544_v33  ;;  %v19129_v31 = vld [vmem:[#allocation17 + $0x16c] ss:$16 sps:$4 sm:$0xff]  }
 0x79c   :  { %v11586_v2 = vpop.f32.mrf.mxu0  ;;  %12728 = vmatpush2.bf16.msra.mxu1 %v19184_v17  ;;  %v19132_v33 = vld [vmem:[#allocation17 + $0x14c] ss:$16 sps:$4 sm:$0xff]  }
 0x79d   :  { %v11587_v0 = vadd.f32 %v11586_v2, %v11546_v51  ;;  %12779 = vmatprep.subr.bf16.mxu1 %v19189_v18 }
 0x79e   :  { %v11588_v8 = vpop.f32.mrf.mxu0 }
 0x79f   :  { %v11625_v63 = vpop.f32.mrf.mxu1  ;;  %v19133_v8 = vld [vmem:[#allocation17 + $0x128] ss:$16 sps:$4 sm:$0xff]  }
 0x7a0   :  { %v11626_v44 = vadd.f32 %v11625_v63, %v11585_v42  ;;  %v11589_v34 = vpop.f32.mrf.mxu0 }
 0x7a1   :  { %v11627_v5 = vpop.f32.mrf.mxu1  ;;  %v19136_v34 = vld [vmem:[#allocation17 + $0x108] ss:$16 sps:$4 sm:$0xff]  }
 0x7a2   :  { %vm11800_vm0 = vcmp.gt.f32.partialorder %v11626_v44, 0.0  ;;  %v11850_v3 = vmul.f32 %v11825_v6, %v11626_v44  ;;  %v11628_v56 = vadd.f32 %v11627_v5, %v11587_v0  ;;  %v19135_v6 = vld [vmem:[#allocation17 + $0x12c] ss:$16 sps:$4 sm:$0xff]  }
 0x7a3   :  { %v11629_v45 = vpop.f32.mrf.mxu1 }
 0x7a4   :  { %vm11801_vm1 = vcmp.gt.f32.partialorder %v11628_v56, 0.0  ;;  %v11851_v55 = vmul.f32 %v11829_v16, %v11628_v56  ;;  %v11858_v48 = vsel %vm11800_vm0, %v11626_v44, %v11850_v3  ;;  %v19138_v16 = vld [vmem:[#allocation17 + $0x10c] ss:$16 sps:$4 sm:$0xff]   ;;  %v8566_v3 = vsub.s32 6, %v22515_v19 }
 0x7a5   :  { %v11630_v41 = vpop.f32.mrf.mxu1  ;;  %v21966_v47 = vpack.c.bf16 %v11858_v48, %v11858_v48 }
 0x7a6   :  { %v11859_v26 = vsel %vm11801_vm1, %v11628_v56, %v11851_v55  ;;  %v8570_v56 = vsub.s32 7, %v22515_v19  ;;  %v8567_v45 = vrot.slane %v21954_v29, %v8566_v3 }
 0x7a7   :  { %v11863_v38 = vpack.c.bf16 %v11859_v26, %v11859_v26  ;;  %v11833_v26 = vrot.slane %v21961_v62, %v8566_v3  ;;  %v19255_v3 = vld [vmem:[#allocation17 + $0x424] ss:$16 sps:$4 sm:$0xff]  }
 0x7a8   :  { %v8571_v55 = vrot.slane %v21954_v29, %v8570_v56 }
 0x7a9   :  { %12688 = vmatprep.mubr.bf16.mxu0 %v11863_v38 }
 0x7aa   :  { %12689 = vmatmul.mubr.bf16.vlgmr.msra.gmra.mxu0 %v21966_v47 }
 0x7ab   :  { %12739 = vmatpush1.bf16.msra.mxu0 %v19091_v35  ;;  %12770 = vmatprep.mubr.bf16.mxu0 %v11863_v38 }
 0x7ac   :  { %12740 = vmatprep.subr.bf16.mxu0 %v19096_v11 }
 0x7af   :  { %12741 = vmatpush1.bf16.msra.mxu0 %v19094_v50 }
 0x7b0   :  { %12742 = vmatprep.subr.bf16.mxu0 %v19099_v22 }
 0x7b3   :  { %12743 = vmatpush1.bf16.msra.mxu0 %v19097_v10 }
 0x7b4   :  { %12744 = vmatprep.subr.bf16.mxu0 %v19102_v13 }
 0x7b7   :  { %12745 = vmatpush1.bf16.msra.mxu0 %v19100_v14 }
 0x7b8   :  { %12746 = vmatprep.subr.bf16.mxu0 %v19105_v24 }
 0x7bb   :  { %12747 = vmatpush1.bf16.msra.mxu0 %v19103_v40 }
 0x7bc   :  { %12748 = vmatprep.subr.bf16.mxu0 %v19108_v57 }
 0x7bf   :  { %12749 = vmatpush1.bf16.msra.mxu0 %v19106_v59 }
 0x7c0   :  { %12750 = vmatprep.subr.bf16.mxu0 %v19111_v28  ;;  %v19187_v28 = vld [vmem:[#allocation17 + $0x2e8] ss:$16 sps:$4 sm:$0xff]  }
 0x7c3   :  { %12751 = vmatpush1.bf16.msra.mxu0 %v19109_v32 }
 0x7c4   :  { %12752 = vmatprep.subr.bf16.mxu0 %v19114_v4  ;;  %v19192_v4 = vld [vmem:[#allocation17 + $0x2cc] ss:$16 sps:$4 sm:$0xff]  }
 0x7c7   :  { %12753 = vmatpush1.bf16.msra.mxu0 %v19112_v7  ;;  %v19195_v7 = vld [vmem:[#allocation17 + $0x2ac] ss:$16 sps:$4 sm:$0xff]  }
 0x7c8   :  { %12754 = vmatprep.subr.bf16.mxu0 %v19117_v25  ;;  %v19193_v25 = vld [vmem:[#allocation17 + $0x2a8] ss:$16 sps:$4 sm:$0xff]  }
 0x7cb   :  { %12755 = vmatpush2.bf16.msra.mxu0 %v19115_v54  ;;  %v19198_v54 = vld [vmem:[#allocation17 + $0x28c] ss:$16 sps:$4 sm:$0xff]  }
 0x7cc   :  { %12756 = vmatprep.subr.bf16.mxu0 %v19120_v46  ;;  %v19235_v46 = vld [vmem:[#allocation17 + $0x4e0] ss:$16 sps:$4 sm:$0xff]  }
 0x7cf   :  { %12757 = vmatpush2.bf16.msra.mxu0 %v19118_v49  ;;  %v19237_v49 = vld [vmem:[#allocation17 + $0x4e4] ss:$16 sps:$4 sm:$0xff]  }
 0x7d0   :  { %12758 = vmatprep.subr.bf16.mxu0 %v19123_v58  ;;  %v19240_v58 = vld [vmem:[#allocation17 + $0x4c4] ss:$16 sps:$4 sm:$0xff]  }
 0x7d3   :  { %12759 = vmatpush2.bf16.msra.mxu0 %v19121_v20  ;;  %v19196_v20 = vld [vmem:[#allocation17 + $0x288] ss:$16 sps:$4 sm:$0xff]  }
 0x7d4   :  { %12760 = vmatprep.subr.bf16.mxu0 %v19126_v37  ;;  %v19238_v37 = vld [vmem:[#allocation17 + $0x4c0] ss:$16 sps:$4 sm:$0xff]  }
 0x7d7   :  { %12761 = vmatpush2.bf16.msra.mxu0 %v19124_v27  ;;  %v19201_v27 = vld [vmem:[#allocation17 + $0x26c] ss:$16 sps:$4 sm:$0xff]  }
 0x7d8   :  { %12762 = vmatprep.subr.bf16.mxu0 %v19129_v31  ;;  %v19243_v31 = vld [vmem:[#allocation17 + $0x4a4] ss:$16 sps:$4 sm:$0xff]  }
 0x7da   :  { %v11666_v2 = vpop.f32.mrf.mxu0 }
 0x7db   :  { %12763 = vmatpush2.bf16.msra.mxu0 %v19127_v9  ;;  %v11667_v1 = vadd.f32 %v11666_v2, %v8567_v45  ;;  %v19199_v9 = vld [vmem:[#allocation17 + $0x268] ss:$16 sps:$4 sm:$0xff]   ;;  %v19204_v2 = vld [vmem:[#allocation17 + $0x24c] ss:$16 sps:$4 sm:$0xff]   ;;  %v19253_v45 = vld [vmem:[#allocation17 + $0x420] ss:$16 sps:$4 sm:$0xff]  }
 0x7dc   :  { %v11668_v60 = vpop.f32.mrf.mxu0  ;;  %12764 = vmatprep.subr.bf16.mxu0 %v19132_v33  ;;  %v19241_v33 = vld [vmem:[#allocation17 + $0x4a0] ss:$16 sps:$4 sm:$0xff]  }
 0x7dd   :  { %v11669_v41 = vadd.f32 %v11668_v60, %v8571_v55  ;;  %v19202_v60 = vld [vmem:[#allocation17 + $0x248] ss:$16 sps:$4 sm:$0xff]   ;;  %v19216_v55 = vld [vmem:[#allocation17 + $0x3cc] ss:$16 sps:$4 sm:$0xff]  }
 0x7de   :  { %v11670_v51 = vpop.f32.mrf.mxu0 }
 0x7df   :  { %12765 = vmatpush2.bf16.msra.mxu0 %v19130_v43  ;;  %v11707_v42 = vpop.f32.mrf.mxu1  ;;  %v19246_v43 = vld [vmem:[#allocation17 + $0x484] ss:$16 sps:$4 sm:$0xff]   ;;  %v19207_v51 = vld [vmem:[#allocation17 + $0x22c] ss:$16 sps:$4 sm:$0xff]  }
 0x7e0   :  { %v11671_v63 = vpop.f32.mrf.mxu0  ;;  %12766 = vmatprep.subr.bf16.mxu0 %v19135_v6  ;;  %v11708_v36 = vadd.f32 %v11707_v42, %v11667_v1  ;;  %v19244_v6 = vld [vmem:[#allocation17 + $0x480] ss:$16 sps:$4 sm:$0xff]   ;;  %v19249_v42 = vld [vmem:[#allocation17 + $0x464] ss:$16 sps:$4 sm:$0xff]  }
 0x7e1   :  { %v11709_v0 = vpop.f32.mrf.mxu1  ;;  %v19247_v63 = vld [vmem:[#allocation17 + $0x460] ss:$16 sps:$4 sm:$0xff]   ;;  %v19258_v1 = vld [vmem:[#allocation17 + $0x404] ss:$16 sps:$4 sm:$0xff]  }
 0x7e2   :  { %v11710_v38 = vadd.f32 %v11709_v0, %v11669_v41  ;;  %v19252_v0 = vld [vmem:[#allocation17 + $0x444] ss:$16 sps:$4 sm:$0xff]   ;;  %v19256_v41 = vld [vmem:[#allocation17 + $0x400] ss:$16 sps:$4 sm:$0xff]  }
 0x7e3   :  { %12767 = vmatpush2.bf16.msra.mxu0 %v19133_v8  ;;  %v11711_v44 = vpop.f32.mrf.mxu1  ;;  %v19205_v8 = vld [vmem:[#allocation17 + $0x228] ss:$16 sps:$4 sm:$0xff]  }
 0x7e4   :  { %12768 = vmatprep.subr.bf16.mxu0 %v19138_v16  ;;  %v19210_v16 = vld [vmem:[#allocation17 + $0x20c] ss:$16 sps:$4 sm:$0xff]   ;;  %v19208_v44 = vld [vmem:[#allocation17 + $0x208] ss:$16 sps:$4 sm:$0xff]  }
 0x7e5   :  { %v11712_v5 = vpop.f32.mrf.mxu1 }
 0x7e6   :  { %v19213_v5 = vld [vmem:[#allocation17 + $0x3ec] ss:$16 sps:$4 sm:$0xff]  }
 0x7e7   :  { %12769 = vmatpush2.bf16.msra.mxu0 %v19136_v34  ;;  %v19250_v34 = vld [vmem:[#allocation17 + $0x440] ss:$16 sps:$4 sm:$0xff]  }
 0x7e8   :  { %13650 = vmatprep.subr.bf16.mxu0 %v19237_v49  ;;  %v19279_v49 = vld [vmem:[#allocation17 + $0x524] ss:$16 sps:$4 sm:$0xff]  }
 0x7ea   :  { %12771 = vmatmul.mubr.bf16.vlgmr.msra.gmra.mxu0 %v21966_v47  ;;  %v11837_v47 = vrot.slane %v21961_v62, %v8570_v56  ;;  %v19190_v62 = vld [vmem:[#allocation17 + $0x2c8] ss:$16 sps:$4 sm:$0xff]  }
 0x7eb   :  { %13651 = vmatpush1.bf16.msra.mxu0 %v19235_v46  ;;  %v19211_v56 = vld [vmem:[#allocation17 + $0x3e8] ss:$16 sps:$4 sm:$0xff]  }
 0x7ec   :  { %13652 = vmatprep.subr.bf16.mxu0 %v19240_v58 }
 0x7ef   :  { %13653 = vmatpush1.bf16.msra.mxu0 %v19238_v37  ;;  %v19282_v37 = vld [vmem:[#allocation17 + $0x504] ss:$16 sps:$4 sm:$0xff]  }
 0x7f0   :  { %13654 = vmatprep.subr.bf16.mxu0 %v19243_v31  ;;  %v19285_v31 = vld [vmem:[#allocation17 + $0x6e4] ss:$16 sps:$4 sm:$0xff]  }
 0x7f3   :  { %13655 = vmatpush1.bf16.msra.mxu0 %v19241_v33  ;;  %v19288_v33 = vld [vmem:[#allocation17 + $0x4ec] ss:$16 sps:$4 sm:$0xff]  }
 0x7f4   :  { %13656 = vmatprep.subr.bf16.mxu0 %v19246_v43  ;;  %v19295_v43 = vld [vmem:[#allocation17 + $0x6a0] ss:$16 sps:$4 sm:$0xff]  }
 0x7f7   :  { %13657 = vmatpush1.bf16.msra.mxu0 %v19244_v6  ;;  %v19301_v6 = vld [vmem:[#allocation17 + $0x680] ss:$16 sps:$4 sm:$0xff]  }
 0x7f8   :  { %13658 = vmatprep.subr.bf16.mxu0 %v19249_v42  ;;  %v19307_v42 = vld [vmem:[#allocation17 + $0x660] ss:$16 sps:$4 sm:$0xff]  }
 0x7fb   :  { %13659 = vmatpush1.bf16.msra.mxu0 %v19247_v63  ;;  %v19313_v63 = vld [vmem:[#allocation17 + $0x640] ss:$16 sps:$4 sm:$0xff]  }
 0x7fc   :  { %13660 = vmatprep.subr.bf16.mxu0 %v19252_v0  ;;  %v19319_v0 = vld [vmem:[#allocation17 + $0x620] ss:$16 sps:$4 sm:$0xff]  }
 0x7ff   :  { %13661 = vmatpush1.bf16.msra.mxu0 %v19250_v34  ;;  %v19325_v34 = vld [vmem:[#allocation17 + $0x600] ss:$16 sps:$4 sm:$0xff]  }
 0x800   :  { %13662 = vmatprep.subr.bf16.mxu0 %v19255_v3  ;;  %v19331_v3 = vld [vmem:[#allocation17 + $0x7e0] ss:$16 sps:$4 sm:$0xff]  }
 0x803   :  { %13663 = vmatpush1.bf16.msra.mxu0 %v19253_v45  ;;  %v19337_v45 = vld [vmem:[#allocation17 + $0x7c0] ss:$16 sps:$4 sm:$0xff]  }
 0x804   :  { %13664 = vmatprep.subr.bf16.mxu0 %v19258_v1  ;;  %v19343_v1 = vld [vmem:[#allocation17 + $0x7a0] ss:$16 sps:$4 sm:$0xff]  }
 0x807   :  { %13665 = vmatpush1.bf16.msra.mxu0 %v19256_v41  ;;  %v19349_v41 = vld [vmem:[#allocation17 + $0x780] ss:$16 sps:$4 sm:$0xff]  }
 0x81a   :  { %v11748_v48 = vpop.f32.mrf.mxu0 }
 0x81b   :  { %v11749_v35 = vadd.f32 %v11748_v48, %v11708_v36  ;;  %v19214_v48 = vld [vmem:[#allocation17 + $0x3c8] ss:$16 sps:$4 sm:$0xff]   ;;  %v19219_v36 = vld [vmem:[#allocation17 + $0x3ac] ss:$16 sps:$4 sm:$0xff]  }
 0x81c   :  { %v11750_v12 = vpop.f32.mrf.mxu0 }
 0x81d   :  { %v11751_v18 = vadd.f32 %v11750_v12, %v11710_v38  ;;  %v19261_v12 = vld [vmem:[#allocation17 + $0x5e4] ss:$16 sps:$4 sm:$0xff]   ;;  %v19259_v38 = vld [vmem:[#allocation17 + $0x5e0] ss:$16 sps:$4 sm:$0xff]  }
 0x81e   :  { %v11752_v11 = vpop.f32.mrf.mxu0  ;;  %13666 = vmatprep.subr.bf16.mxu0 %v19261_v12  ;;  %v19355_v12 = vld [vmem:[#allocation17 + $0x760] ss:$16 sps:$4 sm:$0xff]  }
 0x81f   :  { %v11789_v17 = vpop.f32.mrf.mxu1  ;;  %v19264_v11 = vld [vmem:[#allocation17 + $0x5c4] ss:$16 sps:$4 sm:$0xff]   ;;  %13667 = vmatpush2.bf16.msra.mxu0 %v19259_v38  ;;  %v11994_v38 = vld [vmem:[#allocation19] sm:$0xf] }
 0x820   :  { %v11790_v50 = vadd.f32 %v11789_v17, %v11749_v35  ;;  %v11753_v19 = vpop.f32.mrf.mxu0  ;;  %v19222_v35 = vld [vmem:[#allocation17 + $0x38c] ss:$16 sps:$4 sm:$0xff]   ;;  %v19220_v17 = vld [vmem:[#allocation17 + $0x388] ss:$16 sps:$4 sm:$0xff]   ;;  %13668 = vmatprep.subr.bf16.mxu0 %v19264_v11  ;;  %v19363_v11 = vld [vmem:[#allocation17 + $0x744] ss:$16 sps:$4 sm:$0xff]  }
 0x821   :  { %v11791_v22 = vpop.f32.mrf.mxu1  ;;  %v19223_v19 = vld [vmem:[#allocation17 + $0x368] ss:$16 sps:$4 sm:$0xff]  }
 0x822   :  { %vm11802_vm2 = vcmp.gt.f32.partialorder %v11790_v50, 0.0  ;;  %v11852_v10 = vmul.f32 %v11833_v26, %v11790_v50  ;;  %v11792_v29 = vadd.f32 %v11791_v22, %v11751_v18  ;;  %v19217_v26 = vld [vmem:[#allocation17 + $0x3a8] ss:$16 sps:$4 sm:$0xff]   ;;  %v19225_v18 = vld [vmem:[#allocation17 + $0x36c] ss:$16 sps:$4 sm:$0xff]  }
 0x823   :  { %v11793_v13 = vpop.f32.mrf.mxu1  ;;  %v19265_v22 = vld [vmem:[#allocation17 + $0x5a0] ss:$16 sps:$4 sm:$0xff]  }
 0x824   :  { %vm11803_vm3 = vcmp.gt.f32.partialorder %v11792_v29, 0.0  ;;  %v11853_v14 = vmul.f32 %v11837_v47, %v11792_v29  ;;  %v11860_v24 = vsel %vm11802_vm2, %v11790_v50, %v11852_v10  ;;  %v19262_v47 = vld [vmem:[#allocation17 + $0x5c0] ss:$16 sps:$4 sm:$0xff]   ;;  %v19267_v50 = vld [vmem:[#allocation17 + $0x5a4] ss:$16 sps:$4 sm:$0xff]  }
 0x825   :  { %v11794_v40 = vpop.f32.mrf.mxu1  ;;  %v21976_v32 = vpack.c.bf16 %v11860_v24, %v11860_v24  ;;  %13669 = vmatpush2.bf16.msra.mxu0 %v19262_v47  ;;  %v19228_v10 = vld [vmem:[#allocation17 + $0x34c] ss:$16 sps:$4 sm:$0xff]   ;;  %v19226_v13 = vld [vmem:[#allocation17 + $0x348] ss:$16 sps:$4 sm:$0xff]   ;;  %v12011_v47 = vrot.slane %v11994_v38, %v22514_v23 }
 0x826   :  { %v11861_v57 = vsel %vm11803_vm3, %v11792_v29, %v11853_v14  ;;  %13670 = vmatprep.subr.bf16.mxu0 %v19267_v50  ;;  %v19270_v29 = vld [vmem:[#allocation17 + $0x584] ss:$16 sps:$4 sm:$0xff]   ;;  %v19268_v14 = vld [vmem:[#allocation17 + $0x580] ss:$16 sps:$4 sm:$0xff]   ;;  %v19231_v24 = vld [vmem:[#allocation17 + $0x32c] ss:$16 sps:$4 sm:$0xff]  }
 0x827   :  { %v11865_v59 = vpack.c.bf16 %v11861_v57, %v11861_v57  ;;  %v19273_v40 = vld [vmem:[#allocation17 + $0x564] ss:$16 sps:$4 sm:$0xff]   ;;  %v19229_v57 = vld [vmem:[#allocation17 + $0x328] ss:$16 sps:$4 sm:$0xff]  }
 0x829   :  { %12729 = vmatprep.mubr.bf16.mxu1 %v11865_v59  ;;  %13671 = vmatpush2.bf16.msra.mxu0 %v19265_v22 }
 0x82a   :  { %12730 = vmatmul.mubr.bf16.vlgmr.msra.gmra.mxu1 %v21976_v32  ;;  %13672 = vmatprep.subr.bf16.mxu0 %v19270_v29  ;;  %v19369_v29 = vld [vmem:[#allocation17 + $0x724] ss:$16 sps:$4 sm:$0xff]  }
 0x82b   :  { %12780 = vmatpush1.bf16.msra.mxu1 %v19187_v28  ;;  %12811 = vmatprep.mubr.bf16.mxu1 %v11865_v59  ;;  %v19271_v59 = vld [vmem:[#allocation17 + $0x560] ss:$16 sps:$4 sm:$0xff]   ;;  %v19234_v28 = vld [vmem:[#allocation17 + $0x30c] ss:$16 sps:$4 sm:$0xff]  }
 0x82c   :  { %12781 = vmatprep.subr.bf16.mxu1 %v19192_v4  ;;  %v19276_v4 = vld [vmem:[#allocation17 + $0x544] ss:$16 sps:$4 sm:$0xff]  }
 0x82d   :  { %13673 = vmatpush2.bf16.msra.mxu0 %v19268_v14 }
 0x82e   :  { %13674 = vmatprep.subr.bf16.mxu0 %v19273_v40  ;;  %v19373_v40 = vld [vmem:[#allocation17 + $0x700] ss:$16 sps:$4 sm:$0xff]  }
 0x82f   :  { %12782 = vmatpush1.bf16.msra.mxu1 %v19190_v62  ;;  %v19232_v62 = vld [vmem:[#allocation17 + $0x308] ss:$16 sps:$4 sm:$0xff]  }
 0x830   :  { %12783 = vmatprep.subr.bf16.mxu1 %v19195_v7  ;;  %v19274_v7 = vld [vmem:[#allocation17 + $0x540] ss:$16 sps:$4 sm:$0xff]  }
 0x831   :  { %13675 = vmatpush2.bf16.msra.mxu0 %v19271_v59  ;;  %v11999_v59 = vrot.slane %v11994_v38, %v22496_v21 }
 0x832   :  { %13676 = vmatprep.subr.bf16.mxu0 %v19276_v4  ;;  %v12003_v4 = vrot.slane %v11994_v38, %v22502_v15 }
 0x833   :  { %12784 = vmatpush1.bf16.msra.mxu1 %v19193_v25 }
 0x834   :  { %12785 = vmatprep.subr.bf16.mxu1 %v19198_v54 }
 0x835   :  { %13677 = vmatpush2.bf16.msra.mxu0 %v19274_v7 }
 0x836   :  { %13678 = vmatprep.subr.bf16.mxu0 %v19279_v49 }
 0x837   :  { %12786 = vmatpush1.bf16.msra.mxu1 %v19196_v20  ;;  %v19277_v20 = vld [vmem:[#allocation17 + $0x520] ss:$16 sps:$4 sm:$0xff]  }
 0x838   :  { %12787 = vmatprep.subr.bf16.mxu1 %v19201_v27  ;;  %v19283_v27 = vld [vmem:[#allocation17 + $0x6e0] ss:$16 sps:$4 sm:$0xff]  }
 0x839   :  { %13679 = vmatpush2.bf16.msra.mxu0 %v19277_v20 }
 0x83a   :  { %13680 = vmatprep.subr.bf16.mxu0 %v19282_v37 }
 0x83b   :  { %12788 = vmatpush1.bf16.msra.mxu1 %v19199_v9  ;;  %v19280_v9 = vld [vmem:[#allocation17 + $0x500] ss:$16 sps:$4 sm:$0xff]  }
 0x83c   :  { %12789 = vmatprep.subr.bf16.mxu1 %v19204_v2  ;;  %v19291_v2 = vld [vmem:[#allocation17 + $0x6c4] ss:$16 sps:$4 sm:$0xff]  }
 0x83d   :  { %13681 = vmatpush2.bf16.msra.mxu0 %v19280_v9 }
 0x83e   :  { %13732 = vmatprep.subr.bf16.mxu0 %v19288_v33 }
 0x83f   :  { %12790 = vmatpush1.bf16.msra.mxu1 %v19202_v60  ;;  %v19297_v60 = vld [vmem:[#allocation17 + $0x6a4] ss:$16 sps:$4 sm:$0xff]  }
 0x840   :  { %12791 = vmatprep.subr.bf16.mxu1 %v19207_v51  ;;  %v19303_v51 = vld [vmem:[#allocation17 + $0x684] ss:$16 sps:$4 sm:$0xff]  }
 0x843   :  { %12792 = vmatpush1.bf16.msra.mxu1 %v19205_v8  ;;  %v19309_v8 = vld [vmem:[#allocation17 + $0x664] ss:$16 sps:$4 sm:$0xff]  }
 0x844   :  { %12793 = vmatprep.subr.bf16.mxu1 %v19210_v16  ;;  %v19315_v16 = vld [vmem:[#allocation17 + $0x644] ss:$16 sps:$4 sm:$0xff]  }
 0x847   :  { %12794 = vmatpush1.bf16.msra.mxu1 %v19208_v44  ;;  %v19321_v44 = vld [vmem:[#allocation17 + $0x624] ss:$16 sps:$4 sm:$0xff]  }
 0x848   :  { %12795 = vmatprep.subr.bf16.mxu1 %v19213_v5  ;;  %v19327_v5 = vld [vmem:[#allocation17 + $0x604] ss:$16 sps:$4 sm:$0xff]  }
 0x84b   :  { %12796 = vmatpush2.bf16.msra.mxu1 %v19211_v56  ;;  %v19333_v56 = vld [vmem:[#allocation17 + $0x7e4] ss:$16 sps:$4 sm:$0xff]  }
 0x84c   :  { %12797 = vmatprep.subr.bf16.mxu1 %v19216_v55  ;;  %v19339_v55 = vld [vmem:[#allocation17 + $0x7c4] ss:$16 sps:$4 sm:$0xff]  }
 0x84f   :  { %12798 = vmatpush2.bf16.msra.mxu1 %v19214_v48  ;;  %v19345_v48 = vld [vmem:[#allocation17 + $0x7a4] ss:$16 sps:$4 sm:$0xff]  }
 0x850   :  { %12799 = vmatprep.subr.bf16.mxu1 %v19219_v36  ;;  %v19351_v36 = vld [vmem:[#allocation17 + $0x784] ss:$16 sps:$4 sm:$0xff]  }
 0x853   :  { %12800 = vmatpush2.bf16.msra.mxu1 %v19217_v26  ;;  %v19357_v26 = vld [vmem:[#allocation17 + $0x764] ss:$16 sps:$4 sm:$0xff]  }
 0x854   :  { %12801 = vmatprep.subr.bf16.mxu1 %v19222_v35  ;;  %v19361_v35 = vld [vmem:[#allocation17 + $0x740] ss:$16 sps:$4 sm:$0xff]  }
 0x857   :  { %12802 = vmatpush2.bf16.msra.mxu1 %v19220_v17  ;;  %v12007_v17 = vrot.slane %v11994_v38, %v22513_v53  ;;  %v19354_v38 = vld [vmem:[#allocation17 + $0x58c] ss:$16 sps:$4 sm:$0xff]  }
 0x858   :  { %12803 = vmatprep.subr.bf16.mxu1 %v19225_v18 }
 0x85b   :  { %12804 = vmatpush2.bf16.msra.mxu1 %v19223_v19 }
 0x85c   :  { %12805 = vmatprep.subr.bf16.mxu1 %v19228_v10 }
 0x85f   :  { %12806 = vmatpush2.bf16.msra.mxu1 %v19226_v13  ;;  %v19367_v13 = vld [vmem:[#allocation17 + $0x720] ss:$16 sps:$4 sm:$0xff]  }
 0x860   :  { %12807 = vmatprep.subr.bf16.mxu1 %v19231_v24  ;;  %v19375_v24 = vld [vmem:[#allocation17 + $0x704] ss:$16 sps:$4 sm:$0xff]  }
 0x863   :  { %12808 = vmatpush2.bf16.msra.mxu1 %v19229_v57  ;;  %v19381_v57 = vld [vmem:[#allocation17 + $0x6ec] ss:$16 sps:$4 sm:$0xff]  }
 0x864   :  { %12809 = vmatprep.subr.bf16.mxu1 %v19234_v28  ;;  %v21991_v28 = vld [vmem:[#allocation20] sm:$0xf] }
 0x865   :  { %v12829_v7 = vrot.slane %v21991_v28, %v22496_v21  ;;  %v12833_v20 = vrot.slane %v21991_v28, %v22502_v15 }
 0x867   :  { %12810 = vmatpush2.bf16.msra.mxu1 %v19232_v62 }
 0x868   :  { %13691 = vmatprep.subr.bf16.mxu1 %v19285_v31 }
 0x86a   :  { %12812 = vmatmul.mubr.bf16.vlgmr.msra.gmra.mxu1 %v21976_v32  ;;  %v21980_v25 = vpop.f32.mrf.mxu0  ;;  %v19289_v32 = vld [vmem:[#allocation17 + $0x6c0] ss:$16 sps:$4 sm:$0xff]  }
 0x86b   :  { %13692 = vmatpush1.bf16.msra.mxu1 %v19283_v27  ;;  %v12691_v62 = vadd.f32 %v21980_v25, %v11999_v59 }
 0x86c   :  { %v21982_v54 = vpop.f32.mrf.mxu0  ;;  %13693 = vmatprep.subr.bf16.mxu1 %v19291_v2 }
 0x86d   :  { %v12693_v49 = vadd.f32 %v21982_v54, %v12003_v4  ;;  %v19292_v54 = vld [vmem:[#allocation17 + $0x4c8] ss:$16 sps:$4 sm:$0xff]  }
 0x86e   :  { %v12694_v46 = vpop.f32.mrf.mxu0 }
 0x86f   :  { %13694 = vmatpush1.bf16.msra.mxu1 %v19289_v32 }
 0x870   :  { %v12695_v58 = vpop.f32.mrf.mxu0  ;;  %13695 = vmatprep.subr.bf16.mxu1 %v19297_v60  ;;  %v19286_v60 = vld [vmem:[#allocation17 + $0x4e8] ss:$16 sps:$4 sm:$0xff]  }
 0x873   :  { %13696 = vmatpush1.bf16.msra.mxu1 %v19295_v43 }
 0x874   :  { %13697 = vmatprep.subr.bf16.mxu1 %v19303_v51  ;;  %v19294_v51 = vld [vmem:[#allocation17 + $0x4cc] ss:$16 sps:$4 sm:$0xff]  }
 0x877   :  { %13698 = vmatpush1.bf16.msra.mxu1 %v19301_v6 }
 0x878   :  { %13699 = vmatprep.subr.bf16.mxu1 %v19309_v8  ;;  %v19298_v8 = vld [vmem:[#allocation17 + $0x4a8] ss:$16 sps:$4 sm:$0xff]  }
 0x87b   :  { %13700 = vmatpush1.bf16.msra.mxu1 %v19307_v42  ;;  %v19300_v42 = vld [vmem:[#allocation17 + $0x4ac] ss:$16 sps:$4 sm:$0xff]  }
 0x87c   :  { %13701 = vmatprep.subr.bf16.mxu1 %v19315_v16  ;;  %v19304_v16 = vld [vmem:[#allocation17 + $0x488] ss:$16 sps:$4 sm:$0xff]  }
 0x87f   :  { %13702 = vmatpush1.bf16.msra.mxu1 %v19313_v63  ;;  %v19306_v63 = vld [vmem:[#allocation17 + $0x48c] ss:$16 sps:$4 sm:$0xff]  }
 0x880   :  { %13703 = vmatprep.subr.bf16.mxu1 %v19321_v44  ;;  %v19310_v44 = vld [vmem:[#allocation17 + $0x468] ss:$16 sps:$4 sm:$0xff]  }
 0x883   :  { %13704 = vmatpush1.bf16.msra.mxu1 %v19319_v0  ;;  %v19312_v0 = vld [vmem:[#allocation17 + $0x46c] ss:$16 sps:$4 sm:$0xff]  }
 0x884   :  { %13705 = vmatprep.subr.bf16.mxu1 %v19327_v5  ;;  %v19316_v5 = vld [vmem:[#allocation17 + $0x448] ss:$16 sps:$4 sm:$0xff]  }
 0x887   :  { %13706 = vmatpush1.bf16.msra.mxu1 %v19325_v34  ;;  %v19318_v34 = vld [vmem:[#allocation17 + $0x44c] ss:$16 sps:$4 sm:$0xff]  }
 0x888   :  { %13707 = vmatprep.subr.bf16.mxu1 %v19333_v56  ;;  %v19322_v56 = vld [vmem:[#allocation17 + $0x428] ss:$16 sps:$4 sm:$0xff]  }
 0x88b   :  { %13708 = vmatpush2.bf16.msra.mxu1 %v19331_v3  ;;  %v19324_v3 = vld [vmem:[#allocation17 + $0x42c] ss:$16 sps:$4 sm:$0xff]  }
 0x88c   :  { %13709 = vmatprep.subr.bf16.mxu1 %v19339_v55  ;;  %v19328_v55 = vld [vmem:[#allocation17 + $0x408] ss:$16 sps:$4 sm:$0xff]  }
 0x88f   :  { %13710 = vmatpush2.bf16.msra.mxu1 %v19337_v45  ;;  %v19330_v45 = vld [vmem:[#allocation17 + $0x40c] ss:$16 sps:$4 sm:$0xff]  }
 0x890   :  { %13711 = vmatprep.subr.bf16.mxu1 %v19345_v48  ;;  %v19334_v48 = vld [vmem:[#allocation17 + $0x5e8] ss:$16 sps:$4 sm:$0xff]  }
 0x893   :  { %13712 = vmatpush2.bf16.msra.mxu1 %v19343_v1  ;;  %v19336_v1 = vld [vmem:[#allocation17 + $0x5ec] ss:$16 sps:$4 sm:$0xff]  }
 0x894   :  { %13713 = vmatprep.subr.bf16.mxu1 %v19351_v36  ;;  %v19340_v36 = vld [vmem:[#allocation17 + $0x5c8] ss:$16 sps:$4 sm:$0xff]  }
 0x897   :  { %13714 = vmatpush2.bf16.msra.mxu1 %v19349_v41  ;;  %v19342_v41 = vld [vmem:[#allocation17 + $0x5cc] ss:$16 sps:$4 sm:$0xff]  }
 0x898   :  { %13715 = vmatprep.subr.bf16.mxu1 %v19357_v26  ;;  %v19346_v26 = vld [vmem:[#allocation17 + $0x5a8] ss:$16 sps:$4 sm:$0xff]  }
 0x89b   :  { %13716 = vmatpush2.bf16.msra.mxu1 %v19355_v12  ;;  %v19348_v12 = vld [vmem:[#allocation17 + $0x5ac] ss:$16 sps:$4 sm:$0xff]  }
 0x89c   :  { %13717 = vmatprep.subr.bf16.mxu1 %v19363_v11  ;;  %v19360_v11 = vld [vmem:[#allocation17 + $0x56c] ss:$16 sps:$4 sm:$0xff]  }
 0x89f   :  { %13718 = vmatpush2.bf16.msra.mxu1 %v19361_v35  ;;  %v19352_v35 = vld [vmem:[#allocation17 + $0x588] ss:$16 sps:$4 sm:$0xff]  }
 0x8a0   :  { %13719 = vmatprep.subr.bf16.mxu1 %v19369_v29 }
 0x8a3   :  { %13720 = vmatpush2.bf16.msra.mxu1 %v19367_v13  ;;  %v19370_v13 = vld [vmem:[#allocation17 + $0x528] ss:$16 sps:$4 sm:$0xff]  }
 0x8a4   :  { %13721 = vmatprep.subr.bf16.mxu1 %v19375_v24  ;;  %v12841_v24 = vrot.slane %v21991_v28, %v22514_v23 }
 0x8a7   :  { %13722 = vmatpush2.bf16.msra.mxu1 %v19373_v40  ;;  %v19378_v40 = vld [vmem:[#allocation17 + $0x50c] ss:$16 sps:$4 sm:$0xff]  }
 0x8a8   :  { %13773 = vmatprep.subr.bf16.mxu1 %v19381_v57 }
 0x8aa   :  { %v12772_v18 = vpop.f32.mrf.mxu0 }
 0x8ab   :  { %v21986_v50 = vadd.f32 %v12772_v18, %v12007_v17  ;;  %v19358_v17 = vld [vmem:[#allocation17 + $0x568] ss:$16 sps:$4 sm:$0xff]  }
 0x8ac   :  { %v12774_v19 = vpop.f32.mrf.mxu0  ;;  %v19364_v18 = vld [vmem:[#allocation17 + $0x548] ss:$16 sps:$4 sm:$0xff]  }
 0x8ad   :  { %v21988_v22 = vadd.f32 %v12774_v19, %v12011_v47  ;;  %v19366_v47 = vld [vmem:[#allocation17 + $0x54c] ss:$16 sps:$4 sm:$0xff]  }
 0x8ae   :  { %v12776_v10 = vpop.f32.mrf.mxu0  ;;  %v19372_v19 = vld [vmem:[#allocation17 + $0x52c] ss:$16 sps:$4 sm:$0xff]  }
 0x8af   :  { %v12837_v10 = vrot.slane %v21991_v28, %v22513_v53 }
 0x8b0   :  { %v12777_v14 = vpop.f32.mrf.mxu0 }
 0x8ea   :  { %v12731_v46 = vpop.f32.mrf.mxu1 }
 0x8eb   :  { %v12732_v58 = vadd.f32 %v12731_v46, %v12691_v62 }
 0x8ec   :  { %v12733_v37 = vpop.f32.mrf.mxu1 }
 0x8ed   :  { %vm12820_vm4 = vcmp.gt.f32.partialorder %v12732_v58, 0.0  ;;  %v12846_v27 = vmul.f32 %v12829_v7, %v12732_v58  ;;  %v12734_v31 = vadd.f32 %v12733_v37, %v12693_v49  ;;  %v19376_v7 = vld [vmem:[#allocation17 + $0x508] ss:$16 sps:$4 sm:$0xff]  }
 0x8ee   :  { %v12735_v9 = vpop.f32.mrf.mxu1  ;;  %v19379_v37 = vld [vmem:[#allocation17 + $0x6e8] ss:$16 sps:$4 sm:$0xff]  }
 0x8ef   :  { %vm12821_vm5 = vcmp.gt.f32.partialorder %v12734_v31, 0.0  ;;  %v12847_v33 = vmul.f32 %v12833_v20, %v12734_v31  ;;  %v12850_v32 = vsel %vm12820_vm4, %v12732_v58, %v12846_v27  ;;  %v19384_v27 = vld [vmem:[#allocation17 + $0x6cc] ss:$16 sps:$4 sm:$0xff]   ;;  %v19385_v9 = vld [vmem:[#allocation17 + $0x6a8] ss:$16 sps:$4 sm:$0xff]  }
 0x8f0   :  { %v12736_v2 = vpop.f32.mrf.mxu1  ;;  %v22000_v6 = vpack.c.bf16 %v12850_v32, %v12850_v32  ;;  %v19427_v32 = vld [vmem:[#allocation17 + $0x8e0] ss:$16 sps:$4 sm:$0xff]  }
 0x8f1   :  { %v12851_v25 = vsel %vm12821_vm5, %v12734_v31, %v12847_v33  ;;  %v19387_v31 = vld [vmem:[#allocation17 + $0x6ac] ss:$16 sps:$4 sm:$0xff]   ;;  %v19429_v2 = vld [vmem:[#allocation17 + $0x8e4] ss:$16 sps:$4 sm:$0xff]  }
 0x8f2   :  { %v12855_v43 = vpack.c.bf16 %v12851_v25, %v12851_v25  ;;  %v19390_v33 = vld [vmem:[#allocation17 + $0x68c] ss:$16 sps:$4 sm:$0xff]   ;;  %v19432_v25 = vld [vmem:[#allocation17 + $0x8c4] ss:$16 sps:$4 sm:$0xff]  }
 0x8f4   :  { %13682 = vmatprep.mubr.bf16.mxu0 %v12855_v43 }
 0x8f5   :  { %13683 = vmatmul.mubr.bf16.vlgmr.msra.gmra.mxu0 %v22000_v6 }
 0x8f6   :  { %13733 = vmatpush1.bf16.msra.mxu0 %v19286_v60  ;;  %13764 = vmatprep.mubr.bf16.mxu0 %v12855_v43  ;;  %v19388_v43 = vld [vmem:[#allocation17 + $0x688] ss:$16 sps:$4 sm:$0xff]   ;;  %v19430_v60 = vld [vmem:[#allocation17 + $0x8c0] ss:$16 sps:$4 sm:$0xff]  }
 0x8f7   :  { %13734 = vmatprep.subr.bf16.mxu0 %v19294_v51  ;;  %v19393_v51 = vld [vmem:[#allocation17 + $0x66c] ss:$16 sps:$4 sm:$0xff]  }
 0x8fa   :  { %13735 = vmatpush1.bf16.msra.mxu0 %v19292_v54  ;;  %v19391_v54 = vld [vmem:[#allocation17 + $0x668] ss:$16 sps:$4 sm:$0xff]  }
 0x8fb   :  { %13736 = vmatprep.subr.bf16.mxu0 %v19300_v42  ;;  %v19433_v42 = vld [vmem:[#allocation17 + $0x8a0] ss:$16 sps:$4 sm:$0xff]  }
 0x8fe   :  { %13737 = vmatpush1.bf16.msra.mxu0 %v19298_v8  ;;  %v19396_v8 = vld [vmem:[#allocation17 + $0x64c] ss:$16 sps:$4 sm:$0xff]  }
 0x8ff   :  { %13738 = vmatprep.subr.bf16.mxu0 %v19306_v63  ;;  %v19438_v63 = vld [vmem:[#allocation17 + $0x884] ss:$16 sps:$4 sm:$0xff]  }
 0x902   :  { %13739 = vmatpush1.bf16.msra.mxu0 %v19304_v16  ;;  %v19394_v16 = vld [vmem:[#allocation17 + $0x648] ss:$16 sps:$4 sm:$0xff]  }
 0x903   :  { %13740 = vmatprep.subr.bf16.mxu0 %v19312_v0  ;;  %v19436_v0 = vld [vmem:[#allocation17 + $0x880] ss:$16 sps:$4 sm:$0xff]  }
 0x906   :  { %13741 = vmatpush1.bf16.msra.mxu0 %v19310_v44  ;;  %v19399_v44 = vld [vmem:[#allocation17 + $0x62c] ss:$16 sps:$4 sm:$0xff]  }
 0x907   :  { %13742 = vmatprep.subr.bf16.mxu0 %v19318_v34  ;;  %v19441_v34 = vld [vmem:[#allocation17 + $0x864] ss:$16 sps:$4 sm:$0xff]  }
 0x90a   :  { %13743 = vmatpush1.bf16.msra.mxu0 %v19316_v5  ;;  %v19397_v5 = vld [vmem:[#allocation17 + $0x628] ss:$16 sps:$4 sm:$0xff]  }
 0x90b   :  { %13744 = vmatprep.subr.bf16.mxu0 %v19324_v3  ;;  %v19439_v3 = vld [vmem:[#allocation17 + $0x860] ss:$16 sps:$4 sm:$0xff]  }
 0x90e   :  { %13745 = vmatpush1.bf16.msra.mxu0 %v19322_v56  ;;  %v19402_v56 = vld [vmem:[#allocation17 + $0x60c] ss:$16 sps:$4 sm:$0xff]  }
 0x90f   :  { %13746 = vmatprep.subr.bf16.mxu0 %v19330_v45  ;;  %v19444_v45 = vld [vmem:[#allocation17 + $0x844] ss:$16 sps:$4 sm:$0xff]  }
 0x912   :  { %13747 = vmatpush1.bf16.msra.mxu0 %v19328_v55  ;;  %v19400_v55 = vld [vmem:[#allocation17 + $0x608] ss:$16 sps:$4 sm:$0xff]  }
 0x913   :  { %13748 = vmatprep.subr.bf16.mxu0 %v19336_v1  ;;  %v19442_v1 = vld [vmem:[#allocation17 + $0x840] ss:$16 sps:$4 sm:$0xff]  }
 0x916   :  { %13749 = vmatpush2.bf16.msra.mxu0 %v19334_v48  ;;  %v19405_v48 = vld [vmem:[#allocation17 + $0x7ec] ss:$16 sps:$4 sm:$0xff]  }
 0x917   :  { %13750 = vmatprep.subr.bf16.mxu0 %v19342_v41  ;;  %v19447_v41 = vld [vmem:[#allocation17 + $0x824] ss:$16 sps:$4 sm:$0xff]  }
 0x91a   :  { %13751 = vmatpush2.bf16.msra.mxu0 %v19340_v36  ;;  %v19403_v36 = vld [vmem:[#allocation17 + $0x7e8] ss:$16 sps:$4 sm:$0xff]  }
 0x91b   :  { %13752 = vmatprep.subr.bf16.mxu0 %v19348_v12  ;;  %v19445_v12 = vld [vmem:[#allocation17 + $0x820] ss:$16 sps:$4 sm:$0xff]  }
 0x91e   :  { %13753 = vmatpush2.bf16.msra.mxu0 %v19346_v26  ;;  %v19408_v26 = vld [vmem:[#allocation17 + $0x7cc] ss:$16 sps:$4 sm:$0xff]  }
 0x91f   :  { %13754 = vmatprep.subr.bf16.mxu0 %v19354_v38  ;;  %v19450_v38 = vld [vmem:[#allocation17 + $0x804] ss:$16 sps:$4 sm:$0xff]  }
 0x922   :  { %13755 = vmatpush2.bf16.msra.mxu0 %v19352_v35  ;;  %v19406_v35 = vld [vmem:[#allocation17 + $0x7c8] ss:$16 sps:$4 sm:$0xff]  }
 0x923   :  { %13756 = vmatprep.subr.bf16.mxu0 %v19360_v11  ;;  %v19448_v11 = vld [vmem:[#allocation17 + $0x800] ss:$16 sps:$4 sm:$0xff]  }
 0x926   :  { %13757 = vmatpush2.bf16.msra.mxu0 %v19358_v17  ;;  %v19411_v17 = vld [vmem:[#allocation17 + $0x7ac] ss:$16 sps:$4 sm:$0xff]  }
 0x927   :  { %13758 = vmatprep.subr.bf16.mxu0 %v19366_v47  ;;  %v19453_v47 = vld [vmem:[#allocation17 + $0x9e4] ss:$16 sps:$4 sm:$0xff]  }
 0x92a   :  { %v12813_v29 = vpop.f32.mrf.mxu1  ;;  %13759 = vmatpush2.bf16.msra.mxu0 %v19364_v18  ;;  %v19409_v18 = vld [vmem:[#allocation17 + $0x7a8] ss:$16 sps:$4 sm:$0xff]  }
 0x92b   :  { %v12814_v14 = vadd.f32 %v12813_v29, %v21986_v50  ;;  %13760 = vmatprep.subr.bf16.mxu0 %v19372_v19  ;;  %v19451_v19 = vld [vmem:[#allocation17 + $0x9e0] ss:$16 sps:$4 sm:$0xff]   ;;  %v19456_v29 = vld [vmem:[#allocation17 + $0x9c4] ss:$16 sps:$4 sm:$0xff]  }
 0x92c   :  { %v12815_v57 = vpop.f32.mrf.mxu1 }
 0x92d   :  { %vm12822_vm6 = vcmp.gt.f32.partialorder %v12814_v14, 0.0  ;;  %v12848_v59 = vmul.f32 %v12837_v10, %v12814_v14  ;;  %v12816_v4 = vadd.f32 %v12815_v57, %v21988_v22  ;;  %v19382_v22 = vld [vmem:[#allocation17 + $0x6c8] ss:$16 sps:$4 sm:$0xff]   ;;  %v19414_v10 = vld [vmem:[#allocation17 + $0x78c] ss:$16 sps:$4 sm:$0xff]  }
 0x92e   :  { %v12817_v62 = vpop.f32.mrf.mxu1  ;;  %13761 = vmatpush2.bf16.msra.mxu0 %v19370_v13  ;;  %v19412_v13 = vld [vmem:[#allocation17 + $0x788] ss:$16 sps:$4 sm:$0xff]  }
 0x92f   :  { %vm12823_vm7 = vcmp.gt.f32.partialorder %v12816_v4, 0.0  ;;  %v12849_v46 = vmul.f32 %v12841_v24, %v12816_v4  ;;  %13762 = vmatprep.subr.bf16.mxu0 %v19378_v40  ;;  %v12852_v49 = vsel %vm12822_vm6, %v12814_v14, %v12848_v59  ;;  %v19454_v14 = vld [vmem:[#allocation17 + $0x9c0] ss:$16 sps:$4 sm:$0xff]   ;;  %v19417_v24 = vld [vmem:[#allocation17 + $0x76c] ss:$16 sps:$4 sm:$0xff]  }
 0x930   :  { %v12818_v58 = vpop.f32.mrf.mxu1  ;;  %v22009_v28 = vpack.c.bf16 %v12852_v49, %v12852_v49  ;;  %v19459_v40 = vld [vmem:[#allocation17 + $0x9a4] ss:$16 sps:$4 sm:$0xff]   ;;  %v19415_v57 = vld [vmem:[#allocation17 + $0x768] ss:$16 sps:$4 sm:$0xff]   ;;  %v19457_v59 = vld [vmem:[#allocation17 + $0x9a0] ss:$16 sps:$4 sm:$0xff]  }
 0x931   :  { %v12853_v20 = vsel %vm12823_vm7, %v12816_v4, %v12849_v46  ;;  %v19420_v4 = vld [vmem:[#allocation17 + $0x74c] ss:$16 sps:$4 sm:$0xff]   ;;  %v19462_v62 = vld [vmem:[#allocation17 + $0x984] ss:$16 sps:$4 sm:$0xff]   ;;  %v19460_v46 = vld [vmem:[#allocation17 + $0x980] ss:$16 sps:$4 sm:$0xff]  }
 0x932   :  { %13763 = vmatpush2.bf16.msra.mxu0 %v19376_v7  ;;  %v12857_v50 = vpack.c.bf16 %v12853_v20, %v12853_v20  ;;  %v19418_v7 = vld [vmem:[#allocation17 + $0x748] ss:$16 sps:$4 sm:$0xff]   ;;  %v19423_v49 = vld [vmem:[#allocation17 + $0x72c] ss:$16 sps:$4 sm:$0xff]   ;;  %v19465_v58 = vld [vmem:[#allocation17 + $0x964] ss:$16 sps:$4 sm:$0xff]  }
 0x933   :  { %14645 = vmatprep.subr.bf16.mxu0 %v19429_v2  ;;  %v19421_v20 = vld [vmem:[#allocation17 + $0x728] ss:$16 sps:$4 sm:$0xff]   ;;  %v19475_v2 = vld [vmem:[#allocation17 + $0xae0] ss:$16 sps:$4 sm:$0xff]  }
 0x934   :  { %13723 = vmatprep.mubr.bf16.mxu1 %v12857_v50 }
 0x935   :  { %13724 = vmatmul.mubr.bf16.vlgmr.msra.gmra.mxu1 %v22009_v28  ;;  %13765 = vmatmul.mubr.bf16.vlgmr.msra.gmra.mxu0 %v22000_v6  ;;  %v19435_v6 = vld [vmem:[#allocation17 + $0x8a4] ss:$16 sps:$4 sm:$0xff]  }
 0x936   :  { %13774 = vmatpush1.bf16.msra.mxu1 %v19379_v37  ;;  %13805 = vmatprep.mubr.bf16.mxu1 %v12857_v50  ;;  %v19463_v50 = vld [vmem:[#allocation17 + $0x960] ss:$16 sps:$4 sm:$0xff]   ;;  %v19426_v37 = vld [vmem:[#allocation17 + $0x70c] ss:$16 sps:$4 sm:$0xff]  }
 0x937   :  { %13775 = vmatprep.subr.bf16.mxu1 %v19384_v27  ;;  %14646 = vmatpush1.bf16.msra.mxu0 %v19427_v32  ;;  %v19468_v27 = vld [vmem:[#allocation17 + $0x944] ss:$16 sps:$4 sm:$0xff]  }
 0x938   :  { %14647 = vmatprep.subr.bf16.mxu0 %v19432_v25  ;;  %v19474_v32 = vld [vmem:[#allocation17 + $0x904] ss:$16 sps:$4 sm:$0xff]   ;;  %v19472_v25 = vld [vmem:[#allocation17 + $0x900] ss:$16 sps:$4 sm:$0xff]  }
 0x93a   :  { %13776 = vmatpush1.bf16.msra.mxu1 %v19382_v22  ;;  %v19424_v22 = vld [vmem:[#allocation17 + $0x708] ss:$16 sps:$4 sm:$0xff]  }
 0x93b   :  { %13777 = vmatprep.subr.bf16.mxu1 %v19387_v31  ;;  %14648 = vmatpush1.bf16.msra.mxu0 %v19430_v60  ;;  %v19466_v31 = vld [vmem:[#allocation17 + $0x940] ss:$16 sps:$4 sm:$0xff]   ;;  %v19480_v60 = vld [vmem:[#allocation17 + $0x8ec] ss:$16 sps:$4 sm:$0xff]  }
 0x93c   :  { %14649 = vmatprep.subr.bf16.mxu0 %v19435_v6  ;;  %v19483_v6 = vld [vmem:[#allocation17 + $0xac4] ss:$16 sps:$4 sm:$0xff]  }
 0x93e   :  { %13778 = vmatpush1.bf16.msra.mxu1 %v19385_v9  ;;  %v19471_v9 = vld [vmem:[#allocation17 + $0x924] ss:$16 sps:$4 sm:$0xff]  }
 0x93f   :  { %13779 = vmatprep.subr.bf16.mxu1 %v19390_v33  ;;  %14650 = vmatpush1.bf16.msra.mxu0 %v19433_v42  ;;  %v19469_v33 = vld [vmem:[#allocation17 + $0x920] ss:$16 sps:$4 sm:$0xff]  }
 0x940   :  { %14651 = vmatprep.subr.bf16.mxu0 %v19438_v63  ;;  %v19493_v42 = vld [vmem:[#allocation17 + $0xa80] ss:$16 sps:$4 sm:$0xff]  }
 0x941   :  { %v19499_v63 = vld [vmem:[#allocation17 + $0xa60] ss:$16 sps:$4 sm:$0xff]  }
 0x942   :  { %13780 = vmatpush1.bf16.msra.mxu1 %v19388_v43  ;;  %v19477_v43 = vld [vmem:[#allocation17 + $0xae4] ss:$16 sps:$4 sm:$0xff]  }
 0x943   :  { %13781 = vmatprep.subr.bf16.mxu1 %v19393_v51  ;;  %14652 = vmatpush1.bf16.msra.mxu0 %v19436_v0  ;;  %v19481_v51 = vld [vmem:[#allocation17 + $0xac0] ss:$16 sps:$4 sm:$0xff]  }
 0x944   :  { %14653 = vmatprep.subr.bf16.mxu0 %v19441_v34  ;;  %v19505_v0 = vld [vmem:[#allocation17 + $0xa40] ss:$16 sps:$4 sm:$0xff]  }
 0x945   :  { %v19511_v34 = vld [vmem:[#allocation17 + $0xa20] ss:$16 sps:$4 sm:$0xff]  }
 0x946   :  { %13782 = vmatpush1.bf16.msra.mxu1 %v19391_v54  ;;  %v19487_v54 = vld [vmem:[#allocation17 + $0xaa0] ss:$16 sps:$4 sm:$0xff]  }
 0x947   :  { %13783 = vmatprep.subr.bf16.mxu1 %v19396_v8  ;;  %14654 = vmatpush1.bf16.msra.mxu0 %v19439_v3  ;;  %v19495_v8 = vld [vmem:[#allocation17 + $0xa84] ss:$16 sps:$4 sm:$0xff]   ;;  %v19517_v3 = vld [vmem:[#allocation17 + $0xa00] ss:$16 sps:$4 sm:$0xff]  }
 0x948   :  { %14655 = vmatprep.subr.bf16.mxu0 %v19444_v45  ;;  %v19523_v45 = vld [vmem:[#allocation17 + $0xbe0] ss:$16 sps:$4 sm:$0xff]  }
 0x94a   :  { %13784 = vmatpush1.bf16.msra.mxu1 %v19394_v16  ;;  %v19501_v16 = vld [vmem:[#allocation17 + $0xa64] ss:$16 sps:$4 sm:$0xff]  }
 0x94b   :  { %13785 = vmatprep.subr.bf16.mxu1 %v19399_v44  ;;  %14656 = vmatpush1.bf16.msra.mxu0 %v19442_v1  ;;  %v19507_v44 = vld [vmem:[#allocation17 + $0xa44] ss:$16 sps:$4 sm:$0xff]   ;;  %v19529_v1 = vld [vmem:[#allocation17 + $0xbc0] ss:$16 sps:$4 sm:$0xff]  }
 0x94c   :  { %14657 = vmatprep.subr.bf16.mxu0 %v19447_v41  ;;  %v19535_v41 = vld [vmem:[#allocation17 + $0xba0] ss:$16 sps:$4 sm:$0xff]  }
 0x94e   :  { %13786 = vmatpush1.bf16.msra.mxu1 %v19397_v5  ;;  %v19513_v5 = vld [vmem:[#allocation17 + $0xa24] ss:$16 sps:$4 sm:$0xff]  }
 0x94f   :  { %13787 = vmatprep.subr.bf16.mxu1 %v19402_v56  ;;  %14658 = vmatpush1.bf16.msra.mxu0 %v19445_v12  ;;  %v19519_v56 = vld [vmem:[#allocation17 + $0xa04] ss:$16 sps:$4 sm:$0xff]   ;;  %v19541_v12 = vld [vmem:[#allocation17 + $0xb80] ss:$16 sps:$4 sm:$0xff]  }
 0x950   :  { %14659 = vmatprep.subr.bf16.mxu0 %v19450_v38  ;;  %v19547_v38 = vld [vmem:[#allocation17 + $0xb60] ss:$16 sps:$4 sm:$0xff]  }
 0x952   :  { %13788 = vmatpush1.bf16.msra.mxu1 %v19400_v55  ;;  %v19525_v55 = vld [vmem:[#allocation17 + $0xbe4] ss:$16 sps:$4 sm:$0xff]  }
 0x953   :  { %13789 = vmatprep.subr.bf16.mxu1 %v19405_v48  ;;  %14660 = vmatpush1.bf16.msra.mxu0 %v19448_v11  ;;  %v19531_v48 = vld [vmem:[#allocation17 + $0xbc4] ss:$16 sps:$4 sm:$0xff]   ;;  %v19553_v11 = vld [vmem:[#allocation17 + $0xb40] ss:$16 sps:$4 sm:$0xff]  }
 0x954   :  { %14661 = vmatprep.subr.bf16.mxu0 %v19453_v47 }
 0x956   :  { %13790 = vmatpush2.bf16.msra.mxu1 %v19403_v36  ;;  %v19537_v36 = vld [vmem:[#allocation17 + $0xba4] ss:$16 sps:$4 sm:$0xff]  }
 0x957   :  { %13791 = vmatprep.subr.bf16.mxu1 %v19408_v26  ;;  %14662 = vmatpush2.bf16.msra.mxu0 %v19451_v19  ;;  %v19543_v26 = vld [vmem:[#allocation17 + $0xb84] ss:$16 sps:$4 sm:$0xff]  }
 0x958   :  { %14663 = vmatprep.subr.bf16.mxu0 %v19456_v29  ;;  %v19561_v19 = vld [vmem:[#allocation17 + $0xb24] ss:$16 sps:$4 sm:$0xff]   ;;  %v19559_v29 = vld [vmem:[#allocation17 + $0xb20] ss:$16 sps:$4 sm:$0xff]  }
 0x95a   :  { %13792 = vmatpush2.bf16.msra.mxu1 %v19406_v35  ;;  %v19549_v35 = vld [vmem:[#allocation17 + $0xb64] ss:$16 sps:$4 sm:$0xff]  }
 0x95b   :  { %13793 = vmatprep.subr.bf16.mxu1 %v19411_v17  ;;  %14664 = vmatpush2.bf16.msra.mxu0 %v19454_v14  ;;  %v19555_v17 = vld [vmem:[#allocation17 + $0xb44] ss:$16 sps:$4 sm:$0xff]   ;;  %v19565_v14 = vld [vmem:[#allocation17 + $0xb00] ss:$16 sps:$4 sm:$0xff]  }
 0x95c   :  { %14665 = vmatprep.subr.bf16.mxu0 %v19459_v40  ;;  %v19573_v40 = vld [vmem:[#allocation17 + $0xaec] ss:$16 sps:$4 sm:$0xff]  }
 0x95e   :  { %13794 = vmatpush2.bf16.msra.mxu1 %v19409_v18 }
 0x95f   :  { %13795 = vmatprep.subr.bf16.mxu1 %v19414_v10  ;;  %14666 = vmatpush2.bf16.msra.mxu0 %v19457_v59 }
 0x960   :  { %14667 = vmatprep.subr.bf16.mxu0 %v19462_v62 }
 0x962   :  { %13796 = vmatpush2.bf16.msra.mxu1 %v19412_v13 }
 0x963   :  { %13797 = vmatprep.subr.bf16.mxu1 %v19417_v24  ;;  %14668 = vmatpush2.bf16.msra.mxu0 %v19460_v46  ;;  %v19567_v24 = vld [vmem:[#allocation17 + $0xb04] ss:$16 sps:$4 sm:$0xff]  }
 0x964   :  { %14669 = vmatprep.subr.bf16.mxu0 %v19465_v58 }
 0x966   :  { %13798 = vmatpush2.bf16.msra.mxu1 %v19415_v57  ;;  %v22014_v57 = vld [vmem:[#allocation19 + $0x4] sm:$0xf] }
 0x967   :  { %13799 = vmatprep.subr.bf16.mxu1 %v19420_v4  ;;  %14670 = vmatpush2.bf16.msra.mxu0 %v19463_v50  ;;  %v12993_v59 = vrot.slane %v22014_v57, %v22496_v21  ;;  %v22018_v4 = vld [vmem:[#allocation20 + $0x4] sm:$0xf]  ;;  %v12997_v62 = vrot.slane %v22014_v57, %v22502_v15 }
 0x968   :  { %14671 = vmatprep.subr.bf16.mxu0 %v19468_v27  ;;  %v13824_v46 = vrot.slane %v22018_v4, %v22496_v21 }
 0x96a   :  { %13800 = vmatpush2.bf16.msra.mxu1 %v19418_v7 }
 0x96b   :  { %13801 = vmatprep.subr.bf16.mxu1 %v19423_v49  ;;  %14672 = vmatpush2.bf16.msra.mxu0 %v19466_v31 }
 0x96c   :  { %14673 = vmatprep.subr.bf16.mxu0 %v19471_v9 }
 0x96e   :  { %13802 = vmatpush2.bf16.msra.mxu1 %v19421_v20 }
 0x96f   :  { %13803 = vmatprep.subr.bf16.mxu1 %v19426_v37  ;;  %14674 = vmatpush2.bf16.msra.mxu0 %v19469_v33  ;;  %v13828_v37 = vrot.slane %v22018_v4, %v22502_v15 }
 0x970   :  { %14675 = vmatprep.subr.bf16.mxu0 %v19474_v32 }
 0x972   :  { %13804 = vmatpush2.bf16.msra.mxu1 %v19424_v22 }
 0x973   :  { %14686 = vmatprep.subr.bf16.mxu1 %v19477_v43  ;;  %14676 = vmatpush2.bf16.msra.mxu0 %v19472_v25 }
 0x974   :  { %14727 = vmatprep.subr.bf16.mxu0 %v19480_v60 }
 0x975   :  { %13806 = vmatmul.mubr.bf16.vlgmr.msra.gmra.mxu1 %v22009_v28  ;;  %v19489_v28 = vld [vmem:[#allocation17 + $0xaa4] ss:$16 sps:$4 sm:$0xff]  }
 0x976   :  { %14687 = vmatpush1.bf16.msra.mxu1 %v19475_v2 }
 0x977   :  { %14688 = vmatprep.subr.bf16.mxu1 %v19483_v6 }
 0x97a   :  { %14689 = vmatpush1.bf16.msra.mxu1 %v19481_v51 }
 0x97b   :  { %14690 = vmatprep.subr.bf16.mxu1 %v19489_v28 }
 0x97e   :  { %14691 = vmatpush1.bf16.msra.mxu1 %v19487_v54  ;;  %v19478_v54 = vld [vmem:[#allocation17 + $0x8e8] ss:$16 sps:$4 sm:$0xff]  }
 0x97f   :  { %14692 = vmatprep.subr.bf16.mxu1 %v19495_v8  ;;  %v19484_v8 = vld [vmem:[#allocation17 + $0x8c8] ss:$16 sps:$4 sm:$0xff]  }
 0x982   :  { %14693 = vmatpush1.bf16.msra.mxu1 %v19493_v42  ;;  %v19486_v42 = vld [vmem:[#allocation17 + $0x8cc] ss:$16 sps:$4 sm:$0xff]  }
 0x983   :  { %14694 = vmatprep.subr.bf16.mxu1 %v19501_v16  ;;  %v19490_v16 = vld [vmem:[#allocation17 + $0x8a8] ss:$16 sps:$4 sm:$0xff]  }
 0x986   :  { %14695 = vmatpush1.bf16.msra.mxu1 %v19499_v63  ;;  %v19492_v63 = vld [vmem:[#allocation17 + $0x8ac] ss:$16 sps:$4 sm:$0xff]  }
 0x987   :  { %14696 = vmatprep.subr.bf16.mxu1 %v19507_v44  ;;  %v19496_v44 = vld [vmem:[#allocation17 + $0x888] ss:$16 sps:$4 sm:$0xff]  }
 0x98a   :  { %14697 = vmatpush1.bf16.msra.mxu1 %v19505_v0  ;;  %v19498_v0 = vld [vmem:[#allocation17 + $0x88c] ss:$16 sps:$4 sm:$0xff]  }
 0x98b   :  { %14698 = vmatprep.subr.bf16.mxu1 %v19513_v5  ;;  %v19502_v5 = vld [vmem:[#allocation17 + $0x868] ss:$16 sps:$4 sm:$0xff]  }
 0x98e   :  { %14699 = vmatpush1.bf16.msra.mxu1 %v19511_v34  ;;  %v19504_v34 = vld [vmem:[#allocation17 + $0x86c] ss:$16 sps:$4 sm:$0xff]  }
 0x98f   :  { %14700 = vmatprep.subr.bf16.mxu1 %v19519_v56  ;;  %v19508_v56 = vld [vmem:[#allocation17 + $0x848] ss:$16 sps:$4 sm:$0xff]  }
 0x992   :  { %14701 = vmatpush1.bf16.msra.mxu1 %v19517_v3  ;;  %v19510_v3 = vld [vmem:[#allocation17 + $0x84c] ss:$16 sps:$4 sm:$0xff]  }
 0x993   :  { %14702 = vmatprep.subr.bf16.mxu1 %v19525_v55  ;;  %v19514_v55 = vld [vmem:[#allocation17 + $0x828] ss:$16 sps:$4 sm:$0xff]  }
 0x996   :  { %14703 = vmatpush2.bf16.msra.mxu1 %v19523_v45  ;;  %v19516_v45 = vld [vmem:[#allocation17 + $0x82c] ss:$16 sps:$4 sm:$0xff]  }
 0x997   :  { %14704 = vmatprep.subr.bf16.mxu1 %v19531_v48  ;;  %v19520_v48 = vld [vmem:[#allocation17 + $0x808] ss:$16 sps:$4 sm:$0xff]  }
 0x99a   :  { %14705 = vmatpush2.bf16.msra.mxu1 %v19529_v1  ;;  %v19522_v1 = vld [vmem:[#allocation17 + $0x80c] ss:$16 sps:$4 sm:$0xff]  }
 0x99b   :  { %14706 = vmatprep.subr.bf16.mxu1 %v19537_v36  ;;  %v19526_v36 = vld [vmem:[#allocation17 + $0x9e8] ss:$16 sps:$4 sm:$0xff]  }
 0x99e   :  { %14707 = vmatpush2.bf16.msra.mxu1 %v19535_v41  ;;  %v19528_v41 = vld [vmem:[#allocation17 + $0x9ec] ss:$16 sps:$4 sm:$0xff]  }
 0x99f   :  { %14708 = vmatprep.subr.bf16.mxu1 %v19543_v26  ;;  %v19532_v26 = vld [vmem:[#allocation17 + $0x9c8] ss:$16 sps:$4 sm:$0xff]  }
 0x9a2   :  { %14709 = vmatpush2.bf16.msra.mxu1 %v19541_v12  ;;  %v19534_v12 = vld [vmem:[#allocation17 + $0x9cc] ss:$16 sps:$4 sm:$0xff]  }
 0x9a3   :  { %14710 = vmatprep.subr.bf16.mxu1 %v19549_v35  ;;  %v19538_v35 = vld [vmem:[#allocation17 + $0x9a8] ss:$16 sps:$4 sm:$0xff]  }
 0x9a6   :  { %14711 = vmatpush2.bf16.msra.mxu1 %v19547_v38  ;;  %v19540_v38 = vld [vmem:[#allocation17 + $0x9ac] ss:$16 sps:$4 sm:$0xff]  }
 0x9a7   :  { %14712 = vmatprep.subr.bf16.mxu1 %v19555_v17  ;;  %v19544_v17 = vld [vmem:[#allocation17 + $0x988] ss:$16 sps:$4 sm:$0xff]  }
 0x9aa   :  { %14713 = vmatpush2.bf16.msra.mxu1 %v19553_v11  ;;  %v19546_v11 = vld [vmem:[#allocation17 + $0x98c] ss:$16 sps:$4 sm:$0xff]  }
 0x9ab   :  { %14714 = vmatprep.subr.bf16.mxu1 %v19561_v19  ;;  %v19558_v19 = vld [vmem:[#allocation17 + $0x94c] ss:$16 sps:$4 sm:$0xff]  }
 0x9ae   :  { %14715 = vmatpush2.bf16.msra.mxu1 %v19559_v29  ;;  %v19556_v29 = vld [vmem:[#allocation17 + $0x948] ss:$16 sps:$4 sm:$0xff]  }
 0x9af   :  { %14716 = vmatprep.subr.bf16.mxu1 %v19567_v24 }
 0x9b2   :  { %14717 = vmatpush2.bf16.msra.mxu1 %v19565_v14  ;;  %v19564_v14 = vld [vmem:[#allocation17 + $0x92c] ss:$16 sps:$4 sm:$0xff]  }
 0x9b3   :  { %14768 = vmatprep.subr.bf16.mxu1 %v19573_v40  ;;  %v13832_v40 = vrot.slane %v22018_v4, %v22513_v53 }
 0x9b5   :  { %v13684_v47 = vpop.f32.mrf.mxu0 }
 0x9b6   :  { %v13685_v7 = vadd.f32 %v13684_v47, %v12993_v59  ;;  %v19552_v47 = vld [vmem:[#allocation17 + $0x96c] ss:$16 sps:$4 sm:$0xff]  }
 0x9b7   :  { %v13686_v18 = vpop.f32.mrf.mxu0  ;;  %v22040_v59 = vld [vmem:[#allocation16] sm:$0xff] }
 0x9b8   :  { %v13687_v20 = vadd.f32 %v13686_v18, %v12997_v62  ;;  %v19550_v18 = vld [vmem:[#allocation17 + $0x968] ss:$16 sps:$4 sm:$0xff]   ;;  %v11813_v62 = vrot.slane %v22040_v59, %v22502_v15 }
 0x9b9   :  { %v13688_v10 = vpop.f32.mrf.mxu0 }
 0x9ba   :  { %v13001_v10 = vrot.slane %v22014_v57, %v22513_v53 }
 0x9bb   :  { %v13689_v13 = vpop.f32.mrf.mxu0 }
 0x9bc   :  { %v13005_v13 = vrot.slane %v22014_v57, %v22514_v23  ;;  %v13836_v57 = vrot.slane %v22018_v4, %v22514_v23 }
 0x9f5   :  { %v13725_v49 = vpop.f32.mrf.mxu1  ;;  %v22024_v58 = vpop.f32.mrf.mxu0 }
 0x9f6   :  { %v13726_v50 = vadd.f32 %v13725_v49, %v13685_v7  ;;  %v13767_v24 = vadd.f32 %v22024_v58, %v13001_v10  ;;  %v19613_v10 = vld [vmem:[#allocation17 + $0xa08] ss:$16 sps:$4 sm:$0xff]  }
 0x9f7   :  { %v13727_v27 = vpop.f32.mrf.mxu1  ;;  %v22028_v22 = vpop.f32.mrf.mxu0 }
 0x9f8   :  { %vm13814_vm8 = vcmp.gt.f32.partialorder %v13726_v50, 0.0  ;;  %v13841_v31 = vmul.f32 %v13824_v46, %v13726_v50  ;;  %v13728_v9 = vadd.f32 %v13727_v27, %v13687_v20  ;;  %v19562_v46 = vld [vmem:[#allocation17 + $0x928] ss:$16 sps:$4 sm:$0xff]   ;;  %v13769_v49 = vadd.f32 %v22028_v22, %v13005_v13  ;;  %v19576_v22 = vld [vmem:[#allocation22 + $0x74] ss:$8 sps:$4 sm:$0xff]  }
 0x9f9   :  { %v13729_v33 = vpop.f32.mrf.mxu1  ;;  %v13770_v32 = vpop.f32.mrf.mxu0  ;;  %v19621_v13 = vld [vmem:[#allocation17 + $0xbec] ss:$16 sps:$4 sm:$0xff]  }
 0x9fa   :  { %vm13815_vm9 = vcmp.gt.f32.partialorder %v13728_v9, 0.0  ;;  %v13842_v2 = vmul.f32 %v13828_v37, %v13728_v9  ;;  %v13845_v25 = vsel %vm13814_vm8, %v13726_v50, %v13841_v31  ;;  %v19570_v50 = vld [vmem:[#allocation17 + $0x90c] ss:$16 sps:$4 sm:$0xff]   ;;  %v11847_v31 = vmul.f32 %v11813_v62, %v21918_v52  ;;  %v19568_v33 = vld [vmem:[#allocation17 + $0x908] ss:$16 sps:$4 sm:$0xff]  }
 0x9fb   :  { %v13730_v43 = vpop.f32.mrf.mxu1  ;;  %v13771_v60 = vpop.f32.mrf.mxu0  ;;  %v22030_v28 = vpack.c.bf16 %v13845_v25, %v13845_v25  ;;  %v19627_v62 = vld [vmem:[#allocation17 + $0xbcc] ss:$16 sps:$4 sm:$0xff]  }
 0x9fc   :  { %v13846_v51 = vsel %vm13815_vm9, %v13728_v9, %v13842_v2  ;;  %v19571_v60 = vld [vmem:[#allocation17 + $0xae8] ss:$16 sps:$4 sm:$0xff]  }
 0x9fd   :  { %v13850_v6 = vpack.c.bf16 %v13846_v51, %v13846_v51  ;;  %v11855_v51 = vsel %vm11797_vm11, %v21918_v52, %v11847_v31  ;;  %v19588_v52 = vld [vmem:[#allocation22 + $0x54] ss:$8 sps:$4 sm:$0xff]   ;;  %v19637_v31 = vld [vmem:[#allocation17 + $0xb88] ss:$16 sps:$4 sm:$0xff]  }
 0x9ff   :  { %14677 = vmatprep.mubr.bf16.mxu0 %v13850_v6 }
 0xa00   :  { %14678 = vmatmul.mubr.bf16.vlgmr.msra.gmra.mxu0 %v22030_v28 }
 0xa01   :  { %14728 = vmatpush1.bf16.msra.mxu0 %v19478_v54  ;;  %14759 = vmatprep.mubr.bf16.mxu0 %v13850_v6  ;;  %v19574_v54 = vld [vmem:[#allocation22 + $0x70] ss:$8 sps:$4 sm:$0xff]  }
 0xa02   :  { %14729 = vmatprep.subr.bf16.mxu0 %v19486_v42  ;;  %v19579_v42 = vld [vmem:[#allocation17 + $0xacc] ss:$16 sps:$4 sm:$0xff]  }
 0xa05   :  { %14730 = vmatpush1.bf16.msra.mxu0 %v19484_v8  ;;  %v19582_v8 = vld [vmem:[#allocation22 + $0x64] ss:$8 sps:$4 sm:$0xff]  }
 0xa06   :  { %14731 = vmatprep.subr.bf16.mxu0 %v19492_v63  ;;  %v14845_v63 = vpack.c.bf16 %v11855_v51, %v11855_v51  ;;  %v19657_v51 = vld [vmem:[#allocation17 + $0xb2c] ss:$16 sps:$4 sm:$0xff]  }
 0xa09   :  { %14732 = vmatpush1.bf16.msra.mxu0 %v19490_v16  ;;  %v19577_v16 = vld [vmem:[#allocation17 + $0xac8] ss:$16 sps:$4 sm:$0xff]  }
 0xa0a   :  { %14733 = vmatprep.subr.bf16.mxu0 %v19498_v0  ;;  %v19580_v0 = vld [vmem:[#allocation22 + $0x60] ss:$8 sps:$4 sm:$0xff]  }
 0xa0d   :  { %14734 = vmatpush1.bf16.msra.mxu0 %v19496_v44  ;;  %v19585_v44 = vld [vmem:[#allocation17 + $0xaac] ss:$16 sps:$4 sm:$0xff]  }
 0xa0e   :  { %14735 = vmatprep.subr.bf16.mxu0 %v19504_v34  ;;  %v19583_v34 = vld [vmem:[#allocation17 + $0xaa8] ss:$16 sps:$4 sm:$0xff]  }
 0xa11   :  { %14736 = vmatpush1.bf16.msra.mxu0 %v19502_v5  ;;  %v19586_v5 = vld [vmem:[#allocation22 + $0x50] ss:$8 sps:$4 sm:$0xff]  }
 0xa12   :  { %14737 = vmatprep.subr.bf16.mxu0 %v19510_v3  ;;  %v19591_v3 = vld [vmem:[#allocation17 + $0xa8c] ss:$16 sps:$4 sm:$0xff]  }
 0xa15   :  { %14738 = vmatpush1.bf16.msra.mxu0 %v19508_v56  ;;  %v19594_v56 = vld [vmem:[#allocation22 + $0x44] ss:$8 sps:$4 sm:$0xff]  }
 0xa16   :  { %14739 = vmatprep.subr.bf16.mxu0 %v19516_v45  ;;  %v19592_v45 = vld [vmem:[#allocation22 + $0x40] ss:$8 sps:$4 sm:$0xff]  }
 0xa19   :  { %14740 = vmatpush1.bf16.msra.mxu0 %v19514_v55  ;;  %v19597_v55 = vld [vmem:[#allocation17 + $0xa6c] ss:$16 sps:$4 sm:$0xff]  }
 0xa1a   :  { %14741 = vmatprep.subr.bf16.mxu0 %v19522_v1  ;;  %v19600_v1 = vld [vmem:[#allocation22 + $0x34] ss:$8 sps:$4 sm:$0xff]  }
 0xa1d   :  { %14742 = vmatpush1.bf16.msra.mxu0 %v19520_v48  ;;  %v19595_v48 = vld [vmem:[#allocation17 + $0xa68] ss:$16 sps:$4 sm:$0xff]  }
 0xa1e   :  { %14743 = vmatprep.subr.bf16.mxu0 %v19528_v41  ;;  %v19598_v41 = vld [vmem:[#allocation22 + $0x30] ss:$8 sps:$4 sm:$0xff]  }
 0xa21   :  { %14744 = vmatpush2.bf16.msra.mxu0 %v19526_v36  ;;  %v19603_v36 = vld [vmem:[#allocation17 + $0xa4c] ss:$16 sps:$4 sm:$0xff]  }
 0xa22   :  { %14745 = vmatprep.subr.bf16.mxu0 %v19534_v12  ;;  %v19606_v12 = vld [vmem:[#allocation22 + $0x24] ss:$8 sps:$4 sm:$0xff]  }
 0xa25   :  { %14746 = vmatpush2.bf16.msra.mxu0 %v19532_v26  ;;  %v19601_v26 = vld [vmem:[#allocation17 + $0xa48] ss:$16 sps:$4 sm:$0xff]  }
 0xa26   :  { %14747 = vmatprep.subr.bf16.mxu0 %v19540_v38  ;;  %v19604_v38 = vld [vmem:[#allocation22 + $0x20] ss:$8 sps:$4 sm:$0xff]  }
 0xa29   :  { %14748 = vmatpush2.bf16.msra.mxu0 %v19538_v35  ;;  %v19609_v35 = vld [vmem:[#allocation17 + $0xa2c] ss:$16 sps:$4 sm:$0xff]  }
 0xa2a   :  { %14749 = vmatprep.subr.bf16.mxu0 %v19546_v11  ;;  %v19612_v11 = vld [vmem:[#allocation22 + $0x14] ss:$8 sps:$4 sm:$0xff]  }
 0xa2d   :  { %14750 = vmatpush2.bf16.msra.mxu0 %v19544_v17  ;;  %v19607_v17 = vld [vmem:[#allocation17 + $0xa28] ss:$16 sps:$4 sm:$0xff]  }
 0xa2e   :  { %14751 = vmatprep.subr.bf16.mxu0 %v19552_v47  ;;  %v19610_v47 = vld [vmem:[#allocation22 + $0x10] ss:$8 sps:$4 sm:$0xff]  }
 0xa31   :  { %14752 = vmatpush2.bf16.msra.mxu0 %v19550_v18  ;;  %v19615_v18 = vld [vmem:[#allocation17 + $0xa0c] ss:$16 sps:$4 sm:$0xff]  }
 0xa32   :  { %14753 = vmatprep.subr.bf16.mxu0 %v19558_v19  ;;  %v19618_v19 = vld [vmem:[#allocation22 + $0x4] ss:$8 sps:$4 sm:$0xff]  }
 0xa35   :  { %v13807_v7 = vpop.f32.mrf.mxu1  ;;  %14754 = vmatpush2.bf16.msra.mxu0 %v19556_v29  ;;  %v19616_v29 = vld [vmem:[#allocation22] ss:$8 sps:$4 sm:$0xff]  }
 0xa36   :  { %v13808_v20 = vadd.f32 %v13807_v7, %v13767_v24  ;;  %14755 = vmatprep.subr.bf16.mxu0 %v19564_v14  ;;  %v19624_v14 = vld [vmem:[#allocation22 + $0xf4] ss:$8 sps:$4 sm:$0xff]   ;;  %v19619_v24 = vld [vmem:[#allocation17 + $0xbe8] ss:$16 sps:$4 sm:$0xff]   ;;  %v19630_v7 = vld [vmem:[#allocation22 + $0xe4] ss:$8 sps:$4 sm:$0xff]  }
 0xa37   :  { %v13809_v58 = vpop.f32.mrf.mxu1 }
 0xa38   :  { %vm13816_vm10 = vcmp.gt.f32.partialorder %v13808_v20, 0.0  ;;  %v13843_v37 = vmul.f32 %v13832_v40, %v13808_v20  ;;  %v13810_v27 = vadd.f32 %v13809_v58, %v13769_v49  ;;  %v19622_v40 = vld [vmem:[#allocation22 + $0xf0] ss:$8 sps:$4 sm:$0xff]   ;;  %v19628_v49 = vld [vmem:[#allocation22 + $0xe0] ss:$8 sps:$4 sm:$0xff]  }
 0xa39   :  { %v13811_v9 = vpop.f32.mrf.mxu1  ;;  %14756 = vmatpush2.bf16.msra.mxu0 %v19562_v46  ;;  %v19625_v46 = vld [vmem:[#allocation17 + $0xbc8] ss:$16 sps:$4 sm:$0xff]  }
 0xa3a   :  { %vm13817_vm12 = vcmp.gt.f32.partialorder %v13810_v27, 0.0  ;;  %v13844_v32 = vmul.f32 %v13836_v57, %v13810_v27  ;;  %14757 = vmatprep.subr.bf16.mxu0 %v19570_v50  ;;  %v13847_v2 = vsel %vm13816_vm10, %v13808_v20, %v13843_v37  ;;  %v19633_v20 = vld [vmem:[#allocation17 + $0xbac] ss:$16 sps:$4 sm:$0xff]   ;;  %v19631_v50 = vld [vmem:[#allocation17 + $0xba8] ss:$16 sps:$4 sm:$0xff]  }
 0xa3b   :  { %v13812_v25 = vpop.f32.mrf.mxu1  ;;  %v22050_v6 = vpack.c.bf16 %v13847_v2, %v13847_v2  ;;  %v19636_v57 = vld [vmem:[#allocation22 + $0xd4] ss:$8 sps:$4 sm:$0xff]   ;;  %v19634_v58 = vld [vmem:[#allocation22 + $0xd0] ss:$8 sps:$4 sm:$0xff]   ;;  %v19640_v9 = vld [vmem:[#allocation22 + $0xc0] ss:$8 sps:$4 sm:$0xff]  }
 0xa3c   :  { %v13848_v4 = vsel %vm13817_vm12, %v13810_v27, %v13844_v32  ;;  %v19639_v37 = vld [vmem:[#allocation17 + $0xb8c] ss:$16 sps:$4 sm:$0xff]   ;;  %v19646_v2 = vld [vmem:[#allocation22 + $0xb0] ss:$8 sps:$4 sm:$0xff]  }
 0xa3d   :  { %14758 = vmatpush2.bf16.msra.mxu0 %v19568_v33  ;;  %v13852_v43 = vpack.c.bf16 %v13848_v4, %v13848_v4  ;;  %v19642_v27 = vld [vmem:[#allocation22 + $0xc4] ss:$8 sps:$4 sm:$0xff]   ;;  %v19648_v32 = vld [vmem:[#allocation22 + $0xb4] ss:$8 sps:$4 sm:$0xff]  }
 0xa3e   :  { %15632 = vmatprep.subr.bf16.mxu0 %v19576_v22  ;;  %v19645_v33 = vld [vmem:[#allocation17 + $0xb6c] ss:$16 sps:$4 sm:$0xff]   ;;  %v19643_v22 = vld [vmem:[#allocation17 + $0xb68] ss:$16 sps:$4 sm:$0xff]  }
 0xa3f   :  { %14718 = vmatprep.mubr.bf16.mxu1 %v13852_v43  ;;  %v19651_v25 = vld [vmem:[#allocation17 + $0xb4c] ss:$16 sps:$4 sm:$0xff]  }
 0xa40   :  { %14719 = vmatmul.mubr.bf16.vlgmr.msra.gmra.mxu1 %v22050_v6  ;;  %14760 = vmatmul.mubr.bf16.vlgmr.msra.gmra.mxu0 %v22030_v28  ;;  %v19589_v28 = vld [vmem:[#allocation17 + $0xa88] ss:$16 sps:$4 sm:$0xff]   ;;  %v19654_v4 = vld [vmem:[#allocation22 + $0xa4] ss:$8 sps:$4 sm:$0xff]  }
 0xa41   :  { %14769 = vmatpush1.bf16.msra.mxu1 %v19571_v60  ;;  %14800 = vmatprep.mubr.bf16.mxu1 %v13852_v43  ;;  %v19649_v43 = vld [vmem:[#allocation17 + $0xb48] ss:$16 sps:$4 sm:$0xff]  }
 0xa42   :  { %15633 = vmatpush1.bf16.msra.mxu0 %v19574_v54  ;;  %15664 = vmatprep.mubr.bf16.mxu0 %v14845_v63  ;;  %v19652_v60 = vld [vmem:[#allocation22 + $0xa0] ss:$8 sps:$4 sm:$0xff]   ;;  %v19660_v54 = vld [vmem:[#allocation22 + $0x94] ss:$8 sps:$4 sm:$0xff]  }
 0xa43   :  { %14770 = vmatprep.subr.bf16.mxu1 %v19579_v42  ;;  %15634 = vmatprep.subr.bf16.mxu0 %v19582_v8  ;;  %v11809_v42 = vrot.slane %v22040_v59, %v22496_v21  ;;  %v11821_v8 = vrot.slane %v22040_v59, %v22514_v23  ;;  %v19655_v63 = vld [vmem:[#allocation17 + $0xb28] ss:$16 sps:$4 sm:$0xff]  }
 0xa45   :  { %14771 = vmatpush1.bf16.msra.mxu1 %v19577_v16  ;;  %v19658_v16 = vld [vmem:[#allocation22 + $0x90] ss:$8 sps:$4 sm:$0xff]  }
 0xa46   :  { %15635 = vmatpush1.bf16.msra.mxu0 %v19580_v0  ;;  %14772 = vmatprep.subr.bf16.mxu1 %v19585_v44  ;;  %v19663_v0 = vld [vmem:[#allocation17 + $0xb0c] ss:$16 sps:$4 sm:$0xff]  }
 0xa47   :  { %15636 = vmatprep.subr.bf16.mxu0 %v19588_v52  ;;  %v19666_v44 = vld [vmem:[#allocation22 + $0x84] ss:$8 sps:$4 sm:$0xff]   ;;  %v11846_v52 = vmul.f32 %v11809_v42, %v21915_v39  ;;  %v19745_v42 = vld [vmem:[#allocation22 + $0x2d0] ss:$8 sps:$4 sm:$0xff]  }
 0xa49   :  { %14773 = vmatpush1.bf16.msra.mxu1 %v19583_v34  ;;  %v11849_v34 = vmul.f32 %v11821_v8, %v21940_v61  ;;  %v19750_v8 = vld [vmem:[#allocation22 + $0x2c4] ss:$8 sps:$4 sm:$0xff]  }
 0xa4a   :  { %15637 = vmatpush1.bf16.msra.mxu0 %v19586_v5  ;;  %14774 = vmatprep.subr.bf16.mxu1 %v19591_v3  ;;  %v19661_v5 = vld [vmem:[#allocation17 + $0xb08] ss:$16 sps:$4 sm:$0xff]  }
 0xa4b   :  { %15638 = vmatprep.subr.bf16.mxu0 %v19594_v56  ;;  %v19664_v3 = vld [vmem:[#allocation22 + $0x80] ss:$8 sps:$4 sm:$0xff]   ;;  %v19669_v56 = vld [vmem:[#allocation22 + $0x174] ss:$8 sps:$4 sm:$0xff]  }
 0xa4d   :  { %14775 = vmatpush1.bf16.msra.mxu1 %v19589_v28  ;;  %v19717_v28 = vld [vmem:[#allocation22 + $0x274] ss:$8 sps:$4 sm:$0xff]  }
 0xa4e   :  { %15639 = vmatpush1.bf16.msra.mxu0 %v19592_v45  ;;  %14776 = vmatprep.subr.bf16.mxu1 %v19597_v55  ;;  %v11854_v45 = vsel %vm11796_vm13, %v21915_v39, %v11846_v52  ;;  %v19667_v55 = vld [vmem:[#allocation22 + $0x170] ss:$8 sps:$4 sm:$0xff]   ;;  %v19675_v39 = vld [vmem:[#allocation22 + $0x154] ss:$8 sps:$4 sm:$0xff]  }
 0xa4f   :  { %15640 = vmatprep.subr.bf16.mxu0 %v19600_v1  ;;  %v11857_v1 = vsel %vm11799_vm14, %v21940_v61, %v11849_v34  ;;  %v19723_v61 = vld [vmem:[#allocation22 + $0x254] ss:$8 sps:$4 sm:$0xff]   ;;  %v19703_v52 = vld [vmem:[#allocation22 + $0x1b0] ss:$8 sps:$4 sm:$0xff]   ;;  %v19708_v34 = vld [vmem:[#allocation22 + $0x1a4] ss:$8 sps:$4 sm:$0xff]  }
 0xa51   :  { %14777 = vmatpush1.bf16.msra.mxu1 %v19595_v48  ;;  %v19672_v48 = vld [vmem:[#allocation22 + $0x164] ss:$8 sps:$4 sm:$0xff]  }
 0xa52   :  { %15641 = vmatpush1.bf16.msra.mxu0 %v19598_v41  ;;  %14778 = vmatprep.subr.bf16.mxu1 %v19603_v36  ;;  %v14844_v41 = vpack.c.bf16 %v11854_v45, %v11854_v45  ;;  %v19715_v36 = vld [vmem:[#allocation22 + $0x270] ss:$8 sps:$4 sm:$0xff]   ;;  %v11817_v45 = vrot.slane %v22040_v59, %v22513_v53  ;;  %v19765_v59 = vld [vmem:[#allocation22 + $0x374] ss:$8 sps:$4 sm:$0xff]  }
 0xa53   :  { %15642 = vmatprep.subr.bf16.mxu0 %v19606_v12  ;;  %v14847_v12 = vpack.c.bf16 %v11857_v1, %v11857_v1  ;;  %v19759_v1 = vld [vmem:[#allocation22 + $0x294] ss:$8 sps:$4 sm:$0xff]  }
 0xa55   :  { %14779 = vmatpush1.bf16.msra.mxu1 %v19601_v26  ;;  %v19720_v26 = vld [vmem:[#allocation22 + $0x264] ss:$8 sps:$4 sm:$0xff]  }
 0xa56   :  { %15643 = vmatpush1.bf16.msra.mxu0 %v19604_v38  ;;  %14780 = vmatprep.subr.bf16.mxu1 %v19609_v35  ;;  %v19670_v38 = vld [vmem:[#allocation22 + $0x160] ss:$8 sps:$4 sm:$0xff]  }
 0xa57   :  { %15644 = vmatprep.subr.bf16.mxu0 %v19612_v11  ;;  %v19718_v35 = vld [vmem:[#allocation22 + $0x260] ss:$8 sps:$4 sm:$0xff]   ;;  %v19673_v11 = vld [vmem:[#allocation22 + $0x150] ss:$8 sps:$4 sm:$0xff]  }
 0xa59   :  { %14781 = vmatpush1.bf16.msra.mxu1 %v19607_v17  ;;  %v19678_v17 = vld [vmem:[#allocation22 + $0x144] ss:$8 sps:$4 sm:$0xff]  }
 0xa5a   :  { %15645 = vmatpush1.bf16.msra.mxu0 %v19610_v47  ;;  %14782 = vmatprep.subr.bf16.mxu1 %v19615_v18  ;;  %v19721_v47 = vld [vmem:[#allocation22 + $0x250] ss:$8 sps:$4 sm:$0xff]   ;;  %v19676_v18 = vld [vmem:[#allocation22 + $0x140] ss:$8 sps:$4 sm:$0xff]  }
 0xa5b   :  { %15646 = vmatprep.subr.bf16.mxu0 %v19618_v19  ;;  %v19681_v19 = vld [vmem:[#allocation22 + $0x134] ss:$8 sps:$4 sm:$0xff]  }
 0xa5d   :  { %14783 = vmatpush1.bf16.msra.mxu1 %v19613_v10  ;;  %v19724_v10 = vld [vmem:[#allocation22 + $0x240] ss:$8 sps:$4 sm:$0xff]  }
 0xa5e   :  { %15647 = vmatpush1.bf16.msra.mxu0 %v19616_v29  ;;  %14784 = vmatprep.subr.bf16.mxu1 %v19621_v13  ;;  %v19729_v29 = vld [vmem:[#allocation22 + $0x234] ss:$8 sps:$4 sm:$0xff]   ;;  %v19679_v13 = vld [vmem:[#allocation22 + $0x130] ss:$8 sps:$4 sm:$0xff]  }
 0xa5f   :  { %15648 = vmatprep.subr.bf16.mxu0 %v19624_v14  ;;  %v19684_v14 = vld [vmem:[#allocation22 + $0x124] ss:$8 sps:$4 sm:$0xff]  }
 0xa61   :  { %14785 = vmatpush2.bf16.msra.mxu1 %v19619_v24  ;;  %v19727_v24 = vld [vmem:[#allocation22 + $0x230] ss:$8 sps:$4 sm:$0xff]  }
 0xa62   :  { %15649 = vmatpush2.bf16.msra.mxu0 %v19622_v40  ;;  %14786 = vmatprep.subr.bf16.mxu1 %v19627_v62  ;;  %v19732_v40 = vld [vmem:[#allocation22 + $0x224] ss:$8 sps:$4 sm:$0xff]   ;;  %v19682_v62 = vld [vmem:[#allocation22 + $0x120] ss:$8 sps:$4 sm:$0xff]  }
 0xa63   :  { %15650 = vmatprep.subr.bf16.mxu0 %v19630_v7  ;;  %v19687_v7 = vld [vmem:[#allocation22 + $0x114] ss:$8 sps:$4 sm:$0xff]  }
 0xa65   :  { %14787 = vmatpush2.bf16.msra.mxu1 %v19625_v46  ;;  %v19730_v46 = vld [vmem:[#allocation22 + $0x220] ss:$8 sps:$4 sm:$0xff]  }
 0xa66   :  { %15651 = vmatpush2.bf16.msra.mxu0 %v19628_v49  ;;  %14788 = vmatprep.subr.bf16.mxu1 %v19633_v20  ;;  %v19735_v49 = vld [vmem:[#allocation22 + $0x214] ss:$8 sps:$4 sm:$0xff]   ;;  %v19685_v20 = vld [vmem:[#allocation22 + $0x110] ss:$8 sps:$4 sm:$0xff]  }
 0xa67   :  { %15652 = vmatprep.subr.bf16.mxu0 %v19636_v57  ;;  %v19690_v57 = vld [vmem:[#allocation22 + $0x104] ss:$8 sps:$4 sm:$0xff]  }
 0xa69   :  { %14789 = vmatpush2.bf16.msra.mxu1 %v19631_v50  ;;  %v19733_v50 = vld [vmem:[#allocation22 + $0x210] ss:$8 sps:$4 sm:$0xff]  }
 0xa6a   :  { %15653 = vmatpush2.bf16.msra.mxu0 %v19634_v58  ;;  %14790 = vmatprep.subr.bf16.mxu1 %v19639_v37  ;;  %v19738_v58 = vld [vmem:[#allocation22 + $0x204] ss:$8 sps:$4 sm:$0xff]   ;;  %v19688_v37 = vld [vmem:[#allocation22 + $0x100] ss:$8 sps:$4 sm:$0xff]  }
 0xa6b   :  { %15654 = vmatprep.subr.bf16.mxu0 %v19642_v27  ;;  %v19693_v27 = vld [vmem:[#allocation22 + $0x1f4] ss:$8 sps:$4 sm:$0xff]  }
 0xa6d   :  { %14791 = vmatpush2.bf16.msra.mxu1 %v19637_v31  ;;  %v19736_v31 = vld [vmem:[#allocation22 + $0x200] ss:$8 sps:$4 sm:$0xff]  }
 0xa6e   :  { %15655 = vmatpush2.bf16.msra.mxu0 %v19640_v9  ;;  %14792 = vmatprep.subr.bf16.mxu1 %v19645_v33  ;;  %v19741_v9 = vld [vmem:[#allocation22 + $0x2f4] ss:$8 sps:$4 sm:$0xff]   ;;  %v19691_v33 = vld [vmem:[#allocation22 + $0x1f0] ss:$8 sps:$4 sm:$0xff]  }
 0xa6f   :  { %15656 = vmatprep.subr.bf16.mxu0 %v19648_v32  ;;  %v19696_v32 = vld [vmem:[#allocation22 + $0x1e4] ss:$8 sps:$4 sm:$0xff]  }
 0xa71   :  { %14793 = vmatpush2.bf16.msra.mxu1 %v19643_v22  ;;  %v19739_v22 = vld [vmem:[#allocation22 + $0x2f0] ss:$8 sps:$4 sm:$0xff]  }
 0xa72   :  { %15657 = vmatpush2.bf16.msra.mxu0 %v19646_v2  ;;  %14794 = vmatprep.subr.bf16.mxu1 %v19651_v25  ;;  %v19744_v2 = vld [vmem:[#allocation22 + $0x2e4] ss:$8 sps:$4 sm:$0xff]   ;;  %v19694_v25 = vld [vmem:[#allocation22 + $0x1e0] ss:$8 sps:$4 sm:$0xff]  }
 0xa73   :  { %15658 = vmatprep.subr.bf16.mxu0 %v19654_v4  ;;  %v19699_v4 = vld [vmem:[#allocation22 + $0x1d4] ss:$8 sps:$4 sm:$0xff]  }
 0xa75   :  { %14795 = vmatpush2.bf16.msra.mxu1 %v19649_v43  ;;  %v19742_v43 = vld [vmem:[#allocation22 + $0x2e0] ss:$8 sps:$4 sm:$0xff]  }
 0xa76   :  { %15659 = vmatpush2.bf16.msra.mxu0 %v19652_v60  ;;  %14796 = vmatprep.subr.bf16.mxu1 %v19657_v51  ;;  %v19747_v60 = vld [vmem:[#allocation22 + $0x2d4] ss:$8 sps:$4 sm:$0xff]   ;;  %v19697_v51 = vld [vmem:[#allocation22 + $0x1d0] ss:$8 sps:$4 sm:$0xff]  }
 0xa77   :  { %15660 = vmatprep.subr.bf16.mxu0 %v19660_v54  ;;  %v19702_v54 = vld [vmem:[#allocation22 + $0x1c4] ss:$8 sps:$4 sm:$0xff]  }
 0xa79   :  { %14797 = vmatpush2.bf16.msra.mxu1 %v19655_v63  ;;  %v19700_v63 = vld [vmem:[#allocation22 + $0x1c0] ss:$8 sps:$4 sm:$0xff]  }
 0xa7a   :  { %15661 = vmatpush2.bf16.msra.mxu0 %v19658_v16  ;;  %14798 = vmatprep.subr.bf16.mxu1 %v19663_v0  ;;  %v19705_v16 = vld [vmem:[#allocation22 + $0x1b4] ss:$8 sps:$4 sm:$0xff]   ;;  %v19748_v0 = vld [vmem:[#allocation22 + $0x2c0] ss:$8 sps:$4 sm:$0xff]  }
 0xa7b   :  { %15662 = vmatprep.subr.bf16.mxu0 %v19666_v44  ;;  %v19753_v44 = vld [vmem:[#allocation22 + $0x2b4] ss:$8 sps:$4 sm:$0xff]  }
 0xa7d   :  { %14799 = vmatpush2.bf16.msra.mxu1 %v19661_v5  ;;  %v19751_v5 = vld [vmem:[#allocation22 + $0x2b0] ss:$8 sps:$4 sm:$0xff]  }
 0xa7e   :  { %15663 = vmatpush2.bf16.msra.mxu0 %v19664_v3  ;;  %15673 = vmatprep.subr.bf16.mxu1 %v19669_v56  ;;  %v19756_v3 = vld [vmem:[#allocation22 + $0x2a4] ss:$8 sps:$4 sm:$0xff]   ;;  %v19706_v56 = vld [vmem:[#allocation22 + $0x1a0] ss:$8 sps:$4 sm:$0xff]  }
 0xa7f   :  { %15714 = vmatprep.subr.bf16.mxu0 %v19717_v28  ;;  %v19711_v28 = vld [vmem:[#allocation22 + $0x194] ss:$8 sps:$4 sm:$0xff]  }
 0xa80   :  { %14801 = vmatmul.mubr.bf16.vlgmr.msra.gmra.mxu1 %v22050_v6  ;;  %v19726_v6 = vld [vmem:[#allocation22 + $0x244] ss:$8 sps:$4 sm:$0xff]  }
 0xa81   :  { %15665 = vmatmul.mubr.bf16.vlgmr.msra.gmra.mxu0 %v14844_v41  ;;  %15674 = vmatpush1.bf16.msra.mxu1 %v19667_v55  ;;  %v19754_v55 = vld [vmem:[#allocation22 + $0x2a0] ss:$8 sps:$4 sm:$0xff]   ;;  %v19714_v41 = vld [vmem:[#allocation22 + $0x184] ss:$8 sps:$4 sm:$0xff]  }
 0xa82   :  { %15705 = vmatprep.mubr.bf16.mxu1 %v14847_v12  ;;  %15675 = vmatprep.subr.bf16.mxu1 %v19672_v48  ;;  %v19709_v48 = vld [vmem:[#allocation22 + $0x190] ss:$8 sps:$4 sm:$0xff]  }
 0xa83   :  { %15715 = vmatpush1.bf16.msra.mxu0 %v19715_v36  ;;  %v11848_v36 = vmul.f32 %v11817_v45, %v21937_v30  ;;  %v19757_v12 = vld [vmem:[#allocation22 + $0x290] ss:$8 sps:$4 sm:$0xff]  }
 0xa84   :  { %15716 = vmatprep.subr.bf16.mxu0 %v19720_v26  ;;  %v19762_v26 = vld [vmem:[#allocation22 + $0x284] ss:$8 sps:$4 sm:$0xff]  }
 0xa85   :  { %15676 = vmatpush1.bf16.msra.mxu1 %v19670_v38  ;;  %v19712_v38 = vld [vmem:[#allocation22 + $0x180] ss:$8 sps:$4 sm:$0xff]  }
 0xa86   :  { %15677 = vmatprep.subr.bf16.mxu1 %v19675_v39  ;;  %v11856_v39 = vsel %vm11798_vm15, %v21937_v30, %v11848_v36  ;;  %v19769_v30 = vld [vmem:[#allocation22 + $0x350] ss:$8 sps:$4 sm:$0xff]  }
 0xa87   :  { %15717 = vmatpush1.bf16.msra.mxu0 %v19718_v35  ;;  %v19760_v35 = vld [vmem:[#allocation22 + $0x280] ss:$8 sps:$4 sm:$0xff]  }
 0xa88   :  { %15718 = vmatprep.subr.bf16.mxu0 %v19723_v61  ;;  %v19763_v61 = vld [vmem:[#allocation22 + $0x370] ss:$8 sps:$4 sm:$0xff]  }
 0xa89   :  { %15678 = vmatpush1.bf16.msra.mxu1 %v19673_v11  ;;  %v14846_v11 = vpack.c.bf16 %v11856_v39, %v11856_v39 }
 0xa8a   :  { %15679 = vmatprep.subr.bf16.mxu1 %v19678_v17  ;;  %v19768_v17 = vld [vmem:[#allocation22 + $0x364] ss:$8 sps:$4 sm:$0xff]  }
 0xa8b   :  { %15719 = vmatpush1.bf16.msra.mxu0 %v19721_v47 }
 0xa8c   :  { %15720 = vmatprep.subr.bf16.mxu0 %v19726_v6  ;;  %v19766_v6 = vld [vmem:[#allocation22 + $0x360] ss:$8 sps:$4 sm:$0xff]  }
 0xa8d   :  { %15680 = vmatpush1.bf16.msra.mxu1 %v19676_v18 }
 0xa8e   :  { %15681 = vmatprep.subr.bf16.mxu1 %v19681_v19  ;;  %v19771_v19 = vld [vmem:[#allocation22 + $0x354] ss:$8 sps:$4 sm:$0xff]  }
 0xa8f   :  { %15721 = vmatpush1.bf16.msra.mxu0 %v19724_v10 }
 0xa90   :  { %15722 = vmatprep.subr.bf16.mxu0 %v19729_v29 }
 0xa91   :  { %15682 = vmatpush1.bf16.msra.mxu1 %v19679_v13  ;;  %v19774_v13 = vld [vmem:[#allocation22 + $0x344] ss:$8 sps:$4 sm:$0xff]  }
 0xa92   :  { %15683 = vmatprep.subr.bf16.mxu1 %v19684_v14  ;;  %v19772_v14 = vld [vmem:[#allocation22 + $0x340] ss:$8 sps:$4 sm:$0xff]  }
 0xa93   :  { %15723 = vmatpush1.bf16.msra.mxu0 %v19727_v24  ;;  %v19777_v24 = vld [vmem:[#allocation22 + $0x334] ss:$8 sps:$4 sm:$0xff]  }
 0xa94   :  { %15724 = vmatprep.subr.bf16.mxu0 %v19732_v40  ;;  %v19775_v40 = vld [vmem:[#allocation22 + $0x330] ss:$8 sps:$4 sm:$0xff]  }
 0xa95   :  { %15684 = vmatpush1.bf16.msra.mxu1 %v19682_v62  ;;  %v19780_v62 = vld [vmem:[#allocation22 + $0x324] ss:$8 sps:$4 sm:$0xff]  }
 0xa96   :  { %15685 = vmatprep.subr.bf16.mxu1 %v19687_v7  ;;  %v19778_v7 = vld [vmem:[#allocation22 + $0x320] ss:$8 sps:$4 sm:$0xff]  }
 0xa97   :  { %15725 = vmatpush1.bf16.msra.mxu0 %v19730_v46  ;;  %v19783_v46 = vld [vmem:[#allocation22 + $0x314] ss:$8 sps:$4 sm:$0xff]  }
 0xa98   :  { %15726 = vmatprep.subr.bf16.mxu0 %v19735_v49  ;;  %v19781_v49 = vld [vmem:[#allocation22 + $0x310] ss:$8 sps:$4 sm:$0xff]  }
 0xa99   :  { %15686 = vmatpush1.bf16.msra.mxu1 %v19685_v20  ;;  %v19786_v20 = vld [vmem:[#allocation22 + $0x304] ss:$8 sps:$4 sm:$0xff]  }
 0xa9a   :  { %15687 = vmatprep.subr.bf16.mxu1 %v19690_v57  ;;  %v19784_v57 = vld [vmem:[#allocation22 + $0x300] ss:$8 sps:$4 sm:$0xff]  }
 0xa9b   :  { %15727 = vmatpush1.bf16.msra.mxu0 %v19733_v50  ;;  %v19789_v50 = vld [vmem:[#allocation22 + $0x3f4] ss:$8 sps:$4 sm:$0xff]  }
 0xa9c   :  { %15728 = vmatprep.subr.bf16.mxu0 %v19738_v58  ;;  %v19787_v58 = vld [vmem:[#allocation22 + $0x3f0] ss:$8 sps:$4 sm:$0xff]  }
 0xa9d   :  { %15688 = vmatpush1.bf16.msra.mxu1 %v19688_v37  ;;  %v19792_v37 = vld [vmem:[#allocation22 + $0x3e4] ss:$8 sps:$4 sm:$0xff]  }
 0xa9e   :  { %15689 = vmatprep.subr.bf16.mxu1 %v19693_v27  ;;  %v19790_v27 = vld [vmem:[#allocation22 + $0x3e0] ss:$8 sps:$4 sm:$0xff]  }
 0xa9f   :  { %15729 = vmatpush1.bf16.msra.mxu0 %v19736_v31  ;;  %v19795_v31 = vld [vmem:[#allocation22 + $0x3d4] ss:$8 sps:$4 sm:$0xff]  }
 0xaa0   :  { %15730 = vmatprep.subr.bf16.mxu0 %v19741_v9  ;;  %v19793_v9 = vld [vmem:[#allocation22 + $0x3d0] ss:$8 sps:$4 sm:$0xff]  }
 0xaa1   :  { %15690 = vmatpush2.bf16.msra.mxu1 %v19691_v33  ;;  %v19798_v33 = vld [vmem:[#allocation22 + $0x3c4] ss:$8 sps:$4 sm:$0xff]  }
 0xaa2   :  { %15691 = vmatprep.subr.bf16.mxu1 %v19696_v32  ;;  %v19796_v32 = vld [vmem:[#allocation22 + $0x3c0] ss:$8 sps:$4 sm:$0xff]  }
 0xaa3   :  { %15731 = vmatpush2.bf16.msra.mxu0 %v19739_v22  ;;  %v19801_v22 = vld [vmem:[#allocation22 + $0x3b4] ss:$8 sps:$4 sm:$0xff]  }
 0xaa4   :  { %15732 = vmatprep.subr.bf16.mxu0 %v19744_v2  ;;  %v19799_v2 = vld [vmem:[#allocation22 + $0x3b0] ss:$8 sps:$4 sm:$0xff]  }
 0xaa5   :  { %15692 = vmatpush2.bf16.msra.mxu1 %v19694_v25  ;;  %v19804_v25 = vld [vmem:[#allocation22 + $0x3a4] ss:$8 sps:$4 sm:$0xff]  }
 0xaa6   :  { %15693 = vmatprep.subr.bf16.mxu1 %v19699_v4  ;;  %v19802_v4 = vld [vmem:[#allocation22 + $0x3a0] ss:$8 sps:$4 sm:$0xff]  }
 0xaa7   :  { %15733 = vmatpush2.bf16.msra.mxu0 %v19742_v43  ;;  %v19807_v43 = vld [vmem:[#allocation22 + $0x394] ss:$8 sps:$4 sm:$0xff]  }
 0xaa8   :  { %15734 = vmatprep.subr.bf16.mxu0 %v19747_v60  ;;  %v19805_v60 = vld [vmem:[#allocation22 + $0x390] ss:$8 sps:$4 sm:$0xff]  }
 0xaa9   :  { %15694 = vmatpush2.bf16.msra.mxu1 %v19697_v51  ;;  %v19810_v51 = vld [vmem:[#allocation22 + $0x384] ss:$8 sps:$4 sm:$0xff]  }
 0xaaa   :  { %15695 = vmatprep.subr.bf16.mxu1 %v19702_v54  ;;  %v13983_v54 = vld [vmem:[#allocation19 + $0x8] sm:$0xf] }
 0xaab   :  { %15735 = vmatpush2.bf16.msra.mxu0 %v19745_v42  ;;  %v19808_v42 = vld [vmem:[#allocation22 + $0x380] ss:$8 sps:$4 sm:$0xff]  }
 0xaac   :  { %15736 = vmatprep.subr.bf16.mxu0 %v19750_v8  ;;  %v13988_v8 = vrot.slane %v13983_v54, %v22496_v21 }
 0xaad   :  { %15696 = vmatpush2.bf16.msra.mxu1 %v19700_v63  ;;  %v14814_v63 = vld [vmem:[#allocation20 + $0x8] sm:$0xf] }
 0xaae   :  { %15697 = vmatprep.subr.bf16.mxu1 %v19705_v16  ;;  %v13992_v16 = vrot.slane %v13983_v54, %v22502_v15 }
 0xaaf   :  { %15737 = vmatpush2.bf16.msra.mxu0 %v19748_v0 }
 0xab0   :  { %15738 = vmatprep.subr.bf16.mxu0 %v19753_v44  ;;  %v14819_v44 = vrot.slane %v14814_v63, %v22496_v21 }
 0xab1   :  { %15698 = vmatpush2.bf16.msra.mxu1 %v19703_v52 }
 0xab2   :  { %15699 = vmatprep.subr.bf16.mxu1 %v19708_v34 }
 0xab3   :  { %15739 = vmatpush2.bf16.msra.mxu0 %v19751_v5 }
 0xab4   :  { %15740 = vmatprep.subr.bf16.mxu0 %v19756_v3 }
 0xab5   :  { %15700 = vmatpush2.bf16.msra.mxu1 %v19706_v56  ;;  %v14823_v56 = vrot.slane %v14814_v63, %v22502_v15 }
 0xab6   :  { %15701 = vmatprep.subr.bf16.mxu1 %v19711_v28 }
 0xab7   :  { %15741 = vmatpush2.bf16.msra.mxu0 %v19754_v55 }
 0xab8   :  { %15742 = vmatprep.subr.bf16.mxu0 %v19759_v1 }
 0xab9   :  { %15702 = vmatpush2.bf16.msra.mxu1 %v19709_v48 }
 0xaba   :  { %15703 = vmatprep.subr.bf16.mxu1 %v19714_v41 }
 0xabb   :  { %15743 = vmatpush2.bf16.msra.mxu0 %v19757_v12 }
 0xabc   :  { %15744 = vmatprep.subr.bf16.mxu0 %v19762_v26 }
 0xabd   :  { %15704 = vmatpush2.bf16.msra.mxu1 %v19712_v38 }
 0xabe   :  { %15755 = vmatprep.subr.bf16.mxu1 %v19765_v59 }
 0xabf   :  { %15745 = vmatpush2.bf16.msra.mxu0 %v19760_v35 }
 0xac0   :  { %15706 = vmatmul.mubr.bf16.vlgmr.msra.gmra.mxu1 %v14846_v11  ;;  %v22070_v47 = vpop.f32.mrf.mxu0  ;;  %v14000_v11 = vrot.slane %v13983_v54, %v22514_v23 }
 0xac1   :  { %15756 = vmatpush1.bf16.msra.mxu1 %v19763_v61  ;;  %v14680_v0 = vadd.f32 %v22070_v47, %v13988_v8  ;;  %v13996_v61 = vrot.slane %v13983_v54, %v22513_v53  ;;  %v14827_v47 = vrot.slane %v14814_v63, %v22513_v53 }
 0xac2   :  { %v22072_v18 = vpop.f32.mrf.mxu0  ;;  %15757 = vmatprep.subr.bf16.mxu1 %v19768_v17 }
 0xac3   :  { %v14682_v5 = vadd.f32 %v22072_v18, %v13992_v16 }
 0xac4   :  { %v14683_v10 = vpop.f32.mrf.mxu0 }
 0xac5   :  { %15758 = vmatpush1.bf16.msra.mxu1 %v19766_v6 }
 0xac6   :  { %v14684_v29 = vpop.f32.mrf.mxu0  ;;  %15759 = vmatprep.subr.bf16.mxu1 %v19771_v19 }
 0xac9   :  { %15760 = vmatpush1.bf16.msra.mxu1 %v19769_v30  ;;  %v14831_v30 = vrot.slane %v14814_v63, %v22514_v23 }
 0xaca   :  { %15761 = vmatprep.subr.bf16.mxu1 %v19774_v13 }
 0xacd   :  { %15762 = vmatpush1.bf16.msra.mxu1 %v19772_v14 }
 0xace   :  { %15763 = vmatprep.subr.bf16.mxu1 %v19777_v24 }
 0xad1   :  { %15764 = vmatpush1.bf16.msra.mxu1 %v19775_v40 }
 0xad2   :  { %15765 = vmatprep.subr.bf16.mxu1 %v19780_v62 }
 0xad5   :  { %15766 = vmatpush1.bf16.msra.mxu1 %v19778_v7 }
 0xad6   :  { %15767 = vmatprep.subr.bf16.mxu1 %v19783_v46 }
 0xad9   :  { %15768 = vmatpush1.bf16.msra.mxu1 %v19781_v49 }
 0xada   :  { %15769 = vmatprep.subr.bf16.mxu1 %v19786_v20 }
 0xadd   :  { %15770 = vmatpush1.bf16.msra.mxu1 %v19784_v57 }
 0xade   :  { %15771 = vmatprep.subr.bf16.mxu1 %v19789_v50 }
 0xae1   :  { %15772 = vmatpush2.bf16.msra.mxu1 %v19787_v58  ;;  %v14980_v58 = vld [vmem:[#allocation23] sm:$0x3] }
 0xae2   :  { %15773 = vmatprep.subr.bf16.mxu1 %v19792_v37  ;;  %v14985_v23 = vrot.slane %v14980_v58, %v22496_v21  ;;  %v14989_v37 = vrot.slane %v14980_v58, %v22502_v15 }
 0xae5   :  { %15774 = vmatpush2.bf16.msra.mxu1 %v19790_v27 }
 0xae6   :  { %15775 = vmatprep.subr.bf16.mxu1 %v19795_v31 }
 0xae9   :  { %15776 = vmatpush2.bf16.msra.mxu1 %v19793_v9 }
 0xaea   :  { %15777 = vmatprep.subr.bf16.mxu1 %v19798_v33 }
 0xaed   :  { %15778 = vmatpush2.bf16.msra.mxu1 %v19796_v32 }
 0xaee   :  { %15779 = vmatprep.subr.bf16.mxu1 %v19801_v22 }
 0xaf1   :  { %15780 = vmatpush2.bf16.msra.mxu1 %v19799_v2 }
 0xaf2   :  { %15781 = vmatprep.subr.bf16.mxu1 %v19804_v25 }
 0xaf5   :  { %15782 = vmatpush2.bf16.msra.mxu1 %v19802_v4 }
 0xaf6   :  { %15783 = vmatprep.subr.bf16.mxu1 %v19807_v43 }
 0xaf9   :  { %15784 = vmatpush2.bf16.msra.mxu1 %v19805_v60 }
 0xafa   :  { %15785 = vmatprep.subr.bf16.mxu1 %v19810_v51 }
 0xafd   :  { %15786 = vmatpush2.bf16.msra.mxu1 %v19808_v42 }
 0xb00   :  { %v14720_v52 = vpop.f32.mrf.mxu1  ;;  %v14761_v34 = vpop.f32.mrf.mxu0 }
 0xb01   :  { %v14721_v3 = vadd.f32 %v14720_v52, %v14680_v0  ;;  %v14762_v17 = vadd.f32 %v14761_v34, %v13996_v61 }
 0xb02   :  { %v14722_v28 = vpop.f32.mrf.mxu1  ;;  %v14763_v45 = vpop.f32.mrf.mxu0 }
 0xb03   :  { %vm14809_vm0 = vcmp.gt.f32.partialorder %v14721_v3, 0.0  ;;  %v14836_v55 = vmul.f32 %v14819_v44, %v14721_v3  ;;  %v14723_v1 = vadd.f32 %v14722_v28, %v14682_v5  ;;  %v14764_v18 = vadd.f32 %v14763_v45, %v14000_v11 }
 0xb04   :  { %v14724_v48 = vpop.f32.mrf.mxu1  ;;  %v14765_v41 = vpop.f32.mrf.mxu0 }
 0xb05   :  { %vm14810_vm1 = vcmp.gt.f32.partialorder %v14723_v1, 0.0  ;;  %v14837_v36 = vmul.f32 %v14823_v56, %v14723_v1  ;;  %v14840_v12 = vsel %vm14809_vm0, %v14721_v3, %v14836_v55 }
 0xb06   :  { %v14725_v26 = vpop.f32.mrf.mxu1  ;;  %v14766_v38 = vpop.f32.mrf.mxu0  ;;  %v14848_v35 = vpack.c.bf16 %v14840_v12, %v14840_v12 }
 0xb07   :  { %v14841_v59 = vsel %vm14810_vm1, %v14723_v1, %v14837_v36 }
 0xb08   :  { %v14849_v39 = vpack.c.bf16 %v14841_v59, %v14841_v59 }
 0xb0a   :  { %15746 = vmatprep.mubr.bf16.mxu0 %v14849_v39 }
 0xb0b   :  { %15747 = vmatmul.mubr.bf16.vlgmr.msra.gmra.mxu0 %v14848_v35 }
 0xb40   :  { %v14802_v6 = vpop.f32.mrf.mxu1 }
 0xb41   :  { %v14803_v19 = vadd.f32 %v14802_v6, %v14762_v17  ;;  %v15666_v10 = vpop.f32.mrf.mxu0 }
 0xb42   :  { %v14804_v29 = vpop.f32.mrf.mxu1  ;;  %v15667_v27 = vadd.f32 %v15666_v10, %v14985_v23 }
 0xb43   :  { %vm14811_vm2 = vcmp.gt.f32.partialorder %v14803_v19, 0.0  ;;  %v14838_v13 = vmul.f32 %v14827_v47, %v14803_v19  ;;  %v14805_v14 = vadd.f32 %v14804_v29, %v14764_v18  ;;  %v15668_v24 = vpop.f32.mrf.mxu0 }
 0xb44   :  { %v14806_v40 = vpop.f32.mrf.mxu1  ;;  %v15669_v9 = vadd.f32 %v15668_v24, %v14989_v37 }
 0xb45   :  { %vm14812_vm3 = vcmp.gt.f32.partialorder %v14805_v14, 0.0  ;;  %v14839_v62 = vmul.f32 %v14831_v30, %v14805_v14  ;;  %v15670_v7 = vpop.f32.mrf.mxu0  ;;  %v14842_v46 = vsel %vm14811_vm2, %v14803_v19, %v14838_v13 }
 0xb46   :  { %v14807_v49 = vpop.f32.mrf.mxu1  ;;  %v14850_v50 = vpack.c.bf16 %v14842_v46, %v14842_v46 }
 0xb47   :  { %v15671_v20 = vpop.f32.mrf.mxu0  ;;  %v14843_v57 = vsel %vm14812_vm3, %v14805_v14, %v14839_v62 }
 0xb48   :  { %v14851_v53 = vpack.c.bf16 %v14843_v57, %v14843_v57 }
 0xb4a   :  { %15787 = vmatprep.mubr.bf16.mxu1 %v14851_v53 }
 0xb4b   :  { %15788 = vmatmul.mubr.bf16.vlgmr.msra.gmra.mxu1 %v14850_v50 }
 0xb80   :  { %v15707_v31 = vpop.f32.mrf.mxu1 }
 0xb81   :  { %v15708_v33 = vadd.f32 %v15707_v31, %v15667_v27 }
 0xb82   :  { %v15709_v32 = vpop.f32.mrf.mxu1 }
 0xb83   :  { %v15710_v22 = vadd.f32 %v15709_v32, %v15669_v9 }
 0xb84   :  { %v15711_v2 = vpop.f32.mrf.mxu1 }
 0xb86   :  { %v15712_v25 = vpop.f32.mrf.mxu1 }
 0xbcb   :  { %v15748_v4 = vpop.f32.mrf.mxu0 }
 0xbcc   :  { %v15749_v54 = vadd.f32 %v15748_v4, %v15708_v33 }
 0xbcd   :  { %v15750_v43 = vpop.f32.mrf.mxu0 }
 0xbce   :  { %v15751_v8 = vadd.f32 %v15750_v43, %v15710_v22 }
 0xbcf   :  { %v15752_v60 = vpop.f32.mrf.mxu0 }
 0xbd1   :  { %v15753_v51 = vpop.f32.mrf.mxu0 }
 0xc0b   :  { %v15789_v42 = vpop.f32.mrf.mxu1 }
 0xc0c   :  { %v15790_v63 = vadd.f32 %v15789_v42, %v15749_v54 }
 0xc0d   :  { %v15791_v16 = vpop.f32.mrf.mxu1 }
 0xc0e   :  { %15796 = vst [vmem:[%s22108_s16] sm:$0xff] %v15790_v63  ;;  %v15792_v21 = vadd.f32 %v15791_v16, %v15751_v8 }
 0xc0f   :  { %v15793_v15 = vpop.f32.mrf.mxu1 }
 0xc10   :  { %15797 = vst [vmem:[%s22108_s16 + $0x8] sm:$0xff] %v15792_v21 }
 0xc11   :  { %v15794_v0 = vpop.f32.mrf.mxu1 }
 0xc12   :  { %15806 = vsyncpa [#allocation4], 1 }
 0xc13   :  { %15807 = vsyncpa [#allocation6], 1 }
 0xc14   :  { %15808 = vsyncpa [#allocation9], 1 }
 0xc15   :  { %15809 = vsyncpa [#allocation12], 1 }
 0xc16   :  { %15810 = vsyncpa [#allocation15], 1 }
 0xc17   :  { %15811 = vsyncpa [#allocation18], 1 }
 0xc18   :  { %15812 = vsyncpa [#allocation21], 1 }
 0xc19   :  { %15813 = vsyncpa [#allocation24], 1 }

</bundles_post_ra>
